<compile_context>
chip_gen: v7x
topology: tpu7x:2x2x1
jax: 0.10.0
libtpu: 0.0.40
codegen_flags: <defaults>
</compile_context>

<pallas_src>
import math

import jax
import jax.numpy as jnp
from jax.experimental import pallas as pl
from jax.experimental.pallas import tpu as pltpu

LANE = 128
SUBLANE = 8


def _round_up(x, m):
    return ((x + m - 1) // m) * m


def _pad2(x, rows, cols):
    return jnp.pad(x, ((0, rows - x.shape[0]), (0, cols - x.shape[1])))


def _et_name(et):
    return "__".join(et)


def _full_spec(shape):
    return pl.BlockSpec(shape, lambda i: (0,) * len(shape))


# ----------------------------------------------------------------------------
# Fused forward megakernel (factory closes over the static hetero-graph schema)
# ----------------------------------------------------------------------------
def _make_forward_kernel(names, node_types, time_set, shallow_set, layers_plan,
                         channels, c_pad, entity_table, seed_pad):
    inv_c = 1.0 / float(channels)

    def kernel(*refs):
        out_ref = refs[-1]
        ins = dict(zip(names, refs[: len(names)]))

        # Lane mask (1, c_pad): 1.0 on real channels, 0.0 on padded lanes.
        lane = jax.lax.broadcasted_iota(jnp.int32, (1, c_pad), 1)
        chan_mask = (lane < channels).astype(jnp.float32)

        # ---- encoder + temporal PE + shallow embedding (per node type) ----
        # TODO(synk): torch_frame's column-wise HeteroEncoder has no clean Pallas
        # equivalent; replaced by a dense linear encoder per node type.
        x = {}
        for nt in node_types:
            feat = ins[f"feat:{nt}"][...]                     # bf16 (n_pad, f_pad)
            if nt in time_set:
                # TODO(synk): relbench's HeteroTemporalEncoder bucketizes rel_time in
                # days; here it is a sinusoidal PE (single sin, per-lane phase offset
                # covers the cos half; padded lanes have freq=phase=0 -> sin(0)=0).
                ang = (ins[f"rel_time:{nt}"][...] * ins["pe_freq"][...]
                       + ins["pe_phase"][...])
                pe = jnp.sin(ang).astype(jnp.bfloat16)        # (n_pad, c_pad)
                feat_pe = jnp.concatenate([feat, pe], axis=-1)
                h = (jnp.dot(feat_pe, ins[f"w_enc_temp:{nt}"][...],
                             preferred_element_type=jnp.float32)
                     + ins[f"b_enc_temp:{nt}"][...])
            else:
                h = (jnp.dot(feat, ins[f"w_enc:{nt}"][...],
                             preferred_element_type=jnp.float32)
                     + ins[f"b_enc:{nt}"][...])
            if nt in shallow_set:
                h = h + ins[f"emb:{nt}"][...]
            x[nt] = h                                          # f32 (n_pad, c_pad)

        # ---- RGCN layers: HeteroConv(SAGEConv mean, aggr='sum') -> LayerNorm -> ReLU
        # layers_plan is pruned to the node/edge types reverse-reachable from
        # entity_table, so dead last-layer work is skipped entirely.
        for layer, (edge_entries, norm_nts) in enumerate(layers_plan):
            new_x = {}
            for (etn, src_t, dst_t, fused) in edge_entries:
                a = ins[f"adj:{etn}"][...]                     # bf16 (ndst_pad, nsrc_pad)
                xs = x[src_t].astype(jnp.bfloat16)
                xd = x[dst_t].astype(jnp.bfloat16)
                if fused:
                    # (A @ x_src || x_dst) @ [W_l; W_r]  -- K = 2*c_pad = 256
                    agg = jnp.dot(a, xs, preferred_element_type=jnp.float32)
                    cat = jnp.concatenate([agg.astype(jnp.bfloat16), xd], axis=-1)
                    contrib = (jnp.dot(cat, ins[f"w_lr:{layer}:{etn}"][...],
                                       preferred_element_type=jnp.float32)
                               + ins[f"b_l:{layer}:{etn}"][...])
                else:
                    # Nsrc < Ndst: cheaper to transform before aggregating.
                    xw = jnp.dot(xs, ins[f"w_l:{layer}:{etn}"][...],
                                 preferred_element_type=jnp.float32)
                    contrib = (jnp.dot(a, xw.astype(jnp.bfloat16),
                                       preferred_element_type=jnp.float32)
                               + jnp.dot(xd, ins[f"w_r:{layer}:{etn}"][...],
                                         preferred_element_type=jnp.float32)
                               + ins[f"b_l:{layer}:{etn}"][...])
                new_x[dst_t] = contrib if dst_t not in new_x else new_x[dst_t] + contrib

            # PyG LayerNorm(mode='node') over the REAL channel count (exact centered
            # two-pass; lane mask keeps padded lanes out of the stats), then ReLU.
            x = {}
            for nt in norm_nts:
                h = new_x[nt]
                mean = jnp.sum(h, axis=-1, keepdims=True) * inv_c
                d = (h - mean) * chan_mask
                var = jnp.sum(d * d, axis=-1, keepdims=True) * inv_c
                normed = d * jax.lax.rsqrt(var + 1e-5)
                x[nt] = jnp.maximum(
                    normed * ins[f"gamma:{layer}:{nt}"][...]
                    + ins[f"beta:{layer}:{nt}"][...], 0.0)

        # ---- MLP head (num_layers=1 -> single Linear), seed rows only ----
        xe = x[entity_table][:seed_pad, :].astype(jnp.bfloat16)
        out_ref[...] = (jnp.dot(xe, ins["w_head"][...],
                                preferred_element_type=jnp.float32)
                        + ins["b_head"][...])

    return kernel


# ----------------------------------------------------------------------------
# Model: parameters (lane-padded, bf16 weights), forward builds one pallas_call
# ----------------------------------------------------------------------------
class BaselineModelPallas:
    def __init__(self, key, node_types, edge_types, feat_dim, channels,
                 out_channels, num_layers, shallow_list, time_node_types,
                 num_nodes_dict, time_unit_scale=1.0):
        assert channels % 2 == 0, "sinusoidal PE needs an even channel count"
        self.node_types = list(node_types)
        self.edge_types = [tuple(et) for et in edge_types]
        self.channels = channels
        self.out_channels = out_channels
        self.num_layers = num_layers
        self.shallow_list = list(shallow_list)
        self.time_node_types = [nt for nt in time_node_types if nt in self.node_types]
        # TODO(synk): for epoch-second timestamps set time_unit_scale=1/86400 (days).
        self.time_unit_scale = float(time_unit_scale)

        self.c_pad = _round_up(channels, LANE)
        self.f_pad = _round_up(feat_dim, LANE)
        self.o_pad = _round_up(out_channels, LANE)
        self.n_pad = {nt: _round_up(num_nodes_dict[nt], LANE) for nt in self.node_types}

        def nxt():
            nonlocal key
            key, sub = jax.random.split(key)
            return sub

        def glorot(shape, pad_shape):
            fan_in, fan_out = shape
            lim = (6.0 / (fan_in + fan_out)) ** 0.5
            w = jax.random.uniform(nxt(), shape, jnp.float32, -lim, lim)
            return _pad2(w, *pad_shape).astype(jnp.bfloat16)   # bf16 MXU operands

        def zbias(pad):
            return jnp.zeros((1, pad), jnp.float32)

        cp, fp, op = self.c_pad, self.f_pad, self.o_pad

        # Encoder (simplified HeteroEncoder): linear per node type.
        self.enc = {nt: (glorot((feat_dim, channels), (fp, cp)), zbias(cp))
                    for nt in self.node_types}
        # Temporal encoder linear per time-carrying node type.
        self.temporal = {nt: (glorot((channels, channels), (cp, cp)), zbias(cp))
                         for nt in self.time_node_types}
        # RGCN: per layer { SAGEConv per edge type }, LayerNorm per node type.
        self.conv, self.norm = [], []
        for _ in range(num_layers):
            layer = {}
            for et in self.edge_types:
                layer[_et_name(et)] = dict(
                    w_l=glorot((channels, channels), (cp, cp)),
                    w_r=glorot((channels, channels), (cp, cp)),
                    b_l=zbias(cp))
            self.conv.append(layer)
            self.norm.append({
                nt: (jnp.pad(jnp.ones((channels,), jnp.float32),
                             (0, cp - channels)).reshape(1, cp),
                     jnp.zeros((1, cp), jnp.float32))
                for nt in self.node_types})
        # MLP head (num_layers=1 -> single Linear).
        self.head = (glorot((channels, out_channels), (cp, op)), zbias(op))
        # Shallow embeddings (init std=0.1, as in reset_parameters).
        self.embedding = {
            nt: 0.1 * jax.random.normal(nxt(), (num_nodes_dict[nt], channels),
                                        jnp.float32)
            for nt in self.shallow_list
        }

        # Precomputed sinusoidal-PE lane constants: freq + phase rows (1, c_pad).
        half = channels // 2
        j = jnp.arange(cp)
        k = jnp.where(j < half, j, j - half).astype(jnp.float32)
        inv_freq = jnp.exp(k * (-2.0 / channels * math.log(10000.0)))
        self.pe_freq = jnp.where(j < channels, inv_freq, 0.0).reshape(1, cp)
        self.pe_phase = jnp.where((j >= half) & (j < channels),
                                  jnp.float32(math.pi / 2.0),
                                  jnp.float32(0.0)).reshape(1, cp)

    # ------------------------------------------------------------------
    def _plan_layers(self, entity_table):
        """Forward availability + backward pruning to entity_table."""
        avail_in = [set(self.node_types)]
        computed = []
        for _ in range(self.num_layers):
            comp = {d for (s, _, d) in self.edge_types
                    if s in avail_in[-1] and d in avail_in[-1]}
            computed.append(comp)
            avail_in.append(comp)
        assert entity_table in computed[-1], \
            "entity_table has no incoming edges in the final layer"

        need_out = {entity_table}
        plans = [None] * self.num_layers
        for l in reversed(range(self.num_layers)):
            keep_dst = computed[l] & need_out
            edges = [et for et in self.edge_types
                     if et[2] in keep_dst and et[0] in avail_in[l] and et[2] in avail_in[l]]
            entries = tuple(
                (_et_name(et), et[0], et[2],
                 self.n_pad[et[2]] <= self.n_pad[et[0]])       # fused iff Ndst <= Nsrc
                for et in edges)
            plans[l] = (entries, tuple(sorted(keep_dst)))
            need_out = set()
            for (s, _, d) in edges:
                need_out.add(s)
                need_out.add(d)
        return tuple(plans)

    # ------------------------------------------------------------------
    def __call__(self, batch, entity_table):
        seed_time = batch["seed_time"]
        num_seed = seed_time.shape[0]
        seed_pad = _round_up(max(num_seed, 1), SUBLANE)
        cp, fp, op = self.c_pad, self.f_pad, self.o_pad

        layers_plan = self._plan_layers(entity_table)
        used_ets = {e[0] for (entries, _) in layers_plan for e in entries}

        names, arrays = [], []

        def add(name, arr):
            names.append(name)
            arrays.append(arr)

        if self.time_node_types:
            add("pe_freq", self.pe_freq)
            add("pe_phase", self.pe_phase)

        # Per-node-type inputs: padded features, rel_time column, gathered embeddings.
        for nt in self.node_types:
            n_pad = self.n_pad[nt]
            add(f"feat:{nt}", _pad2(batch["feat"][nt], n_pad, fp).astype(jnp.bfloat16))
            if nt in self.time_node_types:
                rel_time = (seed_time[batch["batch"][nt]]
                            - batch["time"][nt]).astype(jnp.float32) * self.time_unit_scale
                rt = jnp.pad(rel_time, (0, n_pad - rel_time.shape[0])).reshape(n_pad, 1)
                add(f"rel_time:{nt}", rt)
                # Fused encoder+temporal weight: [W_enc; W_temp] (K = f_pad + c_pad).
                w_et = jnp.concatenate([self.enc[nt][0], self.temporal[nt][0]], axis=0)
                add(f"w_enc_temp:{nt}", w_et)
                add(f"b_enc_temp:{nt}", self.enc[nt][1] + self.temporal[nt][1])
            else:
                add(f"w_enc:{nt}", self.enc[nt][0])
                add(f"b_enc:{nt}", self.enc[nt][1])
            if nt in self.embedding:
                emb = self.embedding[nt][batch["n_id"][nt]]
                add(f"emb:{nt}", _pad2(emb, n_pad, cp))

        # Row-normalized dense mean-aggregation adjacency per USED edge type (bf16).
        # TODO(synk): replace with a sparse CSR gather path at real relbench scale.
        for et in self.edge_types:
            etn = _et_name(et)
            if etn not in used_ets:
                continue
            src_t, _, dst_t = et
            src, dst = batch["edge_index"][et]
            a = jnp.zeros((self.n_pad[dst_t], self.n_pad[src_t]), jnp.float32)
            a = a.at[dst, src].add(1.0)
            deg = jnp.sum(a, axis=1, keepdims=True)
            add(f"adj:{etn}", (a / jnp.maximum(deg, 1.0)).astype(jnp.bfloat16))

        # Per-layer conv + norm parameters (only the pruned, needed subset).
        for layer, (entries, norm_nts) in enumerate(layers_plan):
            for (etn, _, _, fused) in entries:
                p = self.conv[layer][etn]
                if fused:
                    add(f"w_lr:{layer}:{etn}",
                        jnp.concatenate([p["w_l"], p["w_r"]], axis=0))   # (2*c_pad, c_pad)
                else:
                    add(f"w_l:{layer}:{etn}", p["w_l"])
                    add(f"w_r:{layer}:{etn}", p["w_r"])
                add(f"b_l:{layer}:{etn}", p["b_l"])
            for nt in norm_nts:
                g, b = self.norm[layer][nt]
                add(f"gamma:{layer}:{nt}", g)
                add(f"beta:{layer}:{nt}", b)

        add("w_head", self.head[0])
        add("b_head", self.head[1])

        kernel = _make_forward_kernel(
            tuple(names), tuple(self.node_types),
            frozenset(self.time_node_types), frozenset(self.embedding),
            layers_plan, self.channels, cp, entity_table, seed_pad)

        # Explicit VMEM budget: working set (x2 headroom for double buffering /
        # intermediates) rather than relying on the backend default.
        total_bytes = sum(int(a.size) * a.dtype.itemsize for a in arrays)
        total_bytes += seed_pad * op * 4
        vmem_limit = min(100 * 1024 * 1024,
                         max(32 * 1024 * 1024, 2 * total_bytes + 4 * 1024 * 1024))

        out = pl.pallas_call(
            kernel,
            out_shape=jax.ShapeDtypeStruct((seed_pad, op), jnp.float32),
            grid=(1,),
            in_specs=[_full_spec(a.shape) for a in arrays],
            out_specs=_full_spec((seed_pad, op)),
            compiler_params=pltpu.CompilerParams(
                dimension_semantics=("arbitrary",),
                vmem_limit_bytes=int(vmem_limit)),
        )(*arrays)
        return out[:num_seed, :self.out_channels]


# ----------------------------------------------------------------------------
# Driver
# ----------------------------------------------------------------------------
if __name__ == "__main__":
    key = jax.random.PRNGKey(0)

    node_types = ["users", "items"]
    edge_types = [("users", "interacts", "items"),
                  ("items", "rev_interacts", "users")]
    num_nodes = {"users": 24, "items": 16}
    feat_dim = 16
    channels = 32
    out_channels = 8
    num_layers = 2
    num_seed = 4
    num_edges = 64
    shallow_list = ["items"]
    time_node_types = ["users", "items"]

    ks = jax.random.split(key, 16)
    batch = {
        "feat": {
            "users": jax.random.normal(ks[0], (num_nodes["users"], feat_dim), jnp.float32),
            "items": jax.random.normal(ks[1], (num_nodes["items"], feat_dim), jnp.float32),
        },
        "time": {
            "users": jax.random.uniform(ks[2], (num_nodes["users"],), jnp.float32, 0.0, 10.0),
            "items": jax.random.uniform(ks[3], (num_nodes["items"],), jnp.float32, 0.0, 10.0),
        },
        "batch": {
            "users": jax.random.randint(ks[4], (num_nodes["users"],), 0, num_seed),
            "items": jax.random.randint(ks[5], (num_nodes["items"],), 0, num_seed),
        },
        "n_id": {
            "items": jax.random.randint(ks[6], (num_nodes["items"],), 0, num_nodes["items"]),
        },
        "edge_index": {
            edge_types[0]: jnp.stack([
                jax.random.randint(ks[7], (num_edges,), 0, num_nodes["users"]),
                jax.random.randint(ks[8], (num_edges,), 0, num_nodes["items"]),
            ]),
            edge_types[1]: jnp.stack([
                jax.random.randint(ks[9], (num_edges,), 0, num_nodes["items"]),
                jax.random.randint(ks[10], (num_edges,), 0, num_nodes["users"]),
            ]),
        },
        "seed_time": jax.random.uniform(ks[11], (num_seed,), jnp.float32, 5.0, 15.0),
    }

    model = BaselineModelPallas(
        ks[12], node_types, edge_types, feat_dim, channels, out_channels,
        num_layers, shallow_list, time_node_types, num_nodes)

    out = model(batch, entity_table="users")
    out = jax.block_until_ready(out)
    assert out.shape == (num_seed, out_channels)
    assert bool(jnp.all(jnp.isfinite(out)))
    print("KERNEL_OK")
</pallas_src>

<mosaic_0001>
module attributes {stable_mosaic.version = 11 : i64} {
  func.func @kernel(%arg0: i32, %arg1: memref<1x128xf32, #tpu.memory_space<vmem>>, %arg2: memref<1x128xf32, #tpu.memory_space<vmem>>, %arg3: memref<128x128xbf16, #tpu.memory_space<vmem>>, %arg4: memref<128x1xf32, #tpu.memory_space<vmem>>, %arg5: memref<256x128xbf16, #tpu.memory_space<vmem>>, %arg6: memref<1x128xf32, #tpu.memory_space<vmem>>, %arg7: memref<128x128xbf16, #tpu.memory_space<vmem>>, %arg8: memref<128x1xf32, #tpu.memory_space<vmem>>, %arg9: memref<256x128xbf16, #tpu.memory_space<vmem>>, %arg10: memref<1x128xf32, #tpu.memory_space<vmem>>, %arg11: memref<128x128xf32, #tpu.memory_space<vmem>>, %arg12: memref<128x128xbf16, #tpu.memory_space<vmem>>, %arg13: memref<128x128xbf16, #tpu.memory_space<vmem>>, %arg14: memref<256x128xbf16, #tpu.memory_space<vmem>>, %arg15: memref<1x128xf32, #tpu.memory_space<vmem>>, %arg16: memref<256x128xbf16, #tpu.memory_space<vmem>>, %arg17: memref<1x128xf32, #tpu.memory_space<vmem>>, %arg18: memref<1x128xf32, #tpu.memory_space<vmem>>, %arg19: memref<1x128xf32, #tpu.memory_space<vmem>>, %arg20: memref<1x128xf32, #tpu.memory_space<vmem>>, %arg21: memref<1x128xf32, #tpu.memory_space<vmem>>, %arg22: memref<256x128xbf16, #tpu.memory_space<vmem>>, %arg23: memref<1x128xf32, #tpu.memory_space<vmem>>, %arg24: memref<1x128xf32, #tpu.memory_space<vmem>>, %arg25: memref<1x128xf32, #tpu.memory_space<vmem>>, %arg26: memref<128x128xbf16, #tpu.memory_space<vmem>>, %arg27: memref<1x128xf32, #tpu.memory_space<vmem>>, %arg28: memref<8x128xf32, #tpu.memory_space<vmem>>) attributes {dimension_semantics = [#tpu.dimension_semantics<arbitrary>], iteration_bounds = array<i64: 1>, scalar_prefetch = 0 : i64, scratch_operands = 0 : i64, tpu.core_type = #tpu.core_type<tc>, window_params = [{pipeline_mode = #tpu.pipeline_mode<synchronous>, transform_indices = @transform_0, window_bounds = array<i64: 1, 128>}, {pipeline_mode = #tpu.pipeline_mode<synchronous>, transform_indices = @transform_1, window_bounds = array<i64: 1, 128>}, {pipeline_mode = #tpu.pipeline_mode<synchronous>, transform_indices = @transform_2, window_bounds = array<i64: 128, 128>}, {pipeline_mode = #tpu.pipeline_mode<synchronous>, transform_indices = @transform_3, window_bounds = array<i64: 128, 1>}, {pipeline_mode = #tpu.pipeline_mode<synchronous>, transform_indices = @transform_4, window_bounds = array<i64: 256, 128>}, {pipeline_mode = #tpu.pipeline_mode<synchronous>, transform_indices = @transform_5, window_bounds = array<i64: 1, 128>}, {pipeline_mode = #tpu.pipeline_mode<synchronous>, transform_indices = @transform_6, window_bounds = array<i64: 128, 128>}, {pipeline_mode = #tpu.pipeline_mode<synchronous>, transform_indices = @transform_7, window_bounds = array<i64: 128, 1>}, {pipeline_mode = #tpu.pipeline_mode<synchronous>, transform_indices = @transform_8, window_bounds = array<i64: 256, 128>}, {pipeline_mode = #tpu.pipeline_mode<synchronous>, transform_indices = @transform_9, window_bounds = array<i64: 1, 128>}, {pipeline_mode = #tpu.pipeline_mode<synchronous>, transform_indices = @transform_10, window_bounds = array<i64: 128, 128>}, {pipeline_mode = #tpu.pipeline_mode<synchronous>, transform_indices = @transform_11, window_bounds = array<i64: 128, 128>}, {pipeline_mode = #tpu.pipeline_mode<synchronous>, transform_indices = @transform_12, window_bounds = array<i64: 128, 128>}, {pipeline_mode = #tpu.pipeline_mode<synchronous>, transform_indices = @transform_13, window_bounds = array<i64: 256, 128>}, {pipeline_mode = #tpu.pipeline_mode<synchronous>, transform_indices = @transform_14, window_bounds = array<i64: 1, 128>}, {pipeline_mode = #tpu.pipeline_mode<synchronous>, transform_indices = @transform_15, window_bounds = array<i64: 256, 128>}, {pipeline_mode = #tpu.pipeline_mode<synchronous>, transform_indices = @transform_16, window_bounds = array<i64: 1, 128>}, {pipeline_mode = #tpu.pipeline_mode<synchronous>, transform_indices = @transform_17, window_bounds = array<i64: 1, 128>}, {pipeline_mode = #tpu.pipeline_mode<synchronous>, transform_indices = @transform_18, window_bounds = array<i64: 1, 128>}, {pipeline_mode = #tpu.pipeline_mode<synchronous>, transform_indices = @transform_19, window_bounds = array<i64: 1, 128>}, {pipeline_mode = #tpu.pipeline_mode<synchronous>, transform_indices = @transform_20, window_bounds = array<i64: 1, 128>}, {pipeline_mode = #tpu.pipeline_mode<synchronous>, transform_indices = @transform_21, window_bounds = array<i64: 256, 128>}, {pipeline_mode = #tpu.pipeline_mode<synchronous>, transform_indices = @transform_22, window_bounds = array<i64: 1, 128>}, {pipeline_mode = #tpu.pipeline_mode<synchronous>, transform_indices = @transform_23, window_bounds = array<i64: 1, 128>}, {pipeline_mode = #tpu.pipeline_mode<synchronous>, transform_indices = @transform_24, window_bounds = array<i64: 1, 128>}, {pipeline_mode = #tpu.pipeline_mode<synchronous>, transform_indices = @transform_25, window_bounds = array<i64: 128, 128>}, {pipeline_mode = #tpu.pipeline_mode<synchronous>, transform_indices = @transform_26, window_bounds = array<i64: 1, 128>}, {pipeline_mode = #tpu.pipeline_mode<synchronous>, transform_indices = @transform_27, window_bounds = array<i64: 8, 128>}]} {
    %0 = tpu.iota {dimensions = array<i32: 1>} : vector<1x128xi32>
    %c32_i32 = arith.constant 32 : i32
    %1 = vector.broadcast %c32_i32 : i32 to vector<1x128xi32>
    %2 = arith.cmpi slt, %0, %1 : vector<1x128xi32>
    %3 = arith.extui %2 : vector<1x128xi1> to vector<1x128xi32>
    %4 = arith.sitofp %3 : vector<1x128xi32> to vector<1x128xf32>
    %c0 = arith.constant 0 : index
    %c0_0 = arith.constant 0 : index
    %5 = vector.load %arg3[%c0, %c0_0] : memref<128x128xbf16, #tpu.memory_space<vmem>>, vector<128x128xbf16>
    %c0_1 = arith.constant 0 : index
    %c0_2 = arith.constant 0 : index
    %6 = vector.load %arg4[%c0_1, %c0_2] : memref<128x1xf32, #tpu.memory_space<vmem>>, vector<128x1xf32>
    %c0_3 = arith.constant 0 : index
    %c0_4 = arith.constant 0 : index
    %7 = vector.load %arg1[%c0_3, %c0_4] : memref<1x128xf32, #tpu.memory_space<vmem>>, vector<1x128xf32>
    %8 = vector.broadcast %6 : vector<128x1xf32> to vector<128x128xf32>
    %9 = vector.broadcast %7 : vector<1x128xf32> to vector<128x128xf32>
    %10 = arith.mulf %8, %9 : vector<128x128xf32>
    %c0_5 = arith.constant 0 : index
    %c0_6 = arith.constant 0 : index
    %11 = vector.load %arg2[%c0_5, %c0_6] : memref<1x128xf32, #tpu.memory_space<vmem>>, vector<1x128xf32>
    %12 = vector.broadcast %11 : vector<1x128xf32> to vector<128x128xf32>
    %13 = arith.addf %10, %12 : vector<128x128xf32>
    %14 = math.sin %13 : vector<128x128xf32>
    %15 = arith.truncf %14 : vector<128x128xf32> to vector<128x128xbf16>
    %16 = tpu.concatenate %5, %15 in 1 : vector<128x128xbf16>, vector<128x128xbf16> -> vector<128x256xbf16>
    %c0_7 = arith.constant 0 : index
    %c0_8 = arith.constant 0 : index
    %17 = vector.load %arg5[%c0_7, %c0_8] : memref<256x128xbf16, #tpu.memory_space<vmem>>, vector<256x128xbf16>
    %cst = arith.constant dense<0.000000e+00> : vector<128x128xf32>
    %18 = tpu.matmul %16, %17, %cst {dimension_numbers = #tpu.dot_dimension_numbers<[1], [0], [0], [1], [0, 0, 1, 1], [], []>} : vector<128x256xbf16>, vector<256x128xbf16>, vector<128x128xf32> -> vector<128x128xf32>
    %c0_9 = arith.constant 0 : index
    %c0_10 = arith.constant 0 : index
    %19 = vector.load %arg6[%c0_9, %c0_10] : memref<1x128xf32, #tpu.memory_space<vmem>>, vector<1x128xf32>
    %20 = vector.broadcast %19 : vector<1x128xf32> to vector<128x128xf32>
    %21 = arith.addf %18, %20 : vector<128x128xf32>
    %c0_11 = arith.constant 0 : index
    %c0_12 = arith.constant 0 : index
    %22 = vector.load %arg7[%c0_11, %c0_12] : memref<128x128xbf16, #tpu.memory_space<vmem>>, vector<128x128xbf16>
    %c0_13 = arith.constant 0 : index
    %c0_14 = arith.constant 0 : index
    %23 = vector.load %arg8[%c0_13, %c0_14] : memref<128x1xf32, #tpu.memory_space<vmem>>, vector<128x1xf32>
    %c0_15 = arith.constant 0 : index
    %c0_16 = arith.constant 0 : index
    %24 = vector.load %arg1[%c0_15, %c0_16] : memref<1x128xf32, #tpu.memory_space<vmem>>, vector<1x128xf32>
    %25 = vector.broadcast %23 : vector<128x1xf32> to vector<128x128xf32>
    %26 = vector.broadcast %24 : vector<1x128xf32> to vector<128x128xf32>
    %27 = arith.mulf %25, %26 : vector<128x128xf32>
    %c0_17 = arith.constant 0 : index
    %c0_18 = arith.constant 0 : index
    %28 = vector.load %arg2[%c0_17, %c0_18] : memref<1x128xf32, #tpu.memory_space<vmem>>, vector<1x128xf32>
    %29 = vector.broadcast %28 : vector<1x128xf32> to vector<128x128xf32>
    %30 = arith.addf %27, %29 : vector<128x128xf32>
    %31 = math.sin %30 : vector<128x128xf32>
    %32 = arith.truncf %31 : vector<128x128xf32> to vector<128x128xbf16>
    %33 = tpu.concatenate %22, %32 in 1 : vector<128x128xbf16>, vector<128x128xbf16> -> vector<128x256xbf16>
    %c0_19 = arith.constant 0 : index
    %c0_20 = arith.constant 0 : index
    %34 = vector.load %arg9[%c0_19, %c0_20] : memref<256x128xbf16, #tpu.memory_space<vmem>>, vector<256x128xbf16>
    %cst_21 = arith.constant dense<0.000000e+00> : vector<128x128xf32>
    %35 = tpu.matmul %33, %34, %cst_21 {dimension_numbers = #tpu.dot_dimension_numbers<[1], [0], [0], [1], [0, 0, 1, 1], [], []>} : vector<128x256xbf16>, vector<256x128xbf16>, vector<128x128xf32> -> vector<128x128xf32>
    %c0_22 = arith.constant 0 : index
    %c0_23 = arith.constant 0 : index
    %36 = vector.load %arg10[%c0_22, %c0_23] : memref<1x128xf32, #tpu.memory_space<vmem>>, vector<1x128xf32>
    %37 = vector.broadcast %36 : vector<1x128xf32> to vector<128x128xf32>
    %38 = arith.addf %35, %37 : vector<128x128xf32>
    %c0_24 = arith.constant 0 : index
    %c0_25 = arith.constant 0 : index
    %39 = vector.load %arg11[%c0_24, %c0_25] : memref<128x128xf32, #tpu.memory_space<vmem>>, vector<128x128xf32>
    %40 = arith.addf %38, %39 : vector<128x128xf32>
    %c0_26 = arith.constant 0 : index
    %c0_27 = arith.constant 0 : index
    %41 = vector.load %arg12[%c0_26, %c0_27] : memref<128x128xbf16, #tpu.memory_space<vmem>>, vector<128x128xbf16>
    %42 = arith.truncf %21 : vector<128x128xf32> to vector<128x128xbf16>
    %43 = arith.truncf %40 : vector<128x128xf32> to vector<128x128xbf16>
    %cst_28 = arith.constant dense<0.000000e+00> : vector<128x128xf32>
    %44 = tpu.matmul %41, %42, %cst_28 {dimension_numbers = #tpu.dot_dimension_numbers<[1], [0], [0], [1], [0, 0, 1, 1], [], []>} : vector<128x128xbf16>, vector<128x128xbf16>, vector<128x128xf32> -> vector<128x128xf32>
    %45 = arith.truncf %44 : vector<128x128xf32> to vector<128x128xbf16>
    %46 = tpu.concatenate %45, %43 in 1 : vector<128x128xbf16>, vector<128x128xbf16> -> vector<128x256xbf16>
    %c0_29 = arith.constant 0 : index
    %c0_30 = arith.constant 0 : index
    %47 = vector.load %arg14[%c0_29, %c0_30] : memref<256x128xbf16, #tpu.memory_space<vmem>>, vector<256x128xbf16>
    %cst_31 = arith.constant dense<0.000000e+00> : vector<128x128xf32>
    %48 = tpu.matmul %46, %47, %cst_31 {dimension_numbers = #tpu.dot_dimension_numbers<[1], [0], [0], [1], [0, 0, 1, 1], [], []>} : vector<128x256xbf16>, vector<256x128xbf16>, vector<128x128xf32> -> vector<128x128xf32>
    %c0_32 = arith.constant 0 : index
    %c0_33 = arith.constant 0 : index
    %49 = vector.load %arg15[%c0_32, %c0_33] : memref<1x128xf32, #tpu.memory_space<vmem>>, vector<1x128xf32>
    %50 = vector.broadcast %49 : vector<1x128xf32> to vector<128x128xf32>
    %51 = arith.addf %48, %50 : vector<128x128xf32>
    %c0_34 = arith.constant 0 : index
    %c0_35 = arith.constant 0 : index
    %52 = vector.load %arg13[%c0_34, %c0_35] : memref<128x128xbf16, #tpu.memory_space<vmem>>, vector<128x128xbf16>
    %53 = arith.truncf %40 : vector<128x128xf32> to vector<128x128xbf16>
    %54 = arith.truncf %21 : vector<128x128xf32> to vector<128x128xbf16>
    %cst_36 = arith.constant dense<0.000000e+00> : vector<128x128xf32>
    %55 = tpu.matmul %52, %53, %cst_36 {dimension_numbers = #tpu.dot_dimension_numbers<[1], [0], [0], [1], [0, 0, 1, 1], [], []>} : vector<128x128xbf16>, vector<128x128xbf16>, vector<128x128xf32> -> vector<128x128xf32>
    %56 = arith.truncf %55 : vector<128x128xf32> to vector<128x128xbf16>
    %57 = tpu.concatenate %56, %54 in 1 : vector<128x128xbf16>, vector<128x128xbf16> -> vector<128x256xbf16>
    %c0_37 = arith.constant 0 : index
    %c0_38 = arith.constant 0 : index
    %58 = vector.load %arg16[%c0_37, %c0_38] : memref<256x128xbf16, #tpu.memory_space<vmem>>, vector<256x128xbf16>
    %cst_39 = arith.constant dense<0.000000e+00> : vector<128x128xf32>
    %59 = tpu.matmul %57, %58, %cst_39 {dimension_numbers = #tpu.dot_dimension_numbers<[1], [0], [0], [1], [0, 0, 1, 1], [], []>} : vector<128x256xbf16>, vector<256x128xbf16>, vector<128x128xf32> -> vector<128x128xf32>
    %c0_40 = arith.constant 0 : index
    %c0_41 = arith.constant 0 : index
    %60 = vector.load %arg17[%c0_40, %c0_41] : memref<1x128xf32, #tpu.memory_space<vmem>>, vector<1x128xf32>
    %61 = vector.broadcast %60 : vector<1x128xf32> to vector<128x128xf32>
    %62 = arith.addf %59, %61 : vector<128x128xf32>
    %cst_42 = arith.constant dense<0.000000e+00> : vector<128xf32>
    %63 = vector.multi_reduction <add>, %51, %cst_42 [1] : vector<128x128xf32> to vector<128xf32>
    %64 = vector.shape_cast %63 : vector<128xf32> to vector<128x1xf32>
    %cst_43 = arith.constant 3.125000e-02 : f32
    %65 = vector.broadcast %cst_43 : f32 to vector<128x1xf32>
    %66 = arith.mulf %64, %65 : vector<128x1xf32>
    %67 = vector.broadcast %66 : vector<128x1xf32> to vector<128x128xf32>
    %68 = arith.subf %51, %67 : vector<128x128xf32>
    %69 = vector.broadcast %4 : vector<1x128xf32> to vector<128x128xf32>
    %70 = arith.mulf %68, %69 : vector<128x128xf32>
    %71 = arith.mulf %70, %70 : vector<128x128xf32>
    %cst_44 = arith.constant dense<0.000000e+00> : vector<128xf32>
    %72 = vector.multi_reduction <add>, %71, %cst_44 [1] : vector<128x128xf32> to vector<128xf32>
    %73 = vector.shape_cast %72 : vector<128xf32> to vector<128x1xf32>
    %cst_45 = arith.constant 3.125000e-02 : f32
    %74 = vector.broadcast %cst_45 : f32 to vector<128x1xf32>
    %75 = arith.mulf %73, %74 : vector<128x1xf32>
    %cst_46 = arith.constant 9.99999974E-6 : f32
    %76 = vector.broadcast %cst_46 : f32 to vector<128x1xf32>
    %77 = arith.addf %75, %76 : vector<128x1xf32>
    %78 = math.rsqrt %77 : vector<128x1xf32>
    %79 = vector.broadcast %78 : vector<128x1xf32> to vector<128x128xf32>
    %80 = arith.mulf %70, %79 : vector<128x128xf32>
    %c0_47 = arith.constant 0 : index
    %c0_48 = arith.constant 0 : index
    %81 = vector.load %arg18[%c0_47, %c0_48] : memref<1x128xf32, #tpu.memory_space<vmem>>, vector<1x128xf32>
    %82 = vector.broadcast %81 : vector<1x128xf32> to vector<128x128xf32>
    %83 = arith.mulf %80, %82 : vector<128x128xf32>
    %c0_49 = arith.constant 0 : index
    %c0_50 = arith.constant 0 : index
    %84 = vector.load %arg19[%c0_49, %c0_50] : memref<1x128xf32, #tpu.memory_space<vmem>>, vector<1x128xf32>
    %85 = vector.broadcast %84 : vector<1x128xf32> to vector<128x128xf32>
    %86 = arith.addf %83, %85 : vector<128x128xf32>
    %cst_51 = arith.constant 0.000000e+00 : f32
    %87 = vector.broadcast %cst_51 : f32 to vector<128x128xf32>
    %88 = arith.maximumf %86, %87 : vector<128x128xf32>
    %cst_52 = arith.constant dense<0.000000e+00> : vector<128xf32>
    %89 = vector.multi_reduction <add>, %62, %cst_52 [1] : vector<128x128xf32> to vector<128xf32>
    %90 = vector.shape_cast %89 : vector<128xf32> to vector<128x1xf32>
    %cst_53 = arith.constant 3.125000e-02 : f32
    %91 = vector.broadcast %cst_53 : f32 to vector<128x1xf32>
    %92 = arith.mulf %90, %91 : vector<128x1xf32>
    %93 = vector.broadcast %92 : vector<128x1xf32> to vector<128x128xf32>
    %94 = arith.subf %62, %93 : vector<128x128xf32>
    %95 = vector.broadcast %4 : vector<1x128xf32> to vector<128x128xf32>
    %96 = arith.mulf %94, %95 : vector<128x128xf32>
    %97 = arith.mulf %96, %96 : vector<128x128xf32>
    %cst_54 = arith.constant dense<0.000000e+00> : vector<128xf32>
    %98 = vector.multi_reduction <add>, %97, %cst_54 [1] : vector<128x128xf32> to vector<128xf32>
    %99 = vector.shape_cast %98 : vector<128xf32> to vector<128x1xf32>
    %cst_55 = arith.constant 3.125000e-02 : f32
    %100 = vector.broadcast %cst_55 : f32 to vector<128x1xf32>
    %101 = arith.mulf %99, %100 : vector<128x1xf32>
    %cst_56 = arith.constant 9.99999974E-6 : f32
    %102 = vector.broadcast %cst_56 : f32 to vector<128x1xf32>
    %103 = arith.addf %101, %102 : vector<128x1xf32>
    %104 = math.rsqrt %103 : vector<128x1xf32>
    %105 = vector.broadcast %104 : vector<128x1xf32> to vector<128x128xf32>
    %106 = arith.mulf %96, %105 : vector<128x128xf32>
    %c0_57 = arith.constant 0 : index
    %c0_58 = arith.constant 0 : index
    %107 = vector.load %arg20[%c0_57, %c0_58] : memref<1x128xf32, #tpu.memory_space<vmem>>, vector<1x128xf32>
    %108 = vector.broadcast %107 : vector<1x128xf32> to vector<128x128xf32>
    %109 = arith.mulf %106, %108 : vector<128x128xf32>
    %c0_59 = arith.constant 0 : index
    %c0_60 = arith.constant 0 : index
    %110 = vector.load %arg21[%c0_59, %c0_60] : memref<1x128xf32, #tpu.memory_space<vmem>>, vector<1x128xf32>
    %111 = vector.broadcast %110 : vector<1x128xf32> to vector<128x128xf32>
    %112 = arith.addf %109, %111 : vector<128x128xf32>
    %cst_61 = arith.constant 0.000000e+00 : f32
    %113 = vector.broadcast %cst_61 : f32 to vector<128x128xf32>
    %114 = arith.maximumf %112, %113 : vector<128x128xf32>
    %c0_62 = arith.constant 0 : index
    %c0_63 = arith.constant 0 : index
    %115 = vector.load %arg13[%c0_62, %c0_63] : memref<128x128xbf16, #tpu.memory_space<vmem>>, vector<128x128xbf16>
    %116 = arith.truncf %88 : vector<128x128xf32> to vector<128x128xbf16>
    %117 = arith.truncf %114 : vector<128x128xf32> to vector<128x128xbf16>
    %cst_64 = arith.constant dense<0.000000e+00> : vector<128x128xf32>
    %118 = tpu.matmul %115, %116, %cst_64 {dimension_numbers = #tpu.dot_dimension_numbers<[1], [0], [0], [1], [0, 0, 1, 1], [], []>} : vector<128x128xbf16>, vector<128x128xbf16>, vector<128x128xf32> -> vector<128x128xf32>
    %119 = arith.truncf %118 : vector<128x128xf32> to vector<128x128xbf16>
    %120 = tpu.concatenate %119, %117 in 1 : vector<128x128xbf16>, vector<128x128xbf16> -> vector<128x256xbf16>
    %c0_65 = arith.constant 0 : index
    %c0_66 = arith.constant 0 : index
    %121 = vector.load %arg22[%c0_65, %c0_66] : memref<256x128xbf16, #tpu.memory_space<vmem>>, vector<256x128xbf16>
    %cst_67 = arith.constant dense<0.000000e+00> : vector<128x128xf32>
    %122 = tpu.matmul %120, %121, %cst_67 {dimension_numbers = #tpu.dot_dimension_numbers<[1], [0], [0], [1], [0, 0, 1, 1], [], []>} : vector<128x256xbf16>, vector<256x128xbf16>, vector<128x128xf32> -> vector<128x128xf32>
    %c0_68 = arith.constant 0 : index
    %c0_69 = arith.constant 0 : index
    %123 = vector.load %arg23[%c0_68, %c0_69] : memref<1x128xf32, #tpu.memory_space<vmem>>, vector<1x128xf32>
    %124 = vector.broadcast %123 : vector<1x128xf32> to vector<128x128xf32>
    %125 = arith.addf %122, %124 : vector<128x128xf32>
    %cst_70 = arith.constant dense<0.000000e+00> : vector<128xf32>
    %126 = vector.multi_reduction <add>, %125, %cst_70 [1] : vector<128x128xf32> to vector<128xf32>
    %127 = vector.shape_cast %126 : vector<128xf32> to vector<128x1xf32>
    %cst_71 = arith.constant 3.125000e-02 : f32
    %128 = vector.broadcast %cst_71 : f32 to vector<128x1xf32>
    %129 = arith.mulf %127, %128 : vector<128x1xf32>
    %130 = vector.broadcast %129 : vector<128x1xf32> to vector<128x128xf32>
    %131 = arith.subf %125, %130 : vector<128x128xf32>
    %132 = vector.broadcast %4 : vector<1x128xf32> to vector<128x128xf32>
    %133 = arith.mulf %131, %132 : vector<128x128xf32>
    %134 = arith.mulf %133, %133 : vector<128x128xf32>
    %cst_72 = arith.constant dense<0.000000e+00> : vector<128xf32>
    %135 = vector.multi_reduction <add>, %134, %cst_72 [1] : vector<128x128xf32> to vector<128xf32>
    %136 = vector.shape_cast %135 : vector<128xf32> to vector<128x1xf32>
    %cst_73 = arith.constant 3.125000e-02 : f32
    %137 = vector.broadcast %cst_73 : f32 to vector<128x1xf32>
    %138 = arith.mulf %136, %137 : vector<128x1xf32>
    %cst_74 = arith.constant 9.99999974E-6 : f32
    %139 = vector.broadcast %cst_74 : f32 to vector<128x1xf32>
    %140 = arith.addf %138, %139 : vector<128x1xf32>
    %141 = math.rsqrt %140 : vector<128x1xf32>
    %142 = vector.broadcast %141 : vector<128x1xf32> to vector<128x128xf32>
    %143 = arith.mulf %133, %142 : vector<128x128xf32>
    %c0_75 = arith.constant 0 : index
    %c0_76 = arith.constant 0 : index
    %144 = vector.load %arg24[%c0_75, %c0_76] : memref<1x128xf32, #tpu.memory_space<vmem>>, vector<1x128xf32>
    %145 = vector.broadcast %144 : vector<1x128xf32> to vector<128x128xf32>
    %146 = arith.mulf %143, %145 : vector<128x128xf32>
    %c0_77 = arith.constant 0 : index
    %c0_78 = arith.constant 0 : index
    %147 = vector.load %arg25[%c0_77, %c0_78] : memref<1x128xf32, #tpu.memory_space<vmem>>, vector<1x128xf32>
    %148 = vector.broadcast %147 : vector<1x128xf32> to vector<128x128xf32>
    %149 = arith.addf %146, %148 : vector<128x128xf32>
    %cst_79 = arith.constant 0.000000e+00 : f32
    %150 = vector.broadcast %cst_79 : f32 to vector<128x128xf32>
    %151 = arith.maximumf %149, %150 : vector<128x128xf32>
    %152 = vector.extract_strided_slice %151 {offsets = [0, 0], sizes = [8, 128], strides = [1, 1]} : vector<128x128xf32> to vector<8x128xf32>
    %153 = arith.truncf %152 : vector<8x128xf32> to vector<8x128xbf16>
    %c0_80 = arith.constant 0 : index
    %c0_81 = arith.constant 0 : index
    %154 = vector.load %arg26[%c0_80, %c0_81] : memref<128x128xbf16, #tpu.memory_space<vmem>>, vector<128x128xbf16>
    %cst_82 = arith.constant dense<0.000000e+00> : vector<8x128xf32>
    %155 = tpu.matmul %153, %154, %cst_82 {dimension_numbers = #tpu.dot_dimension_numbers<[1], [0], [0], [1], [0, 0, 1, 1], [], []>} : vector<8x128xbf16>, vector<128x128xbf16>, vector<8x128xf32> -> vector<8x128xf32>
    %c0_83 = arith.constant 0 : index
    %c0_84 = arith.constant 0 : index
    %156 = vector.load %arg27[%c0_83, %c0_84] : memref<1x128xf32, #tpu.memory_space<vmem>>, vector<1x128xf32>
    %157 = vector.broadcast %156 : vector<1x128xf32> to vector<8x128xf32>
    %158 = arith.addf %155, %157 : vector<8x128xf32>
    %c0_85 = arith.constant 0 : index
    %c0_86 = arith.constant 0 : index
    %159 = vector.load %arg28[%c0_85, %c0_86] : memref<8x128xf32, #tpu.memory_space<vmem>>, vector<8x128xf32>
    tpu.vector_store %arg28[%c0_85, %c0_86], %158 {strides = array<i32>} : memref<8x128xf32, #tpu.memory_space<vmem>>, vector<8x128xf32>,
    return
  }
  func.func @transform_0(%arg0: i32) -> (i32, i32) {
    %c0_i32 = arith.constant 0 : i32
    %c0_i32_0 = arith.constant 0 : i32
    %c0_i32_1 = arith.constant 0 : i32
    return %c0_i32, %c0_i32_0 : i32, i32
  }
  func.func @transform_1(%arg0: i32) -> (i32, i32) {
    %c0_i32 = arith.constant 0 : i32
    %c0_i32_0 = arith.constant 0 : i32
    %c0_i32_1 = arith.constant 0 : i32
    return %c0_i32, %c0_i32_0 : i32, i32
  }
  func.func @transform_2(%arg0: i32) -> (i32, i32) {
    %c0_i32 = arith.constant 0 : i32
    %c0_i32_0 = arith.constant 0 : i32
    %c0_i32_1 = arith.constant 0 : i32
    return %c0_i32, %c0_i32_0 : i32, i32
  }
  func.func @transform_3(%arg0: i32) -> (i32, i32) {
    %c0_i32 = arith.constant 0 : i32
    %c0_i32_0 = arith.constant 0 : i32
    %c0_i32_1 = arith.constant 0 : i32
    return %c0_i32, %c0_i32_0 : i32, i32
  }
  func.func @transform_4(%arg0: i32) -> (i32, i32) {
    %c0_i32 = arith.constant 0 : i32
    %c0_i32_0 = arith.constant 0 : i32
    %c0_i32_1 = arith.constant 0 : i32
    return %c0_i32, %c0_i32_0 : i32, i32
  }
  func.func @transform_5(%arg0: i32) -> (i32, i32) {
    %c0_i32 = arith.constant 0 : i32
    %c0_i32_0 = arith.constant 0 : i32
    %c0_i32_1 = arith.constant 0 : i32
    return %c0_i32, %c0_i32_0 : i32, i32
  }
  func.func @transform_6(%arg0: i32) -> (i32, i32) {
    %c0_i32 = arith.constant 0 : i32
    %c0_i32_0 = arith.constant 0 : i32
    %c0_i32_1 = arith.constant 0 : i32
    return %c0_i32, %c0_i32_0 : i32, i32
  }
  func.func @transform_7(%arg0: i32) -> (i32, i32) {
    %c0_i32 = arith.constant 0 : i32
    %c0_i32_0 = arith.constant 0 : i32
    %c0_i32_1 = arith.constant 0 : i32
    return %c0_i32, %c0_i32_0 : i32, i32
  }
  func.func @transform_8(%arg0: i32) -> (i32, i32) {
    %c0_i32 = arith.constant 0 : i32
    %c0_i32_0 = arith.constant 0 : i32
    %c0_i32_1 = arith.constant 0 : i32
    return %c0_i32, %c0_i32_0 : i32, i32
  }
  func.func @transform_9(%arg0: i32) -> (i32, i32) {
    %c0_i32 = arith.constant 0 : i32
    %c0_i32_0 = arith.constant 0 : i32
    %c0_i32_1 = arith.constant 0 : i32
    return %c0_i32, %c0_i32_0 : i32, i32
  }
  func.func @transform_10(%arg0: i32) -> (i32, i32) {
    %c0_i32 = arith.constant 0 : i32
    %c0_i32_0 = arith.constant 0 : i32
    %c0_i32_1 = arith.constant 0 : i32
    return %c0_i32, %c0_i32_0 : i32, i32
  }
  func.func @transform_11(%arg0: i32) -> (i32, i32) {
    %c0_i32 = arith.constant 0 : i32
    %c0_i32_0 = arith.constant 0 : i32
    %c0_i32_1 = arith.constant 0 : i32
    return %c0_i32, %c0_i32_0 : i32, i32
  }
  func.func @transform_12(%arg0: i32) -> (i32, i32) {
    %c0_i32 = arith.constant 0 : i32
    %c0_i32_0 = arith.constant 0 : i32
    %c0_i32_1 = arith.constant 0 : i32
    return %c0_i32, %c0_i32_0 : i32, i32
  }
  func.func @transform_13(%arg0: i32) -> (i32, i32) {
    %c0_i32 = arith.constant 0 : i32
    %c0_i32_0 = arith.constant 0 : i32
    %c0_i32_1 = arith.constant 0 : i32
    return %c0_i32, %c0_i32_0 : i32, i32
  }
  func.func @transform_14(%arg0: i32) -> (i32, i32) {
    %c0_i32 = arith.constant 0 : i32
    %c0_i32_0 = arith.constant 0 : i32
    %c0_i32_1 = arith.constant 0 : i32
    return %c0_i32, %c0_i32_0 : i32, i32
  }
  func.func @transform_15(%arg0: i32) -> (i32, i32) {
    %c0_i32 = arith.constant 0 : i32
    %c0_i32_0 = arith.constant 0 : i32
    %c0_i32_1 = arith.constant 0 : i32
    return %c0_i32, %c0_i32_0 : i32, i32
  }
  func.func @transform_16(%arg0: i32) -> (i32, i32) {
    %c0_i32 = arith.constant 0 : i32
    %c0_i32_0 = arith.constant 0 : i32
    %c0_i32_1 = arith.constant 0 : i32
    return %c0_i32, %c0_i32_0 : i32, i32
  }
  func.func @transform_17(%arg0: i32) -> (i32, i32) {
    %c0_i32 = arith.constant 0 : i32
    %c0_i32_0 = arith.constant 0 : i32
    %c0_i32_1 = arith.constant 0 : i32
    return %c0_i32, %c0_i32_0 : i32, i32
  }
  func.func @transform_18(%arg0: i32) -> (i32, i32) {
    %c0_i32 = arith.constant 0 : i32
    %c0_i32_0 = arith.constant 0 : i32
    %c0_i32_1 = arith.constant 0 : i32
    return %c0_i32, %c0_i32_0 : i32, i32
  }
  func.func @transform_19(%arg0: i32) -> (i32, i32) {
    %c0_i32 = arith.constant 0 : i32
    %c0_i32_0 = arith.constant 0 : i32
    %c0_i32_1 = arith.constant 0 : i32
    return %c0_i32, %c0_i32_0 : i32, i32
  }
  func.func @transform_20(%arg0: i32) -> (i32, i32) {
    %c0_i32 = arith.constant 0 : i32
    %c0_i32_0 = arith.constant 0 : i32
    %c0_i32_1 = arith.constant 0 : i32
    return %c0_i32, %c0_i32_0 : i32, i32
  }
  func.func @transform_21(%arg0: i32) -> (i32, i32) {
    %c0_i32 = arith.constant 0 : i32
    %c0_i32_0 = arith.constant 0 : i32
    %c0_i32_1 = arith.constant 0 : i32
    return %c0_i32, %c0_i32_0 : i32, i32
  }
  func.func @transform_22(%arg0: i32) -> (i32, i32) {
    %c0_i32 = arith.constant 0 : i32
    %c0_i32_0 = arith.constant 0 : i32
    %c0_i32_1 = arith.constant 0 : i32
    return %c0_i32, %c0_i32_0 : i32, i32
  }
  func.func @transform_23(%arg0: i32) -> (i32, i32) {
    %c0_i32 = arith.constant 0 : i32
    %c0_i32_0 = arith.constant 0 : i32
    %c0_i32_1 = arith.constant 0 : i32
    return %c0_i32, %c0_i32_0 : i32, i32
  }
  func.func @transform_24(%arg0: i32) -> (i32, i32) {
    %c0_i32 = arith.constant 0 : i32
    %c0_i32_0 = arith.constant 0 : i32
    %c0_i32_1 = arith.constant 0 : i32
    return %c0_i32, %c0_i32_0 : i32, i32
  }
  func.func @transform_25(%arg0: i32) -> (i32, i32) {
    %c0_i32 = arith.constant 0 : i32
    %c0_i32_0 = arith.constant 0 : i32
    %c0_i32_1 = arith.constant 0 : i32
    return %c0_i32, %c0_i32_0 : i32, i32
  }
  func.func @transform_26(%arg0: i32) -> (i32, i32) {
    %c0_i32 = arith.constant 0 : i32
    %c0_i32_0 = arith.constant 0 : i32
    %c0_i32_1 = arith.constant 0 : i32
    return %c0_i32, %c0_i32_0 : i32, i32
  }
  func.func @transform_27(%arg0: i32) -> (i32, i32) {
    %c0_i32 = arith.constant 0 : i32
    %c0_i32_0 = arith.constant 0 : i32
    %c0_i32_1 = arith.constant 0 : i32
    return %c0_i32, %c0_i32_0 : i32, i32
  }
}

</mosaic_0001>

<bundles_post_ra>
// kernel: tpu_custom_call.1
= control target key start
LH: loop header
LB: loop body
LE: loop exit
PB: predicated region body
PF: predicated region fallthrough
CT: control target
= control target key end

     0   :  { %s12652_s0 = inlined_call_operand.vmem [shape: f32[1,128], index: 0, kind: input, shape index: {}]   ;;  %s12653_s1 = inlined_call_operand.hbm [shape: f32[1,128], index: 1, kind: input, shape index: {}]   ;;  %s12654_s2 = inlined_call_operand.hbm [shape: bf16[128,128], index: 2, kind: input, shape index: {}]   ;;  %s12655_s3 = inlined_call_operand.vmem [shape: f32[128,1], index: 3, kind: input, shape index: {}]   ;;  %s12656_s4 = inlined_call_operand.vmem [shape: bf16[256,128], index: 4, kind: input, shape index: {}]   ;;  %s12657_s5 = inlined_call_operand.hbm [shape: f32[1,128], index: 5, kind: input, shape index: {}]   ;;  %s12658_s6 = inlined_call_operand.hbm [shape: bf16[128,128], index: 6, kind: input, shape index: {}]   ;;  %s12659_s7 = inlined_call_operand.vmem [shape: f32[128,1], index: 7, kind: input, shape index: {}]   ;;  %s12660_s8 = inlined_call_operand.vmem [shape: bf16[256,128], index: 8, kind: input, shape index: {}]   ;;  %s12661_s9 = inlined_call_operand.hbm [shape: f32[1,128], index: 9, kind: input, shape index: {}]   ;;  %s12662_s10 = inlined_call_operand.hbm [shape: f32[128,128], index: 10, kind: input, shape index: {}]   ;;  %s12663_s11 = inlined_call_operand.hbm [shape: bf16[128,128], index: 11, kind: input, shape index: {}]   ;;  %s12664_s12 = inlined_call_operand.hbm [shape: bf16[128,128], index: 12, kind: input, shape index: {}]   ;;  %s12665_s13 = inlined_call_operand.hbm [shape: bf16[256,128], index: 13, kind: input, shape index: {}]   ;;  %s12666_s14 = inlined_call_operand.hbm [shape: f32[1,128], index: 14, kind: input, shape index: {}]   ;;  %s12667_s15 = inlined_call_operand.hbm [shape: bf16[256,128], index: 15, kind: input, shape index: {}]   ;;  %s12668_s16 = inlined_call_operand.hbm [shape: f32[1,128], index: 16, kind: input, shape index: {}]   ;;  %s12669_s17 = inlined_call_operand.hbm [shape: f32[1,128], index: 17, kind: input, shape index: {}]   ;;  %s12670_s18 = inlined_call_operand.vmem [shape: f32[1,128], index: 18, kind: input, shape index: {}]   ;;  %s12671_s19 = inlined_call_operand.vmem [shape: f32[1,128], index: 19, kind: input, shape index: {}]   ;;  %s12672_s20 = inlined_call_operand.vmem [shape: f32[1,128], index: 20, kind: input, shape index: {}]   ;;  %s12673_s21 = inlined_call_operand.hbm [shape: bf16[256,128], index: 21, kind: input, shape index: {}]   ;;  %s12674_s22 = inlined_call_operand.vmem [shape: f32[1,128], index: 22, kind: input, shape index: {}]   ;;  %s12675_s23 = inlined_call_operand.vmem [shape: f32[1,128], index: 23, kind: input, shape index: {}]   ;;  %s12676_s24 = inlined_call_operand.vmem [shape: f32[1,128], index: 24, kind: input, shape index: {}]   ;;  %s12677_s25 = inlined_call_operand.vmem [shape: bf16[128,128], index: 25, kind: input, shape index: {}]   ;;  %s12678_s26 = inlined_call_operand.vmem [shape: f32[1,128], index: 26, kind: input, shape index: {}]   ;;  %s12679_s27 = inlined_call_operand.hbm [shape: f32[8,128], index: 27, kind: output, shape index: {}]  }
   0x1   :  { %12867 = sst [smem:[#allocation115_spill]] %s12652_s0 }
   0x2   :  { %12868 = sst [smem:[#allocation116_spill]] %s12653_s1 }
   0x3   :  { %12869 = sst [smem:[#allocation117_spill]] %s12654_s2 }
   0x4   :  { %12870 = sst [smem:[#allocation118_spill]] %s12655_s3 }
   0x5   :  { %12871 = sst [smem:[#allocation119_spill]] %s12656_s4 }
   0x6   :  { %12872 = sst [smem:[#allocation120_spill]] %s12657_s5 }
   0x7   :  { %12873 = sst [smem:[#allocation121_spill]] %s12658_s6 }
   0x8   :  { %12874 = sst [smem:[#allocation122_spill]] %s12659_s7 }
   0x9   :  { %12875 = sst [smem:[#allocation123_spill]] %s12660_s8 }
   0xa   :  { %12876 = sst [smem:[#allocation124_spill]] %s12661_s9 }
   0xb   :  { %12877 = sst [smem:[#allocation125_spill]] %s12662_s10 }
   0xc   :  { %12878 = sst [smem:[#allocation126_spill]] %s12663_s11 }
   0xd   :  { %12879 = sst [smem:[#allocation127_spill]] %s12676_s24 }
   0xe   :  { %12880 = sst [smem:[#allocation128_spill]] %s12678_s26 }
   0xf   :  { %12881 = sst [smem:[#allocation129_spill]] %s12679_s27 }
  0x10   :  { %32 = vsyncpa [#allocation3], 0 }
  0x11   :  { %33 = vsyncpa [#allocation6], 0 }
  0x12   :  { %34 = vsyncpa [#allocation9], 0 }
  0x13   :  { %35 = vsyncpa [#allocation12], 0 }
  0x14   :  { %36 = vsyncpa [#allocation15], 0 }
  0x15   :  { %37 = vsyncpa [#allocation18], 0 }
  0x16   :  { %38 = vsyncpa [#allocation21], 0 }
  0x17   :  { %39 = vsyncpa [#allocation24], 0 }
  0x18   :  { %40 = vsyncpa [#allocation4], 0  ;;  %s7928_s7 = smov [#allocation5]   ;;  %s12882_s9 = sld [smem:[#allocation117_spill]] }
  0x19   :  { %s58_s4 = sshll.u32 %s7928_s7, 4  ;;  %s59_s4 = int_to_ptr.vmem [resolvable:$true] %s58_s4 }
  0x1e   :  { %s7580_s5 = scalar_lea.hbm %s12882_s9, 1024 }
  0x1f   :  { %p7581_p0 = scmp.ne.s32.totalorder %s12882_s9, %s7580_s5  ;;  %p7584_p1 = scmp.lt.u32.totalorder %s7580_s5, %s12882_s9 }
  0x21   :  { %p7586_p2 = pnand %p7584_p1, %p7581_p0 }
  0x23   :  { %7589 = shalt.err (!%p7586_p2)
}
  0x24   :  { %s7590_s1 = scalar_lea.vmem %s59_s4, 1024  ;;  %p7595_p4 = scmp.lt.s32.totalorder %s59_s4, %s59_s4 }
  0x25   :  { %p7591_p3 = scmp.ne.s32.totalorder %s59_s4, %s7590_s1  ;;  %p7596_p5 = scmp.lt.s32.totalorder %s7590_s1, %s7590_s1 }
  0x27   :  { %p7597_p6 = por %p7596_p5, %p7595_p4 }
  0x29   :  { %p7598_p7 = pnand %p7597_p6, %p7591_p3 }
  0x2b   :  { %7601 = shalt.err (!%p7598_p7)
}
  0x2c   :  { %s12693_s6 = smov 64   ;;  %s7930_s11 = smov 4  }
  0x2d   :  { %64 = dma.hbm_to_vmem [thread:$0]  %s12882_s9, 1024, %s59_s4, [#allocation6], %s12693_s6, %s12693_s6, %s7930_s11  }
  0x2e   :  { %s7931_s7 = smov [#allocation8]   ;;  %s7932_s30 = smov [#allocation11]  }
  0x2f   :  { %s84_s8 = sshll.u32 %s7931_s7, 4  ;;  %s110_s5 = sshll.u32 %s7932_s30, 4  ;;  %s85_s8 = int_to_ptr.vmem [resolvable:$true] %s84_s8  ;;  %s111_s5 = int_to_ptr.vmem [resolvable:$true] %s110_s5 }
  0x30   :  { %s12883_s10 = sld [smem:[#allocation121_spill]] }
  0x36   :  { %s7602_s29 = scalar_lea.hbm %s12883_s10, 1024 }
  0x37   :  { %p7603_p8 = scmp.ne.s32.totalorder %s12883_s10, %s7602_s29  ;;  %p7606_p9 = scmp.lt.u32.totalorder %s7602_s29, %s12883_s10 }
  0x39   :  { %p7608_p10 = pnand %p7606_p9, %p7603_p8 }
  0x3b   :  { %7611 = shalt.err (!%p7608_p10)
}
  0x3c   :  { %s7612_s4 = scalar_lea.vmem %s85_s8, 1024  ;;  %p7617_p12 = scmp.lt.s32.totalorder %s85_s8, %s85_s8 }
  0x3d   :  { %p7613_p11 = scmp.ne.s32.totalorder %s85_s8, %s7612_s4  ;;  %p7618_p13 = scmp.lt.s32.totalorder %s7612_s4, %s7612_s4 }
  0x3f   :  { %p7619_p0 = por %p7618_p13, %p7617_p12 }
  0x41   :  { %p7620_p1 = pnand %p7619_p0, %p7613_p11 }
  0x43   :  { %7623 = shalt.err (!%p7620_p1)
}
  0x44   :  { %90 = dma.hbm_to_vmem [thread:$0]  %s12883_s10, 1024, %s85_s8, [#allocation9], %s12693_s6, %s12693_s6, %s7930_s11  }
  0x45   :  { %s12884_s26 = sld [smem:[#allocation125_spill]] }
  0x4b   :  { %s7624_s3 = scalar_lea.hbm %s12884_s26, 2048 }
  0x4c   :  { %p7625_p2 = scmp.ne.s32.totalorder %s12884_s26, %s7624_s3  ;;  %p7628_p3 = scmp.lt.u32.totalorder %s7624_s3, %s12884_s26 }
  0x4e   :  { %p7630_p4 = pnand %p7628_p3, %p7625_p2 }
  0x50   :  { %7633 = shalt.err (!%p7630_p4)
}
  0x51   :  { %s7634_s29 = scalar_lea.vmem %s111_s5, 2048  ;;  %p7639_p6 = scmp.lt.s32.totalorder %s111_s5, %s111_s5 }
  0x52   :  { %p7635_p5 = scmp.ne.s32.totalorder %s111_s5, %s7634_s29  ;;  %p7640_p7 = scmp.lt.s32.totalorder %s7634_s29, %s7634_s29 }
  0x54   :  { %p7641_p8 = por %p7640_p7, %p7639_p6 }
  0x56   :  { %p7642_p9 = pnand %p7641_p8, %p7635_p5 }
  0x58   :  { %7645 = shalt.err (!%p7642_p9)
}
  0x59   :  { %s7933_s8 = smov 128   ;;  %s7934_s10 = smov 8  }
  0x5a   :  { %116 = dma.hbm_to_vmem [thread:$0]  %s12884_s26, 2048, %s111_s5, [#allocation12], %s7933_s8, %s7933_s8, %s7934_s10  }
  0x5b   :  { %s7935_s9 = smov [#allocation14]   ;;  %s7936_s27 = smov [#allocation17]  }
  0x5c   :  { %s134_s2 = sshll.u32 %s7935_s9, 4  ;;  %s159_s24 = sshll.u32 %s7936_s27, 4  ;;  %s135_s2 = int_to_ptr.vmem [resolvable:$true] %s134_s2  ;;  %s160_s24 = int_to_ptr.vmem [resolvable:$true] %s159_s24 }
  0x5d   :  { %s7646_s30 = scalar_lea.hbm %s12664_s12, 1024 }
  0x5e   :  { %p7647_p10 = scmp.ne.s32.totalorder %s12664_s12, %s7646_s30  ;;  %p7650_p11 = scmp.lt.u32.totalorder %s7646_s30, %s12664_s12 }
  0x60   :  { %p7652_p12 = pnand %p7650_p11, %p7647_p10 }
  0x62   :  { %7655 = shalt.err (!%p7652_p12)
}
  0x63   :  { %s7656_s5 = scalar_lea.vmem %s135_s2, 1024  ;;  %p7661_p0 = scmp.lt.s32.totalorder %s135_s2, %s135_s2 }
  0x64   :  { %p7657_p13 = scmp.ne.s32.totalorder %s135_s2, %s7656_s5  ;;  %p7662_p1 = scmp.lt.s32.totalorder %s7656_s5, %s7656_s5 }
  0x66   :  { %p7663_p2 = por %p7662_p1, %p7661_p0 }
  0x68   :  { %p7664_p3 = pnand %p7663_p2, %p7657_p13 }
  0x6a   :  { %7667 = shalt.err (!%p7664_p3)
}
  0x6b   :  { %s12885_s26 = smov 64   ;;  %s7668_s4 = scalar_lea.hbm %s12666_s14, 16 }
  0x6c   :  { %140 = dma.hbm_to_vmem [thread:$0]  %s12664_s12, 1024, %s135_s2, [#allocation15], %s12885_s26, %s12885_s26, %s7930_s11  }
  0x6d   :  { %p7669_p4 = scmp.ne.s32.totalorder %s12666_s14, %s7668_s4  ;;  %p7672_p5 = scmp.lt.u32.totalorder %s7668_s4, %s12666_s14 }
  0x6f   :  { %p7674_p6 = pnand %p7672_p5, %p7669_p4 }
  0x71   :  { %7677 = shalt.err (!%p7674_p6)
}
  0x72   :  { %s7678_s30 = scalar_lea.vmem %s160_s24, 16  ;;  %s7682_s28 = scalar_lea.vmem %s160_s24, 32 }
  0x73   :  { %p7679_p7 = scmp.ne.s32.totalorder %s160_s24, %s7678_s30  ;;  %p7683_p8 = scmp.lt.s32.totalorder %s160_s24, %s160_s24 }
  0x74   :  { %p7684_p9 = scmp.lt.s32.totalorder %s7682_s28, %s7678_s30 }
  0x76   :  { %p7685_p10 = por %p7684_p9, %p7683_p8 }
  0x78   :  { %p7686_p11 = pnand %p7685_p10, %p7679_p7 }
  0x7a   :  { %7689 = shalt.err (!%p7686_p11)
}
  0x7b   :  { %162 = dma.hbm_to_vmem [thread:$0]  %s12666_s14, 16, %s160_s24, [#allocation18]  }
  0x7c   :  { %s7937_s0 = smov [#allocation20]   ;;  %s7938_s5 = smov [#allocation2]  }
  0x7d   :  { %s181_s29 = sshll.u32 %s7937_s0, 4  ;;  %s49_s8 = sshll.u32 %s7938_s5, 4  ;;  %s182_s29 = int_to_ptr.vmem [resolvable:$true] %s181_s29  ;;  %s50_s8 = int_to_ptr.vmem [resolvable:$true] %s49_s8 }
  0x7e   :  { %s7690_s6 = scalar_lea.hbm %s12668_s16, 16 }
  0x7f   :  { %p7691_p12 = scmp.ne.s32.totalorder %s12668_s16, %s7690_s6  ;;  %p7694_p13 = scmp.lt.u32.totalorder %s7690_s6, %s12668_s16 }
  0x81   :  { %p7696_p0 = pnand %p7694_p13, %p7691_p12 }
  0x83   :  { %7699 = shalt.err (!%p7696_p0)
}
  0x84   :  { %s7700_s14 = scalar_lea.vmem %s182_s29, 16  ;;  %s7704_s24 = scalar_lea.vmem %s182_s29, 32 }
  0x85   :  { %p7701_p1 = scmp.ne.s32.totalorder %s182_s29, %s7700_s14  ;;  %p7705_p2 = scmp.lt.s32.totalorder %s182_s29, %s182_s29 }
  0x86   :  { %p7706_p3 = scmp.lt.s32.totalorder %s7704_s24, %s7700_s14 }
  0x88   :  { %p7707_p4 = por %p7706_p3, %p7705_p2 }
  0x8a   :  { %p7708_p5 = pnand %p7707_p4, %p7701_p1 }
  0x8c   :  { %7711 = shalt.err (!%p7708_p5)
}
  0x8d   :  { %184 = dma.hbm_to_vmem [thread:$0]  %s12668_s16, 16, %s182_s29, [#allocation21]  }
  0x8e   :  { %s12886_s2 = sld [smem:[#allocation116_spill]] }
  0x94   :  { %s7712_s0 = scalar_lea.hbm %s12886_s2, 16 }
  0x95   :  { %p7713_p6 = scmp.ne.s32.totalorder %s12886_s2, %s7712_s0  ;;  %p7716_p7 = scmp.lt.u32.totalorder %s7712_s0, %s12886_s2 }
  0x97   :  { %p7718_p8 = pnand %p7716_p7, %p7713_p6 }
  0x99   :  { %7721 = shalt.err (!%p7718_p8)
}
  0x9a   :  { %s7722_s4 = scalar_lea.vmem %s50_s8, 16  ;;  %s7726_s9 = scalar_lea.vmem %s50_s8, 32 }
  0x9b   :  { %p7723_p9 = scmp.ne.s32.totalorder %s50_s8, %s7722_s4  ;;  %p7727_p10 = scmp.lt.s32.totalorder %s50_s8, %s50_s8 }
  0x9c   :  { %p7728_p11 = scmp.lt.s32.totalorder %s7726_s9, %s7722_s4 }
  0x9e   :  { %p7729_p12 = por %p7728_p11, %p7727_p10 }
  0xa0   :  { %p7730_p13 = pnand %p7729_p12, %p7723_p9 }
  0xa2   :  { %7733 = shalt.err (!%p7730_p13)
}
  0xa3   :  { %52 = dma.hbm_to_vmem [thread:$0]  %s12886_s2, 16, %s50_s8, [#allocation3]  }
  0xa4   :  { %s7939_s27 = smov [#allocation7]   ;;  %s7940_s14 = smov [#allocation10]  }
  0xa5   :  { %s75_s3 = sshll.u32 %s7939_s27, 4  ;;  %s101_s24 = sshll.u32 %s7940_s14, 4  ;;  %s76_s3 = int_to_ptr.vmem [resolvable:$true] %s75_s3  ;;  %s102_s24 = int_to_ptr.vmem [resolvable:$true] %s101_s24 }
  0xa6   :  { %s12887_s28 = sld [smem:[#allocation120_spill]] }
  0xac   :  { %s7734_s12 = scalar_lea.hbm %s12887_s28, 16 }
  0xad   :  { %p7735_p0 = scmp.ne.s32.totalorder %s12887_s28, %s7734_s12  ;;  %p7738_p1 = scmp.lt.u32.totalorder %s7734_s12, %s12887_s28 }
  0xaf   :  { %p7740_p2 = pnand %p7738_p1, %p7735_p0 }
  0xb1   :  { %7743 = shalt.err (!%p7740_p2)
}
  0xb2   :  { %s7744_s8 = scalar_lea.vmem %s76_s3, 16  ;;  %s7748_s2 = scalar_lea.vmem %s76_s3, 32 }
  0xb3   :  { %p7745_p3 = scmp.ne.s32.totalorder %s76_s3, %s7744_s8  ;;  %p7749_p4 = scmp.lt.s32.totalorder %s76_s3, %s76_s3 }
  0xb4   :  { %p7750_p5 = scmp.lt.s32.totalorder %s7748_s2, %s7744_s8 }
  0xb6   :  { %p7751_p6 = por %p7750_p5, %p7749_p4 }
  0xb8   :  { %p7752_p7 = pnand %p7751_p6, %p7745_p3 }
  0xba   :  { %7755 = shalt.err (!%p7752_p7)
}
  0xbb   :  { %78 = dma.hbm_to_vmem [thread:$0]  %s12887_s28, 16, %s76_s3, [#allocation6]  }
  0xbc   :  { %s12888_s29 = sld [smem:[#allocation124_spill]] }
  0xc2   :  { %s7756_s27 = scalar_lea.hbm %s12888_s29, 16 }
  0xc3   :  { %p7757_p8 = scmp.ne.s32.totalorder %s12888_s29, %s7756_s27  ;;  %p7760_p9 = scmp.lt.u32.totalorder %s7756_s27, %s12888_s29 }
  0xc5   :  { %p7762_p10 = pnand %p7760_p9, %p7757_p8 }
  0xc7   :  { %7765 = shalt.err (!%p7762_p10)
}
  0xc8   :  { %s7766_s0 = scalar_lea.vmem %s102_s24, 16  ;;  %s7770_s5 = scalar_lea.vmem %s102_s24, 32 }
  0xc9   :  { %p7767_p11 = scmp.ne.s32.totalorder %s102_s24, %s7766_s0  ;;  %p7771_p12 = scmp.lt.s32.totalorder %s102_s24, %s102_s24 }
  0xca   :  { %p7772_p13 = scmp.lt.s32.totalorder %s7770_s5, %s7766_s0 }
  0xcc   :  { %p7773_p0 = por %p7772_p13, %p7771_p12 }
  0xce   :  { %p7774_p1 = pnand %p7773_p0, %p7767_p11 }
  0xd0   :  { %7777 = shalt.err (!%p7774_p1)
}
  0xd1   :  { %104 = dma.hbm_to_vmem [thread:$0]  %s12888_s29, 16, %s102_s24, [#allocation9]  }
  0xd2   :  { %s7941_s10 = smov [#allocation13]   ;;  %s7942_s8 = smov [#allocation16]  }
  0xd3   :  { %s122_s1 = sshll.u32 %s7941_s10, 4  ;;  %s146_s2 = sshll.u32 %s7942_s8, 4  ;;  %s123_s1 = int_to_ptr.vmem [resolvable:$true] %s122_s1  ;;  %s147_s2 = int_to_ptr.vmem [resolvable:$true] %s146_s2 }
  0xd4   :  { %s12889_s9 = sld [smem:[#allocation126_spill]] }
  0xda   :  { %s7778_s16 = scalar_lea.hbm %s12889_s9, 1024 }
  0xdb   :  { %p7779_p2 = scmp.ne.s32.totalorder %s12889_s9, %s7778_s16  ;;  %p7782_p3 = scmp.lt.u32.totalorder %s7778_s16, %s12889_s9 }
  0xdd   :  { %p7784_p4 = pnand %p7782_p3, %p7779_p2 }
  0xdf   :  { %7787 = shalt.err (!%p7784_p4)
}
  0xe0   :  { %s7788_s24 = scalar_lea.vmem %s123_s1, 1024  ;;  %p7793_p6 = scmp.lt.s32.totalorder %s123_s1, %s123_s1 }
  0xe1   :  { %p7789_p5 = scmp.ne.s32.totalorder %s123_s1, %s7788_s24  ;;  %p7794_p7 = scmp.lt.s32.totalorder %s7788_s24, %s7788_s24 }
  0xe3   :  { %p7795_p8 = por %p7794_p7, %p7793_p6 }
  0xe5   :  { %p7796_p9 = pnand %p7795_p8, %p7789_p5 }
  0xe7   :  { %7799 = shalt.err (!%p7796_p9)
}
  0xe8   :  { %128 = dma.hbm_to_vmem [thread:$0]  %s12889_s9, 1024, %s123_s1, [#allocation12], %s12885_s26, %s12885_s26, %s7930_s11  }
  0xe9   :  { %s7800_s3 = scalar_lea.hbm %s12665_s13, 2048 }
  0xea   :  { %p7801_p10 = scmp.ne.s32.totalorder %s12665_s13, %s7800_s3  ;;  %p7804_p11 = scmp.lt.u32.totalorder %s7800_s3, %s12665_s13 }
  0xec   :  { %p7806_p12 = pnand %p7804_p11, %p7801_p10 }
  0xee   :  { %7809 = shalt.err (!%p7806_p12)
}
  0xef   :  { %s7810_s4 = scalar_lea.vmem %s147_s2, 2048  ;;  %p7815_p0 = scmp.lt.s32.totalorder %s147_s2, %s147_s2 }
  0xf0   :  { %p7811_p13 = scmp.ne.s32.totalorder %s147_s2, %s7810_s4  ;;  %p7816_p1 = scmp.lt.s32.totalorder %s7810_s4, %s7810_s4 }
  0xf2   :  { %p7817_p2 = por %p7816_p1, %p7815_p0 }
  0xf4   :  { %p7818_p3 = pnand %p7817_p2, %p7811_p13 }
  0xf6   :  { %7821 = shalt.err (!%p7818_p3)
}
  0xf7   :  { %152 = dma.hbm_to_vmem [thread:$0]  %s12665_s13, 2048, %s147_s2, [#allocation15], %s12885_s26, %s12885_s26, %s7930_s11  }
  0xf8   :  { %s7943_s16 = smov [#allocation19]   ;;  %s7944_s14 = smov [#allocation22]  }
  0xf9   :  { %s168_s27 = sshll.u32 %s7943_s16, 4  ;;  %s191_s7 = sshll.u32 %s7944_s14, 4  ;;  %s169_s27 = int_to_ptr.vmem [resolvable:$true] %s168_s27  ;;  %s192_s7 = int_to_ptr.vmem [resolvable:$true] %s191_s7 }
  0xfa   :  { %s7822_s29 = scalar_lea.hbm %s12667_s15, 2048 }
  0xfb   :  { %p7823_p4 = scmp.ne.s32.totalorder %s12667_s15, %s7822_s29  ;;  %p7826_p5 = scmp.lt.u32.totalorder %s7822_s29, %s12667_s15 }
  0xfd   :  { %p7828_p6 = pnand %p7826_p5, %p7823_p4 }
  0xff   :  { %7831 = shalt.err (!%p7828_p6)
}
 0x100   :  { %s7832_s13 = scalar_lea.vmem %s169_s27, 2048  ;;  %p7837_p8 = scmp.lt.s32.totalorder %s169_s27, %s169_s27 }
 0x101   :  { %p7833_p7 = scmp.ne.s32.totalorder %s169_s27, %s7832_s13  ;;  %p7838_p9 = scmp.lt.s32.totalorder %s7832_s13, %s7832_s13 }
 0x103   :  { %p7839_p10 = por %p7838_p9, %p7837_p8 }
 0x105   :  { %p7840_p11 = pnand %p7839_p10, %p7833_p7 }
 0x107   :  { %7843 = shalt.err (!%p7840_p11)
}
 0x108   :  { %174 = dma.hbm_to_vmem [thread:$0]  %s12667_s15, 2048, %s169_s27, [#allocation18], %s12885_s26, %s12885_s26, %s7930_s11  }
 0x109   :  { %s7844_s6 = scalar_lea.hbm %s12669_s17, 16 }
 0x10a   :  { %p7845_p12 = scmp.ne.s32.totalorder %s12669_s17, %s7844_s6  ;;  %p7848_p13 = scmp.lt.u32.totalorder %s7844_s6, %s12669_s17 }
 0x10c   :  { %p7850_p0 = pnand %p7848_p13, %p7845_p12 }
 0x10e   :  { %7853 = shalt.err (!%p7850_p0)
}
 0x10f   :  { %s7854_s14 = scalar_lea.vmem %s192_s7, 16  ;;  %s7858_s30 = scalar_lea.vmem %s192_s7, 32 }
 0x110   :  { %p7855_p1 = scmp.ne.s32.totalorder %s192_s7, %s7854_s14  ;;  %p7859_p2 = scmp.lt.s32.totalorder %s192_s7, %s192_s7 }
 0x111   :  { %p7860_p3 = scmp.lt.s32.totalorder %s7858_s30, %s7854_s14 }
 0x113   :  { %p7861_p4 = por %p7860_p3, %p7859_p2 }
 0x115   :  { %p7862_p5 = pnand %p7861_p4, %p7855_p1 }
 0x117   :  { %7865 = shalt.err (!%p7862_p5)
}
 0x118   :  { %194 = dma.hbm_to_vmem [thread:$0]  %s12669_s17, 16, %s192_s7, [#allocation21]  }
 0x119   :  { %s7945_s24 = smov [#allocation23]   ;;  %s7866_s5 = scalar_lea.hbm %s12673_s21, 2048 }
 0x11a   :  { %s206_s29 = sshll.u32 %s7945_s24, 4  ;;  %p7867_p6 = scmp.ne.s32.totalorder %s12673_s21, %s7866_s5  ;;  %s207_s29 = int_to_ptr.vmem [resolvable:$true] %s206_s29 }
 0x11b   :  { %p7870_p7 = scmp.lt.u32.totalorder %s7866_s5, %s12673_s21 }
 0x11d   :  { %p7872_p8 = pnand %p7870_p7, %p7867_p6 }
 0x11f   :  { %7875 = shalt.err (!%p7872_p8)
}
 0x120   :  { %s7876_s10 = scalar_lea.vmem %s207_s29, 2048  ;;  %p7881_p10 = scmp.lt.s32.totalorder %s207_s29, %s207_s29 }
 0x121   :  { %p7877_p9 = scmp.ne.s32.totalorder %s207_s29, %s7876_s10  ;;  %p7882_p11 = scmp.lt.s32.totalorder %s7876_s10, %s7876_s10 }
 0x123   :  { %p7883_p12 = por %p7882_p11, %p7881_p10 }
 0x125   :  { %p7884_p13 = pnand %p7883_p12, %p7877_p9 }
 0x127   :  { %7887 = shalt.err (!%p7884_p13)
}
 0x128   :  { %212 = dma.hbm_to_vmem [thread:$0]  %s12673_s21, 2048, %s207_s29, [#allocation24], %s12885_s26, %s12885_s26, %s7930_s11  }
 0x129   :  { %7910 = dma.done.wait [#allocation3], 16  }
 0x12a   :  { %7911 = vsyncadd [#allocation3], 4294967280 }
 0x12b   :  { %7912 = dma.done.wait [#allocation6], 1040  }
 0x12c   :  { %7913 = vsyncadd [#allocation6], 4294966256 }
 0x12d   :  { %7914 = dma.done.wait [#allocation9], 1040  }
 0x12e   :  { %7915 = vsyncadd [#allocation9], 4294966256 }
 0x12f   :  { %7916 = dma.done.wait [#allocation12], 3072  }
 0x130   :  { %7917 = vsyncadd [#allocation12], 4294964224 }
 0x131   :  { %7918 = dma.done.wait [#allocation15], 3072  }
 0x132   :  { %7919 = vsyncadd [#allocation15], 4294964224 }
 0x133   :  { %7920 = dma.done.wait [#allocation18], 2064  }
 0x134   :  { %7921 = vsyncadd [#allocation18], 4294965232 }
 0x135   :  { %7922 = dma.done.wait [#allocation21], 32  }
 0x136   :  { %7923 = vsyncadd [#allocation21], 4294967264 }
 0x137   :  { %7924 = dma.done.wait [#allocation24], 2048  }
 0x138   :  { %7925 = vsyncadd [#allocation24], 4294965248  ;;  %v7946_v0 = vmov 0   ;;  %s12890_s26 = sld [smem:[#allocation118_spill]]  ;;  %s12891_s15 = sld [smem:[#allocation122_spill]] }
 0x139   :  { %7250 = vset.pattern.permute.xlu1 %v7946_v0  ;;  %7249 = vset.pattern.permute.xlu0 %v7946_v0  ;;  %s12892_s13 = sld [smem:[#allocation115_spill]]  ;;  %v8386_v34 = vld [vmem:[#allocation2] ss:$0 sm:$0xff]  ;;  %v12707_v56 = vmov 683565275   ;;  %s12971_s21 = sld [smem:[#allocation119_spill]] }
 0x13a   :  { %v12705_v58 = vmov 2475754826   ;;  %v12703_v60 = vmov 2131351028   ;;  %v12701_v63 = vmov 2102212464  }
 0x13b   :  { %s12983_s27 = sld [smem:[#allocation123_spill]]  ;;  %s7955_s2 = smov [#allocation25]  }
 0x13e   :  { %v289_v1 = vld [vmem:[%s12890_s26 + $0x10] sm:$0xff]  ;;  %v287_v2 = vld [vmem:[%s12890_s26] sm:$0xff]  ;;  %v290_v3 = vld [vmem:[%s12890_s26 + $0x18] sm:$0xff] }
 0x13f   :  { %316 = vperm.xlu1 %7250, %v289_v1   ;;  %306 = vperm.xlu0 %7249, %v287_v2   ;;  %v288_v4 = vld [vmem:[%s12890_s26 + $0x8] sm:$0xff]  ;;  %v291_v6 = vld [vmem:[%s12890_s26 + $0x20] sm:$0xff]  ;;  %v294_v7 = vld [vmem:[%s12890_s26 + $0x38] sm:$0xff]  ;;  %v12723_v1 = vmov 920167782  }
 0x140   :  { %v292_v5 = vld [vmem:[%s12890_s26 + $0x28] sm:$0xff]  ;;  %v293_v8 = vld [vmem:[%s12890_s26 + $0x30] sm:$0xff]  ;;  %v295_v10 = vld [vmem:[%s12890_s26 + $0x40] sm:$0xff] }
 0x141   :  { %v296_v9 = vld [vmem:[%s12890_s26 + $0x48] sm:$0xff]  ;;  %v298_v11 = vld [vmem:[%s12890_s26 + $0x58] sm:$0xff]  ;;  %v297_v12 = vld [vmem:[%s12890_s26 + $0x50] sm:$0xff] }
 0x142   :  { %v300_v13 = vld [vmem:[%s12890_s26 + $0x68] sm:$0xff]  ;;  %v299_v14 = vld [vmem:[%s12890_s26 + $0x60] sm:$0xff]  ;;  %v302_v15 = vld [vmem:[%s12890_s26 + $0x78] sm:$0xff] }
 0x143   :  { %321 = vperm.xlu1 %7250, %v290_v3   ;;  %311 = vperm.xlu0 %7249, %v288_v4   ;;  %v301_v16 = vld [vmem:[%s12890_s26 + $0x70] sm:$0xff]  ;;  %v2398_v17 = vld [vmem:[%s12891_s15 + $0x8] sm:$0xff]  ;;  %v2397_v18 = vld [vmem:[%s12891_s15] sm:$0xff] }
 0x144   :  { %v2400_v19 = vld [vmem:[%s12891_s15 + $0x18] sm:$0xff]  ;;  %v2399_v20 = vld [vmem:[%s12891_s15 + $0x10] sm:$0xff]  ;;  %v2402_v21 = vld [vmem:[%s12891_s15 + $0x28] sm:$0xff] }
 0x145   :  { %v2401_v22 = vld [vmem:[%s12891_s15 + $0x20] sm:$0xff]  ;;  %v2404_v23 = vld [vmem:[%s12891_s15 + $0x38] sm:$0xff]  ;;  %v2403_v24 = vld [vmem:[%s12891_s15 + $0x30] sm:$0xff] }
 0x146   :  { %v2406_v25 = vld [vmem:[%s12891_s15 + $0x48] sm:$0xff]  ;;  %v2405_v26 = vld [vmem:[%s12891_s15 + $0x40] sm:$0xff]  ;;  %v2408_v27 = vld [vmem:[%s12891_s15 + $0x58] sm:$0xff] }
 0x147   :  { %331 = vperm.xlu1 %7250, %v292_v5   ;;  %326 = vperm.xlu0 %7249, %v291_v6   ;;  %v2407_v28 = vld [vmem:[%s12891_s15 + $0x50] sm:$0xff]  ;;  %v2410_v29 = vld [vmem:[%s12891_s15 + $0x68] sm:$0xff]  ;;  %v2409_v30 = vld [vmem:[%s12891_s15 + $0x60] sm:$0xff] }
 0x148   :  { %v2412_v31 = vld [vmem:[%s12891_s15 + $0x78] sm:$0xff]  ;;  %v2411_v32 = vld [vmem:[%s12891_s15 + $0x70] sm:$0xff]  ;;  %v8384_v33 = vld [vmem:[%s12892_s13] ss:$0 sm:$0xff] }
 0x14b   :  { %341 = vperm.xlu1 %7250, %v294_v7   ;;  %336 = vperm.xlu0 %7249, %v293_v8  }
 0x14f   :  { %351 = vperm.xlu1 %7250, %v296_v9   ;;  %346 = vperm.xlu0 %7249, %v295_v10   ;;  %v12716_v9 = vmov 1326507024  }
 0x153   :  { %361 = vperm.xlu1 %7250, %v298_v11   ;;  %356 = vperm.xlu0 %7249, %v297_v12  }
 0x157   :  { %371 = vperm.xlu1 %7250, %v300_v13   ;;  %366 = vperm.xlu0 %7249, %v299_v14  }
 0x15b   :  { %381 = vperm.xlu1 %7250, %v302_v15   ;;  %376 = vperm.xlu0 %7249, %v301_v16  }
 0x15f   :  { %2420 = vperm.xlu1 %7250, %v2398_v17   ;;  %2415 = vperm.xlu0 %7249, %v2397_v18  }
 0x163   :  { %2430 = vperm.xlu1 %7250, %v2400_v19   ;;  %2425 = vperm.xlu0 %7249, %v2399_v20  }
 0x167   :  { %2440 = vperm.xlu1 %7250, %v2402_v21   ;;  %2435 = vperm.xlu0 %7249, %v2401_v22  }
 0x16b   :  { %2450 = vperm.xlu1 %7250, %v2404_v23   ;;  %2445 = vperm.xlu0 %7249, %v2403_v24  }
 0x16f   :  { %2460 = vperm.xlu1 %7250, %v2406_v25   ;;  %2455 = vperm.xlu0 %7249, %v2405_v26  }
 0x173   :  { %2470 = vperm.xlu1 %7250, %v2408_v27   ;;  %2465 = vperm.xlu0 %7249, %v2407_v28  }
 0x177   :  { %2480 = vperm.xlu1 %7250, %v2410_v29   ;;  %2475 = vperm.xlu0 %7249, %v2409_v30  }
 0x17b   :  { %2490 = vperm.xlu1 %7250, %v2412_v31   ;;  %2485 = vperm.xlu0 %7249, %v2411_v32  }
 0x1be   :  { %v317_v35 = vpop.permute.xlu1 %316 }
 0x1bf   :  { %v392_v36 = vmul.f32 %v8384_v33, %v317_v35 }
 0x1c1   :  { %v8390_v37 = vadd.f32 %v8386_v34, %v392_v36 }
 0x1c2   :  { %v322_v38 = vpop.permute.xlu1 %321 }
 0x1c3   :  { %12893 = vst [vmem:[#allocation35_spill] sm:$0xff] %v8390_v37  ;;  %v640_v39 = vand.u32 2139095040, %v8390_v37  ;;  %v393_v40 = vmul.f32 %v8384_v33, %v322_v38  ;;  %v12700_v44 = vand.u32 2147483647, %v8390_v37 }
 0x1c5   :  { %v641_v41 = vshrl.u32 %v640_v39, 23  ;;  %v8395_v42 = vadd.f32 %v8386_v34, %v393_v40  ;;  %v644_v48 = vand.u32 8388607, %v12700_v44 }
 0x1c6   :  { %v332_v54 = vpop.permute.xlu1 %331 }
 0x1c7   :  { %12894 = vst [vmem:[#allocation36_spill] sm:$0xff] %v8395_v42  ;;  %v6348_v43 = vadd.s32 4294967169, %v641_v41  ;;  %v744_v45 = vand.u32 2139095040, %v8395_v42  ;;  %v12698_v53 = vand.u32 2147483647, %v8395_v42  ;;  %v645_v62 = vor.u32 8388608, %v644_v48 }
 0x1c8   :  { %v395_v7 = vmul.f32 %v8384_v33, %v332_v54 }
 0x1c9   :  { %v647_v46 = vadd.s32 1, %v6348_v43  ;;  %v745_v47 = vshrl.u32 %v744_v45, 23  ;;  %v748_v11 = vand.u32 8388607, %v12698_v53  ;;  %v685_v24 = vshll.u32 %v645_v62, 8 }
 0x1ca   :  { %v8434_v25 = vadd.f32 %v8386_v34, %v395_v7 }
 0x1cb   :  { %vm648_vm0 = vcmp.gt.s32.totalorder %v647_v46, 0  ;;  %v6352_v50 = vadd.s32 4294967169, %v745_v47  ;;  %v749_v28 = vor.u32 8388608, %v748_v11  ;;  %v307_v47 = vpop.permute.xlu0 %306 }
 0x1cc   :  { %v649_v49 = vsel %vm648_vm0, %v647_v46, 0  ;;  %12895 = vst [vmem:[#allocation37_spill] sm:$0xff] %v8434_v25 }
 0x1cd   :  { %v651_v51 = vand.u32 31, %v649_v49  ;;  %v8401_v52 = vshrl.u32 %v649_v49, 5  ;;  %v751_v3 = vadd.s32 1, %v6352_v50 }
 0x1cf   :  { %v652_v55 = vsub.s32 32, %v651_v51  ;;  %v654_v57 = vshll.u32 %v12707_v56, %v651_v51  ;;  %v657_v59 = vshll.u32 %v12705_v58, %v651_v51  ;;  %v660_v61 = vshll.u32 %v12703_v60, %v651_v51 }
 0x1d0   :  { %v663_v0 = vshll.u32 %v12701_v63, %v651_v51  ;;  %v666_v2 = vshll.u32 %v12723_v1, %v651_v51  ;;  %vm669_vm1 = vcmp.lt.s32.totalorder %v8401_v52, 1  ;;  %vm672_vm2 = vcmp.lt.s32.totalorder %v8401_v52, 4 }
 0x1d1   :  { %v655_v4 = vshrl.u32 %v12705_v58, %v652_v55  ;;  %v658_v5 = vshrl.u32 %v12703_v60, %v652_v55  ;;  %v661_v6 = vshrl.u32 %v12701_v63, %v652_v55  ;;  %v664_v8 = vshrl.u32 %v12723_v1, %v652_v55 }
 0x1d2   :  { %v667_v10 = vshrl.u32 %v12716_v9, %v652_v55  ;;  %vm671_vm3 = vcmp.lt.s32.totalorder %v8401_v52, 3  ;;  %vm752_vm4 = vcmp.gt.s32.totalorder %v751_v3, 0  ;;  %vm670_vm5 = vcmp.lt.s32.totalorder %v8401_v52, 2 }
 0x1d3   :  { %v656_v12 = vor.u32 %v655_v4, %v654_v57  ;;  %v659_v13 = vor.u32 %v658_v5, %v657_v59  ;;  %v662_v14 = vor.u32 %v661_v6, %v660_v61  ;;  %v665_v15 = vor.u32 %v664_v8, %v663_v0 }
 0x1d4   :  { %v668_v16 = vor.u32 %v667_v10, %v666_v2  ;;  %v753_v21 = vsel %vm752_vm4, %v751_v3, 0  ;;  %v653_v41 = vshrl.u32 %v12707_v56, %v652_v55  ;;  %v8459_v57 = vshll.u32 %v749_v28, 8 }
 0x1d5   :  { %v677_v17 = vsel %vm669_vm1, %v656_v12, %v659_v13  ;;  %v681_v18 = vsel %vm669_vm1, %v659_v13, %v662_v14  ;;  %v678_v19 = vsel %vm672_vm2, %v665_v15, 920167782  ;;  %v755_v29 = vand.u32 31, %v753_v21 }
 0x1d6   :  { %v682_v20 = vsel %vm672_vm2, %v668_v16, 1326507024  ;;  %v679_v22 = vsel %vm671_vm3, %v662_v14, %v678_v19  ;;  %v674_v43 = vsel %vm672_vm2, %v662_v14, 2102212464  ;;  %v754_v45 = vshrl.u32 %v753_v21, 5 }
 0x1d7   :  { %v683_v23 = vsel %vm671_vm3, %v665_v15, %v682_v20  ;;  %v680_v26 = vsel %vm670_vm5, %v677_v17, %v679_v22  ;;  %v756_v36 = vsub.s32 32, %v755_v29  ;;  %v758_v38 = vshll.u32 %v12707_v56, %v755_v29 }
 0x1d8   :  { %v684_v27 = vsel %vm670_vm5, %v681_v18, %v683_v23  ;;  %v8443_v32 = vmul.u32.u64.low %v685_v24, %v680_v26  ;;  %v8444_v35 = vmul.u32.u64.high %v685_v24, %v680_v26, %v8443_v32  ;;  %v761_v39 = vshll.u32 %v12705_v58, %v755_v29 }
 0x1d9   :  { %v8440_v30 = vmul.u32.u64.low %v685_v24, %v684_v27  ;;  %v8441_v31 = vmul.u32.u64.high %v685_v24, %v684_v27, %v8440_v30  ;;  %v764_v40 = vshll.u32 %v12703_v60, %v755_v29  ;;  %v767_v46 = vshll.u32 %v12701_v63, %v755_v29 }
 0x1da   :  { %v759_v48 = vshrl.u32 %v12705_v58, %v756_v36  ;;  %v762_v49 = vshrl.u32 %v12703_v60, %v756_v36  ;;  %v765_v50 = vshrl.u32 %v12701_v63, %v756_v36  ;;  %v770_v51 = vshll.u32 %v12723_v1, %v755_v29 }
 0x1db   :  { %v768_v54 = vshrl.u32 %v12723_v1, %v756_v36  ;;  %v771_v62 = vshrl.u32 %v12716_v9, %v756_v36  ;;  %v673_v0 = vsel %vm669_vm1, %v653_v41, %v656_v12  ;;  %v675_v2 = vsel %vm671_vm3, %v659_v13, %v674_v43  ;;  %v8475_v13 = vpop.permute.xlu0 %311 }
 0x1dc   :  { %v760_v55 = vor.u32 %v759_v48, %v758_v38  ;;  %v763_v59 = vor.u32 %v762_v49, %v761_v39  ;;  %v766_v61 = vor.u32 %v765_v50, %v764_v40  ;;  %v952_v4 = vand.u32 2139095040, %v8434_v25 }
 0x1dd   :  { %v769_v3 = vor.u32 %v768_v54, %v767_v46  ;;  %v695_v5 = vadd.s32 1, %v8444_v35  ;;  %v772_v6 = vor.u32 %v771_v62, %v770_v51  ;;  %vm773_vm6 = vcmp.lt.s32.totalorder %v754_v45, 1 }
 0x1de   :  { %vm776_vm7 = vcmp.lt.s32.totalorder %v754_v45, 4  ;;  %vm775_vm8 = vcmp.lt.s32.totalorder %v754_v45, 3  ;;  %v781_v7 = vsel %vm773_vm6, %v760_v55, %v763_v59  ;;  %v785_v10 = vsel %vm773_vm6, %v763_v59, %v766_v61 }
 0x1df   :  { %v782_v8 = vsel %vm776_vm7, %v769_v3, 920167782  ;;  %vm694_vm9 = vc.u32 %v8441_v31, %v8443_v32  ;;  %vm774_vm10 = vcmp.lt.s32.totalorder %v754_v45, 2  ;;  %v786_v12 = vsel %vm776_vm7, %v772_v6, 1326507024  ;;  %v327_v30 = vpop.permute.xlu0 %326 }
 0x1e0   :  { %v783_v11 = vsel %vm775_vm8, %v766_v61, %v782_v8  ;;  %v676_v14 = vsel %vm670_vm5, %v673_v0, %v675_v2  ;;  %v787_v16 = vsel %vm775_vm8, %v769_v3, %v786_v12  ;;  %v757_v17 = vshrl.u32 %v12707_v56, %v756_v36 }
 0x1e1   :  { %v784_v15 = vsel %vm774_vm10, %v781_v7, %v783_v11  ;;  %v788_v18 = vsel %vm774_vm10, %v785_v10, %v787_v16  ;;  %v696_v21 = vsel %vm694_vm9, %v695_v5, %v8444_v35  ;;  %v953_v52 = vshrl.u32 %v952_v4, 23 }
 0x1e2   :  { %v8484_v19 = vmul.u32.u64.low %v8459_v57, %v784_v15  ;;  %v8485_v20 = vmul.u32.u64.high %v8459_v57, %v784_v15, %v8484_v19  ;;  %v8490_v22 = vmul.u32.u64.low %v8459_v57, %v788_v18  ;;  %v8491_v23 = vmul.u32.u64.high %v8459_v57, %v788_v18, %v8490_v22 }
 0x1e3   :  { %v692_v26 = vmul.u32 %v685_v24, %v676_v14  ;;  %v778_v27 = vsel %vm776_vm7, %v766_v61, 2102212464  ;;  %v6360_v28 = vadd.s32 4294967169, %v953_v52  ;;  %v777_v36 = vsel %vm773_vm6, %v757_v17, %v760_v55  ;;  %v342_v22 = vpop.permute.xlu1 %341 }
 0x1e4   :  { %v779_v38 = vsel %vm775_vm8, %v763_v59, %v778_v27  ;;  %v12696_v40 = vand.u32 2147483647, %v8434_v25  ;;  %v394_v35 = vmul.f32 %v8384_v33, %v327_v30  ;;  %v799_v43 = vadd.s32 1, %v8485_v20 }
 0x1e5   :  { %v8494_v29 = vadd.s32 %v696_v21, %v692_v26  ;;  %v959_v39 = vadd.s32 1, %v6360_v28  ;;  %v780_v24 = vsel %vm774_vm10, %v777_v36, %v779_v38  ;;  %vm798_vm12 = vc.u32 %v8491_v23, %v8484_v19 }
 0x1e6   :  { %v390_v49 = vmul.f32 %v8384_v33, %v307_v47  ;;  %v796_v50 = vmul.u32 %v8459_v57, %v780_v24  ;;  %v800_v55 = vsel %vm798_vm12, %v799_v43, %v8485_v20  ;;  %v956_v45 = vand.u32 8388607, %v12696_v40 }
 0x1e7   :  { %vm960_vm11 = vcmp.gt.s32.totalorder %v959_v39, 0  ;;  %v698_v41 = vadd.s32 536870912, %v8494_v29  ;;  %v8513_v59 = vadd.f32 %v8386_v34, %v394_v35 }
 0x1e8   :  { %v961_v46 = vsel %vm960_vm11, %v959_v39, 0  ;;  %v957_v10 = vor.u32 8388608, %v956_v45  ;;  %v801_v12 = vadd.s32 %v800_v55, %v796_v50  ;;  %v8527_v17 = vadd.f32 %v8386_v34, %v390_v49 }
 0x1e9   :  { %v963_v48 = vand.u32 31, %v961_v46  ;;  %v8507_v54 = vshrl.u32 %v698_v41, 30  ;;  %12897 = vst [vmem:[#allocation39_spill] sm:$0xff] %v8513_v59  ;;  %v962_v57 = vshrl.u32 %v961_v46, 5  ;;  %v848_v11 = vand.u32 2139095040, %v8513_v59 }
 0x1ea   :  { %v997_v26 = vshll.u32 %v957_v10, 8  ;;  %v802_v28 = vadd.s32 536870912, %v801_v12  ;;  %v397_v41 = vmul.f32 %v8384_v33, %v342_v22  ;;  %v432_v45 = vand.u32 2139095040, %v8527_v17 }
 0x1eb   :  { %v964_v51 = vsub.s32 32, %v963_v48  ;;  %12896 = vst [vmem:[#allocation38_spill] sm:$0xff] %v8507_v54  ;;  %v966_v61 = vshll.u32 %v12707_v56, %v963_v48  ;;  %v969_v0 = vshll.u32 %v12705_v58, %v963_v48  ;;  %v972_v2 = vshll.u32 %v12703_v60, %v963_v48 }
 0x1ec   :  { %v975_v7 = vshll.u32 %v12701_v63, %v963_v48  ;;  %v978_v16 = vshll.u32 %v12723_v1, %v963_v48  ;;  %vm981_vm13 = vcmp.lt.s32.totalorder %v962_v57, 1  ;;  %v700_v18 = vshll.u32 %v8507_v54, 30 }
 0x1ed   :  { %v967_v62 = vshrl.u32 %v12705_v58, %v964_v51  ;;  %v970_v47 = vshrl.u32 %v12703_v60, %v964_v51  ;;  %v973_v3 = vshrl.u32 %v12701_v63, %v964_v51  ;;  %v976_v4 = vshrl.u32 %v12723_v1, %v964_v51 }
 0x1ee   :  { %v979_v8 = vshrl.u32 %v12716_v9, %v964_v51  ;;  %vm984_vm14 = vcmp.lt.s32.totalorder %v962_v57, 4  ;;  %vm983_vm15 = vcmp.lt.s32.totalorder %v962_v57, 3  ;;  %v849_v27 = vshrl.u32 %v848_v11, 23 }
 0x1ef   :  { %v968_v5 = vor.u32 %v967_v62, %v966_v61  ;;  %v971_v6 = vor.u32 %v970_v47, %v969_v0  ;;  %v974_v14 = vor.u32 %v973_v3, %v972_v2  ;;  %v977_v15 = vor.u32 %v976_v4, %v975_v7 }
 0x1f0   :  { %v980_v20 = vor.u32 %v979_v8, %v978_v16  ;;  %vm982_vm0 = vcmp.lt.s32.totalorder %v962_v57, 2  ;;  %v965_v38 = vshrl.u32 %v12707_v56, %v964_v51  ;;  %v6356_v55 = vadd.s32 4294967169, %v849_v27 }
 0x1f1   :  { %v989_v21 = vsel %vm981_vm13, %v968_v5, %v971_v6  ;;  %v990_v52 = vsel %vm984_vm14, %v977_v15, 920167782  ;;  %v986_v30 = vsel %vm984_vm14, %v974_v14, 2102212464  ;;  %v993_v35 = vsel %vm981_vm13, %v971_v6, %v974_v14 }
 0x1f2   :  { %v991_v36 = vsel %vm983_vm15, %v974_v14, %v990_v52  ;;  %v994_v24 = vsel %vm984_vm14, %v980_v20, 1326507024  ;;  %v985_v48 = vsel %vm981_vm13, %v965_v38, %v968_v5  ;;  %v987_v49 = vsel %vm983_vm15, %v971_v6, %v986_v30 }
 0x1f3   :  { %v992_v39 = vsel %vm982_vm0, %v989_v21, %v991_v36  ;;  %v995_v50 = vsel %vm983_vm15, %v977_v15, %v994_v24  ;;  %v8544_v51 = vsub.s32 %v8494_v29, %v700_v18  ;;  %v8547_v61 = vshrl.u32 %v802_v28, 30 }
 0x1f4   :  { %v8536_v43 = vmul.u32.u64.low %v997_v26, %v992_v39  ;;  %v8537_v46 = vmul.u32.u64.high %v997_v26, %v992_v39, %v8536_v43  ;;  %v996_v62 = vsel %vm982_vm0, %v993_v35, %v995_v50  ;;  %v8554_v2 = vadd.f32 %v8386_v34, %v397_v41 }
 0x1f5   :  { %12898 = vst [vmem:[#allocation40_spill] sm:$0xff] %v8547_v61  ;;  %v8550_v0 = vmul.u32.u64.low %v997_v26, %v996_v62  ;;  %v8551_v47 = vmul.u32.u64.high %v997_v26, %v996_v62, %v8550_v0  ;;  %v988_v3 = vsel %vm982_vm0, %v985_v48, %v987_v49  ;;  %v391_v29 = vmul.f32 %v8384_v33, %v8475_v13 }
 0x1f6   :  { %12899 = vst [vmem:[#allocation41_spill] sm:$0xff] %v8554_v2  ;;  %v1007_v4 = vadd.s32 1, %v8537_v46  ;;  %v855_v5 = vadd.s32 1, %v6356_v55  ;;  %v703_v6 = vsub.s32 0, %v8544_v51  ;;  %v433_v7 = vshrl.u32 %v432_v45, 23  ;;  %v337_v0 = vpop.permute.xlu0 %336 }
 0x1f7   :  { %v804_v8 = vshll.u32 %v8547_v61, 30  ;;  %v12697_v10 = vand.u32 2147483647, %v8513_v59  ;;  %v1004_v11 = vmul.u32 %v997_v26, %v988_v3  ;;  %vm1006_vm1 = vc.u32 %v8551_v47, %v8536_v43 }
 0x1f8   :  { %vm856_vm2 = vcmp.gt.s32.totalorder %v855_v5, 0  ;;  %v1160_v57 = vand.u32 2139095040, %v8554_v2  ;;  %v1008_v14 = vsel %vm1006_vm1, %v1007_v4, %v8537_v46  ;;  %v6349_v18 = vmin.u32 %v703_v6, %v8544_v51 }
 0x1f9   :  { %v857_v15 = vsel %vm856_vm2, %v855_v5, 0  ;;  %v1009_v16 = vadd.s32 %v1008_v14, %v1004_v11  ;;  %v6340_v20 = vadd.s32 4294967169, %v433_v7  ;;  %v8569_v21 = vadd.f32 %v8386_v34, %v391_v29 }
 0x1fa   :  { %v859_v13 = vand.u32 31, %v857_v15  ;;  %v852_v22 = vand.u32 8388607, %v12697_v10  ;;  %v8573_v52 = vsub.s32 %v801_v12, %v804_v8  ;;  %v1161_v28 = vshrl.u32 %v1160_v57, 23 }
 0x1fb   :  { %12900 = vst [vmem:[#allocation42_spill] sm:$0xff] %v8569_v21  ;;  %v1010_v26 = vadd.s32 536870912, %v1009_v16  ;;  %v8575_v30 = vshrl.u32 %v857_v15, 5  ;;  %v705_v6 = vclz %v6349_v18  ;;  %v536_v7 = vand.u32 2139095040, %v8569_v21 }
 0x1fc   :  { %v860_v27 = vsub.s32 32, %v859_v13  ;;  %v862_v36 = vshll.u32 %v12707_v56, %v859_v13  ;;  %v865_v38 = vshll.u32 %v12705_v58, %v859_v13  ;;  %v868_v39 = vshll.u32 %v12703_v60, %v859_v13 }
 0x1fd   :  { %v8580_v35 = vshrl.u32 %v1010_v26, 30  ;;  %v871_v12 = vshll.u32 %v12701_v63, %v859_v13  ;;  %v874_v49 = vshll.u32 %v12723_v1, %v859_v13  ;;  %v807_v55 = vsub.s32 0, %v8573_v52 }
 0x1fe   :  { %v863_v41 = vshrl.u32 %v12705_v58, %v860_v27  ;;  %v866_v24 = vshrl.u32 %v12703_v60, %v860_v27  ;;  %v869_v46 = vshrl.u32 %v12701_v63, %v860_v27  ;;  %v872_v48 = vshrl.u32 %v12723_v1, %v860_v27 }
 0x1ff   :  { %12901 = vst [vmem:[#allocation43_spill] sm:$0xff] %v8580_v35  ;;  %v875_v50 = vshrl.u32 %v12716_v9, %v860_v27  ;;  %v6368_v62 = vadd.s32 4294967169, %v1161_v28  ;;  %v1012_v8 = vshll.u32 %v8580_v35, 30  ;;  %v439_v11 = vadd.s32 1, %v6340_v20 }
 0x200   :  { %v864_v45 = vor.u32 %v863_v41, %v862_v36  ;;  %v867_v3 = vor.u32 %v866_v24, %v865_v38  ;;  %v870_v4 = vor.u32 %v869_v46, %v868_v39  ;;  %v873_v29 = vor.u32 %v872_v48, %v871_v12 }
 0x201   :  { %v876_v5 = vor.u32 %v875_v50, %v874_v49  ;;  %v853_v57 = vor.u32 8388608, %v852_v22  ;;  %vm880_vm3 = vcmp.lt.s32.totalorder %v8575_v30, 4  ;;  %v396_v14 = vmul.f32 %v8384_v33, %v337_v0 }
 0x202   :  { %v6353_v15 = vmin.u32 %v807_v55, %v8573_v52  ;;  %vm877_vm4 = vcmp.lt.s32.totalorder %v8575_v30, 1  ;;  %vm879_vm5 = vcmp.lt.s32.totalorder %v8575_v30, 3  ;;  %v886_v13 = vsel %vm880_vm3, %v873_v29, 920167782 }
 0x203   :  { %v885_v18 = vsel %vm877_vm4, %v864_v45, %v867_v3  ;;  %v887_v20 = vsel %vm879_vm5, %v870_v4, %v886_v13  ;;  %v890_v22 = vsel %vm880_vm3, %v876_v5, 1326507024  ;;  %v1167_v26 = vadd.s32 1, %v6368_v62 }
 0x204   :  { %v6350_v28 = vadd.s32 4294967294, %v705_v6  ;;  %v8605_v36 = vsub.s32 %v1009_v16, %v1012_v8  ;;  %v889_v38 = vsel %vm877_vm4, %v867_v3, %v870_v4  ;;  %v891_v39 = vsel %vm879_vm5, %v873_v29, %v890_v22 }
 0x205   :  { %vm440_vm6 = vcmp.gt.s32.totalorder %v439_v11, 0  ;;  %vm878_vm7 = vcmp.lt.s32.totalorder %v8575_v30, 2  ;;  %vm1168_vm8 = vcmp.gt.s32.totalorder %v1167_v26, 0  ;;  %v537_v41 = vshrl.u32 %v536_v7, 23 }
 0x206   :  { %v888_v24 = vsel %vm878_vm7, %v885_v18, %v887_v20  ;;  %v12695_v12 = vand.u32 2147483647, %v8554_v2  ;;  %v1169_v46 = vsel %vm1168_vm8, %v1167_v26, 0  ;;  %v809_v48 = vclz %v6353_v15 }
 0x207   :  { %v892_v16 = vsel %vm878_vm7, %v889_v38, %v891_v39  ;;  %v8617_v49 = vshll.u32 %v853_v57, 8  ;;  %v1171_v50 = vand.u32 31, %v1169_v46  ;;  %vm6351_vm9 = vcmp.lt.s32.totalorder %v6350_v28, 0 }
 0x208   :  { %v8619_v55 = vsel %vm440_vm6, %v439_v11, 0  ;;  %v1015_v62 = vsub.s32 0, %v8605_v36  ;;  %v8623_v0 = vadd.f32 %v8386_v34, %v396_v14  ;;  %v882_v29 = vsel %vm880_vm3, %v870_v4, 2102212464 }
 0x209   :  { %v8628_v5 = vmul.u32.u64.low %v8617_v49, %v888_v24  ;;  %v8629_v6 = vmul.u32.u64.high %v8617_v49, %v888_v24, %v8628_v5  ;;  %v8632_v7 = vsub.s32 32, %v1171_v50  ;;  %v8634_v8 = vadd.s32 4294967169, %v537_v41 }
 0x20a   :  { %12902 = vst [vmem:[#allocation44_spill] sm:$0xff] %v8623_v0  ;;  %v861_v11 = vshrl.u32 %v12707_v56, %v860_v27  ;;  %v8638_v57 = vmul.u32.u64.low %v8617_v49, %v892_v16  ;;  %v8639_v15 = vmul.u32.u64.high %v8617_v49, %v892_v16, %v8638_v57  ;;  %v8641_v14 = vsel %vm6351_vm9, 0, %v6350_v28 }
 0x20b   :  { %v6354_v13 = vadd.s32 4294967294, %v809_v48  ;;  %v1164_v4 = vand.u32 8388607, %v12695_v12  ;;  %v1175_v18 = vshrl.u32 %v12705_v58, %v8632_v7  ;;  %v6361_v20 = vmin.u32 %v1015_v62, %v8605_v36 }
 0x20c   :  { %v881_v22 = vsel %vm877_vm4, %v861_v11, %v864_v45  ;;  %v883_v27 = vsel %vm879_vm5, %v867_v3, %v882_v29  ;;  %v1056_v26 = vand.u32 2139095040, %v8623_v0  ;;  %v1174_v28 = vshll.u32 %v12707_v56, %v1171_v50 }
 0x20d   :  { %v1177_v38 = vshll.u32 %v12705_v58, %v1171_v50  ;;  %v1178_v39 = vshrl.u32 %v12703_v60, %v8632_v7  ;;  %v1181_v41 = vshrl.u32 %v12701_v63, %v8632_v7  ;;  %v8659_v24 = vshrl.u32 %v1169_v46, 5 }
 0x20e   :  { %v1180_v48 = vshll.u32 %v12703_v60, %v1171_v50  ;;  %v1183_v45 = vshll.u32 %v12701_v63, %v1171_v50  ;;  %v1184_v3 = vshrl.u32 %v12723_v1, %v8632_v7  ;;  %v8665_v16 = vor.u32 %v1175_v18, %v1174_v28 }
 0x20f   :  { %v8667_v62 = vor.u32 %v1178_v39, %v1177_v38  ;;  %v1186_v29 = vshll.u32 %v12723_v1, %v1171_v50  ;;  %v1187_v11 = vshrl.u32 %v12716_v9, %v8632_v7  ;;  %v709_v57 = vsub.s32 32, %v8641_v14 }
 0x210   :  { %vm6355_vm10 = vcmp.lt.s32.totalorder %v6354_v13, 0  ;;  %v1182_v46 = vor.u32 %v1181_v41, %v1180_v48  ;;  %v1185_v12 = vor.u32 %v1184_v3, %v1183_v45  ;;  %v884_v40 = vsel %vm878_vm7, %v881_v22, %v883_v27 }
 0x211   :  { %v903_v10 = vadd.s32 1, %v8629_v6  ;;  %v1165_v53 = vor.u32 8388608, %v1164_v4  ;;  %v1188_v18 = vor.u32 %v1187_v11, %v1186_v29  ;;  %v1017_v28 = vclz %v6361_v20 }
 0x212   :  { %vm902_vm11 = vc.u32 %v8639_v15, %v8628_v5  ;;  %vm1189_vm12 = vcmp.lt.s32.totalorder %v8659_v24, 1  ;;  %vm1192_vm13 = vcmp.lt.s32.totalorder %v8659_v24, 4  ;;  %vm1191_vm14 = vcmp.lt.s32.totalorder %v8659_v24, 3 }
 0x213   :  { %v1197_v30 = vsel %vm1189_vm12, %v8665_v16, %v8667_v62  ;;  %v1198_v50 = vsel %vm1192_vm13, %v1185_v12, 920167782  ;;  %v1057_v4 = vshrl.u32 %v1056_v26, 23  ;;  %v713_v20 = vsub.s32 4294967266, %v8641_v14 }
 0x214   :  { %v8689_v22 = vsel %vm6355_vm10, 0, %v6354_v13  ;;  %vm1190_vm15 = vcmp.lt.s32.totalorder %v8659_v24, 2  ;;  %v1199_v27 = vsel %vm1191_vm14, %v1182_v46, %v1198_v50  ;;  %v904_v38 = vsel %vm902_vm11, %v903_v10, %v8629_v6 }
 0x215   :  { %v1200_v39 = vsel %vm1190_vm15, %v1197_v30, %v1199_v27  ;;  %v1201_v41 = vsel %vm1189_vm12, %v8667_v62, %v1182_v46  ;;  %v1202_v26 = vsel %vm1192_vm13, %v1188_v18, 1326507024  ;;  %v6362_v48 = vadd.s32 4294967294, %v1017_v28 }
 0x216   :  { %v900_v13 = vmul.u32 %v8617_v49, %v884_v40  ;;  %v1203_v45 = vsel %vm1191_vm14, %v1185_v12, %v1202_v26  ;;  %v8705_v3 = vshll.u32 %v1165_v53, 8  ;;  %v693_v10 = vadd.s32 %v8443_v32, %v8441_v31 }
 0x217   :  { %v817_v6 = vsub.s32 4294967266, %v8689_v22  ;;  %v1204_v29 = vsel %vm1190_vm15, %v1201_v41, %v1203_v45  ;;  %v6364_v11 = vadd.s32 4294967169, %v1057_v4  ;;  %v8713_v30 = vand.u32 31, %v8619_v55 }
 0x218   :  { %v8715_v18 = vadd.s32 %v904_v38, %v900_v13  ;;  %v8718_v40 = vmul.u32.u64.low %v8705_v3, %v1200_v39  ;;  %v8719_v49 = vmul.u32.u64.high %v8705_v3, %v1200_v39, %v8718_v40  ;;  %v711_v53 = vshrl.u32 %v693_v10, %v709_v57  ;;  %v352_v57 = vpop.permute.xlu1 %351 }
 0x219   :  { %v8723_v12 = vmul.u32.u64.low %v8705_v3, %v1204_v29  ;;  %v8724_v31 = vmul.u32.u64.high %v8705_v3, %v1204_v29, %v8723_v12  ;;  %v1063_v32 = vadd.s32 1, %v6364_v11  ;;  %v710_v28 = vshll.u32 %v8544_v51, %v8641_v14 }
 0x21a   :  { %v714_v50 = vadd.s32 127, %v713_v20  ;;  %v8729_v4 = vadd.s32 1, %v8634_v8  ;;  %vm6363_vm0 = vcmp.lt.s32.totalorder %v6362_v48, 0  ;;  %v813_v27 = vsub.s32 32, %v8689_v22 }
 0x21b   :  { %v818_v38 = vadd.s32 127, %v817_v6  ;;  %v1194_v39 = vsel %vm1192_vm13, %v1182_v46, 2102212464  ;;  %vm1064_vm1 = vcmp.gt.s32.totalorder %v1063_v32, 0  ;;  %v906_v41 = vadd.s32 536870912, %v8715_v18 }
 0x21c   :  { %v1173_v26 = vshrl.u32 %v12707_v56, %v8632_v7  ;;  %v12699_v51 = vand.u32 2147483647, %v8623_v0  ;;  %v1065_v14 = vsel %vm1064_vm1, %v1063_v32, 0  ;;  %v8738_v20 = vor.u32 %v711_v53, %v710_v28 }
 0x21d   :  { %v797_v8 = vadd.s32 %v8484_v19, %v8491_v23  ;;  %v8742_v13 = vsel %vm6363_vm0, 0, %v6362_v48  ;;  %v1067_v45 = vand.u32 31, %v1065_v14  ;;  %v715_v10 = vshll.u32 %v714_v50, 23 }
 0x21e   :  { %v1193_v46 = vsel %vm1189_vm12, %v1173_v26, %v8665_v16  ;;  %v1195_v7 = vsel %vm1191_vm14, %v8667_v62, %v1194_v39  ;;  %v399_v6 = vmul.f32 %v8384_v33, %v352_v57  ;;  %v814_v29 = vshll.u32 %v8573_v52, %v8689_v22 }
 0x21f   :  { %v815_v11 = vshrl.u32 %v797_v8, %v813_v27  ;;  %v819_v53 = vshll.u32 %v818_v38, 23  ;;  %v8753_v19 = vsub.s32 32, %v1067_v45  ;;  %v1025_v23 = vsub.s32 4294967266, %v8742_v13 }
 0x220   :  { %v8756_v48 = vshrl.u32 %v906_v41, 30  ;;  %v1215_v12 = vadd.s32 1, %v8719_v49  ;;  %v1060_v16 = vand.u32 8388607, %v12699_v51  ;;  %v1196_v62 = vsel %vm1190_vm15, %v1193_v46, %v1195_v7 }
 0x221   :  { %vm1214_vm2 = vc.u32 %v8724_v31, %v8718_v40  ;;  %v1071_v52 = vshrl.u32 %v12705_v58, %v8753_v19  ;;  %v1074_v22 = vshrl.u32 %v12703_v60, %v8753_v19  ;;  %v1070_v32 = vshll.u32 %v12707_v56, %v1067_v45 }
 0x222   :  { %12903 = vst [vmem:[#allocation45_spill] sm:$0xff] %v8756_v48  ;;  %v1073_v28 = vshll.u32 %v12705_v58, %v1067_v45  ;;  %v1077_v50 = vshrl.u32 %v12701_v63, %v8753_v19  ;;  %v8774_v27 = vadd.f32 %v8386_v34, %v399_v6  ;;  %v8776_v24 = vshrl.u32 %v1065_v14, 5 }
 0x223   :  { %v1076_v38 = vshll.u32 %v12703_v60, %v1067_v45  ;;  %v1079_v39 = vshll.u32 %v12701_v63, %v1067_v45  ;;  %v1080_v57 = vshrl.u32 %v12723_v1, %v8753_v19  ;;  %vm544_vm3 = vcmp.gt.s32.totalorder %v8729_v4, 0 }
 0x224   :  { %12904 = vst [vmem:[#allocation46_spill] sm:$0xff] %v8774_v27  ;;  %v1212_v41 = vmul.u32 %v8705_v3, %v1196_v62  ;;  %v1216_v26 = vsel %vm1214_vm2, %v1215_v12, %v8719_v49  ;;  %v8785_v8 = vor.u32 %v1071_v52, %v1070_v32  ;;  %v8787_v46 = vor.u32 %v1074_v22, %v1073_v28 }
 0x225   :  { %v1078_v7 = vor.u32 %v1077_v50, %v1076_v38  ;;  %v1081_v14 = vor.u32 %v1080_v57, %v1079_v39  ;;  %v1082_v6 = vshll.u32 %v12723_v1, %v1067_v45  ;;  %v1083_v51 = vshrl.u32 %v12716_v9, %v8753_v19 }
 0x226   :  { %v716_v44 = vor.u32 4788187, %v715_v10  ;;  %v816_v63 = vor.u32 %v815_v11, %v814_v29  ;;  %v908_v60 = vshll.u32 %v8756_v48, 30  ;;  %v1061_v58 = vor.u32 8388608, %v1060_v16  ;;  %v347_v11 = vpop.permute.xlu0 %346 }
 0x227   :  { %v8793_v56 = vadd.s32 %v1216_v26, %v1212_v41  ;;  %v1084_v3 = vor.u32 %v1083_v51, %v1082_v6  ;;  %vm1085_vm4 = vcmp.lt.s32.totalorder %v8776_v24, 1  ;;  %v1368_v49 = vand.u32 2139095040, %v8774_v27 }
 0x228   :  { %v820_v12 = vor.u32 4788187, %v819_v53  ;;  %v1026_v62 = vadd.s32 127, %v1025_v23  ;;  %vm1088_vm5 = vcmp.lt.s32.totalorder %v8776_v24, 4  ;;  %v1093_v45 = vsel %vm1085_vm4, %v8785_v8, %v8787_v46 }
 0x229   :  { %vm1087_vm6 = vcmp.lt.s32.totalorder %v8776_v24, 3  ;;  %v1094_v10 = vsel %vm1088_vm5, %v1081_v14, 920167782  ;;  %v1097_v51 = vsel %vm1085_vm4, %v8787_v46, %v1078_v7  ;;  %v1098_v29 = vsel %vm1088_vm5, %v1084_v3, 1326507024 }
 0x22a   :  { %v8811_v53 = vsub.s32 %v8715_v18, %v908_v60  ;;  %vm1086_vm7 = vcmp.lt.s32.totalorder %v8776_v24, 2  ;;  %v1095_v23 = vsel %vm1087_vm6, %v1078_v7, %v1094_v10  ;;  %v8816_v16 = vshll.u32 %v1061_v58, 8 }
 0x22b   :  { %v1218_v52 = vadd.s32 536870912, %v8793_v56  ;;  %v1096_v22 = vsel %vm1086_vm7, %v1093_v45, %v1095_v23  ;;  %v1099_v32 = vsel %vm1087_vm6, %v1081_v14, %v1098_v29  ;;  %v1369_v28 = vshrl.u32 %v1368_v49, 23 }
 0x22c   :  { %v1021_v50 = vsub.s32 32, %v8742_v13  ;;  %v1027_v60 = vshll.u32 %v1026_v62, 23  ;;  %v1100_v18 = vsel %vm1086_vm7, %v1097_v51, %v1099_v32  ;;  %v398_v38 = vmul.f32 %v8384_v33, %v347_v11 }
 0x22d   :  { %v8828_v58 = vmul.u32.u64.low %v8816_v16, %v1100_v18  ;;  %v8829_v39 = vmul.u32.u64.high %v8816_v16, %v1100_v18, %v8828_v58  ;;  %v8832_v57 = vmul.u32.u64.low %v8816_v16, %v1096_v22  ;;  %v8833_v41 = vmul.u32.u64.high %v8816_v16, %v1096_v22, %v8832_v57 }
 0x22e   :  { %v8837_v26 = vshrl.u32 %v8619_v55, 5  ;;  %v8840_v14 = vsub.s32 32, %v8713_v30  ;;  %v911_v6 = vsub.s32 0, %v8811_v53  ;;  %v6376_v3 = vadd.s32 4294967169, %v1369_v28 }
 0x22f   :  { %v719_v33 = vcvt.s32.f32 %v8738_v20  ;;  %v8847_v49 = vsel %vm544_vm3, %v8729_v4, 0  ;;  %v1005_v62 = vadd.s32 %v8536_v43, %v8551_v47  ;;  %v8851_v45 = vshrl.u32 %v1218_v52, 30 }
 0x230   :  { %12905 = vst [vmem:[#allocation47_spill] sm:$0xff] %v8837_v26  ;;  %v717_v55 = vand.u32 2147483647, %v716_v44  ;;  %v823_v10 = vcvt.s32.f32 %v816_v63  ;;  %v1375_v51 = vadd.s32 1, %v6376_v3  ;;  %v8854_v29 = vadd.f32 %v8386_v34, %v398_v38 }
 0x231   :  { %12906 = vst [vmem:[#allocation48_spill] sm:$0xff] %v8851_v45  ;;  %v821_v11 = vand.u32 2147483647, %v820_v12  ;;  %v1023_v23 = vshrl.u32 %v1005_v62, %v1021_v50  ;;  %v8856_v22 = vor.u32 4788187, %v1027_v60  ;;  %v6357_v4 = vmin.u32 %v911_v6, %v8811_v53 }
 0x232   :  { %12907 = vst [vmem:[#allocation49_spill] sm:$0xff] %v8854_v29  ;;  %v1090_v20 = vsel %vm1088_vm5, %v1078_v7, 2102212464  ;;  %v12908_v32 = vmov 683565275   ;;  %vm1376_vm8 = vcmp.gt.s32.totalorder %v1375_v51, 0  ;;  %v1022_v44 = vshll.u32 %v8605_v36, %v8742_v13 }
 0x233   :  { %v1069_v43 = vshrl.u32 %v12908_v32, %v8753_v19  ;;  %v12709_v47 = vand.u32 2147483647, %v8774_v27  ;;  %v1220_v34 = vshll.u32 %v8851_v45, 30  ;;  %v1111_v63 = vadd.s32 1, %v8833_v41 }
 0x234   :  { %v1377_v12 = vsel %vm1376_vm8, %v1375_v51, 0  ;;  %v1091_v52 = vsel %vm1087_vm6, %v8787_v46, %v1090_v20  ;;  %vm1110_vm9 = vc.u32 %v8829_v39, %v8832_v57  ;;  %v1264_v19 = vand.u32 2139095040, %v8854_v29 }
 0x235   :  { %v1089_v7 = vsel %vm1085_vm4, %v1069_v43, %v8785_v8  ;;  %v8877_v28 = vmul.f32 %v719_v33, %v717_v55  ;;  %v8879_v36 = vmul.f32 %v823_v10, %v821_v11  ;;  %v8882_v13 = vshrl.u32 %v8847_v49, 5 }
 0x236   :  { %v1379_v50 = vand.u32 31, %v1377_v12  ;;  %v8884_v60 = vor.u32 %v1023_v23, %v1022_v44  ;;  %v1029_v8 = vand.u32 2147483647, %v8856_v22  ;;  %v913_v18 = vclz %v6357_v4 }
 0x237   :  { %12909 = vst [vmem:[#allocation50_spill] sm:$0xff] %v8882_v13  ;;  %v1372_v46 = vand.u32 8388607, %v12709_v47  ;;  %v8890_v38 = vsub.s32 %v8793_v56, %v1220_v34  ;;  %v1092_v58 = vsel %vm1086_vm7, %v1089_v7, %v1091_v52  ;;  %v1112_v6 = vsel %vm1110_vm9, %v1111_v63, %v8833_v41 }
 0x238   :  { %v1380_v3 = vsub.s32 32, %v1379_v50  ;;  %v1378_v33 = vshrl.u32 %v1377_v12, 5  ;;  %v1382_v62 = vshll.u32 %v12908_v32, %v1379_v50  ;;  %v12910_v55 = vmov 2475754826  }
 0x239   :  { %v1385_v10 = vshll.u32 %v12910_v55, %v1379_v50  ;;  %v1265_v51 = vshrl.u32 %v1264_v19, 23  ;;  %v12911_v23 = vmov 2131351028   ;;  %v12912_v56 = vmov 2102212464  }
 0x23a   :  { %v1383_v11 = vshrl.u32 %v12910_v55, %v1380_v3  ;;  %v1386_v22 = vshrl.u32 %v12911_v23, %v1380_v3  ;;  %v1388_v20 = vshll.u32 %v12911_v23, %v1379_v50  ;;  %v1389_v4 = vshrl.u32 %v12912_v56, %v1380_v3 }
 0x23b   :  { %v1108_v24 = vmul.u32 %v8816_v16, %v1092_v58  ;;  %v1391_v43 = vshll.u32 %v12912_v56, %v1379_v50  ;;  %v1392_v41 = vshrl.u32 %v12723_v1, %v1380_v3  ;;  %v1394_v44 = vshll.u32 %v12723_v1, %v1379_v50 }
 0x23c   :  { %v1384_v34 = vor.u32 %v1383_v11, %v1382_v62  ;;  %v1387_v63 = vor.u32 %v1386_v22, %v1385_v10  ;;  %v1390_v12 = vor.u32 %v1389_v4, %v1388_v20  ;;  %v1395_v7 = vshrl.u32 %v12716_v9, %v1380_v3 }
 0x23d   :  { %v6358_v52 = vadd.s32 4294967294, %v913_v18  ;;  %v8906_v19 = vadd.s32 %v1112_v6, %v1108_v24  ;;  %v1373_v47 = vor.u32 8388608, %v1372_v46  ;;  %v1393_v45 = vor.u32 %v1392_v41, %v1391_v43 }
 0x23e   :  { %v1223_v35 = vsub.s32 0, %v8890_v38  ;;  %v1396_v48 = vor.u32 %v1395_v7, %v1394_v44  ;;  %vm1397_vm10 = vcmp.lt.s32.totalorder %v1378_v33, 1  ;;  %v6372_v16 = vadd.s32 4294967169, %v1265_v51 }
 0x23f   :  { %v1381_v58 = vshrl.u32 %v12908_v32, %v1380_v3  ;;  %vm1399_vm11 = vcmp.lt.s32.totalorder %v1378_v33, 3  ;;  %vm1400_vm12 = vcmp.lt.s32.totalorder %v1378_v33, 4  ;;  %v1405_v50 = vsel %vm1397_vm10, %v1384_v34, %v1387_v63  ;;  %v362_v3 = vpop.permute.xlu1 %361 }
 0x240   :  { %v1402_v62 = vsel %vm1400_vm12, %v1390_v12, 2102212464  ;;  %v1406_v10 = vsel %vm1400_vm12, %v1393_v45, 920167782  ;;  %v1409_v11 = vsel %vm1397_vm10, %v1387_v63, %v1390_v12  ;;  %v1410_v22 = vsel %vm1400_vm12, %v1396_v48, 1326507024 }
 0x241   :  { %v1114_v18 = vadd.s32 536870912, %v8906_v19  ;;  %vm1398_vm13 = vcmp.lt.s32.totalorder %v1378_v33, 2  ;;  %v1407_v46 = vsel %vm1399_vm11, %v1390_v12, %v1406_v10  ;;  %v1413_v6 = vshll.u32 %v1373_v47, 8 }
 0x242   :  { %v1401_v20 = vsel %vm1397_vm10, %v1381_v58, %v1384_v34  ;;  %v1408_v4 = vsel %vm1398_vm13, %v1405_v50, %v1407_v46  ;;  %v1411_v51 = vsel %vm1399_vm11, %v1393_v45, %v1410_v22  ;;  %v1271_v24 = vadd.s32 1, %v6372_v16  ;;  %v8929_v34 = vld [vmem:[%s12892_s13] ss:$0 sm:$0xff]  ;;  %v357_v22 = vpop.permute.xlu0 %356 }
 0x243   :  { %v1403_v43 = vsel %vm1399_vm11, %v1387_v63, %v1402_v62  ;;  %v1412_v41 = vsel %vm1398_vm13, %v1409_v11, %v1411_v51  ;;  %v8916_v44 = vmul.u32.u64.low %v1413_v6, %v1408_v4  ;;  %v8917_v7 = vmul.u32.u64.high %v1413_v6, %v1408_v4, %v8916_v44  ;;  %v8952_v4 = vld [vmem:[#allocation2] ss:$0 sm:$0xff] }
 0x244   :  { %v1031_v48 = vcvt.s32.f32 %v8884_v60  ;;  %v8921_v9 = vmul.u32.u64.low %v1413_v6, %v1412_v41  ;;  %v8922_v12 = vmul.u32.u64.high %v1413_v6, %v1412_v41, %v8921_v9  ;;  %vm1272_vm14 = vcmp.gt.s32.totalorder %v1271_v24, 0 }
 0x245   :  { %vm6359_vm15 = vcmp.lt.s32.totalorder %v6358_v52, 0  ;;  %v8924_v47 = vshrl.u32 %v1114_v18, 30  ;;  %v1273_v45 = vsel %vm1272_vm14, %v1271_v24, 0  ;;  %v401_v63 = vmul.f32 %v8929_v34, %v362_v3 }
 0x246   :  { %v8933_v16 = vand.u32 31, %v8847_v49  ;;  %v8935_v58 = vmul.f32 %v1031_v48, %v1029_v8  ;;  %v1404_v60 = vsel %vm1398_vm13, %v1401_v20, %v1403_v43  ;;  %v1275_v9 = vand.u32 31, %v1273_v45 }
 0x247   :  { %12913 = vst [vmem:[#allocation51_spill] sm:$0xff] %v8924_v47  ;;  %v6369_v10 = vmin.u32 %v1223_v35, %v8890_v38  ;;  %v1423_v11 = vadd.s32 1, %v8917_v7  ;;  %v8943_v18 = vsel %vm6359_vm15, 0, %v6358_v52  ;;  %vm1422_vm0 = vc.u32 %v8922_v12, %v8916_v44 }
 0x248   :  { %12914 = vst [vmem:[#allocation52_spill] sm:$0xff] %v8933_v16  ;;  %v12718_v49 = vand.u32 2147483647, %v8854_v29  ;;  %v8948_v8 = vsub.s32 32, %v1275_v9  ;;  %v1116_v33 = vshll.u32 %v8924_v47, 30  ;;  %v1420_v46 = vmul.u32 %v1413_v6, %v1404_v60 }
 0x249   :  { %v1424_v20 = vsel %vm1422_vm0, %v1423_v11, %v8917_v7  ;;  %v8955_v35 = vadd.f32 %v8952_v4, %v401_v63  ;;  %v901_v51 = vadd.s32 %v8628_v5, %v8639_v15  ;;  %v8963_v3 = vmul.f32 %v8929_v34, %v357_v22 }
 0x24a   :  { %v1279_v24 = vshrl.u32 %v12910_v55, %v8948_v8  ;;  %v917_v6 = vsub.s32 32, %v8943_v18  ;;  %v1225_v43 = vclz %v6369_v10  ;;  %v8966_v41 = vadd.s32 %v1424_v20, %v1420_v46 }
 0x24b   :  { %12915 = vst [vmem:[#allocation53_spill] sm:$0xff] %v8955_v35  ;;  %v1282_v7 = vshrl.u32 %v12911_v23, %v8948_v8  ;;  %v1268_v48 = vand.u32 8388607, %v12718_v49  ;;  %v1278_v63 = vshll.u32 %v12908_v32, %v1275_v9  ;;  %v1281_v5 = vshll.u32 %v12910_v55, %v1275_v9 }
 0x24c   :  { %v1285_v15 = vshrl.u32 %v12912_v56, %v8948_v8  ;;  %v8977_v60 = vsub.s32 %v8906_v19, %v1116_v33  ;;  %v8979_v11 = vshrl.u32 %v1273_v45, 5  ;;  %v1284_v10 = vshll.u32 %v12911_v23, %v1275_v9 }
 0x24d   :  { %v1576_v22 = vand.u32 2139095040, %v8955_v35  ;;  %v1280_v46 = vor.u32 %v1279_v24, %v1278_v63  ;;  %v1283_v20 = vor.u32 %v1282_v7, %v1281_v5  ;;  %v1287_v49 = vshll.u32 %v12912_v56, %v1275_v9 }
 0x24e   :  { %v1288_v52 = vshrl.u32 %v12723_v1, %v8948_v8  ;;  %v1426_v62 = vadd.s32 536870912, %v8966_v41  ;;  %v1286_v50 = vor.u32 %v1285_v15, %v1284_v10  ;;  %v1290_v47 = vshll.u32 %v12723_v1, %v1275_v9 }
 0x24f   :  { %v12916_v19 = vmov 1326507024   ;;  %vm639_vm1 = vcmp.lt.s32.totalorder %v8390_v37, 0  ;;  %v921_v33 = vsub.s32 4294967266, %v8943_v18  ;;  %v6370_v61 = vadd.s32 4294967294, %v1225_v43 }
 0x250   :  { %v1291_v45 = vshrl.u32 %v12916_v19, %v8948_v8  ;;  %v1269_v24 = vor.u32 8388608, %v1268_v48  ;;  %v1289_v7 = vor.u32 %v1288_v52, %v1287_v49  ;;  %v1119_v63 = vsub.s32 0, %v8977_v60 }
 0x251   :  { %vm1293_vm2 = vcmp.lt.s32.totalorder %v8979_v11, 1  ;;  %vm1296_vm3 = vcmp.lt.s32.totalorder %v8979_v11, 4  ;;  %vm1295_vm4 = vcmp.lt.s32.totalorder %v8979_v11, 3  ;;  %v1577_v10 = vshrl.u32 %v1576_v22, 23 }
 0x252   :  { %v1292_v5 = vor.u32 %v1291_v45, %v1290_v47  ;;  %v1301_v9 = vsel %vm1293_vm2, %v1280_v46, %v1283_v20  ;;  %v1302_v15 = vsel %vm1296_vm3, %v1289_v7, 920167782  ;;  %vm743_vm5 = vcmp.lt.s32.totalorder %v8395_v42, 0 }
 0x253   :  { %vm951_vm6 = vcmp.lt.s32.totalorder %v8434_v25, 0  ;;  %v9002_v49 = vshrl.u32 %v1426_v62, 30  ;;  %vm1294_vm7 = vcmp.lt.s32.totalorder %v8979_v11, 2  ;;  %v1303_v47 = vsel %vm1295_vm4, %v1286_v50, %v1302_v15 }
 0x254   :  { %v1305_v52 = vsel %vm1293_vm2, %v1283_v20, %v1286_v50  ;;  %v918_v43 = vshll.u32 %v8811_v53, %v8943_v18  ;;  %v919_v48 = vshrl.u32 %v901_v51, %v917_v6  ;;  %v1304_v22 = vsel %vm1294_vm7, %v1301_v9, %v1303_v47 }
 0x255   :  { %12917 = vst [vmem:[#allocation54_spill] sm:$0xff] %v9002_v49  ;;  %v1306_v45 = vsel %vm1296_vm3, %v1292_v5, 1326507024  ;;  %v922_v62 = vadd.s32 127, %v921_v33  ;;  %vm6371_vm8 = vcmp.lt.s32.totalorder %v6370_v61, 0  ;;  %v9017_v54 = vshll.u32 %v1269_v24, 8 }
 0x256   :  { %v1307_v1 = vsel %vm1295_vm4, %v1289_v7, %v1306_v45  ;;  %v6365_v15 = vmin.u32 %v1119_v63, %v8977_v60  ;;  %v12728_v53 = vand.u32 2147483647, %v8955_v35  ;;  %v6384_v18 = vadd.s32 4294967169, %v1577_v10 }
 0x257   :  { %v1308_v13 = vsel %vm1294_vm7, %v1305_v52, %v1307_v1  ;;  %v1428_v51 = vshll.u32 %v9002_v49, 30  ;;  %v1298_v6 = vsel %vm1296_vm3, %v1286_v50, 2102212464  ;;  %v1277_v24 = vshrl.u32 %v12908_v32, %v8948_v8 }
 0x258   :  { %v9027_v33 = vmul.u32.u64.low %v9017_v54, %v1304_v22  ;;  %v9028_v5 = vmul.u32.u64.high %v9017_v54, %v1304_v22, %v9027_v33  ;;  %v9034_v7 = vmul.u32.u64.low %v9017_v54, %v1308_v13  ;;  %v9035_v63 = vmul.u32.u64.high %v9017_v54, %v1308_v13, %v9034_v7 }
 0x259   :  { %v1583_v1 = vadd.s32 1, %v6384_v18  ;;  %v12918_v9 = vxor.u32 2147483648, %v8877_v28  ;;  %v9045_v50 = vsub.s32 32, %v8933_v16  ;;  %v9047_v47 = vor.u32 %v919_v48, %v918_v43 }
 0x25a   :  { %v923_v52 = vshll.u32 %v922_v62, 23  ;;  %v1297_v8 = vsel %vm1293_vm2, %v1277_v24, %v1280_v46  ;;  %v1299_v13 = vsel %vm1295_vm4, %v1283_v20, %v1298_v6  ;;  %v9055_v22 = vadd.f32 %v8952_v4, %v8963_v3 }
 0x25b   :  { %v9042_v10 = vsel %vm639_vm1, %v12918_v9, %v8877_v28  ;;  %12920 = vst [vmem:[#allocation56_spill] sm:$0xff] %v9045_v50  ;;  %vm1584_vm9 = vcmp.gt.s32.totalorder %v1583_v1, 0  ;;  %v9058_v28 = vsel %vm6371_vm8, 0, %v6370_v61  ;;  %v1121_v45 = vclz %v6365_v15 }
 0x25c   :  { %12919 = vst [vmem:[#allocation55_spill] sm:$0xff] %v9042_v10  ;;  %12921 = vst [vmem:[#allocation57_spill] sm:$0xff] %v9055_v22  ;;  %v9061_v18 = vsub.s32 %v8966_v41, %v1428_v51  ;;  %v1585_v43 = vsel %vm1584_vm9, %v1583_v1, 0  ;;  %v12922_v48 = vxor.u32 2147483648, %v8879_v36  ;;  %v12924_v20 = vxor.u32 2147483648, %v8935_v58 }
 0x25d   :  { %v1580_v61 = vand.u32 8388607, %v12728_v53  ;;  %v1587_v41 = vand.u32 31, %v1585_v43  ;;  %v9079_v62 = vor.u32 4788187, %v923_v52  ;;  %v1213_v51 = vadd.s32 %v8718_v40, %v8724_v31 }
 0x25e   :  { %v9068_v46 = vsel %vm743_vm5, %v12922_v48, %v8879_v36  ;;  %v9075_v3 = vsel %vm951_vm6, %v12924_v20, %v8935_v58  ;;  %v1300_v36 = vsel %vm1294_vm7, %v1297_v8, %v1299_v13  ;;  %v1229_v6 = vsub.s32 32, %v9058_v28 }
 0x25f   :  { %12923 = vst [vmem:[#allocation58_spill] sm:$0xff] %v9068_v46  ;;  %12925 = vst [vmem:[#allocation59_spill] sm:$0xff] %v9075_v3  ;;  %v1230_v58 = vshll.u32 %v8890_v38, %v9058_v28  ;;  %v1233_v24 = vsub.s32 4294967266, %v9058_v28  ;;  %v1588_v7 = vsub.s32 32, %v1587_v41  ;;  %v6366_v1 = vadd.s32 4294967294, %v1121_v45 }
 0x260   :  { %v1431_v9 = vsub.s32 0, %v9061_v18  ;;  %v1319_v52 = vadd.s32 1, %v9028_v5  ;;  %v1472_v48 = vand.u32 2139095040, %v9055_v22  ;;  %v1316_v40 = vmul.u32 %v9017_v54, %v1300_v36 }
 0x261   :  { %vm1318_vm10 = vc.u32 %v9035_v63, %v9027_v33  ;;  %v1581_v31 = vor.u32 8388608, %v1580_v61  ;;  %v1591_v11 = vshrl.u32 %v12910_v55, %v1588_v7  ;;  %v1590_v38 = vshll.u32 %v12908_v32, %v1587_v41 }
 0x262   :  { %v1593_v8 = vshll.u32 %v12910_v55, %v1587_v41  ;;  %v1594_v13 = vshrl.u32 %v12911_v23, %v1588_v7  ;;  %v1597_v28 = vshrl.u32 %v12912_v56, %v1588_v7  ;;  %v9101_v45 = vshrl.u32 %v1585_v43, 5 }
 0x263   :  { %v1596_v20 = vshll.u32 %v12911_v23, %v1587_v41  ;;  %v1599_v54 = vshll.u32 %v12912_v56, %v1587_v41  ;;  %v12926_v36 = vmov 920167782   ;;  %v1320_v61 = vsel %vm1318_vm10, %v1319_v52, %v9028_v5  ;;  %v372_v52 = vpop.permute.xlu1 %371 }
 0x264   :  { %v1600_v53 = vshrl.u32 %v12926_v36, %v1588_v7  ;;  %v1592_v15 = vor.u32 %v1591_v11, %v1590_v38  ;;  %v1595_v49 = vor.u32 %v1594_v13, %v1593_v8  ;;  %v1473_v3 = vshrl.u32 %v1472_v48, 23 }
 0x265   :  { %v1598_v25 = vor.u32 %v1597_v28, %v1596_v20  ;;  %v1602_v42 = vshll.u32 %v12926_v36, %v1587_v41  ;;  %v1603_v10 = vshrl.u32 %v12916_v19, %v1588_v7  ;;  %v1231_v37 = vshrl.u32 %v1213_v51, %v1229_v6 }
 0x266   :  { %v1601_v46 = vor.u32 %v1600_v53, %v1599_v54  ;;  %v1234_v43 = vadd.s32 127, %v1233_v24  ;;  %vm6367_vm11 = vcmp.lt.s32.totalorder %v6366_v1, 0  ;;  %v6377_v16 = vmin.u32 %v1431_v9, %v9061_v18 }
 0x267   :  { %v9110_v50 = vadd.s32 %v1320_v61, %v1316_v40  ;;  %v1604_v21 = vor.u32 %v1603_v10, %v1602_v42  ;;  %vm1605_vm12 = vcmp.lt.s32.totalorder %v9101_v45, 1  ;;  %vm1608_vm13 = vcmp.lt.s32.totalorder %v9101_v45, 4 }
 0x268   :  { %vm1607_vm14 = vcmp.lt.s32.totalorder %v9101_v45, 3  ;;  %v1613_v53 = vsel %vm1605_vm12, %v1592_v15, %v1595_v49  ;;  %v1614_v5 = vsel %vm1608_vm13, %v1601_v46, 920167782  ;;  %v6380_v41 = vadd.s32 4294967169, %v1473_v3 }
 0x269   :  { %vm1606_vm15 = vcmp.lt.s32.totalorder %v9101_v45, 2  ;;  %v1615_v51 = vsel %vm1607_vm14, %v1598_v25, %v1614_v5  ;;  %v1617_v42 = vsel %vm1605_vm12, %v1595_v49, %v1598_v25  ;;  %v9124_v10 = vshll.u32 %v1581_v31, 8 }
 0x26a   :  { %v9126_v6 = vsel %vm6367_vm11, 0, %v6366_v1  ;;  %v1616_v24 = vsel %vm1606_vm15, %v1613_v53, %v1615_v51  ;;  %v1618_v9 = vsel %vm1608_vm13, %v1604_v21, 1326507024  ;;  %v12742_v3 = vand.u32 2147483647, %v9055_v22 }
 0x26b   :  { %v1433_v48 = vclz %v6377_v16  ;;  %v1619_v40 = vsel %vm1607_vm14, %v1601_v46, %v1618_v9  ;;  %v9136_v11 = vmul.u32.u64.low %v9124_v10, %v1616_v24  ;;  %v9137_v38 = vmul.u32.u64.high %v9124_v10, %v1616_v24, %v9136_v11 }
 0x26c   :  { %v925_v1 = vand.u32 2147483647, %v9079_v62  ;;  %v1322_v31 = vadd.s32 536870912, %v9110_v50  ;;  %v1620_v8 = vsel %vm1606_vm15, %v1617_v42, %v1619_v40  ;;  %v1479_v21 = vadd.s32 1, %v6380_v41 }
 0x26d   :  { %v9144_v13 = vor.u32 %v1231_v37, %v1230_v58  ;;  %v9147_v16 = vmul.u32.u64.low %v9124_v10, %v1620_v8  ;;  %v9148_v28 = vmul.u32.u64.high %v9124_v10, %v1620_v8, %v9147_v16  ;;  %v403_v46 = vmul.f32 %v8929_v34, %v372_v52 }
 0x26e   :  { %v1235_v20 = vshll.u32 %v1234_v43, 23  ;;  %v1129_v54 = vsub.s32 4294967266, %v9126_v6  ;;  %v1610_v62 = vsel %vm1608_vm13, %v1598_v25, 2102212464  ;;  %vm1480_vm0 = vcmp.gt.s32.totalorder %v1479_v21, 0 }
 0x26f   :  { %v6378_v61 = vadd.s32 4294967294, %v1433_v48  ;;  %v1589_v53 = vshrl.u32 %v12908_v32, %v1588_v7  ;;  %v1476_v37 = vand.u32 8388607, %v12742_v3  ;;  %v1481_v58 = vsel %vm1480_vm0, %v1479_v21, 0 }
 0x270   :  { %v12927_v5 = vcvt.s32.f32 %v9047_v47  ;;  %v9161_v51 = vshrl.u32 %v1322_v31, 30  ;;  %v1631_v43 = vadd.s32 1, %v9137_v38  ;;  %v1483_v42 = vand.u32 31, %v1481_v58 }
 0x271   :  { %v1109_v25 = vadd.s32 %v8832_v57, %v8829_v39  ;;  %v1609_v24 = vsel %vm1605_vm12, %v1589_v53, %v1592_v15  ;;  %v1611_v7 = vsel %vm1607_vm14, %v1595_v49, %v1610_v62  ;;  %vm1630_vm2 = vc.u32 %v9148_v28, %v9136_v11 }
 0x272   :  { %v9159_v41 = vmul.f32 %v12927_v5, %v925_v1  ;;  %12928 = vst [vmem:[#allocation60_spill] sm:$0xff] %v9161_v51  ;;  %v9172_v47 = vor.u32 4788187, %v1235_v20  ;;  %v1125_v52 = vsub.s32 32, %v9126_v6  ;;  %v9176_v48 = vadd.s32 127, %v1129_v54 }
 0x273   :  { %vm6379_vm3 = vcmp.lt.s32.totalorder %v6378_v61, 0  ;;  %v1477_v40 = vor.u32 8388608, %v1476_v37  ;;  %v1484_v39 = vsub.s32 32, %v1483_v42  ;;  %v9179_v57 = vadd.f32 %v8952_v4, %v403_v46 }
 0x274   :  { %v1324_v15 = vshll.u32 %v9161_v51, 30  ;;  %v1612_v49 = vsel %vm1606_vm15, %v1609_v24, %v1611_v7  ;;  %v1632_v1 = vsel %vm1630_vm2, %v1631_v43, %v9137_v38  ;;  %v9185_v31 = vshrl.u32 %v1481_v58, 5 }
 0x275   :  { %12929 = vst [vmem:[#allocation61_spill] sm:$0xff] %v9179_v57  ;;  %v1486_v8 = vshll.u32 %v12908_v32, %v1483_v42  ;;  %v1487_v21 = vshrl.u32 %v12910_v55, %v1484_v39  ;;  %v1489_v16 = vshll.u32 %v12910_v55, %v1483_v42  ;;  %v1490_v20 = vshrl.u32 %v12911_v23, %v1484_v39 }
 0x276   :  { %v1492_v46 = vshll.u32 %v12911_v23, %v1483_v42  ;;  %v1493_v54 = vshrl.u32 %v12912_v56, %v1484_v39  ;;  %v1495_v62 = vshll.u32 %v12912_v56, %v1483_v42  ;;  %v1496_v45 = vshrl.u32 %v12926_v36, %v1484_v39 }
 0x277   :  { %v1126_v38 = vshll.u32 %v8977_v60, %v9126_v6  ;;  %v1628_v53 = vmul.u32 %v9124_v10, %v1612_v49  ;;  %v1488_v37 = vor.u32 %v1487_v21, %v1486_v8  ;;  %v1491_v58 = vor.u32 %v1490_v20, %v1489_v16 }
 0x278   :  { %v9199_v5 = vsel %vm6379_vm3, 0, %v6378_v61  ;;  %v1494_v43 = vor.u32 %v1493_v54, %v1492_v46  ;;  %v1497_v24 = vor.u32 %v1496_v45, %v1495_v62  ;;  %v1784_v7 = vand.u32 2139095040, %v9179_v57 }
 0x279   :  { %v1127_v3 = vshrl.u32 %v1109_v25, %v1125_v52  ;;  %v9202_v9 = vadd.s32 %v1632_v1, %v1628_v53  ;;  %v1498_v51 = vshll.u32 %v12926_v36, %v1483_v42  ;;  %v1499_v26 = vshrl.u32 %v12916_v19, %v1484_v39 }
 0x27a   :  { %v1131_v60 = vshll.u32 %v9176_v48, 23  ;;  %v9208_v10 = vsub.s32 %v9110_v50, %v1324_v15  ;;  %vm1501_vm4 = vcmp.lt.s32.totalorder %v9185_v31, 1  ;;  %v1517_v6 = vshll.u32 %v1477_v40, 8 }
 0x27b   :  { %v1441_v61 = vsub.s32 4294967266, %v9199_v5  ;;  %v1500_v49 = vor.u32 %v1499_v26, %v1498_v51  ;;  %vm1504_vm7 = vcmp.lt.s32.totalorder %v9185_v31, 4  ;;  %v1509_v25 = vsel %vm1501_vm4, %v1488_v37, %v1491_v58  ;;  %v367_v51 = vpop.permute.xlu0 %366 }
 0x27c   :  { %vm1503_vm8 = vcmp.lt.s32.totalorder %v9185_v31, 3  ;;  %v1510_v42 = vsel %vm1504_vm7, %v1497_v24, 920167782  ;;  %v1513_v52 = vsel %vm1501_vm4, %v1491_v58, %v1494_v43  ;;  %v1785_v48 = vshrl.u32 %v1784_v7, 23 }
 0x27d   :  { %v1634_v50 = vadd.s32 536870912, %v9202_v9  ;;  %vm1502_vm9 = vcmp.lt.s32.totalorder %v9185_v31, 2  ;;  %v1511_v40 = vsel %vm1503_vm8, %v1494_v43, %v1510_v42  ;;  %v1514_v26 = vsel %vm1504_vm7, %v1500_v49, 1326507024 }
 0x27e   :  { %v1327_v15 = vsub.s32 0, %v9208_v10  ;;  %v1506_v1 = vsel %vm1504_vm7, %v1494_v43, 2102212464  ;;  %v1512_v8 = vsel %vm1502_vm9, %v1509_v25, %v1511_v40  ;;  %v1515_v21 = vsel %vm1503_vm8, %v1497_v24, %v1514_v26 }
 0x27f   :  { %v1485_v16 = vshrl.u32 %v12908_v32, %v1484_v39  ;;  %v1516_v20 = vsel %vm1502_vm9, %v1513_v52, %v1515_v21  ;;  %v9230_v46 = vmul.u32.u64.low %v1517_v6, %v1512_v8  ;;  %v9231_v54 = vmul.u32.u64.high %v1517_v6, %v1512_v8, %v9230_v46 }
 0x280   :  { %v9234_v62 = vmul.u32.u64.low %v1517_v6, %v1516_v20  ;;  %v9235_v45 = vmul.u32.u64.high %v1517_v6, %v1516_v20, %v9234_v62  ;;  %v6392_v53 = vadd.s32 4294967169, %v1785_v48  ;;  %v402_v43 = vmul.f32 %v8929_v34, %v367_v51 }
 0x281   :  { %v9238_v7 = vshrl.u32 %v1634_v50, 30  ;;  %v1505_v24 = vsel %vm1501_vm4, %v1485_v16, %v1488_v37  ;;  %v1507_v39 = vsel %vm1503_vm8, %v1491_v58, %v1506_v1  ;;  %v12746_v49 = vand.u32 2147483647, %v9179_v57 }
 0x282   :  { %v1237_v25 = vand.u32 2147483647, %v9172_v47  ;;  %v1128_v42 = vor.u32 %v1127_v3, %v1126_v38  ;;  %v1132_v52 = vor.u32 4788187, %v1131_v60  ;;  %v1791_v40 = vadd.s32 1, %v6392_v53 }
 0x283   :  { %12930 = vst [vmem:[#allocation62_spill] sm:$0xff] %v9238_v7  ;;  %v1437_v26 = vsub.s32 32, %v9199_v5  ;;  %v1442_v48 = vadd.s32 127, %v1441_v61  ;;  %v6373_v51 = vmin.u32 %v1327_v15, %v9208_v10  ;;  %v1527_v50 = vadd.s32 1, %v9231_v54 }
 0x284   :  { %v1508_v37 = vsel %vm1502_vm9, %v1505_v24, %v1507_v39  ;;  %vm1526_vm10 = vc.u32 %v9235_v45, %v9230_v46  ;;  %vm1792_vm11 = vcmp.gt.s32.totalorder %v1791_v40, 0  ;;  %v9254_v58 = vadd.f32 %v8952_v4, %v402_v43 }
 0x285   :  { %v1421_v3 = vadd.s32 %v8916_v44, %v8922_v12  ;;  %v1636_v47 = vshll.u32 %v9238_v7, 30  ;;  %v1788_v38 = vand.u32 8388607, %v12746_v49  ;;  %v1793_v60 = vsel %vm1792_vm11, %v1791_v40, 0 }
 0x286   :  { %12931 = vst [vmem:[#allocation63_spill] sm:$0xff] %v9254_v58  ;;  %v12932_v61 = vcvt.s32.f32 %v9144_v13  ;;  %v1135_v15 = vcvt.s32.f32 %v1128_v42  ;;  %v1528_v1 = vsel %vm1526_vm10, %v1527_v50, %v9231_v54  ;;  %v1795_v8 = vand.u32 31, %v1793_v60 }
 0x287   :  { %v1133_v21 = vand.u32 2147483647, %v1132_v52  ;;  %v1438_v16 = vshll.u32 %v9061_v18, %v9199_v5  ;;  %v1439_v20 = vshrl.u32 %v1421_v3, %v1437_v26  ;;  %v1524_v44 = vmul.u32 %v1517_v6, %v1508_v37 }
 0x288   :  { %v9263_v31 = vmul.f32 %v12932_v61, %v1237_v25  ;;  %v1443_v12 = vshll.u32 %v1442_v48, 23  ;;  %v1329_v62 = vclz %v6373_v51  ;;  %v1796_v53 = vsub.s32 32, %v1795_v8 }
 0x289   :  { %v1680_v43 = vand.u32 2139095040, %v9254_v58  ;;  %v9270_v24 = vsub.s32 %v9202_v9, %v1636_v47  ;;  %v9272_v13 = vadd.s32 %v1528_v1, %v1524_v44  ;;  %v1789_v39 = vor.u32 8388608, %v1788_v38 }
 0x28a   :  { %v1794_v25 = vshrl.u32 %v1793_v60, 5  ;;  %v1798_v54 = vshll.u32 %v12908_v32, %v1795_v8  ;;  %v1799_v42 = vshrl.u32 %v12910_v55, %v1796_v53  ;;  %v1801_v18 = vshll.u32 %v12910_v55, %v1795_v8 }
 0x28b   :  { %v1802_v5 = vshrl.u32 %v12911_v23, %v1796_v53  ;;  %v1804_v6 = vshll.u32 %v12911_v23, %v1795_v8  ;;  %v1805_v52 = vshrl.u32 %v12912_v56, %v1796_v53  ;;  %v1807_v40 = vshll.u32 %v12912_v56, %v1795_v8 }
 0x28c   :  { %v1808_v9 = vshrl.u32 %v12926_v36, %v1796_v53  ;;  %v9282_v26 = vmul.f32 %v1135_v15, %v1133_v21  ;;  %v1800_v48 = vor.u32 %v1799_v42, %v1798_v54  ;;  %v1681_v50 = vshrl.u32 %v1680_v43, 23  ;;  %v382_v54 = vpop.permute.xlu1 %381 }
 0x28d   :  { %v1803_v51 = vor.u32 %v1802_v5, %v1801_v18  ;;  %v9284_v37 = vor.u32 %v1439_v20, %v1438_v16  ;;  %v9286_v3 = vor.u32 4788187, %v1443_v12  ;;  %v1806_v47 = vor.u32 %v1805_v52, %v1804_v6 }
 0x28e   :  { %v1809_v38 = vor.u32 %v1808_v9, %v1807_v40  ;;  %v6374_v60 = vadd.s32 4294967294, %v1329_v62  ;;  %v1530_v61 = vadd.s32 536870912, %v9272_v13  ;;  %v1810_v1 = vshll.u32 %v12926_v36, %v1795_v8 }
 0x28f   :  { %v1811_v44 = vshrl.u32 %v12916_v19, %v1796_v53  ;;  %v1639_v49 = vsub.s32 0, %v9270_v24  ;;  %vm1813_vm12 = vcmp.lt.s32.totalorder %v1794_v25, 1  ;;  %vm1816_vm13 = vcmp.lt.s32.totalorder %v1794_v25, 4 }
 0x290   :  { %v1829_v15 = vshll.u32 %v1789_v39, 8  ;;  %v1818_v16 = vsel %vm1816_vm13, %v1806_v47, 2102212464  ;;  %v1821_v20 = vsel %vm1813_vm12, %v1800_v48, %v1803_v51  ;;  %v6388_v12 = vadd.s32 4294967169, %v1681_v50 }
 0x291   :  { %v1812_v21 = vor.u32 %v1811_v44, %v1810_v1  ;;  %v1797_v43 = vshrl.u32 %v12908_v32, %v1796_v53  ;;  %vm1815_vm14 = vcmp.lt.s32.totalorder %v1794_v25, 3  ;;  %v1822_v62 = vsel %vm1816_vm13, %v1809_v38, 920167782 }
 0x292   :  { %v1825_v8 = vsel %vm1813_vm12, %v1803_v51, %v1806_v47  ;;  %vm847_vm15 = vcmp.lt.s32.totalorder %v8513_v59, 0  ;;  %vm1159_vm0 = vcmp.lt.s32.totalorder %v8554_v2, 0  ;;  %v9299_v42 = vshrl.u32 %v1530_v61, 30 }
 0x293   :  { %vm1814_vm2 = vcmp.lt.s32.totalorder %v1794_v25, 2  ;;  %v1823_v39 = vsel %vm1815_vm14, %v1806_v47, %v1822_v62  ;;  %v1826_v18 = vsel %vm1816_vm13, %v1812_v21, 1326507024  ;;  %vm1055_vm3 = vcmp.lt.s32.totalorder %v8623_v0, 0 }
 0x294   :  { %12933 = vst [vmem:[#allocation64_spill] sm:$0xff] %v9299_v42  ;;  %v1817_v53 = vsel %vm1813_vm12, %v1797_v43, %v1800_v48  ;;  %v1819_v5 = vsel %vm1815_vm14, %v1803_v51, %v1818_v16  ;;  %v1824_v6 = vsel %vm1814_vm2, %v1821_v20, %v1823_v39  ;;  %v1827_v52 = vsel %vm1815_vm14, %v1809_v38, %v1826_v18 }
 0x295   :  { %v1828_v40 = vsel %vm1814_vm2, %v1825_v8, %v1827_v52  ;;  %v9306_v9 = vmul.u32.u64.low %v1829_v15, %v1824_v6  ;;  %v9307_v50 = vmul.u32.u64.high %v1829_v15, %v1824_v6, %v9306_v9  ;;  %v405_v61 = vmul.f32 %v8929_v34, %v382_v54 }
 0x296   :  { %v6385_v47 = vmin.u32 %v1639_v49, %v9270_v24  ;;  %v9312_v1 = vmul.u32.u64.low %v1829_v15, %v1828_v40  ;;  %v9313_v44 = vmul.u32.u64.high %v1829_v15, %v1828_v40, %v9312_v1  ;;  %v1687_v21 = vadd.s32 1, %v6388_v12 }
 0x297   :  { %vm6375_vm4 = vcmp.lt.s32.totalorder %v6374_v60, 0  ;;  %v1532_v48 = vshll.u32 %v9299_v42, 30  ;;  %v1820_v51 = vsel %vm1814_vm2, %v1817_v53, %v1819_v5  ;;  %v12747_v38 = vand.u32 2147483647, %v9254_v58 }
 0x298   :  { %v929_v16 = vxor.u32 2147483648, %v9159_v41  ;;  %v1241_v20 = vxor.u32 2147483648, %v9263_v31  ;;  %v1137_v43 = vxor.u32 2147483648, %v9282_v26  ;;  %vm1688_vm7 = vcmp.gt.s32.totalorder %v1687_v21, 0 }
 0x299   :  { %v1445_v49 = vand.u32 2147483647, %v9286_v3  ;;  %v1447_v62 = vcvt.s32.f32 %v9284_v37  ;;  %v1839_v12 = vadd.s32 1, %v9307_v50  ;;  %v1689_v8 = vsel %vm1688_vm7, %v1687_v21, 0 }
 0x29a   :  { %v9324_v54 = vsel %vm6375_vm4, 0, %v6374_v60  ;;  %v1641_v25 = vclz %v6385_v47  ;;  %v1836_v39 = vmul.u32 %v1829_v15, %v1820_v51  ;;  %vm1838_vm8 = vc.u32 %v9313_v44, %v9306_v9 }
 0x29b   :  { %v9329_v18 = vsub.s32 %v9272_v13, %v1532_v48  ;;  %v1840_v53 = vsel %vm1838_vm8, %v1839_v12, %v9307_v50  ;;  %v1684_v3 = vand.u32 8388607, %v12747_v38  ;;  %v9335_v37 = vadd.f32 %v8952_v4, %v405_v61 }
 0x29c   :  { %v9340_v60 = vsel %vm847_vm15, %v929_v16, %v9159_v41  ;;  %v9345_v15 = vsel %vm1159_vm0, %v1241_v20, %v9263_v31  ;;  %v9347_v13 = vadd.s32 %v1840_v53, %v1836_v39  ;;  %v1691_v5 = vand.u32 31, %v1689_v8 }
 0x29d   :  { %12934 = vst [vmem:[#allocation65_spill] sm:$0xff] %v9335_v37  ;;  %12935 = vst [vmem:[#allocation66_spill] sm:$0xff] %v9340_v60  ;;  %v9352_v6 = vsel %vm1055_vm3, %v1137_v43, %v9282_v26  ;;  %v9354_v52 = vmul.f32 %v1447_v62, %v1445_v49  ;;  %v1317_v40 = vadd.s32 %v9027_v33, %v9035_v63  ;;  %v1333_v41 = vsub.s32 32, %v9324_v54 }
 0x29e   :  { %12936 = vst [vmem:[#allocation67_spill] sm:$0xff] %v9345_v15  ;;  %12937 = vst [vmem:[#allocation68_spill] sm:$0xff] %v9352_v6  ;;  %v1337_v50 = vsub.s32 4294967266, %v9324_v54  ;;  %v6386_v61 = vadd.s32 4294967294, %v1641_v25  ;;  %v1690_v31 = vshrl.u32 %v1689_v8, 5  ;;  %v1692_v47 = vsub.s32 32, %v1691_v5 }
 0x29f   :  { %v1535_v1 = vsub.s32 0, %v9329_v18  ;;  %v1842_v21 = vadd.s32 536870912, %v9347_v13  ;;  %v1685_v48 = vor.u32 8388608, %v1684_v3  ;;  %v1992_v26 = vand.u32 2139095040, %v9335_v37 }
 0x2a0   :  { %v1694_v51 = vshll.u32 %v12908_v32, %v1691_v5  ;;  %v1695_v16 = vshrl.u32 %v12910_v55, %v1692_v47  ;;  %v1697_v33 = vshll.u32 %v12910_v55, %v1691_v5  ;;  %v1698_v63 = vshrl.u32 %v12911_v23, %v1692_v47 }
 0x2a1   :  { %v1700_v20 = vshll.u32 %v12911_v23, %v1691_v5  ;;  %v1701_v43 = vshrl.u32 %v12912_v56, %v1692_v47  ;;  %v1703_v49 = vshll.u32 %v12912_v56, %v1691_v5  ;;  %v1704_v62 = vshrl.u32 %v12926_v36, %v1692_v47 }
 0x2a2   :  { %v1696_v12 = vor.u32 %v1695_v16, %v1694_v51  ;;  %v1699_v8 = vor.u32 %v1698_v63, %v1697_v33  ;;  %vm1709_vm9 = vcmp.lt.s32.totalorder %v1690_v31, 1  ;;  %vm1711_vm10 = vcmp.lt.s32.totalorder %v1690_v31, 3 }
 0x2a3   :  { %v1702_v25 = vor.u32 %v1701_v43, %v1700_v20  ;;  %v1705_v39 = vor.u32 %v1704_v62, %v1703_v49  ;;  %v1706_v53 = vshll.u32 %v12926_v36, %v1691_v5  ;;  %v1707_v3 = vshrl.u32 %v12916_v19, %v1692_v47 }
 0x2a4   :  { %v9373_v38 = vshrl.u32 %v1842_v21, 30  ;;  %v1693_v7 = vshrl.u32 %v12908_v32, %v1692_v47  ;;  %vm1712_vm11 = vcmp.lt.s32.totalorder %v1690_v31, 4  ;;  %v1717_v42 = vsel %vm1709_vm9, %v1696_v12, %v1699_v8  ;;  %v377_v47 = vpop.permute.xlu0 %376 }
 0x2a5   :  { %v1708_v15 = vor.u32 %v1707_v3, %v1706_v53  ;;  %v1714_v2 = vsel %vm1712_vm11, %v1702_v25, 2102212464  ;;  %v1718_v6 = vsel %vm1712_vm11, %v1705_v39, 920167782  ;;  %v1993_v51 = vshrl.u32 %v1992_v26, 23 }
 0x2a6   :  { %12938 = vst [vmem:[#allocation69_spill] sm:$0xff] %v9373_v38  ;;  %vm1710_vm12 = vcmp.lt.s32.totalorder %v1690_v31, 2  ;;  %v1719_v16 = vsel %vm1711_vm10, %v1702_v25, %v1718_v6  ;;  %v1721_v33 = vsel %vm1709_vm9, %v1699_v8, %v1702_v25  ;;  %v1725_v63 = vshll.u32 %v1685_v48, 8 }
 0x2a7   :  { %vm6387_vm13 = vcmp.lt.s32.totalorder %v6386_v61, 0  ;;  %v1713_v5 = vsel %vm1709_vm9, %v1693_v7, %v1696_v12  ;;  %v1720_v21 = vsel %vm1710_vm12, %v1717_v42, %v1719_v16  ;;  %v1722_v20 = vsel %vm1712_vm11, %v1708_v15, 1326507024 }
 0x2a8   :  { %v1715_v43 = vsel %vm1711_vm10, %v1699_v8, %v1714_v2  ;;  %v1723_v49 = vsel %vm1711_vm10, %v1705_v39, %v1722_v20  ;;  %v9383_v62 = vmul.u32.u64.low %v1725_v63, %v1720_v21  ;;  %v9384_v53 = vmul.u32.u64.high %v1725_v63, %v1720_v21, %v9383_v62 }
 0x2a9   :  { %v6381_v6 = vmin.u32 %v1535_v1, %v9329_v18  ;;  %v1844_v26 = vshll.u32 %v9373_v38, 30  ;;  %v1724_v48 = vsel %vm1710_vm12, %v1721_v33, %v1723_v49  ;;  %v6400_v25 = vadd.s32 4294967169, %v1993_v51 }
 0x2aa   :  { %v9391_v42 = vmul.u32.u64.low %v1725_v63, %v1724_v48  ;;  %v9392_v15 = vmul.u32.u64.high %v1725_v63, %v1724_v48, %v9391_v42  ;;  %v404_v2 = vmul.f32 %v8929_v34, %v377_v47  ;;  %v1335_v12 = vshrl.u32 %v1317_v40, %v1333_v41 }
 0x2ab   :  { %v9395_v8 = vadd.s32 127, %v1337_v50  ;;  %v1716_v39 = vsel %vm1710_vm12, %v1713_v5, %v1715_v43  ;;  %v1999_v3 = vadd.s32 1, %v6400_v25  ;;  %v1334_v1 = vshll.u32 %v9208_v10, %v9324_v54 }
 0x2ac   :  { %v1629_v16 = vadd.s32 %v9136_v11, %v9148_v28  ;;  %v9403_v51 = vsel %vm6387_vm13, 0, %v6386_v61  ;;  %v1735_v33 = vadd.s32 1, %v9384_v53  ;;  %v1537_v21 = vclz %v6381_v6 }
 0x2ad   :  { %v9407_v20 = vsub.s32 %v9347_v13, %v1844_v26  ;;  %v12754_v40 = vand.u32 2147483647, %v9335_v37  ;;  %vm2000_vm14 = vcmp.gt.s32.totalorder %v1999_v3, 0  ;;  %v1732_v41 = vmul.u32 %v1725_v63, %v1716_v39 }
 0x2ae   :  { %vm1734_vm2 = vc.u32 %v9392_v15, %v9383_v62  ;;  %v2001_v10 = vsel %vm2000_vm14, %v1999_v3, 0  ;;  %v9413_v54 = vadd.f32 %v8952_v4, %v404_v2  ;;  %v9415_v11 = vor.u32 %v1335_v12, %v1334_v1 }
 0x2af   :  { %v1339_v28 = vshll.u32 %v9395_v8, 23  ;;  %v1736_v50 = vsel %vm1734_vm2, %v1735_v33, %v9384_v53  ;;  %v2003_v61 = vand.u32 31, %v2001_v10  ;;  %v1645_v13 = vsub.s32 32, %v9403_v51 }
 0x2b0   :  { %12939 = vst [vmem:[#allocation70_spill] sm:$0xff] %v9413_v54  ;;  %v1646_v31 = vshll.u32 %v9270_v24, %v9403_v51  ;;  %v1649_v63 = vsub.s32 4294967266, %v9403_v51  ;;  %v1737_v5 = vadd.s32 %v1736_v50, %v1732_v41  ;;  %v6382_v47 = vadd.s32 4294967294, %v1537_v21 }
 0x2b1   :  { %v1847_v43 = vsub.s32 0, %v9407_v20  ;;  %v1996_v4 = vand.u32 8388607, %v12754_v40  ;;  %v2004_v49 = vsub.s32 32, %v2003_v61  ;;  %v9426_v26 = vshrl.u32 %v2001_v10, 5 }
 0x2b2   :  { %v1738_v6 = vadd.s32 536870912, %v1737_v5  ;;  %v2006_v53 = vshll.u32 %v12908_v32, %v2003_v61  ;;  %v1888_v48 = vand.u32 2139095040, %v9413_v54  ;;  %v2009_v24 = vshll.u32 %v12910_v55, %v2003_v61 }
 0x2b3   :  { %v2007_v25 = vshrl.u32 %v12910_v55, %v2004_v49  ;;  %v2010_v42 = vshrl.u32 %v12911_v23, %v2004_v49  ;;  %v2013_v2 = vshrl.u32 %v12912_v56, %v2004_v49  ;;  %v2012_v8 = vshll.u32 %v12911_v23, %v2003_v61 }
 0x2b4   :  { %v9434_v12 = vshrl.u32 %v1738_v6, 30  ;;  %v2015_v39 = vshll.u32 %v12912_v56, %v2003_v61  ;;  %v2016_v3 = vshrl.u32 %v12926_v36, %v2004_v49  ;;  %v1647_v1 = vshrl.u32 %v1629_v16, %v1645_v13 }
 0x2b5   :  { %v1650_v51 = vadd.s32 127, %v1649_v63  ;;  %v2008_v33 = vor.u32 %v2007_v25, %v2006_v53  ;;  %v2011_v21 = vor.u32 %v2010_v42, %v2009_v24  ;;  %v6393_v41 = vmin.u32 %v1847_v43, %v9407_v20 }
 0x2b6   :  { %12940 = vst [vmem:[#allocation71_spill] sm:$0xff] %v9434_v12  ;;  %v1740_v10 = vshll.u32 %v9434_v12, 30  ;;  %v2014_v50 = vor.u32 %v2013_v2, %v2012_v8  ;;  %v2017_v40 = vor.u32 %v2016_v3, %v2015_v39  ;;  %vm6383_vm4 = vcmp.lt.s32.totalorder %v6382_v47, 0 }
 0x2b7   :  { %v1997_v7 = vor.u32 8388608, %v1996_v4  ;;  %v2018_v6 = vshll.u32 %v12926_v36, %v2003_v61  ;;  %v2019_v38 = vshrl.u32 %v12916_v19, %v2004_v49  ;;  %vm2021_vm7 = vcmp.lt.s32.totalorder %v9426_v26, 1 }
 0x2b8   :  { %v9443_v0 = vsub.s32 %v1737_v5, %v1740_v10  ;;  %vm2024_vm8 = vcmp.lt.s32.totalorder %v9426_v26, 4  ;;  %v1889_v16 = vshrl.u32 %v1888_v48, 23  ;;  %vm2023_vm9 = vcmp.lt.s32.totalorder %v9426_v26, 3 }
 0x2b9   :  { %v2020_v13 = vor.u32 %v2019_v38, %v2018_v6  ;;  %v2029_v63 = vsel %vm2021_vm7, %v2008_v33, %v2011_v21  ;;  %v2030_v43 = vsel %vm2024_vm8, %v2017_v40, 920167782  ;;  %v1849_v4 = vclz %v6393_v41 }
 0x2ba   :  { %v1743_v61 = vsub.s32 0, %v9443_v0  ;;  %vm2022_vm10 = vcmp.lt.s32.totalorder %v9426_v26, 2  ;;  %v2031_v5 = vsel %vm2023_vm9, %v2014_v50, %v2030_v43  ;;  %v2033_v38 = vsel %vm2021_vm7, %v2011_v21, %v2014_v50 }
 0x2bb   :  { %v2032_v53 = vsel %vm2022_vm10, %v2029_v63, %v2031_v5  ;;  %v2034_v48 = vsel %vm2024_vm8, %v2020_v13, 1326507024  ;;  %v2037_v25 = vshll.u32 %v1997_v7, 8  ;;  %v1540_v24 = vsel %vm6383_vm4, 0, %v6382_v47 }
 0x2bc   :  { %v6389_v42 = vmin.u32 %v1743_v61, %v9443_v0  ;;  %v2026_v2 = vsel %vm2024_vm8, %v2014_v50, 2102212464  ;;  %v2035_v8 = vsel %vm2023_vm9, %v2017_v40, %v2034_v48  ;;  %v6396_v10 = vadd.s32 4294967169, %v1889_v16  ;;  %v2421_v16 = vpop.permute.xlu1 %2420 }
 0x2bd   :  { %v2036_v39 = vsel %vm2022_vm10, %v2033_v38, %v2035_v8  ;;  %v9470_v3 = vmul.u32.u64.low %v2037_v25, %v2032_v53  ;;  %v9471_v41 = vmul.u32.u64.high %v2037_v25, %v2032_v53, %v9470_v3  ;;  %v9474_v6 = vor.u32 4788187, %v1339_v28 }
 0x2be   :  { %v2005_v7 = vshrl.u32 %v12908_v32, %v2004_v49  ;;  %v9477_v47 = vmul.u32.u64.low %v2037_v25, %v2036_v39  ;;  %v9478_v13 = vmul.u32.u64.high %v2037_v25, %v2036_v39, %v9477_v47  ;;  %v9481_v63 = vor.u32 %v1647_v1, %v1646_v31 }
 0x2bf   :  { %v6394_v40 = vadd.s32 4294967294, %v1849_v4  ;;  %v1895_v43 = vadd.s32 1, %v6396_v10  ;;  %v1651_v61 = vshll.u32 %v1650_v51, 23  ;;  %v1541_v5 = vsub.s32 32, %v1540_v24 }
 0x2c0   :  { %v2025_v53 = vsel %vm2021_vm7, %v2005_v7, %v2008_v33  ;;  %v2027_v28 = vsel %vm2023_vm9, %v2011_v21, %v2026_v2  ;;  %v1745_v38 = vclz %v6389_v42  ;;  %v2047_v49 = vadd.s32 1, %v9471_v41 }
 0x2c1   :  { %v12759_v48 = vand.u32 2147483647, %v9413_v54  ;;  %vm1896_vm11 = vcmp.gt.s32.totalorder %v1895_v43, 0  ;;  %v1525_v1 = vadd.s32 %v9230_v46, %v9235_v45  ;;  %vm2046_vm12 = vc.u32 %v9478_v13, %v9470_v3 }
 0x2c2   :  { %v1897_v51 = vsel %vm1896_vm11, %v1895_v43, 0  ;;  %vm6395_vm13 = vcmp.lt.s32.totalorder %v6394_v40, 0  ;;  %v2028_v33 = vsel %vm2022_vm10, %v2025_v53, %v2027_v28  ;;  %v9497_v4 = vmul.f32 %v8929_v34, %v2421_v16 }
 0x2c3   :  { %v1899_v21 = vand.u32 31, %v1897_v51  ;;  %v9499_v42 = vor.u32 4788187, %v1651_v61  ;;  %v1543_v8 = vshrl.u32 %v1525_v1, %v1541_v5  ;;  %v1545_v39 = vsub.s32 4294967266, %v1540_v24 }
 0x2c4   :  { %v6390_v10 = vadd.s32 4294967294, %v1745_v38  ;;  %v2048_v46 = vsel %vm2046_vm12, %v2047_v49, %v9471_v41  ;;  %v1892_v45 = vand.u32 8388607, %v12759_v48  ;;  %v9505_v47 = vsel %vm6395_vm13, 0, %v6394_v40 }
 0x2c5   :  { %v1900_v7 = vsub.s32 32, %v1899_v21  ;;  %v2044_v26 = vmul.u32 %v2037_v25, %v2028_v33  ;;  %v9507_v43 = vshrl.u32 %v1897_v51, 5  ;;  %v1902_v34 = vshll.u32 %v12908_v32, %v1899_v21 }
 0x2c6   :  { %v1905_v53 = vshll.u32 %v12910_v55, %v1899_v21  ;;  %v1908_v16 = vshll.u32 %v12911_v23, %v1899_v21  ;;  %v1911_v40 = vshll.u32 %v12912_v56, %v1899_v21  ;;  %v1542_v38 = vshll.u32 %v9329_v18, %v1540_v24 }
 0x2c7   :  { %v1903_v61 = vshrl.u32 %v12910_v55, %v1900_v7  ;;  %v1906_v5 = vshrl.u32 %v12911_v23, %v1900_v7  ;;  %v1909_v28 = vshrl.u32 %v12912_v56, %v1900_v7  ;;  %v9514_v41 = vadd.s32 %v2048_v46, %v2044_v26 }
 0x2c8   :  { %v1912_v25 = vshrl.u32 %v12926_v36, %v1900_v7  ;;  %vm6391_vm14 = vcmp.lt.s32.totalorder %v6390_v10, 0  ;;  %v1546_v51 = vadd.s32 127, %v1545_v39  ;;  %v1857_v33 = vsub.s32 4294967266, %v9505_v47 }
 0x2c9   :  { %v1904_v49 = vor.u32 %v1903_v61, %v1902_v34  ;;  %v1907_v1 = vor.u32 %v1906_v5, %v1905_v53  ;;  %v1910_v48 = vor.u32 %v1909_v28, %v1908_v16  ;;  %v9521_v50 = vor.u32 %v1543_v8, %v1542_v38  ;;  %v2431_v34 = vpop.permute.xlu1 %2430 }
 0x2ca   :  { %v1913_v2 = vor.u32 %v1912_v25, %v1911_v40  ;;  %v1893_v46 = vor.u32 8388608, %v1892_v45  ;;  %v1914_v26 = vshll.u32 %v12926_v36, %v1899_v21  ;;  %v1915_v31 = vshrl.u32 %v12916_v19, %v1900_v7  ;;  %v9535_v21 = vpop.permute.xlu0 %2415 }
 0x2cb   :  { %v9525_v12 = vsel %vm6391_vm14, 0, %v6390_v10  ;;  %v2050_v60 = vadd.s32 536870912, %v9514_v41  ;;  %vm1917_vm2 = vcmp.lt.s32.totalorder %v9507_v43, 1  ;;  %vm1920_vm4 = vcmp.lt.s32.totalorder %v9507_v43, 4 }
 0x2cc   :  { %v1916_v18 = vor.u32 %v1915_v31, %v1914_v26  ;;  %vm1919_vm7 = vcmp.lt.s32.totalorder %v9507_v43, 3  ;;  %v1925_v24 = vsel %vm1917_vm2, %v1904_v49, %v1907_v1  ;;  %v1926_v8 = vsel %vm1920_vm4, %v1913_v2, 920167782 }
 0x2cd   :  { %v1547_v39 = vshll.u32 %v1546_v51, 23  ;;  %v1858_v10 = vadd.s32 127, %v1857_v33  ;;  %vm1918_vm8 = vcmp.lt.s32.totalorder %v9507_v43, 2  ;;  %v1927_v45 = vsel %vm1919_vm7, %v1910_v48, %v1926_v8 }
 0x2ce   :  { %v1928_v31 = vsel %vm1918_vm8, %v1925_v24, %v1927_v45  ;;  %v1929_v61 = vsel %vm1917_vm2, %v1907_v1, %v1910_v48  ;;  %v1930_v53 = vsel %vm1920_vm4, %v1916_v18, 1326507024  ;;  %v9546_v5 = vshll.u32 %v1893_v46, 8  ;;  %v9564_v46 = vld [vmem:[%s12892_s13] ss:$0 sm:$0xff] }
 0x2cf   :  { %v1853_v28 = vsub.s32 32, %v9505_v47  ;;  %v1753_v16 = vsub.s32 4294967266, %v9525_v12  ;;  %v9550_v40 = vshrl.u32 %v2050_v60, 30  ;;  %v1931_v25 = vsel %vm1919_vm7, %v1913_v2, %v1930_v53 }
 0x2d0   :  { %v1932_v38 = vsel %vm1918_vm8, %v1929_v61, %v1931_v25  ;;  %v9557_v51 = vmul.u32.u64.low %v9546_v5, %v1928_v31  ;;  %v9558_v33 = vmul.u32.u64.high %v9546_v5, %v1928_v31, %v9557_v51  ;;  %v2496_v26 = vmul.f32 %v9564_v46, %v2431_v34  ;;  %v9576_v61 = vld [vmem:[#allocation2] ss:$0 sm:$0xff] }
 0x2d1   :  { %12941 = vst [vmem:[#allocation72_spill] sm:$0xff] %v9550_v40  ;;  %v1548_v60 = vor.u32 4788187, %v1547_v39  ;;  %v1922_v18 = vsel %vm1920_vm4, %v1910_v48, 2102212464  ;;  %v9570_v2 = vmul.u32.u64.low %v9546_v5, %v1932_v38  ;;  %v9571_v24 = vmul.u32.u64.high %v9546_v5, %v1932_v38, %v9570_v2  ;;  %v2426_v39 = vpop.permute.xlu0 %2425 }
 0x2d2   :  { %v1837_v8 = vadd.s32 %v9306_v9, %v9313_v44  ;;  %v1859_v45 = vshll.u32 %v1858_v10, 23  ;;  %v1901_v31 = vshrl.u32 %v12908_v32, %v1900_v7  ;;  %v9580_v53 = vadd.f32 %v9576_v61, %v9497_v4 }
 0x2d3   :  { %v1653_v34 = vand.u32 2147483647, %v9499_v42  ;;  %v1551_v48 = vcvt.s32.f32 %v9521_v50  ;;  %v1754_v25 = vadd.s32 127, %v1753_v16  ;;  %v2052_v38 = vshll.u32 %v9550_v40, 30 }
 0x2d4   :  { %12942 = vst [vmem:[#allocation73_spill] sm:$0xff] %v9580_v53  ;;  %vm1367_vm9 = vcmp.lt.s32.totalorder %v8774_v27, 0  ;;  %v1855_v9 = vshrl.u32 %v1837_v8, %v1853_v28  ;;  %v1921_v44 = vsel %vm1917_vm2, %v1901_v31, %v1904_v49  ;;  %v1923_v7 = vsel %vm1919_vm7, %v1907_v1, %v1922_v18 }
 0x2d5   :  { %v9591_v4 = vadd.f32 %v9576_v61, %v2496_v26  ;;  %v1549_v10 = vand.u32 2147483647, %v1548_v60  ;;  %v1749_v42 = vsub.s32 32, %v9525_v12  ;;  %v1943_v50 = vadd.s32 1, %v9558_v33 }
 0x2d6   :  { %v2495_v16 = vmul.f32 %v9564_v46, %v2426_v39  ;;  %v1854_v2 = vshll.u32 %v9407_v20, %v9505_v47  ;;  %v1860_v28 = vor.u32 4788187, %v1859_v45  ;;  %vm1942_vm10 = vc.u32 %v9571_v24, %v9557_v51 }
 0x2d7   :  { %12943 = vst [vmem:[#allocation74_spill] sm:$0xff] %v9591_v4  ;;  %v2632_v49 = vand.u32 2139095040, %v9580_v53  ;;  %vm1263_vm11 = vcmp.lt.s32.totalorder %v8854_v29, 0  ;;  %v1733_v1 = vadd.s32 %v9383_v62, %v9392_v15  ;;  %v1755_v26 = vshll.u32 %v1754_v25, 23 }
 0x2d8   :  { %v9605_v60 = vsub.s32 %v9514_v41, %v2052_v38  ;;  %v1924_v18 = vsel %vm1918_vm8, %v1921_v44, %v1923_v7  ;;  %v12944_v20 = vand.u32 2147483647, %v9474_v6  ;;  %v12945_v47 = vcvt.s32.f32 %v9415_v11 }
 0x2d9   :  { %vm12775_vm12 = vcmp.lt.s32.totalorder %v8955_v35, 0  ;;  %v12946_v45 = vcvt.s32.f32 %v9481_v63  ;;  %v1856_v39 = vor.u32 %v1855_v9, %v1854_v2  ;;  %v2840_v62 = vand.u32 2139095040, %v9591_v4 }
 0x2da   :  { %v1344_v8 = vmul.f32 %v12945_v47, %v12944_v20  ;;  %vm12835_vm13 = vcmp.lt.s32.totalorder %v9055_v22, 0  ;;  %v1552_v15 = vmul.f32 %v1551_v48, %v1549_v10  ;;  %v1751_v41 = vshrl.u32 %v1733_v1, %v1749_v42 }
 0x2db   :  { %v1656_v31 = vmul.f32 %v12946_v45, %v1653_v34  ;;  %v1944_v43 = vsel %vm1942_vm10, %v1943_v50, %v9558_v33  ;;  %v9620_v25 = vadd.f32 %v9576_v61, %v2495_v16  ;;  %v1861_v6 = vand.u32 2147483647, %v1860_v28  ;;  %v2441_v50 = vpop.permute.xlu1 %2440 }
 0x2dc   :  { %v1940_v11 = vmul.u32 %v9546_v5, %v1924_v18  ;;  %v2633_v38 = vshrl.u32 %v2632_v49, 23  ;;  %v2841_v44 = vshrl.u32 %v2840_v62, 23  ;;  %v1750_v63 = vshll.u32 %v9443_v0, %v9525_v12 }
 0x2dd   :  { %12947 = vst [vmem:[#allocation75_spill] sm:$0xff] %v9620_v25  ;;  %v1756_v34 = vor.u32 4788187, %v1755_v26  ;;  %v2055_v9 = vsub.s32 0, %v9605_v60  ;;  %v2493_v48 = vmul.f32 %v9564_v46, %v9535_v21  ;;  %v1345_v7 = vxor.u32 2147483648, %v1344_v8 }
 0x2de   :  { %v1863_v10 = vcvt.s32.f32 %v1856_v39  ;;  %v9628_v33 = vadd.s32 %v1944_v43, %v1940_v11  ;;  %v6441_v42 = vadd.s32 4294967169, %v2841_v44  ;;  %v12948_v5 = vxor.u32 2147483648, %v9354_v52 }
 0x2df   :  { %v1657_v0 = vxor.u32 2147483648, %v1656_v31  ;;  %v1752_v12 = vor.u32 %v1751_v41, %v1750_v63  ;;  %v2736_v2 = vand.u32 2139095040, %v9620_v25  ;;  %v1553_v28 = vxor.u32 2147483648, %v1552_v15 }
 0x2e0   :  { %v9635_v16 = vsel %vm1367_vm9, %v12948_v5, %v9354_v52  ;;  %v9638_v49 = vmul.f32 %v1863_v10, %v1861_v6  ;;  %v6433_v21 = vadd.s32 4294967169, %v2633_v38  ;;  %v2847_v1 = vadd.s32 1, %v6441_v42 }
 0x2e1   :  { %12949 = vst [vmem:[#allocation76_spill] sm:$0xff] %v9635_v16  ;;  %v1757_v26 = vand.u32 2147483647, %v1756_v34  ;;  %v9641_v18 = vmin.u32 %v2055_v9, %v9605_v60  ;;  %v9644_v20 = vadd.f32 %v9576_v61, %v2493_v48  ;;  %v2498_v47 = vmul.f32 %v9564_v46, %v2441_v50 }
 0x2e2   :  { %v9649_v52 = vsel %vm1263_vm11, %v1345_v7, %v1344_v8  ;;  %v1946_v45 = vadd.s32 536870912, %v9628_v33  ;;  %v12762_v39 = vand.u32 2147483647, %v9591_v4  ;;  %vm2848_vm14 = vcmp.gt.s32.totalorder %v2847_v1, 0 }
 0x2e3   :  { %12950 = vst [vmem:[#allocation77_spill] sm:$0xff] %v9644_v20  ;;  %12951 = vst [vmem:[#allocation78_spill] sm:$0xff] %v9649_v52  ;;  %v9655_v62 = vsel %vm12775_vm12, %v1657_v0, %v1656_v31  ;;  %v1759_v41 = vcvt.s32.f32 %v1752_v12  ;;  %v2849_v43 = vsel %vm2848_vm14, %v2847_v1, 0  ;;  %v2737_v6 = vshrl.u32 %v2736_v2, 23 }
 0x2e4   :  { %12952 = vst [vmem:[#allocation79_spill] sm:$0xff] %v9655_v62  ;;  %v9659_v11 = vsel %vm12835_vm13, %v1553_v28, %v1552_v15  ;;  %v2639_v8 = vadd.s32 1, %v6433_v21  ;;  %v2851_v44 = vand.u32 31, %v2849_v43  ;;  %v2057_v34 = vclz %v9641_v18 }
 0x2e5   :  { %12953 = vst [vmem:[#allocation80_spill] sm:$0xff] %v9659_v11  ;;  %v9662_v63 = vmul.f32 %v1759_v41, %v1757_v26  ;;  %v2528_v9 = vand.u32 2139095040, %v9644_v20  ;;  %v9667_v31 = vadd.f32 %v9576_v61, %v2498_v47  ;;  %v9669_v48 = vshrl.u32 %v1946_v45, 30 }
 0x2e6   :  { %v2844_v7 = vand.u32 8388607, %v12762_v39  ;;  %v2852_v15 = vsub.s32 32, %v2851_v44  ;;  %v2850_v42 = vshrl.u32 %v2849_v43, 5  ;;  %v2854_v50 = vshll.u32 %v12908_v32, %v2851_v44 }
 0x2e7   :  { %12954 = vst [vmem:[#allocation81_spill] sm:$0xff] %v9667_v31  ;;  %12955 = vst [vmem:[#allocation82_spill] sm:$0xff] %v9669_v48  ;;  %v2857_v5 = vshll.u32 %v12910_v55, %v2851_v44  ;;  %v6437_v0 = vadd.s32 4294967169, %v2737_v6  ;;  %vm2640_vm2 = vcmp.gt.s32.totalorder %v2639_v8, 0  ;;  %v2860_v28 = vshll.u32 %v12911_v23, %v2851_v44 }
 0x2e8   :  { %v2855_v12 = vshrl.u32 %v12910_v55, %v2852_v15  ;;  %v2858_v2 = vshrl.u32 %v12911_v23, %v2852_v15  ;;  %v2861_v21 = vshrl.u32 %v12912_v56, %v2852_v15  ;;  %v2863_v1 = vshll.u32 %v12912_v56, %v2851_v44 }
 0x2e9   :  { %v2864_v26 = vshrl.u32 %v12926_v36, %v2852_v15  ;;  %v2866_v18 = vshll.u32 %v12926_v36, %v2851_v44  ;;  %v2867_v47 = vshrl.u32 %v12916_v19, %v2852_v15  ;;  %v2845_v45 = vor.u32 8388608, %v2844_v7 }
 0x2ea   :  { %v2856_v41 = vor.u32 %v2855_v12, %v2854_v50  ;;  %v2859_v43 = vor.u32 %v2858_v2, %v2857_v5  ;;  %v2862_v6 = vor.u32 %v2861_v21, %v2860_v28  ;;  %v1948_v39 = vshll.u32 %v9669_v48, 30 }
 0x2eb   :  { %v2853_v38 = vshrl.u32 %v12908_v32, %v2852_v15  ;;  %v2865_v10 = vor.u32 %v2864_v26, %v2863_v1  ;;  %v2868_v40 = vor.u32 %v2867_v47, %v2866_v18  ;;  %vm2869_vm4 = vcmp.lt.s32.totalorder %v2850_v42, 1  ;;  %v2436_v47 = vpop.permute.xlu0 %2435 }
 0x2ec   :  { %vm2872_vm7 = vcmp.lt.s32.totalorder %v2850_v42, 4  ;;  %v12956_v62 = vand.u32 2147483647, %v9620_v25  ;;  %v2743_v11 = vadd.s32 1, %v6437_v0  ;;  %vm2871_vm8 = vcmp.lt.s32.totalorder %v2850_v42, 3 }
 0x2ed   :  { %v2873_v44 = vsel %vm2869_vm4, %v2853_v38, %v2856_v41  ;;  %v2874_v22 = vsel %vm2872_vm7, %v2862_v6, 2102212464  ;;  %v2877_v53 = vsel %vm2869_vm4, %v2856_v41, %v2859_v43  ;;  %v2878_v50 = vsel %vm2872_vm7, %v2865_v10, 920167782 }
 0x2ee   :  { %v2740_v35 = vand.u32 8388607, %v12956_v62  ;;  %v2875_v7 = vsel %vm2871_vm8, %v2859_v43, %v2874_v22  ;;  %v2881_v5 = vsel %vm2869_vm4, %v2859_v43, %v2862_v6  ;;  %v2882_v12 = vsel %vm2872_vm7, %v2868_v40, 1326507024 }
 0x2ef   :  { %v9689_v2 = vsub.s32 %v9628_v33, %v1948_v39  ;;  %vm2870_vm10 = vcmp.lt.s32.totalorder %v2850_v42, 2  ;;  %v2879_v15 = vsel %vm2871_vm8, %v2862_v6, %v2878_v50  ;;  %v2885_v28 = vshll.u32 %v2845_v45, 8  ;;  %v2446_v29 = vpop.permute.xlu0 %2445 }
 0x2f0   :  { %v2880_v21 = vsel %vm2870_vm10, %v2877_v53, %v2879_v15  ;;  %v2883_v1 = vsel %vm2871_vm8, %v2865_v10, %v2882_v12  ;;  %v2741_v26 = vor.u32 8388608, %v2740_v35  ;;  %vm2744_vm14 = vcmp.gt.s32.totalorder %v2743_v11, 0 }
 0x2f1   :  { %v2876_v62 = vsel %vm2870_vm10, %v2873_v44, %v2875_v7  ;;  %v2884_v0 = vsel %vm2870_vm10, %v2881_v5, %v2883_v1  ;;  %v2745_v18 = vsel %vm2744_vm14, %v2743_v11, 0  ;;  %v3048_v38 = vand.u32 2139095040, %v9667_v31 }
 0x2f2   :  { %v9692_v22 = vmul.u32.u64.low %v2885_v28, %v2884_v0  ;;  %v9693_v41 = vmul.u32.u64.high %v2885_v28, %v2884_v0, %v9692_v22  ;;  %v9695_v40 = vmul.u32.u64.low %v2885_v28, %v2880_v21  ;;  %v9696_v43 = vmul.u32.u64.high %v2885_v28, %v2880_v21, %v9695_v40 }
 0x2f3   :  { %v9700_v39 = vadd.s32 4294967294, %v2057_v34  ;;  %v9703_v35 = vsel %vm2640_vm2, %v2639_v8, 0  ;;  %v2747_v53 = vand.u32 31, %v2745_v18  ;;  %v1951_v11 = vsub.s32 0, %v9689_v2 }
 0x2f4   :  { %v9706_v10 = vshrl.u32 %v2528_v9, 23  ;;  %v2497_v45 = vmul.f32 %v9564_v46, %v2436_v47  ;;  %v2892_v6 = vmul.u32 %v2885_v28, %v2876_v62  ;;  %v9710_v7 = vshll.u32 %v2741_v26, 8 }
 0x2f5   :  { %v2748_v44 = vsub.s32 32, %v2747_v53  ;;  %v3049_v50 = vshrl.u32 %v3048_v38, 23  ;;  %vm2894_vm4 = vc.u32 %v9693_v41, %v9695_v40  ;;  %v2895_v8 = vadd.s32 1, %v9696_v43 }
 0x2f6   :  { %v2746_v34 = vshrl.u32 %v2745_v18, 5  ;;  %v2750_v5 = vshll.u32 %v12908_v32, %v2747_v53  ;;  %v2753_v12 = vshll.u32 %v12910_v55, %v2747_v53  ;;  %v2756_v28 = vshll.u32 %v12911_v23, %v2747_v53 }
 0x2f7   :  { %v2751_v9 = vshrl.u32 %v12910_v55, %v2748_v44  ;;  %v2754_v15 = vshrl.u32 %v12911_v23, %v2748_v44  ;;  %vm6403_vm2 = vcmp.lt.s32.totalorder %v9700_v39, 0  ;;  %v2896_v21 = vsel %vm2894_vm4, %v2895_v8, %v9696_v43 }
 0x2f8   :  { %v2757_v1 = vshrl.u32 %v12912_v56, %v2748_v44  ;;  %v2759_v26 = vshll.u32 %v12912_v56, %v2747_v53  ;;  %v2760_v62 = vshrl.u32 %v12926_v36, %v2748_v44  ;;  %vm12784_vm7 = vcmp.lt.s32.totalorder %v9179_v57, 0 }
 0x2f9   :  { %vm12813_vm8 = vcmp.lt.s32.totalorder %v9254_v58, 0  ;;  %v6397_v0 = vmin.u32 %v1951_v11, %v9689_v2  ;;  %v2897_v18 = vadd.s32 %v2896_v21, %v2892_v6  ;;  %v2752_v38 = vor.u32 %v2751_v9, %v2750_v5 }
 0x2fa   :  { %v2755_v47 = vor.u32 %v2754_v15, %v2753_v12  ;;  %v2758_v22 = vor.u32 %v2757_v1, %v2756_v28  ;;  %v2761_v42 = vor.u32 %v2760_v62, %v2759_v26  ;;  %v2762_v33 = vshll.u32 %v12926_v36, %v2747_v53 }
 0x2fb   :  { %v2763_v43 = vshrl.u32 %v12916_v19, %v2748_v44  ;;  %v2898_v8 = vadd.s32 536870912, %v2897_v18  ;;  %v2749_v48 = vshrl.u32 %v12908_v32, %v2748_v44  ;;  %vm2765_vm10 = vcmp.lt.s32.totalorder %v2746_v34, 1 }
 0x2fc   :  { %v6449_v20 = vadd.s32 4294967169, %v3049_v50  ;;  %vm2766_vm14 = vcmp.lt.s32.totalorder %v2746_v34, 2  ;;  %vm2767_vm4 = vcmp.lt.s32.totalorder %v2746_v34, 3  ;;  %vm2768_vm12 = vcmp.lt.s32.totalorder %v2746_v34, 4 }
 0x2fd   :  { %v2764_v16 = vor.u32 %v2763_v43, %v2762_v33  ;;  %v9731_v27 = vshrl.u32 %v2898_v8, 30  ;;  %v2770_v11 = vsel %vm2768_vm12, %v2758_v22, 2102212464  ;;  %v2773_v6 = vsel %vm2765_vm10, %v2752_v38, %v2755_v47 }
 0x2fe   :  { %v2774_v5 = vsel %vm2768_vm12, %v2761_v42, 920167782  ;;  %v2769_v9 = vsel %vm2765_vm10, %v2749_v48, %v2752_v38  ;;  %v2777_v15 = vsel %vm2765_vm10, %v2755_v47, %v2758_v22  ;;  %v2771_v21 = vsel %vm2767_vm4, %v2755_v47, %v2770_v11 }
 0x2ff   :  { %12957 = vst [vmem:[#allocation83_spill] sm:$0xff] %v9731_v27  ;;  %v2775_v12 = vsel %vm2767_vm4, %v2758_v22, %v2774_v5  ;;  %v2778_v53 = vsel %vm2768_vm12, %v2764_v16, 1326507024  ;;  %v2900_v28 = vshll.u32 %v9731_v27, 30  ;;  %v9742_v62 = vadd.f32 %v9576_v61, %v2497_v45 }
 0x300   :  { %v2776_v44 = vsel %vm2766_vm14, %v2773_v6, %v2775_v12  ;;  %v2779_v1 = vsel %vm2767_vm4, %v2761_v42, %v2778_v53  ;;  %v3055_v47 = vadd.s32 1, %v6449_v20  ;;  %v12959_v42 = vxor.u32 2147483648, %v9638_v49 }
 0x301   :  { %v2780_v33 = vsel %vm2766_vm14, %v2777_v15, %v2779_v1  ;;  %v9737_v50 = vmul.u32.u64.low %v9710_v7, %v2776_v44  ;;  %v9738_v26 = vmul.u32.u64.high %v9710_v7, %v2776_v44, %v9737_v50  ;;  %12958 = vst [vmem:[#allocation84_spill] sm:$0xff] %v9742_v62  ;;  %v9744_v48 = vsub.s32 %v2897_v18, %v2900_v28 }
 0x302   :  { %v9747_v16 = vmul.u32.u64.low %v9710_v7, %v2780_v33  ;;  %v9748_v38 = vmul.u32.u64.high %v9710_v7, %v2780_v33, %v9747_v16  ;;  %v9755_v22 = vsel %vm12784_vm7, %v12959_v42, %v9638_v49  ;;  %v12961_v43 = vxor.u32 2147483648, %v9662_v63 }
 0x303   :  { %12960 = vst [vmem:[#allocation85_spill] sm:$0xff] %v9755_v22  ;;  %v2045_v18 = vadd.s32 %v9470_v3, %v9478_v13  ;;  %v2772_v8 = vsel %vm2766_vm14, %v2769_v9, %v2771_v21  ;;  %v9770_v20 = vsel %vm6403_vm2, 0, %v9700_v39  ;;  %v9773_v49 = vshrl.u32 %v9703_v35, 5 }
 0x304   :  { %v9762_v45 = vsel %vm12813_vm8, %v12961_v43, %v9662_v63  ;;  %v6429_v11 = vadd.s32 4294967169, %v9706_v10  ;;  %vm3056_vm12 = vcmp.gt.s32.totalorder %v3055_v47, 0  ;;  %v1953_v6 = vclz %v6397_v0 }
 0x305   :  { %12962 = vst [vmem:[#allocation86_spill] sm:$0xff] %v9762_v45  ;;  %12963 = vst [vmem:[#allocation87_spill] sm:$0xff] %v9773_v49  ;;  %v2791_v63 = vadd.s32 1, %v9738_v26  ;;  %v12964_v5 = vand.u32 2147483647, %v9667_v31  ;;  %v3057_v3 = vsel %vm3056_vm12, %v3055_v47, 0  ;;  %v2788_v34 = vmul.u32 %v9710_v7, %v2772_v8 }
 0x306   :  { %v2903_v13 = vsub.s32 0, %v9744_v48  ;;  %vm2790_vm2 = vc.u32 %v9748_v38, %v9737_v50  ;;  %v2944_v39 = vand.u32 2139095040, %v9742_v62  ;;  %v9786_v10 = vadd.s32 %v9557_v51, %v9571_v24 }
 0x307   :  { %v3052_v12 = vand.u32 8388607, %v12964_v5  ;;  %v9789_v0 = vand.u32 31, %v9703_v35  ;;  %v2792_v9 = vsel %vm2790_vm2, %v2791_v63, %v9738_v26  ;;  %v3059_v15 = vand.u32 31, %v3057_v3 }
 0x308   :  { %v2061_v53 = vsub.s32 32, %v9770_v20  ;;  %v2065_v28 = vsub.s32 4294967266, %v9770_v20  ;;  %v2793_v21 = vadd.s32 %v2792_v9, %v2788_v34  ;;  %v6398_v44 = vadd.s32 4294967294, %v1953_v6 }
 0x309   :  { %12965 = vst [vmem:[#allocation88_spill] sm:$0xff] %v9789_v0  ;;  %v9796_v1 = vadd.s32 1, %v6429_v11  ;;  %v3053_v33 = vor.u32 8388608, %v3052_v12  ;;  %v3060_v51 = vsub.s32 32, %v3059_v15  ;;  %v6442_v24 = vmin.u32 %v2903_v13, %v9744_v48 }
 0x30a   :  { %v2794_v35 = vadd.s32 536870912, %v2793_v21  ;;  %v3062_v16 = vshll.u32 %v12908_v32, %v3059_v15  ;;  %v2945_v26 = vshrl.u32 %v2944_v39, 23  ;;  %v3065_v42 = vshll.u32 %v12910_v55, %v3059_v15 }
 0x30b   :  { %v3063_v47 = vshrl.u32 %v12910_v55, %v3060_v51  ;;  %v3066_v43 = vshrl.u32 %v12911_v23, %v3060_v51  ;;  %v3069_v8 = vshrl.u32 %v12912_v56, %v3060_v51  ;;  %v3058_v63 = vshrl.u32 %v3057_v3, 5 }
 0x30c   :  { %v3068_v11 = vshll.u32 %v12911_v23, %v3059_v15  ;;  %v3072_v6 = vshrl.u32 %v12926_v36, %v3060_v51  ;;  %v3075_v5 = vshrl.u32 %v12916_v19, %v3060_v51  ;;  %v3071_v34 = vshll.u32 %v12912_v56, %v3059_v15 }
 0x30d   :  { %v3064_v12 = vor.u32 %v3063_v47, %v3062_v16  ;;  %v3067_v13 = vor.u32 %v3066_v43, %v3065_v42  ;;  %v3074_v39 = vshll.u32 %v12926_v36, %v3059_v15  ;;  %v2063_v9 = vshrl.u32 %v2045_v18, %v2061_v53 }
 0x30e   :  { %vm6399_vm10 = vcmp.lt.s32.totalorder %v6398_v44, 0  ;;  %v9809_v7 = vshrl.u32 %v2794_v35, 30  ;;  %v3070_v22 = vor.u32 %v3069_v8, %v3068_v11  ;;  %v2066_v57 = vadd.s32 127, %v2065_v28 }
 0x30f   :  { %v3073_v45 = vor.u32 %v3072_v6, %v3071_v34  ;;  %v3076_v3 = vor.u32 %v3075_v5, %v3074_v39  ;;  %v6445_v58 = vadd.s32 4294967169, %v2945_v26  ;;  %vm2536_vm14 = vcmp.gt.s32.totalorder %v9796_v1, 0 }
 0x310   :  { %12966 = vst [vmem:[#allocation89_spill] sm:$0xff] %v9809_v7  ;;  %v2905_v27 = vclz %v6442_v24  ;;  %vm3077_vm4 = vcmp.lt.s32.totalorder %v3058_v63, 1  ;;  %vm3080_vm12 = vcmp.lt.s32.totalorder %v3058_v63, 4  ;;  %v9812_v16 = vsel %vm6399_vm10, 0, %v6398_v44 }
 0x311   :  { %v3085_v47 = vsel %vm3077_vm4, %v3064_v12, %v3067_v13  ;;  %v3086_v42 = vsel %vm3080_vm12, %v3073_v45, 920167782  ;;  %v3093_v15 = vshll.u32 %v3053_v33, 8  ;;  %v2796_v18 = vshll.u32 %v9809_v7, 30 }
 0x312   :  { %vm3078_vm2 = vcmp.lt.s32.totalorder %v3058_v63, 2  ;;  %vm3079_vm7 = vcmp.lt.s32.totalorder %v3058_v63, 3  ;;  %v3082_v53 = vsel %vm3080_vm12, %v3070_v22, 2102212464  ;;  %v3089_v35 = vsel %vm3077_vm4, %v3067_v13, %v3070_v22 }
 0x313   :  { %v3087_v28 = vsel %vm3079_vm7, %v3070_v22, %v3086_v42  ;;  %v3090_v26 = vsel %vm3080_vm12, %v3076_v3, 1326507024  ;;  %v2951_v43 = vadd.s32 1, %v6445_v58  ;;  %v1961_v24 = vsub.s32 4294967266, %v9812_v16  ;;  %v2451_v58 = vpop.permute.xlu1 %2450 }
 0x314   :  { %v6443_v8 = vadd.s32 4294967294, %v2905_v27  ;;  %v3061_v44 = vshrl.u32 %v12908_v32, %v3060_v51  ;;  %v3088_v11 = vsel %vm3078_vm2, %v3085_v47, %v3087_v28  ;;  %v2067_v6 = vshll.u32 %v2066_v57, 23 }
 0x315   :  { %v3091_v5 = vsel %vm3079_vm7, %v3073_v45, %v3090_v26  ;;  %v9820_v33 = vmul.u32.u64.low %v3093_v15, %v3088_v11  ;;  %v9821_v34 = vmul.u32.u64.high %v3093_v15, %v3088_v11, %v9820_v33  ;;  %v3083_v42 = vsel %vm3079_vm7, %v3067_v13, %v3082_v53 }
 0x316   :  { %v3081_v39 = vsel %vm3077_vm4, %v3061_v44, %v3064_v12  ;;  %v3092_v22 = vsel %vm3078_vm2, %v3089_v35, %v3091_v5  ;;  %vm2952_vm10 = vcmp.gt.s32.totalorder %v2951_v43, 0  ;;  %v9826_v3 = vsub.s32 %v2793_v21, %v2796_v18 }
 0x317   :  { %v9828_v27 = vmul.u32.u64.low %v3093_v15, %v3092_v22  ;;  %v9829_v7 = vmul.u32.u64.high %v3093_v15, %v3092_v22, %v9828_v27  ;;  %v2953_v51 = vsel %vm2952_vm10, %v2951_v43, 0  ;;  %v1957_v57 = vsub.s32 32, %v9812_v16 }
 0x318   :  { %v1962_v45 = vadd.s32 127, %v1961_v24  ;;  %vm6444_vm12 = vcmp.lt.s32.totalorder %v6443_v8, 0  ;;  %v2955_v47 = vand.u32 31, %v2953_v51  ;;  %v9833_v28 = vsub.s32 32, %v9789_v0 }
 0x319   :  { %v3084_v12 = vsel %vm3078_vm2, %v3081_v39, %v3083_v42  ;;  %v3103_v13 = vadd.s32 1, %v9821_v34  ;;  %v2500_v53 = vmul.f32 %v9564_v46, %v2451_v58  ;;  %v12968_v21 = vshll.u32 %v9605_v60, %v9770_v20 }
 0x31a   :  { %12967 = vst [vmem:[#allocation90_spill] sm:$0xff] %v9833_v28  ;;  %v9846_v35 = vsel %vm2536_vm14, %v9796_v1, 0  ;;  %v12787_v26 = vand.u32 2147483647, %v9742_v62  ;;  %v2956_v43 = vsub.s32 32, %v2955_v47  ;;  %v9851_v63 = vsel %vm6444_vm12, 0, %v6443_v8 }
 0x31b   :  { %v9841_v18 = vor.u32 %v2063_v9, %v12968_v21  ;;  %v9849_v24 = vor.u32 4788187, %v2067_v6  ;;  %v2799_v44 = vsub.s32 0, %v9826_v3  ;;  %vm3102_vm7 = vc.u32 %v9829_v7, %v9820_v33 }
 0x31c   :  { %v1958_v60 = vshll.u32 %v9689_v2, %v9812_v16  ;;  %v1959_v20 = vshrl.u32 %v9786_v10, %v1957_v57  ;;  %v1963_v9 = vshll.u32 %v1962_v45, 23  ;;  %v3100_v1 = vmul.u32 %v3093_v15, %v3084_v12 }
 0x31d   :  { %v3104_v11 = vsel %vm3102_vm7, %v3103_v13, %v9821_v34  ;;  %v2959_v5 = vshrl.u32 %v12910_v55, %v2956_v43  ;;  %v2962_v6 = vshrl.u32 %v12911_v23, %v2956_v43  ;;  %v9863_v8 = vadd.f32 %v9576_v61, %v2500_v53 }
 0x31e   :  { %v2913_v39 = vsub.s32 4294967266, %v9851_v63  ;;  %v9866_v42 = vadd.s32 %v3104_v11, %v3100_v1  ;;  %v2948_v2 = vand.u32 8388607, %v12787_v26  ;;  %v2958_v10 = vshll.u32 %v12908_v32, %v2955_v47 }
 0x31f   :  { %v6438_v16 = vmin.u32 %v2799_v44, %v9826_v3  ;;  %v2961_v15 = vshll.u32 %v12910_v55, %v2955_v47  ;;  %v2964_v34 = vshll.u32 %v12911_v23, %v2955_v47  ;;  %v2965_v22 = vshrl.u32 %v12912_v56, %v2956_v43 }
 0x320   :  { %v2954_v58 = vshrl.u32 %v2953_v51, 5  ;;  %v2960_v27 = vor.u32 %v2959_v5, %v2958_v10  ;;  %v2967_v57 = vshll.u32 %v12912_v56, %v2955_v47  ;;  %v2968_v45 = vshrl.u32 %v12926_v36, %v2956_v43 }
 0x321   :  { %v2963_v12 = vor.u32 %v2962_v6, %v2961_v15  ;;  %v2966_v13 = vor.u32 %v2965_v22, %v2964_v34  ;;  %v2970_v53 = vshll.u32 %v12926_v36, %v2955_v47  ;;  %v2971_v21 = vshrl.u32 %v12916_v19, %v2956_v43 }
 0x322   :  { %v1960_v1 = vor.u32 %v1959_v20, %v1958_v60  ;;  %v1964_v44 = vor.u32 4788187, %v1963_v9  ;;  %v3106_v11 = vadd.s32 536870912, %v9866_v42  ;;  %v2969_v26 = vor.u32 %v2968_v45, %v2967_v57 }
 0x323   :  { %v2914_v49 = vadd.s32 127, %v2913_v39  ;;  %v2949_v28 = vor.u32 8388608, %v2948_v2  ;;  %v2972_v0 = vor.u32 %v2971_v21, %v2970_v53  ;;  %v3256_v51 = vand.u32 2139095040, %v9863_v8 }
 0x324   :  { %v2801_v5 = vclz %v6438_v16  ;;  %v2957_v10 = vshrl.u32 %v12908_v32, %v2956_v43  ;;  %vm2973_vm14 = vcmp.lt.s32.totalorder %v2954_v58, 1  ;;  %vm2976_vm4 = vcmp.lt.s32.totalorder %v2954_v58, 4 }
 0x325   :  { %vm2975_vm2 = vcmp.lt.s32.totalorder %v2954_v58, 3  ;;  %v2978_v6 = vsel %vm2976_vm4, %v2966_v13, 2102212464  ;;  %v2981_v47 = vsel %vm2973_vm14, %v2960_v27, %v2963_v12  ;;  %v2982_v15 = vsel %vm2976_vm4, %v2969_v26, 920167782 }
 0x326   :  { %v9882_v34 = vshrl.u32 %v3106_v11, 30  ;;  %vm2974_vm10 = vcmp.lt.s32.totalorder %v2954_v58, 2  ;;  %v2983_v60 = vsel %vm2975_vm2, %v2966_v13, %v2982_v15  ;;  %v2985_v20 = vsel %vm2973_vm14, %v2963_v12, %v2966_v13 }
 0x327   :  { %v2984_v9 = vsel %vm2974_vm10, %v2981_v47, %v2983_v60  ;;  %v2986_v39 = vsel %vm2976_vm4, %v2972_v0, 1326507024  ;;  %v2989_v2 = vshll.u32 %v2949_v28, 8  ;;  %v3257_v22 = vshrl.u32 %v3256_v51, 23 }
 0x328   :  { %12969 = vst [vmem:[#allocation91_spill] sm:$0xff] %v9882_v34  ;;  %v6439_v57 = vadd.s32 4294967294, %v2801_v5  ;;  %v2977_v16 = vsel %vm2973_vm14, %v2957_v10, %v2960_v27  ;;  %v2979_v45 = vsel %vm2975_vm2, %v2963_v12, %v2978_v6  ;;  %v2987_v43 = vsel %vm2975_vm2, %v2969_v26, %v2986_v39 }
 0x329   :  { %v2988_v53 = vsel %vm2974_vm10, %v2985_v20, %v2987_v43  ;;  %v9886_v21 = vmul.u32.u64.low %v2989_v2, %v2984_v9  ;;  %v9887_v52 = vmul.u32.u64.high %v2989_v2, %v2984_v9, %v9886_v21  ;;  %v6457_v11 = vadd.s32 4294967169, %v3257_v22  ;;  %v2461_v20 = vpop.permute.xlu1 %2460 }
 0x32a   :  { %v2071_v15 = vcvt.s32.f32 %v9841_v18  ;;  %v3108_v13 = vshll.u32 %v9882_v34, 30  ;;  %v9892_v47 = vmul.u32.u64.low %v2989_v2, %v2988_v53  ;;  %v9893_v0 = vmul.u32.u64.high %v2989_v2, %v2988_v53, %v9892_v47 }
 0x32b   :  { %v2069_v28 = vand.u32 2147483647, %v9849_v24  ;;  %v1967_v27 = vcvt.s32.f32 %v1960_v1  ;;  %v2980_v26 = vsel %vm2974_vm10, %v2977_v16, %v2979_v45  ;;  %v3263_v12 = vadd.s32 1, %v6457_v11 }
 0x32c   :  { %v1965_v51 = vand.u32 2147483647, %v1964_v44  ;;  %v2893_v5 = vadd.s32 %v9695_v40, %v9693_v41  ;;  %vm6440_vm12 = vcmp.lt.s32.totalorder %v6439_v57, 0  ;;  %v2499_v10 = vmul.f32 %v9564_v46, %v2446_v29 }
 0x32d   :  { %v2909_v18 = vsub.s32 32, %v9851_v63  ;;  %v2915_v6 = vshll.u32 %v2914_v49, 23  ;;  %v2999_v60 = vadd.s32 1, %v9887_v52  ;;  %vm3264_vm7 = vcmp.gt.s32.totalorder %v3263_v12, 0 }
 0x32e   :  { %v9903_v24 = vsub.s32 %v9866_v42, %v3108_v13  ;;  %v2996_v58 = vmul.u32 %v2989_v2, %v2980_v26  ;;  %vm2998_vm14 = vc.u32 %v9893_v0, %v9886_v21  ;;  %v3265_v1 = vsel %vm3264_vm7, %v3263_v12, 0 }
 0x32f   :  { %v9907_v44 = vsel %vm6440_vm12, 0, %v6439_v57  ;;  %v3000_v41 = vsel %vm2998_vm14, %v2999_v60, %v9887_v52  ;;  %v12794_v29 = vand.u32 2147483647, %v9863_v8  ;;  %v3267_v40 = vand.u32 31, %v3265_v1 }
 0x330   :  { %v9911_v49 = vmul.f32 %v2071_v15, %v2069_v28  ;;  %v9913_v9 = vmul.f32 %v1967_v27, %v1965_v51  ;;  %v3001_v39 = vadd.s32 %v3000_v41, %v2996_v58  ;;  %v9916_v42 = vmul.f32 %v9564_v46, %v2461_v20  ;;  %v7251_v58 = vld [vmem:[%s12971_s21 + $0x40] sm:$0xff]  }
 0x331   :  { %v2910_v2 = vshll.u32 %v9744_v48, %v9851_v63  ;;  %v2911_v22 = vshrl.u32 %v2893_v5, %v2909_v18  ;;  %v2789_v57 = vadd.s32 %v9737_v50, %v9748_v38  ;;  %v3268_v16 = vsub.s32 32, %v3267_v40  ;;  %6600 = vmatprep.subr.bf16.mxu0 %v7251_v58 }
 0x332   :  { %v9922_v52 = vor.u32 4788187, %v2915_v6  ;;  %v2805_v45 = vsub.s32 32, %v9907_v44  ;;  %v3111_v43 = vsub.s32 0, %v9903_v24  ;;  %v3002_v53 = vadd.s32 536870912, %v3001_v39 }
 0x333   :  { %v3260_v11 = vand.u32 8388607, %v12794_v29  ;;  %v3271_v46 = vshrl.u32 %v12910_v55, %v3268_v16  ;;  %v3274_v15 = vshrl.u32 %v12911_v23, %v3268_v16  ;;  %v9931_v48 = vadd.f32 %v9576_v61, %v2499_v10 }
 0x334   :  { %v3266_v63 = vshrl.u32 %v3265_v1, 5  ;;  %v3270_v50 = vshll.u32 %v12908_v32, %v3267_v40  ;;  %v3273_v38 = vshll.u32 %v12910_v55, %v3267_v40  ;;  %v3277_v13 = vshrl.u32 %v12912_v56, %v3268_v16 }
 0x335   :  { %v9936_v47 = vshrl.u32 %v3002_v53, 30  ;;  %v3276_v28 = vshll.u32 %v12911_v23, %v3267_v40  ;;  %v3279_v27 = vshll.u32 %v12912_v56, %v3267_v40  ;;  %v3280_v26 = vshrl.u32 %v12926_v36, %v3268_v16 }
 0x336   :  { %v2912_v12 = vor.u32 %v2911_v22, %v2910_v2  ;;  %v6450_v51 = vmin.u32 %v3111_v43, %v9903_v24  ;;  %v3272_v5 = vor.u32 %v3271_v46, %v3270_v50  ;;  %v3275_v10 = vor.u32 %v3274_v15, %v3273_v38 }
 0x337   :  { %12970 = vst [vmem:[#allocation92_spill] sm:$0xff] %v9936_v47  ;;  %v3278_v18 = vor.u32 %v3277_v13, %v3276_v28  ;;  %v3281_v6 = vor.u32 %v3280_v26, %v3279_v27  ;;  %v3282_v60 = vshll.u32 %v12926_v36, %v3267_v40  ;;  %v3283_v20 = vshrl.u32 %v12916_v19, %v3268_v16 }
 0x338   :  { %v2917_v1 = vand.u32 2147483647, %v9922_v52  ;;  %v2807_v41 = vshrl.u32 %v2789_v57, %v2805_v45  ;;  %v2809_v53 = vsub.s32 4294967266, %v9907_v44  ;;  %v3261_v2 = vor.u32 8388608, %v3260_v11 }
 0x339   :  { %v3004_v22 = vshll.u32 %v9936_v47, 30  ;;  %v3284_v43 = vor.u32 %v3283_v20, %v3282_v60  ;;  %vm3285_vm4 = vcmp.lt.s32.totalorder %v3266_v63, 1  ;;  %v3152_v46 = vand.u32 2139095040, %v9931_v48 }
 0x33a   :  { %v3113_v40 = vclz %v6450_v51  ;;  %vm3287_vm2 = vcmp.lt.s32.totalorder %v3266_v63, 3  ;;  %vm3288_vm10 = vcmp.lt.s32.totalorder %v3266_v63, 4  ;;  %v3293_v15 = vsel %vm3285_vm4, %v3272_v5, %v3275_v10 }
 0x33b   :  { %v3290_v50 = vsel %vm3288_vm10, %v3278_v18, 2102212464  ;;  %v3294_v38 = vsel %vm3288_vm10, %v3281_v6, 920167782  ;;  %v3297_v52 = vsel %vm3285_vm4, %v3275_v10, %v3278_v18  ;;  %v3298_v57 = vsel %vm3288_vm10, %v3284_v43, 1326507024 }
 0x33c   :  { %v3269_v45 = vshrl.u32 %v12908_v32, %v3268_v16  ;;  %vm3286_vm12 = vcmp.lt.s32.totalorder %v3266_v63, 2  ;;  %v3295_v11 = vsel %vm3287_vm2, %v3278_v18, %v3294_v38  ;;  %v3301_v13 = vshll.u32 %v3261_v2, 8 }
 0x33d   :  { %v9955_v28 = vsub.s32 %v3001_v39, %v3004_v22  ;;  %v3296_v27 = vsel %vm3286_vm12, %v3293_v15, %v3295_v11  ;;  %v3299_v26 = vsel %vm3287_vm2, %v3281_v6, %v3298_v57  ;;  %v3153_v51 = vshrl.u32 %v3152_v46, 23 }
 0x33e   :  { %vm12805_vm7 = vcmp.lt.s32.totalorder %v9335_v37, 0  ;;  %vm12806_vm14 = vcmp.lt.s32.totalorder %v9413_v54, 0  ;;  %v6451_v60 = vadd.s32 4294967294, %v3113_v40  ;;  %v3289_v20 = vsel %vm3285_vm4, %v3269_v45, %v3272_v5  ;;  %v10038_v37 = vld [vmem:[%s12892_s13] ss:$0 sm:$0xff] }
 0x33f   :  { %v3291_v16 = vsel %vm3287_vm2, %v3275_v10, %v3290_v50  ;;  %v3300_v58 = vsel %vm3286_vm12, %v3297_v52, %v3299_v26  ;;  %v9967_v39 = vmul.u32.u64.low %v3301_v13, %v3296_v27  ;;  %v9968_v22 = vmul.u32.u64.high %v3301_v13, %v3296_v27, %v9967_v39 }
 0x340   :  { %v9964_v18 = vmul.u32.u64.low %v3301_v13, %v3300_v58  ;;  %v9965_v2 = vmul.u32.u64.high %v3301_v13, %v3300_v58, %v9964_v18  ;;  %v9972_v6 = vand.u32 31, %v9846_v35  ;;  %v2919_v43 = vcvt.s32.f32 %v2912_v12 }
 0x341   :  { %v2810_v46 = vadd.s32 127, %v2809_v53  ;;  %v6453_v15 = vadd.s32 4294967169, %v3153_v51  ;;  %v2806_v5 = vshll.u32 %v9826_v3, %v9907_v44  ;;  %v3007_v10 = vsub.s32 0, %v9955_v28 }
 0x342   :  { %12972 = vst [vmem:[#allocation93_spill] sm:$0xff] %v9972_v6  ;;  %v3292_v40 = vsel %vm3286_vm12, %v3289_v20, %v3291_v16  ;;  %v9980_v50 = vadd.f32 %v9576_v61, %v9916_v42  ;;  %v2073_v38 = vxor.u32 2147483648, %v9911_v49  ;;  %v1969_v52 = vxor.u32 2147483648, %v9913_v9 }
 0x343   :  { %v9984_v57 = vmul.f32 %v2919_v43, %v2917_v1  ;;  %v3159_v12 = vadd.s32 1, %v6453_v15  ;;  %v9986_v53 = vor.u32 %v2807_v41, %v2806_v5  ;;  %vm6452_vm4 = vcmp.lt.s32.totalorder %v6451_v60, 0 }
 0x344   :  { %vm3310_vm2 = vc.u32 %v9965_v2, %v9967_v39  ;;  %v3311_v3 = vadd.s32 1, %v9968_v22  ;;  %v2811_v44 = vshll.u32 %v2810_v46, 23  ;;  %v3308_v63 = vmul.u32 %v3301_v13, %v3292_v40 }
 0x345   :  { %v12795_v61 = vand.u32 2147483647, %v9931_v48  ;;  %vm3160_vm10 = vcmp.gt.s32.totalorder %v3159_v12, 0  ;;  %v6446_v42 = vmin.u32 %v3007_v10, %v9955_v28  ;;  %v3464_v11 = vand.u32 2139095040, %v9980_v50 }
 0x346   :  { %v3312_v45 = vsel %vm3310_vm2, %v3311_v3, %v9968_v22  ;;  %v3161_v1 = vsel %vm3160_vm10, %v3159_v12, 0  ;;  %v9996_v41 = vshrl.u32 %v9846_v35, 5  ;;  %v9999_v27 = vsub.s32 32, %v9972_v6  ;;  %v2456_v3 = vpop.permute.xlu0 %2455 }
 0x347   :  { %v10001_v26 = vsel %vm6452_vm4, 0, %v6451_v60  ;;  %v3313_v51 = vadd.s32 %v3312_v45, %v3308_v63  ;;  %v10006_v13 = vsel %vm12805_vm7, %v2073_v38, %v9911_v49  ;;  %v10011_v20 = vsel %vm12806_vm14, %v1969_v52, %v9913_v9 }
 0x348   :  { %12973 = vst [vmem:[#allocation94_spill] sm:$0xff] %v9996_v41  ;;  %12974 = vst [vmem:[#allocation95_spill] sm:$0xff] %v9999_v27  ;;  %v3163_v35 = vand.u32 31, %v3161_v1  ;;  %v10014_v58 = vor.u32 4788187, %v2811_v44  ;;  %v2815_v18 = vcvt.s32.f32 %v9986_v53  ;;  %v3121_v43 = vsub.s32 4294967266, %v10001_v26 }
 0x349   :  { %12975 = vst [vmem:[#allocation96_spill] sm:$0xff] %v10006_v13  ;;  %12976 = vst [vmem:[#allocation97_spill] sm:$0xff] %v10011_v20  ;;  %v3314_v60 = vadd.s32 536870912, %v3313_v51  ;;  %v3156_v22 = vand.u32 8388607, %v12795_v61  ;;  %v3009_v49 = vclz %v6446_v42  ;;  %v3465_v15 = vshrl.u32 %v3464_v11, 23 }
 0x34a   :  { %v3164_v46 = vsub.s32 32, %v3163_v35  ;;  %v10020_v5 = vshrl.u32 %v3161_v1, 5  ;;  %v3166_v9 = vshll.u32 %v12908_v32, %v3163_v35  ;;  %v3169_v10 = vshll.u32 %v12910_v55, %v3163_v35 }
 0x34b   :  { %v3172_v40 = vshll.u32 %v12911_v23, %v3163_v35  ;;  %v10025_v38 = vshrl.u32 %v3314_v60, 30  ;;  %v3157_v44 = vor.u32 8388608, %v3156_v22  ;;  %v3175_v63 = vshll.u32 %v12912_v56, %v3163_v35 }
 0x34c   :  { %v3167_v52 = vshrl.u32 %v12910_v55, %v3164_v46  ;;  %v3170_v12 = vshrl.u32 %v12911_v23, %v3164_v46  ;;  %v3173_v53 = vshrl.u32 %v12912_v56, %v3164_v46  ;;  %v3176_v42 = vshrl.u32 %v12926_v36, %v3164_v46 }
 0x34d   :  { %12977 = vst [vmem:[#allocation98_spill] sm:$0xff] %v10025_v38  ;;  %v3178_v45 = vshll.u32 %v12926_v36, %v3163_v35  ;;  %v3179_v60 = vshrl.u32 %v12916_v19, %v3164_v46  ;;  %v2813_v61 = vand.u32 2147483647, %v10014_v58  ;;  %v3122_v16 = vadd.s32 127, %v3121_v43 }
 0x34e   :  { %v3168_v1 = vor.u32 %v3167_v52, %v3166_v9  ;;  %v3171_v11 = vor.u32 %v3170_v12, %v3169_v10  ;;  %v3174_v29 = vor.u32 %v3173_v53, %v3172_v40  ;;  %v3177_v13 = vor.u32 %v3176_v42, %v3175_v63 }
 0x34f   :  { %v2501_v22 = vmul.f32 %v10038_v37, %v2456_v3  ;;  %v3316_v20 = vshll.u32 %v10025_v38, 30  ;;  %v3180_v54 = vor.u32 %v3179_v60, %v3178_v45  ;;  %vm3181_vm12 = vcmp.lt.s32.totalorder %v10020_v5, 1 }
 0x350   :  { %v6465_v35 = vadd.s32 4294967169, %v3465_v15  ;;  %v6447_v9 = vadd.s32 4294967294, %v3009_v49  ;;  %vm3184_vm4 = vcmp.lt.s32.totalorder %v10020_v5, 4  ;;  %v3189_v58 = vsel %vm3181_vm12, %v3168_v1, %v3171_v11 }
 0x351   :  { %v3197_v43 = vshll.u32 %v3157_v44, 8  ;;  %vm3183_vm2 = vcmp.lt.s32.totalorder %v10020_v5, 3  ;;  %v3190_v10 = vsel %vm3184_vm4, %v3177_v13, 920167782  ;;  %v3193_v40 = vsel %vm3181_vm12, %v3171_v11, %v3174_v29 }
 0x352   :  { %v3194_v52 = vsel %vm3184_vm4, %v3180_v54, 1326507024  ;;  %v3165_v12 = vshrl.u32 %v12908_v32, %v3164_v46  ;;  %vm3182_vm10 = vcmp.lt.s32.totalorder %v10020_v5, 2  ;;  %v3186_v53 = vsel %vm3184_vm4, %v3174_v29, 2102212464 }
 0x353   :  { %v3191_v15 = vsel %vm3183_vm2, %v3174_v29, %v3190_v10  ;;  %v10051_v49 = vsub.s32 %v3313_v51, %v3316_v20  ;;  %v3195_v63 = vsel %vm3183_vm2, %v3177_v13, %v3194_v52  ;;  %v3471_v44 = vadd.s32 1, %v6465_v35  ;;  %v10072_v52 = vld [vmem:[#allocation2] ss:$0 sm:$0xff] }
 0x354   :  { %v3192_v3 = vsel %vm3182_vm10, %v3189_v58, %v3191_v15  ;;  %v3185_v42 = vsel %vm3181_vm12, %v3165_v12, %v3168_v1  ;;  %v3196_v45 = vsel %vm3182_vm10, %v3193_v40, %v3195_v63  ;;  %v3187_v46 = vsel %vm3183_vm2, %v3171_v11, %v3186_v53  ;;  %v2471_v1 = vpop.permute.xlu1 %2470 }
 0x355   :  { %v10059_v54 = vmul.u32.u64.low %v3197_v43, %v3192_v3  ;;  %v10060_v60 = vmul.u32.u64.high %v3197_v43, %v3192_v3, %v10059_v54  ;;  %v10063_v38 = vmul.u32.u64.low %v3197_v43, %v3196_v45  ;;  %v10064_v29 = vmul.u32.u64.high %v3197_v43, %v3196_v45, %v10063_v38 }
 0x356   :  { %vm3472_vm4 = vcmp.gt.s32.totalorder %v3471_v44, 0  ;;  %v3101_v51 = vadd.s32 %v9820_v33, %v9829_v7  ;;  %v3117_v13 = vsub.s32 32, %v10001_v26  ;;  %v3123_v20 = vshll.u32 %v3122_v16, 23 }
 0x357   :  { %v3473_v35 = vsel %vm3472_vm4, %v3471_v44, 0  ;;  %v10069_v58 = vmul.f32 %v2815_v18, %v2813_v61  ;;  %v12802_v10 = vand.u32 2147483647, %v9980_v50  ;;  %v10075_v11 = vadd.f32 %v10072_v52, %v2501_v22 }
 0x358   :  { %v3475_v40 = vand.u32 31, %v3473_v35  ;;  %vm6448_vm12 = vcmp.lt.s32.totalorder %v6447_v9, 0  ;;  %v3319_v38 = vsub.s32 0, %v10051_v49  ;;  %v3188_v7 = vsel %vm3182_vm10, %v3185_v42, %v3187_v46 }
 0x359   :  { %v3207_v33 = vadd.s32 1, %v10060_v60  ;;  %v10083_v61 = vadd.s32 %v9886_v21, %v9893_v0  ;;  %vm3206_vm2 = vc.u32 %v10064_v29, %v10059_v54  ;;  %v10088_v18 = vmul.f32 %v10038_v37, %v2471_v1 }
 0x35a   :  { %v3476_v16 = vsub.s32 32, %v3475_v40  ;;  %v3118_v22 = vshll.u32 %v9903_v24, %v10001_v26  ;;  %v3119_v12 = vshrl.u32 %v3101_v51, %v3117_v13  ;;  %v10092_v53 = vor.u32 4788187, %v3123_v20 }
 0x35b   :  { %v3208_v5 = vsel %vm3206_vm2, %v3207_v33, %v10060_v60  ;;  %v10095_v15 = vsel %vm6448_vm12, 0, %v6447_v9  ;;  %v3204_v3 = vmul.u32 %v3197_v43, %v3188_v7  ;;  %v3468_v21 = vand.u32 8388607, %v12802_v10 }
 0x35c   :  { %v3479_v0 = vshrl.u32 %v12910_v55, %v3476_v16  ;;  %v6458_v63 = vmin.u32 %v3319_v38, %v10051_v49  ;;  %v3478_v44 = vshll.u32 %v12908_v32, %v3475_v40  ;;  %v3482_v42 = vshrl.u32 %v12911_v23, %v3476_v16 }
 0x35d   :  { %v3360_v24 = vand.u32 2139095040, %v10075_v11  ;;  %v10104_v26 = vadd.s32 %v3208_v5, %v3204_v3  ;;  %v3481_v45 = vshll.u32 %v12910_v55, %v3475_v40  ;;  %v3484_v9 = vshll.u32 %v12911_v23, %v3475_v40 }
 0x35e   :  { %v3485_v43 = vshrl.u32 %v12912_v56, %v3476_v16  ;;  %v3120_v60 = vor.u32 %v3119_v12, %v3118_v22  ;;  %v3125_v46 = vand.u32 2147483647, %v10092_v53  ;;  %v3474_v51 = vshrl.u32 %v3473_v35, 5  ;;  %v7252_v35 = vld [vmem:[%s12971_s21] sm:$0xff]  }
 0x35f   :  { %v3480_v13 = vor.u32 %v3479_v0, %v3478_v44  ;;  %v3483_v20 = vor.u32 %v3482_v42, %v3481_v45  ;;  %v3487_v38 = vshll.u32 %v12912_v56, %v3475_v40  ;;  %v3488_v7 = vshrl.u32 %v12926_v36, %v3476_v16  ;;  %6601 = vmatpush3.bf16.msra.mxu0 %v7252_v35 }
 0x360   :  { %v3486_v1 = vor.u32 %v3485_v43, %v3484_v9  ;;  %v3017_v33 = vsub.s32 4294967266, %v10095_v15  ;;  %v3469_v5 = vor.u32 8388608, %v3468_v21  ;;  %v3490_v3 = vshll.u32 %v12926_v36, %v3475_v40  ;;  %v7253_v9 = vld [vmem:[%s12971_s21 + $0x48] sm:$0xff]  }
 0x361   :  { %v3491_v10 = vshrl.u32 %v12916_v19, %v3476_v16  ;;  %v3321_v34 = vclz %v6458_v63  ;;  %v3210_v22 = vadd.s32 536870912, %v10104_v26  ;;  %v3489_v12 = vor.u32 %v3488_v7, %v3487_v38  ;;  %6602 = vmatprep.subr.bf16.mxu0 %v7253_v9 }
 0x362   :  { %v3361_v53 = vshrl.u32 %v3360_v24, 23  ;;  %v3477_v0 = vshrl.u32 %v12908_v32, %v3476_v16  ;;  %vm3493_vm10 = vcmp.lt.s32.totalorder %v3474_v51, 1  ;;  %vm3496_vm4 = vcmp.lt.s32.totalorder %v3474_v51, 4 }
 0x363   :  { %v3492_v44 = vor.u32 %v3491_v10, %v3490_v3  ;;  %vm3495_vm12 = vcmp.lt.s32.totalorder %v3474_v51, 3  ;;  %v3498_v21 = vsel %vm3496_vm4, %v3486_v1, 2102212464  ;;  %v3501_v40 = vsel %vm3493_vm10, %v3480_v13, %v3483_v20 }
 0x364   :  { %v3502_v42 = vsel %vm3496_vm4, %v3489_v12, 920167782  ;;  %vm3494_vm2 = vcmp.lt.s32.totalorder %v3474_v51, 2  ;;  %v3505_v24 = vsel %vm3493_vm10, %v3483_v20, %v3486_v1  ;;  %v3509_v45 = vshll.u32 %v3469_v5, 8 }
 0x365   :  { %v3503_v63 = vsel %vm3495_vm12, %v3486_v1, %v3502_v42  ;;  %vm12848_vm7 = vcmp.lt.s32.totalorder %v9591_v4, 0  ;;  %vm12849_vm14 = vcmp.lt.s32.totalorder %v9620_v25, 0  ;;  %v10128_v10 = vshrl.u32 %v3210_v22, 30  ;;  %v7254_v1 = vld [vmem:[%s12971_s21 + $0x8] sm:$0xff]  }
 0x366   :  { %v3497_v16 = vsel %vm3493_vm10, %v3477_v0, %v3480_v13  ;;  %v3504_v43 = vsel %vm3494_vm2, %v3501_v40, %v3503_v63  ;;  %v3506_v38 = vsel %vm3496_vm4, %v3492_v44, 1326507024  ;;  %v3499_v7 = vsel %vm3495_vm12, %v3483_v20, %v3498_v21  ;;  %v2466_v44 = vpop.permute.xlu0 %2465  ;;  %6603 = vmatpush3.bf16.msra.mxu0 %v7254_v1  ;;  %v7255_v20 = vld [vmem:[%s12971_s21 + $0x50] sm:$0xff]  }
 0x367   :  { %12978 = vst [vmem:[#allocation99_spill] sm:$0xff] %v10128_v10  ;;  %v3507_v5 = vsel %vm3495_vm12, %v3489_v12, %v3506_v38  ;;  %v10137_v3 = vmul.u32.u64.low %v3509_v45, %v3504_v43  ;;  %v10138_v35 = vmul.u32.u64.high %v3509_v45, %v3504_v43, %v10137_v3  ;;  %v3013_v22 = vsub.s32 32, %v10095_v15  ;;  %6604 = vmatprep.subr.bf16.mxu0 %v7255_v20 }
 0x368   :  { %v3018_v13 = vadd.s32 127, %v3017_v33  ;;  %v3508_v0 = vsel %vm3494_vm2, %v3505_v24, %v3507_v5  ;;  %v6461_v40 = vadd.s32 4294967169, %v3361_v53  ;;  %v3127_v42 = vcvt.s32.f32 %v3120_v60 }
 0x369   :  { %v6459_v63 = vadd.s32 4294967294, %v3321_v34  ;;  %v10143_v47 = vmul.u32.u64.low %v3509_v45, %v3508_v0  ;;  %v10144_v41 = vmul.u32.u64.high %v3509_v45, %v3508_v0, %v10143_v47  ;;  %v3212_v12 = vshll.u32 %v10128_v10, 30  ;;  %v7256_v34 = vld [vmem:[%s12971_s21 + $0x10] sm:$0xff]  }
 0x36a   :  { %v3500_v21 = vsel %vm3494_vm2, %v3497_v16, %v3499_v7  ;;  %v3367_v9 = vadd.s32 1, %v6461_v40  ;;  %v10153_v33 = vadd.f32 %v10072_v52, %v10088_v18  ;;  %v2817_v60 = vxor.u32 2147483648, %v10069_v58  ;;  %6605 = vmatpush3.bf16.msra.mxu0 %v7256_v34  ;;  %v7261_v40 = vld [vmem:[%s12971_s21 + $0x68] sm:$0xff]  }
 0x36b   :  { %v10159_v47 = vmul.f32 %v3127_v42, %v3125_v46  ;;  %v3519_v53 = vadd.s32 1, %v10138_v35  ;;  %v2503_v24 = vmul.f32 %v10038_v37, %v2466_v44  ;;  %v3015_v51 = vshrl.u32 %v10083_v61, %v3013_v22  ;;  %v7257_v46 = vld [vmem:[%s12971_s21 + $0x58] sm:$0xff]  }
 0x36c   :  { %v3019_v16 = vshll.u32 %v3018_v13, 23  ;;  %v12810_v43 = vand.u32 2147483647, %v10075_v11  ;;  %vm3368_vm10 = vcmp.gt.s32.totalorder %v3367_v9, 0  ;;  %vm6460_vm4 = vcmp.lt.s32.totalorder %v6459_v63, 0  ;;  %6606 = vmatprep.subr.bf16.mxu0 %v7257_v46 }
 0x36d   :  { %v3516_v18 = vmul.u32 %v3509_v45, %v3500_v21  ;;  %vm3518_vm12 = vc.u32 %v10144_v41, %v10137_v3  ;;  %v3369_v38 = vsel %vm3368_vm10, %v3367_v9, 0  ;;  %v10171_v1 = vsub.s32 %v10104_v26, %v3212_v12  ;;  %v7258_v45 = vld [vmem:[%s12971_s21 + $0x18] sm:$0xff]  }
 0x36e   :  { %v3520_v61 = vsel %vm3518_vm12, %v3519_v53, %v10138_v35  ;;  %v3371_v7 = vand.u32 31, %v3369_v38  ;;  %v3672_v5 = vand.u32 2139095040, %v10153_v33  ;;  %v12979_v22 = vxor.u32 2147483648, %v9984_v57  ;;  %6607 = vmatpush3.bf16.msra.mxu0 %v7258_v45 }
 0x36f   :  { %v10188_v26 = vsel %vm12849_vm14, %v2817_v60, %v10069_v58  ;;  %v3014_v35 = vshll.u32 %v9955_v28, %v10095_v15  ;;  %v10192_v0 = vadd.s32 %v3520_v61, %v3516_v18  ;;  %v10195_v44 = vor.u32 4788187, %v3019_v16  ;;  %v7259_v15 = vld [vmem:[%s12971_s21 + $0x60] sm:$0xff]  }
 0x370   :  { %v10183_v13 = vsel %vm12848_vm7, %v12979_v22, %v9984_v57  ;;  %12981 = vst [vmem:[#allocation101_spill] sm:$0xff] %v10188_v26  ;;  %v3372_v42 = vsub.s32 32, %v3371_v7  ;;  %v10198_v20 = vadd.f32 %v10072_v52, %v2503_v24  ;;  %v10203_v58 = vsel %vm6460_vm4, 0, %v6459_v63  ;;  %v7260_v63 = vld [vmem:[%s12971_s21 + $0x20] sm:$0xff]   ;;  %6608 = vmatprep.subr.bf16.mxu0 %v7259_v15  ;;  %v7262_v15 = vld [vmem:[%s12971_s21 + $0x28] sm:$0xff]  }
 0x371   :  { %12980 = vst [vmem:[#allocation100_spill] sm:$0xff] %v10183_v13  ;;  %v10200_v57 = vor.u32 %v3015_v51, %v3014_v35  ;;  %v3522_v12 = vadd.s32 536870912, %v10192_v0  ;;  %v3364_v28 = vand.u32 8388607, %v12810_v43  ;;  %v3215_v21 = vsub.s32 0, %v10171_v1 }
 0x372   :  { %v3374_v9 = vshll.u32 %v12908_v32, %v3371_v7  ;;  %v3375_v34 = vshrl.u32 %v12910_v55, %v3372_v42  ;;  %v3673_v60 = vshrl.u32 %v3672_v5, 23  ;;  %v3377_v53 = vshll.u32 %v12910_v55, %v3371_v7  ;;  %6609 = vmatpush3.bf16.msra.mxu0 %v7260_v63 }
 0x373   :  { %v3378_v24 = vshrl.u32 %v12911_v23, %v3372_v42  ;;  %v3380_v51 = vshll.u32 %v12911_v23, %v3371_v7  ;;  %v3381_v16 = vshrl.u32 %v12912_v56, %v3372_v42  ;;  %v10221_v18 = vshrl.u32 %v3522_v12, 30  ;;  %6610 = vmatprep.subr.bf16.mxu0 %v7261_v40 }
 0x374   :  { %v3370_v46 = vshrl.u32 %v3369_v38, 5  ;;  %v3383_v61 = vshll.u32 %v12912_v56, %v3371_v7  ;;  %v3384_v5 = vshrl.u32 %v12926_v36, %v3372_v42  ;;  %v3376_v45 = vor.u32 %v3375_v34, %v3374_v9 }
 0x375   :  { %12982 = vst [vmem:[#allocation102_spill] sm:$0xff] %v10221_v18  ;;  %v3379_v22 = vor.u32 %v3378_v24, %v3377_v53  ;;  %v3382_v35 = vor.u32 %v3381_v16, %v3380_v51  ;;  %v3365_v10 = vor.u32 8388608, %v3364_v28  ;;  %v3386_v12 = vshll.u32 %v12926_v36, %v3371_v7 }
 0x376   :  { %v3385_v13 = vor.u32 %v3384_v5, %v3383_v61  ;;  %v3387_v38 = vshrl.u32 %v12916_v19, %v3372_v42  ;;  %v3329_v9 = vsub.s32 4294967266, %v10203_v58  ;;  %v6454_v34 = vmin.u32 %v3215_v21, %v10171_v1  ;;  %6611 = vmatpush3.bf16.msra.mxu0 %v7262_v15  ;;  %v7264_v61 = vld [vmem:[%s12971_s21 + $0x30] sm:$0xff]  }
 0x377   :  { %v3373_v63 = vshrl.u32 %v12908_v32, %v3372_v42  ;;  %v6473_v53 = vadd.s32 4294967169, %v3673_v60  ;;  %v3524_v24 = vshll.u32 %v10221_v18, 30  ;;  %vm3389_vm2 = vcmp.lt.s32.totalorder %v3370_v46, 1  ;;  %v7263_v42 = vld [vmem:[%s12971_s21 + $0x70] sm:$0xff]  }
 0x378   :  { %v3388_v28 = vor.u32 %v3387_v38, %v3386_v12  ;;  %vm3392_vm10 = vcmp.lt.s32.totalorder %v3370_v46, 4  ;;  %vm12824_vm4 = vcmp.lt.s32.totalorder %v9667_v31, 0  ;;  %vm3391_vm12 = vcmp.lt.s32.totalorder %v3370_v46, 3  ;;  %6612 = vmatprep.subr.bf16.mxu0 %v7263_v42 }
 0x379   :  { %v3394_v7 = vsel %vm3392_vm10, %v3382_v35, 2102212464  ;;  %v3397_v51 = vsel %vm3389_vm2, %v3376_v45, %v3379_v22  ;;  %v3398_v16 = vsel %vm3392_vm10, %v3385_v13, 920167782  ;;  %vm3390_vm8 = vcmp.lt.s32.totalorder %v3370_v46, 2 }
 0x37a   :  { %v3399_v40 = vsel %vm3391_vm12, %v3382_v35, %v3398_v16  ;;  %v3401_v21 = vsel %vm3389_vm2, %v3379_v22, %v3382_v35  ;;  %v3405_v60 = vshll.u32 %v3365_v10, 8  ;;  %v3217_v5 = vclz %v6454_v34  ;;  %6613 = vmatpush3.bf16.msra.mxu0 %v7264_v61 }
 0x37b   :  { %v3393_v12 = vsel %vm3389_vm2, %v3373_v63, %v3376_v45  ;;  %v3400_v38 = vsel %vm3390_vm8, %v3397_v51, %v3399_v40  ;;  %v3402_v15 = vsel %vm3392_vm10, %v3388_v28, 1326507024  ;;  %v3395_v43 = vsel %vm3391_vm12, %v3379_v22, %v3394_v7  ;;  %v7265_v63 = vld [vmem:[%s12971_s21 + $0x78] sm:$0xff]  }
 0x37c   :  { %v3403_v18 = vsel %vm3391_vm12, %v3385_v13, %v3402_v15  ;;  %v10252_v4 = vmul.u32.u64.low %v3405_v60, %v3400_v38  ;;  %v10253_v26 = vmul.u32.u64.high %v3405_v60, %v3400_v38, %v10252_v4  ;;  %v10257_v10 = vsub.s32 %v10192_v0, %v3524_v24  ;;  %v7266_v13 = vld [vmem:[%s12983_s27 + $0x40] sm:$0xff]   ;;  %6614 = vmatprep.subr.bf16.mxu0 %v7265_v63 }
 0x37d   :  { %v3404_v35 = vsel %vm3390_vm8, %v3401_v21, %v3403_v18  ;;  %v3679_v45 = vadd.s32 1, %v6473_v53  ;;  %v3568_v34 = vand.u32 2139095040, %v10198_v20  ;;  %v3021_v22 = vand.u32 2147483647, %v10195_v44  ;;  %v7267_v18 = vld [vmem:[%s12971_s21 + $0x38] sm:$0xff]   ;;  %v7268_v53 = vld [vmem:[%s12983_s27] sm:$0xff]   ;;  %6664 = vmatprep.subr.bf16.mxu1 %v7266_v13 }
 0x37e   :  { %v3023_v28 = vcvt.s32.f32 %v10200_v57  ;;  %v10269_v7 = vmul.u32.u64.low %v3405_v60, %v3404_v35  ;;  %v10270_v0 = vmul.u32.u64.high %v3405_v60, %v3404_v35, %v10269_v7  ;;  %v3325_v24 = vsub.s32 32, %v10203_v58  ;;  %6615 = vmatpush3.bf16.msra.mxu0 %v7267_v18  ;;  %6665 = vmatpush3.bf16.msra.mxu1 %v7268_v53 }
 0x37f   :  { %v3330_v51 = vadd.s32 127, %v3329_v9  ;;  %v3396_v16 = vsel %vm3390_vm8, %v3393_v12, %v3395_v43  ;;  %vm3680_vm2 = vcmp.gt.s32.totalorder %v3679_v45, 0  ;;  %v6455_v44 = vadd.s32 4294967294, %v3217_v5 }
 0x380   :  { %v3415_v57 = vadd.s32 1, %v10253_v26  ;;  %v12984_v42 = vand.u32 2147483647, %v10153_v33  ;;  %v3681_v21 = vsel %vm3680_vm2, %v3679_v45, 0  ;;  %v3309_v61 = vadd.s32 %v9967_v39, %v9965_v2 }
 0x381   :  { %v3527_v38 = vsub.s32 0, %v10257_v10  ;;  %v3683_v9 = vand.u32 31, %v3681_v21  ;;  %v3569_v46 = vshrl.u32 %v3568_v34, 23  ;;  %v12985_v43 = vxor.u32 2147483648, %v10159_v47 }
 0x382   :  { %v3676_v40 = vand.u32 8388607, %v12984_v42  ;;  %v10293_v12 = vmul.f32 %v3023_v28, %v3021_v22  ;;  %v3412_v15 = vmul.u32 %v3405_v60, %v3396_v16  ;;  %vm3414_vm8 = vc.u32 %v10270_v0, %v10252_v4 }
 0x383   :  { %v10291_v5 = vsel %vm12824_vm4, %v12985_v43, %v10159_v47  ;;  %v3326_v2 = vshll.u32 %v10051_v49, %v10203_v58  ;;  %v3327_v39 = vshrl.u32 %v3309_v61, %v3325_v24  ;;  %v3331_v35 = vshll.u32 %v3330_v51, 23 }
 0x384   :  { %12986 = vst [vmem:[#allocation103_spill] sm:$0xff] %v10291_v5  ;;  %v3416_v45 = vsel %vm3414_vm8, %v3415_v57, %v10253_v26  ;;  %vm6456_vm10 = vcmp.lt.s32.totalorder %v6455_v44, 0  ;;  %v3677_v63 = vor.u32 8388608, %v3676_v40  ;;  %v3684_v13 = vsub.s32 32, %v3683_v9 }
 0x385   :  { %v3417_v34 = vadd.s32 %v3416_v45, %v3412_v15  ;;  %v6466_v47 = vmin.u32 %v3527_v38, %v10257_v10  ;;  %v3682_v7 = vshrl.u32 %v3681_v21, 5  ;;  %v3686_v22 = vshll.u32 %v12908_v32, %v3683_v9 }
 0x386   :  { %v6469_v60 = vadd.s32 4294967169, %v3569_v46  ;;  %v3687_v18 = vshrl.u32 %v12910_v55, %v3684_v13  ;;  %v3689_v53 = vshll.u32 %v12910_v55, %v3683_v9  ;;  %v3690_v49 = vshrl.u32 %v12911_v23, %v3684_v13 }
 0x387   :  { %v3418_v28 = vadd.s32 536870912, %v3417_v34  ;;  %v3692_v58 = vshll.u32 %v12911_v23, %v3683_v9  ;;  %v3693_v26 = vshrl.u32 %v12912_v56, %v3684_v13  ;;  %v3695_v24 = vshll.u32 %v12912_v56, %v3683_v9 }
 0x388   :  { %v3696_v51 = vshrl.u32 %v12926_v36, %v3684_v13  ;;  %v10310_v16 = vsel %vm6456_vm10, 0, %v6455_v44  ;;  %v3688_v42 = vor.u32 %v3687_v18, %v3686_v22  ;;  %v3691_v40 = vor.u32 %v3690_v49, %v3689_v53 }
 0x389   :  { %v10312_v57 = vshrl.u32 %v3418_v28, 30  ;;  %v10314_v21 = vor.u32 %v3327_v39, %v3326_v2  ;;  %v10316_v61 = vor.u32 4788187, %v3331_v35  ;;  %v3694_v38 = vor.u32 %v3693_v26, %v3692_v58 }
 0x38a   :  { %v3697_v46 = vor.u32 %v3696_v51, %v3695_v24  ;;  %v3529_v43 = vclz %v6466_v47  ;;  %v3698_v15 = vshll.u32 %v12926_v36, %v3683_v9  ;;  %v3699_v45 = vshrl.u32 %v12916_v19, %v3684_v13 }
 0x38b   :  { %12987 = vst [vmem:[#allocation104_spill] sm:$0xff] %v10312_v57  ;;  %v3717_v5 = vshll.u32 %v3677_v63, 8  ;;  %v3225_v31 = vsub.s32 4294967266, %v10310_v16  ;;  %vm3701_vm12 = vcmp.lt.s32.totalorder %v3682_v7, 1  ;;  %vm3704_vm2 = vcmp.lt.s32.totalorder %v3682_v7, 4 }
 0x38c   :  { %v3575_v44 = vadd.s32 1, %v6469_v60  ;;  %v3420_v22 = vshll.u32 %v10312_v57, 30  ;;  %v3700_v28 = vor.u32 %v3699_v45, %v3698_v15  ;;  %v3706_v2 = vsel %vm3704_vm2, %v3694_v38, 2102212464 }
 0x38d   :  { %v3709_v39 = vsel %vm3701_vm12, %v3688_v42, %v3691_v40  ;;  %v3685_v35 = vshrl.u32 %v12908_v32, %v3684_v13  ;;  %vm3703_vm8 = vcmp.lt.s32.totalorder %v3682_v7, 3  ;;  %v3710_v18 = vsel %vm3704_vm2, %v3697_v46, 920167782 }
 0x38e   :  { %v3713_v47 = vsel %vm3701_vm12, %v3691_v40, %v3694_v38  ;;  %v6467_v53 = vadd.s32 4294967294, %v3529_v43  ;;  %vm3702_vm10 = vcmp.lt.s32.totalorder %v3682_v7, 2  ;;  %v3711_v9 = vsel %vm3703_vm8, %v3694_v38, %v3710_v18 }
 0x38f   :  { %v3714_v49 = vsel %vm3704_vm2, %v3700_v28, 1326507024  ;;  %v3705_v63 = vsel %vm3701_vm12, %v3685_v35, %v3688_v42  ;;  %v3707_v58 = vsel %vm3703_vm8, %v3691_v40, %v3706_v2  ;;  %v3712_v26 = vsel %vm3702_vm10, %v3709_v39, %v3711_v9  ;;  %v2481_v35 = vpop.permute.xlu1 %2480 }
 0x390   :  { %v3715_v24 = vsel %vm3703_vm8, %v3697_v46, %v3714_v49  ;;  %v10323_v51 = vsub.s32 %v3417_v34, %v3420_v22  ;;  %v10325_v57 = vmul.u32.u64.low %v3717_v5, %v3712_v26  ;;  %v10326_v15 = vmul.u32.u64.high %v3717_v5, %v3712_v26, %v10325_v57 }
 0x391   :  { %v3716_v60 = vsel %vm3702_vm10, %v3713_v47, %v3715_v24  ;;  %v12825_v25 = vand.u32 2147483647, %v10198_v20  ;;  %vm3576_vm4 = vcmp.gt.s32.totalorder %v3575_v44, 0  ;;  %v3221_v7 = vsub.s32 32, %v10310_v16 }
 0x392   :  { %v10329_v45 = vmul.u32.u64.low %v3717_v5, %v3716_v60  ;;  %v10330_v13 = vmul.u32.u64.high %v3717_v5, %v3716_v60, %v10329_v45  ;;  %v10334_v38 = vadd.s32 127, %v3225_v31  ;;  %v3708_v42 = vsel %vm3702_vm10, %v3705_v63, %v3707_v58 }
 0x393   :  { %v3577_v40 = vsel %vm3576_vm4, %v3575_v44, 0  ;;  %v3205_v43 = vadd.s32 %v10059_v54, %v10064_v29  ;;  %vm6468_vm12 = vcmp.lt.s32.totalorder %v6467_v53, 0  ;;  %v3423_v2 = vsub.s32 0, %v10323_v51 }
 0x394   :  { %v3579_v22 = vand.u32 31, %v3577_v40  ;;  %v3727_v39 = vadd.s32 1, %v10326_v15  ;;  %v10345_v31 = vadd.s32 %v10137_v3, %v10144_v41  ;;  %v3724_v44 = vmul.u32 %v3717_v5, %v3708_v42 }
 0x395   :  { %vm3726_vm4 = vc.u32 %v10330_v13, %v10325_v57  ;;  %v10349_v47 = vshrl.u32 %v3205_v43, %v3221_v7  ;;  %v3227_v54 = vshll.u32 %v10334_v38, 23  ;;  %v3572_v9 = vand.u32 8388607, %v12825_v25  ;;  %v2476_v7 = vpop.permute.xlu0 %2475 }
 0x396   :  { %v3580_v18 = vsub.s32 32, %v3579_v22  ;;  %v3728_v29 = vsel %vm3726_vm4, %v3727_v39, %v10326_v15  ;;  %v10355_v49 = vsel %vm6468_vm12, 0, %v6467_v53  ;;  %v2506_v3 = vmul.f32 %v10038_v37, %v2481_v35 }
 0x397   :  { %v3729_v63 = vadd.s32 %v3728_v29, %v3724_v44  ;;  %v6462_v5 = vmin.u32 %v3423_v2, %v10323_v51  ;;  %v3582_v58 = vshll.u32 %v12908_v32, %v3579_v22  ;;  %v3585_v26 = vshll.u32 %v12910_v55, %v3579_v22 }
 0x398   :  { %v3583_v41 = vshrl.u32 %v12910_v55, %v3580_v18  ;;  %v3586_v24 = vshrl.u32 %v12911_v23, %v3580_v18  ;;  %v3578_v15 = vshrl.u32 %v3577_v40, 5  ;;  %v3588_v45 = vshll.u32 %v12911_v23, %v3579_v22 }
 0x399   :  { %v3730_v60 = vadd.s32 536870912, %v3729_v63  ;;  %v3589_v53 = vshrl.u32 %v12912_v56, %v3580_v18  ;;  %v3591_v43 = vshll.u32 %v12912_v56, %v3579_v22  ;;  %v3592_v39 = vshrl.u32 %v12926_v36, %v3580_v18 }
 0x39a   :  { %v3584_v38 = vor.u32 %v3583_v41, %v3582_v58  ;;  %v3587_v42 = vor.u32 %v3586_v24, %v3585_v26  ;;  %v3594_v44 = vshll.u32 %v12926_v36, %v3579_v22  ;;  %v3595_v29 = vshrl.u32 %v12916_v19, %v3580_v18 }
 0x39b   :  { %v10367_v2 = vshrl.u32 %v3730_v60, 30  ;;  %v3590_v35 = vor.u32 %v3589_v53, %v3588_v45  ;;  %v3533_v40 = vsub.s32 32, %v10355_v49  ;;  %v3573_v25 = vor.u32 8388608, %v3572_v9 }
 0x39c   :  { %v3593_v34 = vor.u32 %v3592_v39, %v3591_v43  ;;  %v2505_v46 = vmul.f32 %v10038_v37, %v2476_v7  ;;  %v3537_v41 = vsub.s32 4294967266, %v10355_v49  ;;  %v3425_v58 = vclz %v6462_v5 }
 0x39d   :  { %12988 = vst [vmem:[#allocation105_spill] sm:$0xff] %v10367_v2  ;;  %v3596_v26 = vor.u32 %v3595_v29, %v3594_v44  ;;  %v10375_v24 = vadd.f32 %v10072_v52, %v2506_v3  ;;  %v3732_v60 = vshll.u32 %v10367_v2, 30  ;;  %v3581_v45 = vshrl.u32 %v12908_v32, %v3580_v18 }
 0x39e   :  { %vm3597_vm2 = vcmp.lt.s32.totalorder %v3578_v15, 1  ;;  %vm3600_vm8 = vcmp.lt.s32.totalorder %v3578_v15, 4  ;;  %vm3599_vm10 = vcmp.lt.s32.totalorder %v3578_v15, 3  ;;  %vm3598_vm12 = vcmp.lt.s32.totalorder %v3578_v15, 2 }
 0x39f   :  { %v3602_v22 = vsel %vm3600_vm8, %v3590_v35, 2102212464  ;;  %v3605_v53 = vsel %vm3597_vm2, %v3584_v38, %v3587_v42  ;;  %v3606_v9 = vsel %vm3600_vm8, %v3593_v34, 920167782  ;;  %v3609_v7 = vsel %vm3597_vm2, %v3587_v42, %v3590_v35 }
 0x3a0   :  { %v3607_v43 = vsel %vm3599_vm10, %v3590_v35, %v3606_v9  ;;  %v3613_v39 = vshll.u32 %v3573_v25, 8  ;;  %vm12834_vm4 = vcmp.lt.s32.totalorder %v9742_v62, 0  ;;  %v3538_v5 = vadd.s32 127, %v3537_v41 }
 0x3a1   :  { %v3601_v44 = vsel %vm3597_vm2, %v3581_v45, %v3584_v38  ;;  %v3608_v3 = vsel %vm3598_vm12, %v3605_v53, %v3607_v43  ;;  %v3610_v29 = vsel %vm3600_vm8, %v3596_v26, 1326507024  ;;  %v3603_v28 = vsel %vm3599_vm10, %v3587_v42, %v3602_v22 }
 0x3a2   :  { %v3611_v2 = vsel %vm3599_vm10, %v3593_v34, %v3610_v29  ;;  %v10381_v18 = vmul.u32.u64.low %v3613_v39, %v3608_v3  ;;  %v10382_v6 = vmul.u32.u64.high %v3613_v39, %v3608_v3, %v10381_v18  ;;  %v10385_v27 = vsub.s32 %v3729_v63, %v3732_v60  ;;  %v2491_v3 = vpop.permute.xlu1 %2490 }
 0x3a3   :  { %v3612_v59 = vsel %vm3598_vm12, %v3609_v7, %v3611_v2  ;;  %v3880_v35 = vand.u32 2139095040, %v10375_v24  ;;  %v10390_v25 = vadd.f32 %v10072_v52, %v2505_v46  ;;  %v3222_v38 = vshll.u32 %v10171_v1, %v10310_v16 }
 0x3a4   :  { %v6463_v41 = vadd.s32 4294967294, %v3425_v58  ;;  %v10394_v26 = vmul.u32.u64.low %v3613_v39, %v3612_v59  ;;  %v10395_v42 = vmul.u32.u64.high %v3613_v39, %v3612_v59, %v10394_v26  ;;  %v3228_v34 = vor.u32 4788187, %v3227_v54 }
 0x3a5   :  { %12989 = vst [vmem:[#allocation106_spill] sm:$0xff] %v10390_v25  ;;  %v3535_v45 = vshrl.u32 %v10345_v31, %v3533_v40  ;;  %v3604_v63 = vsel %vm3598_vm12, %v3601_v44, %v3603_v28  ;;  %v3881_v60 = vshrl.u32 %v3880_v35, 23  ;;  %v12990_v2 = vand.u32 2147483647, %v10316_v61 }
 0x3a6   :  { %v12991_v22 = vcvt.s32.f32 %v10314_v21  ;;  %v3224_v46 = vor.u32 %v10349_v47, %v3222_v38  ;;  %v3539_v9 = vshll.u32 %v3538_v5, 23  ;;  %v3623_v1 = vadd.s32 1, %v10382_v6 }
 0x3a7   :  { %v3534_v59 = vshll.u32 %v10257_v10, %v10355_v49  ;;  %v3735_v16 = vsub.s32 0, %v10385_v27  ;;  %v6481_v31 = vadd.s32 4294967169, %v3881_v60  ;;  %v3776_v28 = vand.u32 2139095040, %v10390_v25 }
 0x3a8   :  { %v10403_v53 = vmul.f32 %v12991_v22, %v12990_v2  ;;  %vm6464_vm2 = vcmp.lt.s32.totalorder %v6463_v41, 0  ;;  %v3620_v54 = vmul.u32 %v3613_v39, %v3604_v63  ;;  %vm3622_vm8 = vc.u32 %v10395_v42, %v10381_v18 }
 0x3a9   :  { %v12833_v21 = vand.u32 2147483647, %v10375_v24  ;;  %v3229_v61 = vand.u32 2147483647, %v3228_v34  ;;  %v10414_v47 = vor.u32 %v3535_v45, %v3534_v59  ;;  %v3624_v15 = vsel %vm3622_vm8, %v3623_v1, %v10382_v6 }
 0x3aa   :  { %v3887_v40 = vadd.s32 1, %v6481_v31  ;;  %v12992_v10 = vxor.u32 2147483648, %v10293_v12  ;;  %v3231_v58 = vcvt.s32.f32 %v3224_v46  ;;  %v10424_v43 = vor.u32 4788187, %v3539_v9 }
 0x3ab   :  { %v3625_v7 = vadd.s32 %v3624_v15, %v3620_v54  ;;  %v10426_v39 = vsel %vm6464_vm2, 0, %v6463_v41  ;;  %v6474_v5 = vmin.u32 %v3735_v16, %v10385_v27  ;;  %v3777_v44 = vshrl.u32 %v3776_v28, 23 }
 0x3ac   :  { %v10422_v49 = vsel %vm12834_vm4, %v12992_v10, %v10293_v12  ;;  %vm3888_vm10 = vcmp.gt.s32.totalorder %v3887_v40, 0  ;;  %v3884_v35 = vand.u32 8388607, %v12833_v21  ;;  %v10432_v12 = vmul.f32 %v3231_v58, %v3229_v61 }
 0x3ad   :  { %12993 = vst [vmem:[#allocation107_spill] sm:$0xff] %v10422_v49  ;;  %v3626_v29 = vadd.s32 536870912, %v3625_v7  ;;  %v3889_v38 = vsel %vm3888_vm10, %v3887_v40, 0  ;;  %v3543_v26 = vcvt.s32.f32 %v10414_v47  ;;  %v10437_v41 = vadd.s32 %v10252_v4, %v10270_v0 }
 0x3ae   :  { %v3891_v34 = vand.u32 31, %v3889_v38  ;;  %v3541_v45 = vand.u32 2147483647, %v10424_v43  ;;  %v2508_v2 = vmul.f32 %v10038_v37, %v2491_v3  ;;  %v3737_v22 = vclz %v6474_v5 }
 0x3af   :  { %v10441_v60 = vshrl.u32 %v3626_v29, 30  ;;  %v12836_v9 = vand.u32 2147483647, %v10390_v25  ;;  %v6477_v1 = vadd.s32 4294967169, %v3777_v44  ;;  %v3885_v16 = vor.u32 8388608, %v3884_v35  ;;  %v7273_v25 = vld [vmem:[%s12983_s27 + $0x10] sm:$0xff]  }
 0x3b0   :  { %v3892_v46 = vsub.s32 32, %v3891_v34  ;;  %v3890_v31 = vshrl.u32 %v3889_v38, 5  ;;  %v3894_v4 = vshll.u32 %v12908_v32, %v3891_v34  ;;  %v3897_v28 = vshll.u32 %v12910_v55, %v3891_v34 }
 0x3b1   :  { %12994 = vst [vmem:[#allocation108_spill] sm:$0xff] %v10441_v60  ;;  %v3628_v59 = vshll.u32 %v10441_v60, 30  ;;  %v3900_v54 = vshll.u32 %v12911_v23, %v3891_v34  ;;  %v3903_v61 = vshll.u32 %v12912_v56, %v3891_v34  ;;  %v3906_v43 = vshll.u32 %v12926_v36, %v3891_v34 }
 0x3b2   :  { %v3895_v0 = vshrl.u32 %v12910_v55, %v3892_v46  ;;  %v3898_v15 = vshrl.u32 %v12911_v23, %v3892_v46  ;;  %v3901_v40 = vshrl.u32 %v12912_v56, %v3892_v46  ;;  %v3904_v10 = vshrl.u32 %v12926_v36, %v3892_v46 }
 0x3b3   :  { %v10451_v37 = vsub.s32 %v3625_v7, %v3628_v59  ;;  %v3907_v5 = vshrl.u32 %v12916_v19, %v3892_v46  ;;  %v3783_v44 = vadd.s32 1, %v6477_v1  ;;  %v6475_v21 = vadd.s32 4294967294, %v3737_v22 }
 0x3b4   :  { %v3896_v58 = vor.u32 %v3895_v0, %v3894_v4  ;;  %v3899_v29 = vor.u32 %v3898_v15, %v3897_v28  ;;  %v3902_v35 = vor.u32 %v3901_v40, %v3900_v54  ;;  %v3905_v38 = vor.u32 %v3904_v10, %v3903_v61 }
 0x3b5   :  { %v3631_v3 = vsub.s32 0, %v10451_v37  ;;  %v3908_v7 = vor.u32 %v3907_v5, %v3906_v43  ;;  %v3925_v59 = vshll.u32 %v3885_v16, 8  ;;  %v10460_v6 = vadd.f32 %v10072_v52, %v2508_v2 }
 0x3b6   :  { %v3893_v4 = vshrl.u32 %v12908_v32, %v3892_v46  ;;  %vm3909_vm12 = vcmp.lt.s32.totalorder %v3890_v31, 1  ;;  %vm3912_vm2 = vcmp.lt.s32.totalorder %v3890_v31, 4  ;;  %vm3911_vm8 = vcmp.lt.s32.totalorder %v3890_v31, 3 }
 0x3b7   :  { %12995 = vst [vmem:[#allocation109_spill] sm:$0xff] %v10460_v6  ;;  %v6470_v63 = vmin.u32 %v3631_v3, %v10451_v37  ;;  %v3914_v34 = vsel %vm3912_vm2, %v3902_v35, 2102212464  ;;  %v3917_v1 = vsel %vm3909_vm12, %v3896_v58, %v3899_v29  ;;  %v3918_v0 = vsel %vm3912_vm2, %v3905_v38, 920167782 }
 0x3b8   :  { %vm3910_vm10 = vcmp.lt.s32.totalorder %v3890_v31, 2  ;;  %v3919_v28 = vsel %vm3911_vm8, %v3902_v35, %v3918_v0  ;;  %v3921_v54 = vsel %vm3909_vm12, %v3899_v29, %v3902_v35  ;;  %vm3784_vm4 = vcmp.gt.s32.totalorder %v3783_v44, 0 }
 0x3b9   :  { %v3433_v22 = vsub.s32 4294967266, %v10426_v39  ;;  %v3913_v16 = vsel %vm3909_vm12, %v3893_v4, %v3896_v58  ;;  %v3920_v52 = vsel %vm3910_vm10, %v3917_v1, %v3919_v28  ;;  %v3922_v2 = vsel %vm3912_vm2, %v3908_v7, 1326507024 }
 0x3ba   :  { %v3915_v61 = vsel %vm3911_vm8, %v3899_v29, %v3914_v34  ;;  %v3923_v15 = vsel %vm3911_vm8, %v3905_v38, %v3922_v2  ;;  %v10466_v40 = vmul.u32.u64.low %v3925_v59, %v3920_v52  ;;  %v10467_v46 = vmul.u32.u64.high %v3925_v59, %v3920_v52, %v10466_v40 }
 0x3bb   :  { %v3633_v10 = vclz %v6470_v63  ;;  %v3924_v43 = vsel %vm3910_vm10, %v3921_v54, %v3923_v15  ;;  %v3780_v5 = vand.u32 8388607, %v12836_v9  ;;  %v3785_v3 = vsel %vm3784_vm4, %v3783_v44, 0 }
 0x3bc   :  { %vm6476_vm13 = vcmp.lt.s32.totalorder %v6475_v21, 0  ;;  %v10473_v35 = vmul.u32.u64.low %v3925_v59, %v3924_v43  ;;  %v10474_v0 = vmul.u32.u64.high %v3925_v59, %v3924_v43, %v10473_v35  ;;  %v4088_v58 = vand.u32 2139095040, %v10460_v6 }
 0x3bd   :  { %v10480_v38 = vmul.f32 %v3543_v26, %v3541_v45  ;;  %v3916_v63 = vsel %vm3910_vm10, %v3913_v16, %v3915_v61  ;;  %v3787_v7 = vand.u32 31, %v3785_v3  ;;  %v3430_v4 = vshll.u32 %v10323_v51, %v10426_v39 }
 0x3be   :  { %v12996_v44 = vsub.s32 32, %v10426_v39  ;;  %v10488_v1 = vadd.s32 127, %v3433_v22  ;;  %v3935_v28 = vadd.s32 1, %v10467_v46  ;;  %v10491_v54 = vsel %vm6476_vm13, 0, %v6475_v21 }
 0x3bf   :  { %v6471_v52 = vadd.s32 4294967294, %v3633_v10  ;;  %v3781_v47 = vor.u32 8388608, %v3780_v5  ;;  %v3788_v26 = vsub.s32 32, %v3787_v7  ;;  %v3932_v45 = vmul.u32 %v3925_v59, %v3916_v63 }
 0x3c0   :  { %v3431_v34 = vshrl.u32 %v10437_v41, %v12996_v44  ;;  %vm3934_vm4 = vc.u32 %v10474_v0, %v10466_v40  ;;  %v3790_v31 = vshll.u32 %v12908_v32, %v3787_v7  ;;  %v4089_v51 = vshrl.u32 %v4088_v58, 23 }
 0x3c1   :  { %v3936_v39 = vsel %vm3934_vm4, %v3935_v28, %v10467_v46  ;;  %v3791_v41 = vshrl.u32 %v12910_v55, %v3788_v26  ;;  %v3793_v22 = vshll.u32 %v12910_v55, %v3787_v7  ;;  %v3794_v16 = vshrl.u32 %v12911_v23, %v3788_v26 }
 0x3c2   :  { %v3937_v21 = vadd.s32 %v3936_v39, %v3932_v45  ;;  %v3786_v2 = vshrl.u32 %v3785_v3, 5  ;;  %v3796_v61 = vshll.u32 %v12911_v23, %v3787_v7  ;;  %v3797_v59 = vshrl.u32 %v12912_v56, %v3788_v26 }
 0x3c3   :  { %v3792_v15 = vor.u32 %v3791_v41, %v3790_v31  ;;  %v3795_v10 = vor.u32 %v3794_v16, %v3793_v22  ;;  %v3799_v43 = vshll.u32 %v12912_v56, %v3787_v7  ;;  %v3800_v5 = vshrl.u32 %v12926_v36, %v3788_v26 }
 0x3c4   :  { %v3435_v46 = vshll.u32 %v10488_v1, 23  ;;  %v3745_v35 = vsub.s32 4294967266, %v10491_v54  ;;  %v3938_v58 = vadd.s32 536870912, %v3937_v21  ;;  %v3798_v63 = vor.u32 %v3797_v59, %v3796_v61 }
 0x3c5   :  { %v3801_v44 = vor.u32 %v3800_v5, %v3799_v43  ;;  %v3802_v28 = vshll.u32 %v12926_v36, %v3787_v7  ;;  %v3803_v3 = vshrl.u32 %v12916_v19, %v3788_v26  ;;  %v3821_v45 = vshll.u32 %v3781_v47, 8 }
 0x3c6   :  { %vm6472_vm13 = vcmp.lt.s32.totalorder %v6471_v52, 0  ;;  %v10508_v39 = vshrl.u32 %v3938_v58, 30  ;;  %vm3805_vm12 = vcmp.lt.s32.totalorder %v3786_v2, 1  ;;  %v6489_v31 = vadd.s32 4294967169, %v4089_v51 }
 0x3c7   :  { %v3789_v41 = vshrl.u32 %v12908_v32, %v3788_v26  ;;  %v3804_v22 = vor.u32 %v3803_v3, %v3802_v28  ;;  %vm3808_vm2 = vcmp.lt.s32.totalorder %v3786_v2, 4  ;;  %v3813_v1 = vsel %vm3805_vm12, %v3792_v15, %v3795_v10 }
 0x3c8   :  { %12997 = vst [vmem:[#allocation110_spill] sm:$0xff] %v10508_v39  ;;  %v3940_v16 = vshll.u32 %v10508_v39, 30  ;;  %vm3807_vm8 = vcmp.lt.s32.totalorder %v3786_v2, 3  ;;  %v3810_v61 = vsel %vm3808_vm2, %v3798_v63, 2102212464  ;;  %vm3806_vm10 = vcmp.lt.s32.totalorder %v3786_v2, 2 }
 0x3c9   :  { %v3814_v59 = vsel %vm3808_vm2, %v3801_v44, 920167782  ;;  %v3817_v47 = vsel %vm3805_vm12, %v3795_v10, %v3798_v63  ;;  %v3818_v43 = vsel %vm3808_vm2, %v3804_v22, 1326507024  ;;  %v3746_v5 = vadd.s32 127, %v3745_v35 }
 0x3ca   :  { %v3815_v7 = vsel %vm3807_vm8, %v3798_v63, %v3814_v59  ;;  %v10514_v58 = vsub.s32 %v3937_v21, %v3940_v16  ;;  %v3809_v51 = vsel %vm3805_vm12, %v3789_v41, %v3792_v15  ;;  %v3811_v28 = vsel %vm3807_vm8, %v3795_v10, %v3810_v61 }
 0x3cb   :  { %v3816_v26 = vsel %vm3806_vm10, %v3813_v1, %v3815_v7  ;;  %v3819_v3 = vsel %vm3807_vm8, %v3801_v44, %v3818_v43  ;;  %v10522_v39 = vor.u32 %v3431_v34, %v3430_v4  ;;  %v10525_v59 = vsel %vm6472_vm13, 0, %v6471_v52 }
 0x3cc   :  { %v10518_v9 = vmul.u32.u64.low %v3821_v45, %v3816_v26  ;;  %v10519_v29 = vmul.u32.u64.high %v3821_v45, %v3816_v26, %v10518_v9  ;;  %v3820_v63 = vsel %vm3806_vm10, %v3817_v47, %v3819_v3  ;;  %v12839_v21 = vand.u32 2147483647, %v10460_v6 }
 0x3cd   :  { %v3943_v35 = vsub.s32 0, %v10514_v58  ;;  %v10530_v15 = vmul.u32.u64.low %v3821_v45, %v3820_v63  ;;  %v10531_v41 = vmul.u32.u64.high %v3821_v45, %v3820_v63, %v10530_v15  ;;  %v4095_v10 = vadd.s32 1, %v6489_v31 }
 0x3ce   :  { %v10534_v22 = vor.u32 4788187, %v3435_v46  ;;  %v3725_v4 = vadd.s32 %v10325_v57, %v10330_v13  ;;  %v3812_v34 = vsel %vm3806_vm10, %v3809_v51, %v3811_v28  ;;  %v3741_v52 = vsub.s32 32, %v10491_v54  ;;  %v2486_v13 = vpop.permute.xlu0 %2485 }
 0x3cf   :  { %v3747_v1 = vshll.u32 %v3746_v5, 23  ;;  %v3831_v16 = vadd.s32 1, %v10519_v29  ;;  %vm4096_vm4 = vcmp.gt.s32.totalorder %v4095_v10, 0  ;;  %v3641_v7 = vsub.s32 4294967266, %v10525_v59 }
 0x3d0   :  { %v4092_v31 = vand.u32 8388607, %v12839_v21  ;;  %v4097_v46 = vsel %vm4096_vm4, %v4095_v10, 0  ;;  %v6482_v47 = vmin.u32 %v3943_v35, %v10514_v58  ;;  %v3828_v43 = vmul.u32 %v3821_v45, %v3812_v34  ;;  %v7571_v34 = vld [vmem:[%s12892_s13] ss:$0 sm:$0xff]  ;;  %s13207_s13 = sld [smem:[#allocation127_spill]] }
 0x3d1   :  { %vm3830_vm13 = vc.u32 %v10531_v41, %v10518_v9  ;;  %v4099_v57 = vand.u32 31, %v4097_v46  ;;  %v3742_v5 = vshll.u32 %v10385_v27, %v10491_v54  ;;  %v3621_v51 = vadd.s32 %v10381_v18, %v10395_v42 }
 0x3d2   :  { %v3832_v26 = vsel %vm3830_vm13, %v3831_v16, %v10519_v29  ;;  %v3743_v28 = vshrl.u32 %v3725_v4, %v3741_v52  ;;  %v10554_v3 = vor.u32 4788187, %v3747_v1  ;;  %v3637_v35 = vsub.s32 32, %v10525_v59  ;;  %v7270_v16 = vld [vmem:[%s12983_s27 + $0x48] sm:$0xff]  }
 0x3d3   :  { %v3833_v63 = vadd.s32 %v3832_v26, %v3828_v43  ;;  %v4100_v45 = vsub.s32 32, %v4099_v57  ;;  %v10557_v15 = vadd.s32 127, %v3641_v7  ;;  %v4093_v10 = vor.u32 8388608, %v4092_v31  ;;  %v7271_v43 = vld [vmem:[%s12983_s27 + $0x8] sm:$0xff]   ;;  %6666 = vmatprep.subr.bf16.mxu1 %v7270_v16 }
 0x3d4   :  { %v2507_v27 = vmul.f32 %v7571_v34, %v2486_v13  ;;  %v3945_v54 = vclz %v6482_v47  ;;  %v10562_v18 = vshrl.u32 %v4097_v46, 5  ;;  %v4102_v29 = vshll.u32 %v12908_v32, %v4099_v57  ;;  %v7272_v13 = vld [vmem:[%s12983_s27 + $0x50] sm:$0xff]   ;;  %6667 = vmatpush3.bf16.msra.mxu1 %v7271_v43 }
 0x3d5   :  { %v3834_v21 = vadd.s32 536870912, %v3833_v63  ;;  %v4103_v42 = vshrl.u32 %v12910_v55, %v4100_v45  ;;  %v4105_v4 = vshll.u32 %v12910_v55, %v4099_v57  ;;  %v4106_v52 = vshrl.u32 %v12911_v23, %v4100_v45  ;;  %6668 = vmatprep.subr.bf16.mxu1 %v7272_v13 }
 0x3d6   :  { %v4108_v1 = vshll.u32 %v12911_v23, %v4099_v57  ;;  %v4109_v31 = vshrl.u32 %v12912_v56, %v4100_v45  ;;  %v4111_v46 = vshll.u32 %v12912_v56, %v4099_v57  ;;  %v4112_v47 = vshrl.u32 %v12926_v36, %v4100_v45 }
 0x3d7   :  { %v10572_v7 = vshrl.u32 %v3834_v21, 30  ;;  %v4104_v26 = vor.u32 %v4103_v42, %v4102_v29  ;;  %v4107_v34 = vor.u32 %v4106_v52, %v4105_v4  ;;  %v4114_v44 = vshll.u32 %v12926_v36, %v4099_v57 }
 0x3d8   :  { %v4115_v21 = vshrl.u32 %v12916_v19, %v4100_v45  ;;  %v3744_v61 = vor.u32 %v3743_v28, %v3742_v5  ;;  %v4110_v6 = vor.u32 %v4109_v31, %v4108_v1  ;;  %v4113_v60 = vor.u32 %v4112_v47, %v4111_v46  ;;  %6669 = vmatpush3.bf16.msra.mxu1 %v7273_v25  ;;  %v7276_v1 = vld [vmem:[%s12983_s27 + $0x18] sm:$0xff]  }
 0x3d9   :  { %12998 = vst [vmem:[#allocation111_spill] sm:$0xff] %v10572_v7  ;;  %v3836_v2 = vshll.u32 %v10572_v7, 30  ;;  %v3749_v49 = vand.u32 2147483647, %v10554_v3  ;;  %v3639_v62 = vshrl.u32 %v3621_v51, %v3637_v35  ;;  %v6483_v42 = vadd.s32 4294967294, %v3945_v54 }
 0x3da   :  { %v4116_v29 = vor.u32 %v4115_v21, %v4114_v44  ;;  %v3643_v57 = vshll.u32 %v10557_v15, 23  ;;  %vm4117_vm12 = vcmp.lt.s32.totalorder %v10562_v18, 1  ;;  %vm4120_vm2 = vcmp.lt.s32.totalorder %v10562_v18, 4  ;;  %v7572_v51 = vld [vmem:[#allocation2] ss:$0 sm:$0xff] }
 0x3db   :  { %v10593_v5 = vshll.u32 %v4093_v10, 8  ;;  %v10595_v28 = vsub.s32 %v3833_v63, %v3836_v2  ;;  %v4122_v4 = vsel %vm4120_vm2, %v4110_v6, 2102212464  ;;  %v4125_v3 = vsel %vm4117_vm12, %v4104_v26, %v4107_v34 }
 0x3dc   :  { %v10601_v35 = vadd.f32 %v7572_v51, %v2507_v27  ;;  %vm12859_vm8 = vcmp.lt.s32.totalorder %v9863_v8, 0  ;;  %vm12865_vm10 = vcmp.lt.s32.totalorder %v9931_v48, 0  ;;  %v4101_v44 = vshrl.u32 %v12908_v32, %v4100_v45  ;;  %v7275_v45 = vld [vmem:[%s12983_s27 + $0x58] sm:$0xff]  }
 0x3dd   :  { %vm4119_vm4 = vcmp.lt.s32.totalorder %v10562_v18, 3  ;;  %v4126_v2 = vsel %vm4120_vm2, %v4113_v60, 920167782  ;;  %v4129_v63 = vsel %vm4117_vm12, %v4107_v34, %v4110_v6  ;;  %vm12858_vm13 = vcmp.lt.s32.totalorder %v9980_v50, 0  ;;  %6670 = vmatprep.subr.bf16.mxu1 %v7275_v45 }
 0x3de   :  { %12999 = vst [vmem:[#allocation112_spill] sm:$0xff] %v10601_v35  ;;  %vm6484_vm7 = vcmp.lt.s32.totalorder %v6483_v42, 0  ;;  %vm4118_vm14 = vcmp.lt.s32.totalorder %v10562_v18, 2  ;;  %v4127_v15 = vsel %vm4119_vm4, %v4110_v6, %v4126_v2  ;;  %v4130_v10 = vsel %vm4120_vm2, %v4116_v29, 1326507024  ;;  %v7277_v6 = vld [vmem:[%s12983_s27 + $0x60] sm:$0xff]   ;;  %6671 = vmatpush3.bf16.msra.mxu1 %v7276_v1 }
 0x3df   :  { %v4121_v27 = vsel %vm4117_vm12, %v4101_v44, %v4104_v26  ;;  %v4123_v54 = vsel %vm4119_vm4, %v4107_v34, %v4122_v4  ;;  %v4128_v25 = vsel %vm4118_vm14, %v4125_v3, %v4127_v15  ;;  %v4131_v52 = vsel %vm4119_vm4, %v4113_v60, %v4130_v10  ;;  %v7278_v34 = vld [vmem:[%s12983_s27 + $0x20] sm:$0xff]   ;;  %6672 = vmatprep.subr.bf16.mxu1 %v7277_v6  ;;  %v7281_v6 = vld [vmem:[%s12983_s27 + $0x28] sm:$0xff]  }
 0x3e0   :  { %v3839_v16 = vsub.s32 0, %v10595_v28  ;;  %v4132_v31 = vsel %vm4118_vm14, %v4129_v63, %v4131_v52  ;;  %v10632_v46 = vmul.u32.u64.low %v10593_v5, %v4128_v25  ;;  %v10633_v47 = vmul.u32.u64.high %v10593_v5, %v4128_v25, %v10632_v46 }
 0x3e1   :  { %v3751_v60 = vcvt.s32.f32 %v3744_v61  ;;  %v10637_v43 = vmul.u32.u64.low %v10593_v5, %v4132_v31  ;;  %v10638_v13 = vmul.u32.u64.high %v10593_v5, %v4132_v31, %v10637_v43  ;;  %v3984_v26 = vand.u32 2139095040, %v10601_v35 }
 0x3e2   :  { %v3638_v21 = vshll.u32 %v10451_v37, %v10525_v59  ;;  %v10647_v29 = vsel %vm6484_vm7, 0, %v6483_v42  ;;  %v4124_v61 = vsel %vm4118_vm14, %v4121_v27, %v4123_v54  ;;  %v12850_v4 = vand.u32 2147483647, %v10601_v35  ;;  %6673 = vmatpush3.bf16.msra.mxu1 %v7278_v34  ;;  %v7280_v54 = vld [vmem:[%s12983_s27 + $0x68] sm:$0xff]  }
 0x3e3   :  { %v13000_v3 = vand.u32 2147483647, %v10534_v22  ;;  %v13001_v51 = vcvt.s32.f32 %v10522_v39  ;;  %v10658_v2 = vmul.f32 %v3751_v60, %v3749_v49  ;;  %v3644_v63 = vor.u32 4788187, %v3643_v57  ;;  %6674 = vmatprep.subr.bf16.mxu1 %v7280_v54 }
 0x3e4   :  { %v3985_v15 = vshrl.u32 %v3984_v26, 23  ;;  %v3640_v37 = vor.u32 %v3639_v62, %v3638_v21  ;;  %v6478_v59 = vmin.u32 %v3839_v16, %v10595_v28  ;;  %v4143_v42 = vadd.s32 1, %v10633_v47  ;;  %v7282_v16 = vld [vmem:[%s12983_s27 + $0x70] sm:$0xff]  }
 0x3e5   :  { %v10656_v44 = vmul.f32 %v13001_v51, %v13000_v3  ;;  %v12851_v18 = vand.u32 2147483647, %v8527_v17  ;;  %v3953_v10 = vsub.s32 4294967266, %v10647_v29  ;;  %v4140_v45 = vmul.u32 %v10593_v5, %v4124_v61  ;;  %v7283_v61 = vld [vmem:[%s12983_s27 + $0x30] sm:$0xff]  }
 0x3e6   :  { %vm4142_vm7 = vc.u32 %v10638_v13, %v10632_v46  ;;  %v6485_v39 = vadd.s32 4294967169, %v3985_v15  ;;  %v13002_v49 = vxor.u32 2147483648, %v10403_v53  ;;  %v13003_v22 = vxor.u32 2147483648, %v10432_v12  ;;  %6675 = vmatpush3.bf16.msra.mxu1 %v7281_v6  ;;  %v7285_v6 = vld [vmem:[%s12983_s27 + $0x78] sm:$0xff]  }
 0x3e7   :  { %v4144_v5 = vsel %vm4142_vm7, %v4143_v42, %v10633_v47  ;;  %v3988_v27 = vand.u32 8388607, %v12850_v4  ;;  %v3647_v47 = vcvt.s32.f32 %v3640_v37  ;;  %v3841_v60 = vclz %v6478_v59  ;;  %6676 = vmatprep.subr.bf16.mxu1 %v7282_v16 }
 0x3e8   :  { %v10672_v62 = vsel %vm12859_vm8, %v13002_v49, %v10403_v53  ;;  %v10679_v57 = vsel %vm12865_vm10, %v13003_v22, %v10432_v12  ;;  %v13004_v53 = vxor.u32 2147483648, %v10480_v38  ;;  %v3645_v12 = vand.u32 2147483647, %v3644_v63 }
 0x3e9   :  { %v4145_v1 = vadd.s32 %v4144_v5, %v4140_v45  ;;  %v3991_v43 = vadd.s32 1, %v6485_v39  ;;  %v10703_v26 = vadd.s32 127, %v3953_v10  ;;  %v10707_v21 = vand.u32 8388607, %v12851_v18 }
 0x3ea   :  { %v10692_v25 = vsel %vm12858_vm13, %v13004_v53, %v10480_v38  ;;  %v3949_v38 = vsub.s32 32, %v10647_v29  ;;  %v3933_v3 = vadd.s32 %v10466_v40, %v10474_v0  ;;  %v3989_v51 = vor.u32 8388608, %v3988_v27  ;;  %6677 = vmatpush3.bf16.msra.mxu1 %v7283_v61 }
 0x3eb   :  { %v4146_v34 = vadd.s32 536870912, %v4145_v1  ;;  %vm3992_vm14 = vcmp.gt.s32.totalorder %v3991_v43, 0  ;;  %v447_v63 = vshrl.u32 %v12910_v55, %v8840_v14  ;;  %v10716_v15 = vmul.f32 %v3647_v47, %v3645_v12  ;;  %6678 = vmatprep.subr.bf16.mxu1 %v7285_v6 }
 0x3ec   :  { %v3993_v59 = vsel %vm3992_vm14, %v3991_v43, 0  ;;  %v10722_v42 = vshrl.u32 %v12908_v32, %v8840_v14  ;;  %v10726_v45 = vadd.s32 4294967294, %v3841_v60  ;;  %v446_v0 = vshll.u32 %v12908_v32, %v8713_v30 }
 0x3ed   :  { %v10718_v37 = vshrl.u32 %v4146_v34, 30  ;;  %v3995_v40 = vand.u32 31, %v3993_v59  ;;  %v10730_v39 = vshrl.u32 %v3933_v3, %v3949_v38  ;;  %v449_v5 = vshll.u32 %v12910_v55, %v8713_v30  ;;  %v7286_v38 = vld [vmem:[%s12983_s27 + $0x38] sm:$0xff]   ;;  %s13208_s27 = sld [smem:[#allocation128_spill]] }
 0x3ee   :  { %v10736_v54 = vshll.u32 %v3989_v51, 8  ;;  %v10738_v53 = vor.u32 %v447_v63, %v446_v0  ;;  %v450_v12 = vshrl.u32 %v12911_v23, %v8840_v14  ;;  %v3994_v47 = vshrl.u32 %v3993_v59, 5  ;;  %6679 = vmatpush3.bf16.msra.mxu1 %v7286_v38 }
 0x3ef   :  { %13005 = vst [vmem:[#allocation113_spill] sm:$0xff] %v10718_v37  ;;  %v3996_v27 = vsub.s32 32, %v3995_v40  ;;  %v4148_v16 = vshll.u32 %v10718_v37, 30  ;;  %v3998_v60 = vshll.u32 %v12908_v32, %v3995_v40  ;;  %v4001_v43 = vshll.u32 %v12910_v55, %v3995_v40 }
 0x3f0   :  { %vm6480_vm12 = vcmp.lt.s32.totalorder %v10726_v45, 0  ;;  %v4004_v3 = vshll.u32 %v12911_v23, %v3995_v40  ;;  %v4007_v63 = vshll.u32 %v12912_v56, %v3995_v40  ;;  %v4010_v0 = vshll.u32 %v12926_v36, %v3995_v40 }
 0x3f1   :  { %v3999_v34 = vshrl.u32 %v12910_v55, %v3996_v27  ;;  %v4002_v61 = vshrl.u32 %v12911_v23, %v3996_v27  ;;  %v4005_v51 = vshrl.u32 %v12912_v56, %v3996_v27  ;;  %v4008_v59 = vshrl.u32 %v12926_v36, %v3996_v27 }
 0x3f2   :  { %v4011_v4 = vshrl.u32 %v12916_v19, %v3996_v27  ;;  %v451_v22 = vor.u32 %v450_v12, %v449_v5  ;;  %v10760_v49 = vsub.s32 %v4145_v1, %v4148_v16  ;;  %v452_v6 = vshll.u32 %v12911_v23, %v8713_v30 }
 0x3f3   :  { %v4000_v18 = vor.u32 %v3999_v34, %v3998_v60  ;;  %v4003_v31 = vor.u32 %v4002_v61, %v4001_v43  ;;  %v4006_v52 = vor.u32 %v4005_v51, %v4004_v3  ;;  %v4009_v10 = vor.u32 %v4008_v59, %v4007_v63 }
 0x3f4   :  { %v4012_v37 = vor.u32 %v4011_v4, %v4010_v0  ;;  %vm4013_vm2 = vcmp.lt.s32.totalorder %v3994_v47, 1  ;;  %v453_v7 = vshrl.u32 %v12912_v56, %v8840_v14  ;;  %v455_v40 = vshll.u32 %v12912_v56, %v8713_v30 }
 0x3f5   :  { %v456_v60 = vshrl.u32 %v12926_v36, %v8840_v14  ;;  %v3997_v43 = vshrl.u32 %v12908_v32, %v3996_v27  ;;  %vm4015_vm4 = vcmp.lt.s32.totalorder %v3994_v47, 3  ;;  %vm4016_vm7 = vcmp.lt.s32.totalorder %v3994_v47, 4 }
 0x3f6   :  { %v4021_v1 = vsel %vm4013_vm2, %v4000_v18, %v4003_v31  ;;  %v4018_v4 = vsel %vm4016_vm7, %v4006_v52, 2102212464  ;;  %v4022_v5 = vsel %vm4016_vm7, %v4009_v10, 920167782  ;;  %v4025_v12 = vsel %vm4013_vm2, %v4003_v31, %v4006_v52 }
 0x3f7   :  { %v4026_v16 = vsel %vm4016_vm7, %v4012_v37, 1326507024  ;;  %v4151_v38 = vsub.s32 0, %v10760_v49  ;;  %vm4014_vm14 = vcmp.lt.s32.totalorder %v3994_v47, 2  ;;  %v4023_v34 = vsel %vm4015_vm4, %v4006_v52, %v4022_v5 }
 0x3f8   :  { %v4027_v61 = vsel %vm4015_vm4, %v4009_v10, %v4026_v16  ;;  %v4024_v3 = vsel %vm4014_vm14, %v4021_v1, %v4023_v34  ;;  %v457_v51 = vor.u32 %v456_v60, %v455_v40  ;;  %v459_v63 = vshrl.u32 %v12916_v19, %v8840_v14 }
 0x3f9   :  { %v4028_v27 = vsel %vm4014_vm14, %v4025_v12, %v4027_v61  ;;  %v4017_v59 = vsel %vm4013_vm2, %v3997_v43, %v4000_v18  ;;  %v4019_v0 = vsel %vm4015_vm4, %v4003_v31, %v4018_v4  ;;  %v454_v10 = vor.u32 %v453_v7, %v452_v6  ;;  %v13006_v31 = vld [vmem:[#allocation47_spill] sm:$0xff] }
 0x3fa   :  { %v10783_v37 = vmul.u32.u64.low %v10736_v54, %v4028_v27  ;;  %v10784_v35 = vmul.u32.u64.high %v10736_v54, %v4028_v27, %v10783_v37  ;;  %v10787_v52 = vmul.u32.u64.low %v10736_v54, %v4024_v3  ;;  %v10788_v5 = vmul.u32.u64.high %v10736_v54, %v4024_v3, %v10787_v52 }
 0x3fb   :  { %v458_v40 = vshll.u32 %v12926_v36, %v8713_v30  ;;  %vm12864_vm7 = vcmp.lt.s32.totalorder %v10075_v11, 0  ;;  %v10797_v14 = vsel %vm6480_vm12, 0, %v10726_v45  ;;  %v6490_v18 = vmin.u32 %v4151_v38, %v10760_v49 }
 0x3fc   :  { %vm461_vm2 = vcmp.lt.s32.totalorder %v13006_v31, 1  ;;  %vm464_vm4 = vcmp.lt.s32.totalorder %v13006_v31, 4  ;;  %vm12860_vm13 = vcmp.lt.s32.totalorder %v10153_v33, 0  ;;  %v4020_v7 = vsel %vm4014_vm14, %v4017_v59, %v4019_v0 }
 0x3fd   :  { %v460_v6 = vor.u32 %v459_v63, %v458_v40  ;;  %v469_v30 = vsel %vm461_vm2, %v10738_v53, %v451_v22  ;;  %v470_v60 = vsel %vm464_vm4, %v457_v51, 920167782  ;;  %v13007_v45 = vshll.u32 %v10514_v58, %v10647_v29 }
 0x3fe   :  { %v13008_v1 = vshll.u32 %v10703_v26, 23  ;;  %vm4038_vm12 = vc.u32 %v10784_v35, %v10787_v52  ;;  %vm463_vm14 = vcmp.lt.s32.totalorder %v13006_v31, 3  ;;  %v4039_v47 = vadd.s32 1, %v10788_v5 }
 0x3ff   :  { %v10813_v43 = vor.u32 %v10730_v39, %v13007_v45  ;;  %vm462_vm8 = vcmp.lt.s32.totalorder %v13006_v31, 2  ;;  %v466_v12 = vsel %vm464_vm4, %v454_v10, 2102212464  ;;  %v471_v58 = vsel %vm463_vm14, %v454_v10, %v470_v60 }
 0x400   :  { %v10817_v4 = vor.u32 4788187, %v13008_v1  ;;  %v3849_v29 = vsub.s32 4294967266, %v10797_v14  ;;  %v4036_v26 = vmul.u32 %v10736_v54, %v4020_v7  ;;  %v472_v39 = vsel %vm462_vm8, %v469_v30, %v471_v58 }
 0x401   :  { %v473_v16 = vsel %vm461_vm2, %v451_v22, %v454_v10  ;;  %v4153_v38 = vclz %v6490_v18  ;;  %v4040_v34 = vsel %vm4038_vm12, %v4039_v47, %v10788_v5  ;;  %v474_v61 = vsel %vm464_vm4, %v460_v6, 1326507024 }
 0x402   :  { %v13009_v3 = vor.u32 8388608, %v10707_v21  ;;  %v4041_v63 = vadd.s32 %v4040_v34, %v4036_v26  ;;  %v465_v54 = vsel %vm461_vm2, %v10722_v42, %v10738_v53  ;;  %v467_v59 = vsel %vm463_vm14, %v451_v22, %v466_v12 }
 0x403   :  { %v475_v0 = vsel %vm463_vm14, %v457_v51, %v474_v61  ;;  %v3845_v37 = vsub.s32 32, %v10797_v14  ;;  %v3850_v40 = vadd.s32 127, %v3849_v29  ;;  %v13010_v42 = vxor.u32 2147483648, %v10656_v44  ;;  %v13016_v61 = vld [vmem:[#allocation52_spill] sm:$0xff] }
 0x404   :  { %v477_v27 = vshll.u32 %v13009_v3, 8  ;;  %v476_v5 = vsel %vm462_vm8, %v473_v16, %v475_v0  ;;  %v4042_v18 = vadd.s32 536870912, %v4041_v63  ;;  %v3829_v53 = vadd.s32 %v10518_v9, %v10531_v41  ;;  %v13015_v16 = vld [vmem:[#allocation56_spill] sm:$0xff] }
 0x405   :  { %v10862_v22 = vsel %vm12864_vm7, %v13010_v42, %v10656_v44  ;;  %v6491_v51 = vadd.s32 4294967294, %v4153_v38  ;;  %v468_v30 = vsel %vm462_vm8, %v465_v54, %v467_v59  ;;  %v13011_v60 = vxor.u32 2147483648, %v10658_v2  ;;  %v13014_v44 = vld [vmem:[#allocation42_spill] sm:$0xff] }
 0x406   :  { %v10850_v10 = vmul.u32.u64.low %v477_v27, %v472_v39  ;;  %v10851_v21 = vmul.u32.u64.high %v477_v27, %v472_v39, %v10850_v10  ;;  %v10854_v7 = vmul.u32.u64.low %v477_v27, %v476_v5  ;;  %v10855_v6 = vmul.u32.u64.high %v477_v27, %v476_v5, %v10854_v7 }
 0x407   :  { %v10873_v45 = vsel %vm12860_vm13, %v13011_v60, %v10658_v2  ;;  %v3649_v1 = vxor.u32 2147483648, %v10716_v15  ;;  %v10876_v47 = vshrl.u32 %v4042_v18, 30  ;;  %v533_v12 = vand.u32 2147483647, %v13014_v44 }
 0x408   :  { %13012 = vst [vmem:[#allocation47_spill] sm:$0xff] %v10873_v45  ;;  %v3957_v58 = vand.u32 2147483647, %v10817_v4  ;;  %v3959_v9 = vcvt.s32.f32 %v10813_v43  ;;  %v3847_v41 = vshrl.u32 %v3829_v53, %v3845_v37  ;;  %v487_v31 = vadd.s32 1, %v10851_v21  ;;  %v7274_v45 = vld [vmem:[#allocation5 + $0x8] sm:$0xff]  }
 0x409   :  { %13013 = vst [vmem:[#allocation114_spill] sm:$0xff] %v10876_v47  ;;  %v3851_v29 = vshll.u32 %v3850_v40, 23  ;;  %v4044_v26 = vshll.u32 %v10876_v47, 30  ;;  %v484_v39 = vmul.u32 %v477_v27, %v468_v30  ;;  %vm486_vm8 = vc.u32 %v10855_v6, %v10850_v10 }
 0x40a   :  { %vm6492_vm2 = vcmp.lt.s32.totalorder %v6491_v51, 0  ;;  %v488_v2 = vsel %vm486_vm8, %v487_v31, %v10851_v21  ;;  %v551_v38 = vshrl.u32 %v12910_v55, %v13015_v16  ;;  %v554_v4 = vshrl.u32 %v12911_v23, %v13015_v16 }
 0x40b   :  { %v489_v43 = vadd.s32 %v488_v2, %v484_v39  ;;  %v540_v34 = vand.u32 8388607, %v533_v12  ;;  %v550_v3 = vshll.u32 %v12908_v32, %v13016_v61  ;;  %v553_v27 = vshll.u32 %v12910_v55, %v13016_v61  ;;  %v13017_v2 = vld [vmem:[#allocation50_spill] sm:$0xff] }
 0x40c   :  { %v556_v54 = vshll.u32 %v12911_v23, %v13016_v61  ;;  %v557_v59 = vshrl.u32 %v12912_v56, %v13015_v16  ;;  %v559_v0 = vshll.u32 %v12912_v56, %v13016_v61  ;;  %v560_v37 = vshrl.u32 %v12926_v36, %v13015_v16 }
 0x40d   :  { %v10904_v5 = vsub.s32 %v4041_v63, %v4044_v26  ;;  %v490_v21 = vadd.s32 536870912, %v489_v43  ;;  %v562_v40 = vshll.u32 %v12926_v36, %v13016_v61  ;;  %v563_v18 = vshrl.u32 %v12916_v19, %v13015_v16 }
 0x40e   :  { %v552_v7 = vor.u32 %v551_v38, %v550_v3  ;;  %v555_v42 = vor.u32 %v554_v4, %v553_v27  ;;  %v558_v53 = vor.u32 %v557_v59, %v556_v54  ;;  %v561_v30 = vor.u32 %v560_v37, %v559_v0 }
 0x40f   :  { %v3852_v60 = vor.u32 4788187, %v3851_v29  ;;  %v10910_v31 = vshrl.u32 %v490_v21, 30  ;;  %v564_v39 = vor.u32 %v563_v18, %v562_v40  ;;  %vm568_vm4 = vcmp.lt.s32.totalorder %v13017_v2, 4 }
 0x410   :  { %vm12863_vm12 = vcmp.lt.s32.totalorder %v10198_v20, 0  ;;  %v3846_v63 = vshll.u32 %v10595_v28, %v10797_v14  ;;  %v4156_v26 = vsel %vm6492_vm2, 0, %v6491_v51  ;;  %v541_v61 = vor.u32 8388608, %v540_v34 }
 0x411   :  { %v574_v38 = vsel %vm568_vm4, %v561_v30, 920167782  ;;  %v4047_v4 = vsub.s32 0, %v10904_v5  ;;  %v492_v29 = vshll.u32 %v10910_v31, 30  ;;  %vm565_vm14 = vcmp.lt.s32.totalorder %v13017_v2, 1 }
 0x412   :  { %vm567_vm8 = vcmp.lt.s32.totalorder %v13017_v2, 3  ;;  %v573_v3 = vsel %vm565_vm14, %v552_v7, %v555_v42  ;;  %v577_v14 = vsel %vm565_vm14, %v555_v42, %v558_v53  ;;  %v578_v51 = vsel %vm568_vm4, %v564_v39, 1326507024 }
 0x413   :  { %v575_v28 = vsel %vm567_vm8, %v558_v53, %v574_v38  ;;  %v10931_v34 = vmul.f32 %v3959_v9, %v3957_v58  ;;  %v3848_v27 = vor.u32 %v3847_v41, %v3846_v63  ;;  %v3853_v54 = vand.u32 2147483647, %v3852_v60 }
 0x414   :  { %v10933_v59 = vsub.s32 %v489_v43, %v492_v29  ;;  %v4157_v0 = vsub.s32 32, %v4156_v26  ;;  %vm566_vm2 = vcmp.lt.s32.totalorder %v13017_v2, 2  ;;  %v579_v37 = vsel %vm567_vm8, %v561_v30, %v578_v51 }
 0x415   :  { %v581_v21 = vshll.u32 %v541_v61, 8  ;;  %v570_v18 = vsel %vm568_vm4, %v558_v53, 2102212464  ;;  %v576_v58 = vsel %vm566_vm2, %v573_v3, %v575_v28  ;;  %v580_v9 = vsel %vm566_vm2, %v577_v14, %v579_v37 }
 0x416   :  { %v495_v40 = vsub.s32 0, %v10933_v59  ;;  %v6486_v41 = vmin.u32 %v4047_v4, %v10904_v5  ;;  %v549_v43 = vshrl.u32 %v12908_v32, %v13015_v16  ;;  %v3855_v30 = vcvt.s32.f32 %v3848_v27 }
 0x417   :  { %v10948_v60 = vmul.u32.u64.low %v581_v21, %v580_v9  ;;  %v10949_v39 = vmul.u32.u64.high %v581_v21, %v580_v9, %v10948_v60  ;;  %v4141_v63 = vadd.s32 %v10632_v46, %v10638_v13  ;;  %v4161_v61 = vsub.s32 4294967266, %v4156_v26 }
 0x418   :  { %v6341_v53 = vmin.u32 %v495_v40, %v10933_v59  ;;  %v569_v38 = vsel %vm565_vm14, %v549_v43, %v552_v7  ;;  %v571_v29 = vsel %vm567_vm8, %v555_v42, %v570_v18  ;;  %v10967_v16 = vsel %vm12863_vm12, %v3649_v1, %v10716_v15  ;;  %v13018_v15 = vld [vmem:[#allocation38_spill] sm:$0xff] }
 0x419   :  { %v10958_v4 = vmul.u32.u64.low %v581_v21, %v576_v58  ;;  %v10959_v3 = vmul.u32.u64.high %v581_v21, %v576_v58, %v10958_v4  ;;  %v4159_v46 = vshrl.u32 %v4141_v63, %v4157_v0  ;;  %vm431_vm4 = vcmp.lt.s32.totalorder %v8527_v17, 0 }
 0x41a   :  { %v497_v13 = vclz %v6341_v53  ;;  %v10971_v28 = vmul.f32 %v3855_v30, %v3853_v54  ;;  %v4158_v42 = vshll.u32 %v10760_v49, %v4156_v26  ;;  %v4049_v14 = vclz %v6486_v41  ;;  %v13022_v26 = vld [vmem:[#allocation35_spill] sm:$0xff] }
 0x41b   :  { %v572_v27 = vsel %vm566_vm2, %v569_v38, %v571_v29  ;;  %vm590_vm14 = vc.u32 %v10949_v39, %v10958_v4  ;;  %v723_v1 = vsub.s32 4, %v13018_v15  ;;  %v4162_v0 = vadd.s32 127, %v4161_v61  ;;  %v13026_v41 = vld [vmem:[#allocation55_spill] sm:$0xff] }
 0x41c   :  { %v6342_v51 = vadd.s32 4294967294, %v497_v13  ;;  %v13019_v37 = vand.u32 2147483647, %v8527_v17  ;;  %v515_v54 = vsub.s32 4, %v10910_v31  ;;  %v591_v49 = vadd.s32 1, %v10959_v3 }
 0x41d   :  { %v13023_v18 = vand.u32 2147483647, %v13022_v26  ;;  %v10993_v58 = vor.u32 %v4159_v46, %v4158_v42  ;;  %v4037_v9 = vadd.s32 %v10787_v52, %v10784_v35  ;;  %v6487_v60 = vadd.s32 4294967294, %v4049_v14  ;;  %v13027_v14 = vld [vmem:[#allocation40_spill] sm:$0xff] }
 0x41e   :  { %vm10981_vm8 = vcmp.le.f32.partialorder %v13019_v37, 0.7853982  ;;  %vm6343_vm2 = vcmp.lt.s32.totalorder %v6342_v51, 0  ;;  %v588_v63 = vmul.u32 %v581_v21, %v572_v27  ;;  %v592_v61 = vsel %vm590_vm14, %v591_v49, %v10959_v3 }
 0x41f   :  { %vm10989_vm13 = vcmp.le.f32.partialorder %v13023_v18, 0.7853982  ;;  %v500_v30 = vsel %vm6343_vm2, 0, %v6342_v51  ;;  %v485_v53 = vadd.s32 %v10850_v10, %v10855_v6  ;;  %v724_v35 = vsel %vm639_vm1, %v723_v1, %v13018_v15  ;;  %v13028_v1 = vld [vmem:[#allocation36_spill] sm:$0xff]  ;;  %v13032_v18 = vld [vmem:[#allocation58_spill] sm:$0xff] }
 0x420   :  { %v725_v43 = vsel %vm10989_vm13, %v13022_v26, %v13026_v41  ;;  %v501_v38 = vsub.s32 32, %v500_v30  ;;  %v505_v29 = vsub.s32 4294967266, %v500_v30  ;;  %v4163_v52 = vshll.u32 %v4162_v0, 23 }
 0x421   :  { %v516_v46 = vsel %vm431_vm4, %v515_v54, %v10910_v31  ;;  %v593_v13 = vadd.s32 %v592_v61, %v588_v63  ;;  %7371 = vcosq.f32 %v725_v43  ;;  %v502_v21 = vshll.u32 %v10933_v59, %v500_v30 }
 0x422   :  { %v503_v42 = vshrl.u32 %v485_v53, %v501_v38  ;;  %v506_v3 = vadd.s32 127, %v505_v29  ;;  %v827_v51 = vsub.s32 4, %v13027_v14  ;;  %vm6488_vm14 = vcmp.lt.s32.totalorder %v6487_v60, 0 }
 0x423   :  { %v594_v10 = vadd.s32 536870912, %v593_v13  ;;  %v726_v6 = vsel %vm10989_vm13, 0, %v724_v35  ;;  %7373 = vsinq.f32 %v725_v43  ;;  %v13029_v0 = vand.u32 2147483647, %v13028_v1 }
 0x424   :  { %v504_v27 = vor.u32 %v503_v42, %v502_v21  ;;  %v507_v15 = vshll.u32 %v506_v3, 23  ;;  %v828_v59 = vsel %vm743_vm5, %v827_v51, %v13027_v14  ;;  %v11023_v37 = vor.u32 4788187, %v4163_v52  ;;  %v13033_v52 = vld [vmem:[#allocation45_spill] sm:$0xff]  ;;  %v13034_v14 = vld [vmem:[#allocation39_spill] sm:$0xff] }
 0x425   :  { %vm11016_vm1 = vcmp.le.f32.partialorder %v13029_v0, 0.7853982  ;;  %v595_v49 = vshrl.u32 %v594_v10, 30  ;;  %v11030_v41 = vsel %vm6488_vm14, 0, %v6487_v60  ;;  %v518_v30 = vsel %vm10981_vm8, 0, %v516_v46 }
 0x426   :  { %v829_v2 = vsel %vm11016_vm1, %v13028_v1, %v13032_v18  ;;  %v508_v43 = vor.u32 4788187, %v507_v15  ;;  %v730_v61 = vadd.s32 3, %v726_v6  ;;  %v830_v53 = vsel %vm11016_vm1, 0, %v828_v59  ;;  %v13038_v15 = vld [vmem:[#allocation66_spill] sm:$0xff] }
 0x427   :  { %7375 = vcosq.f32 %v829_v2  ;;  %v596_v63 = vshll.u32 %v595_v49, 30  ;;  %v511_v29 = vcvt.s32.f32 %v504_v27  ;;  %v619_v35 = vsub.s32 4, %v595_v49 }
 0x428   :  { %7377 = vsinq.f32 %v829_v2  ;;  %v509_v38 = vand.u32 2147483647, %v508_v43  ;;  %v931_v21 = vsub.s32 4, %v13033_v52  ;;  %v4053_v42 = vsub.s32 32, %v11030_v41  ;;  %v13047_v2 = vld [vmem:[#allocation44_spill] sm:$0xff] }
 0x429   :  { %v522_v60 = vadd.s32 3, %v518_v30  ;;  %v11038_v3 = vsub.s32 %v593_v13, %v596_v63  ;;  %v13035_v51 = vand.u32 2147483647, %v13034_v14  ;;  %vm535_vm13 = vcmp.lt.s32.totalorder %v13014_v44, 0 }
 0x42a   :  { %v512_v10 = vmul.f32 %v511_v29, %v509_v38  ;;  %v834_v6 = vadd.s32 3, %v830_v53  ;;  %vm11055_vm2 = vcmp.le.f32.partialorder %v533_v12, 0.7853982  ;;  %v932_v18 = vsel %vm847_vm15, %v931_v21, %v13033_v52 }
 0x42b   :  { %vm11042_vm5 = vcmp.le.f32.partialorder %v13035_v51, 0.7853982  ;;  %v7372_v0 = vpop.eup %7371  ;;  %v599_v59 = vsub.s32 0, %v11038_v3  ;;  %v620_v30 = vsel %vm535_vm13, %v619_v35, %v595_v49  ;;  %v11066_v63 = vand.u32 3, %v730_v61 }
 0x42c   :  { %v933_v27 = vsel %vm11042_vm5, %v13034_v14, %v13038_v15  ;;  %v513_v43 = vxor.u32 2147483648, %v512_v10  ;;  %v11068_v38 = vshrl.u32 %v4037_v9, %v4053_v42  ;;  %v11070_v12 = vand.u32 3, %v522_v60 }
 0x42d   :  { %v7374_v53 = vpop.eup %7373  ;;  %v6345_v29 = vmin.u32 %v599_v59, %v11038_v3  ;;  %7379 = vcosq.f32 %v933_v27  ;;  %v11075_v52 = vand.u32 3, %v834_v6  ;;  %v934_v21 = vsel %vm11042_vm5, 0, %v932_v18 }
 0x42e   :  { %v514_v51 = vsel %vm431_vm4, %v513_v43, %v512_v10  ;;  %7381 = vsinq.f32 %v933_v27  ;;  %v622_v61 = vsel %vm11055_vm2, 0, %v620_v30  ;;  %v737_v35 = vxor.u32 2147483648, %v7372_v0  ;;  %v13041_v43 = vld [vmem:[#allocation37_spill] sm:$0xff] }
 0x42f   :  { %v517_v49 = vsel %vm10981_vm8, %v8527_v17, %v514_v51  ;;  %v601_v9 = vclz %v6345_v29  ;;  %v589_v60 = vadd.s32 %v10958_v4, %v10949_v39  ;;  %vm733_vm15 = vcmp.eq.s32.totalorder %v11066_v63, 0  ;;  %v13045_v4 = vld [vmem:[#allocation43_spill] sm:$0xff] }
 0x430   :  { %v734_v10 = vxor.u32 2147483648, %v7374_v53  ;;  %vm736_vm4 = vcmp.eq.s32.totalorder %v11066_v63, 2  ;;  %7383 = vcosq.f32 %v517_v49  ;;  %v938_v40 = vadd.s32 3, %v934_v21  ;;  %v13046_v21 = vld [vmem:[#allocation59_spill] sm:$0xff] }
 0x431   :  { %v7376_v42 = vpop.eup %7375  ;;  %v6346_v6 = vadd.s32 4294967294, %v601_v9  ;;  %7385 = vsinq.f32 %v517_v49  ;;  %v626_v27 = vadd.s32 3, %v622_v61  ;;  %vm837_vm8 = vcmp.eq.s32.totalorder %v11075_v52, 0 }
 0x432   :  { %v7378_v46 = vpop.eup %7377  ;;  %v841_v15 = vxor.u32 2147483648, %v7376_v42  ;;  %v738_v18 = vsel %vm736_vm4, %v737_v35, %v7374_v53  ;;  %v13042_v30 = vand.u32 2147483647, %v13041_v43  ;;  %v1035_v29 = vsub.s32 4, %v13045_v4 }
 0x433   :  { %v838_v59 = vxor.u32 2147483648, %v7378_v46  ;;  %vm6347_vm14 = vcmp.lt.s32.totalorder %v6346_v6, 0  ;;  %v735_v9 = vsel %vm733_vm15, %v7372_v0, %v734_v10  ;;  %vm840_vm5 = vcmp.eq.s32.totalorder %v11075_v52, 2 }
 0x434   :  { %vm11091_vm1 = vcmp.le.f32.partialorder %v13042_v30, 0.7853982  ;;  %v604_v51 = vsel %vm6347_vm14, 0, %v6346_v6  ;;  %vm729_vm4 = vweird.f32 %v13022_v26  ;;  %v842_v35 = vsel %vm840_vm5, %v841_v15, %v7378_v46 }
 0x435   :  { %v1037_v49 = vsel %vm11091_vm1, %v13041_v43, %v13046_v21  ;;  %v605_v53 = vsub.s32 32, %v604_v51  ;;  %v609_v61 = vsub.s32 4294967266, %v604_v51  ;;  %v939_v30 = vand.u32 3, %v938_v40  ;;  %v13051_v40 = vld [vmem:[#allocation51_spill] sm:$0xff] }
 0x436   :  { %v606_v54 = vshll.u32 %v11038_v3, %v604_v51  ;;  %v839_v6 = vsel %vm837_vm8, %v7376_v42, %v838_v59  ;;  %v1036_v0 = vsel %vm951_vm6, %v1035_v29, %v13045_v4  ;;  %7387 = vcosq.f32 %v1037_v49  ;;  %v13052_v51 = vld [vmem:[#allocation68_spill] sm:$0xff] }
 0x437   :  { %v7380_v10 = vpop.eup %7379  ;;  %v607_v7 = vshrl.u32 %v589_v60, %v605_v53  ;;  %v610_v13 = vadd.s32 127, %v609_v61  ;;  %v1038_v21 = vsel %vm11091_vm1, 0, %v1036_v0  ;;  %v13048_v47 = vand.u32 2147483647, %v13047_v2 }
 0x438   :  { %v7382_v3 = vpop.eup %7381  ;;  %v945_v15 = vxor.u32 2147483648, %v7380_v10  ;;  %7389 = vsinq.f32 %v1037_v49  ;;  %v1042_v42 = vadd.s32 3, %v1038_v21  ;;  %v1139_v59 = vsub.s32 4, %v13051_v40 }
 0x439   :  { %vm11114_vm15 = vcmp.le.f32.partialorder %v13048_v47, 0.7853982  ;;  %vm528_vm6 = vcmp.eq.s32.totalorder %v11070_v12, 2  ;;  %v608_v4 = vor.u32 %v607_v7, %v606_v54  ;;  %v611_v60 = vshll.u32 %v610_v13, 23 }
 0x43a   :  { %v942_v29 = vxor.u32 2147483648, %v7382_v3  ;;  %v1141_v39 = vsel %vm11114_vm15, %v13047_v2, %v13052_v51  ;;  %v11124_v47 = vand.u32 3, %v626_v27  ;;  %vm732_vm8 = vcmp.lt.s32.totalorder %v11066_v63, 2  ;;  %v7384_v49 = vpop.eup %7383 }
 0x43b   :  { %vm833_vm14 = vweird.f32 %v13028_v1  ;;  %vm836_vm1 = vcmp.lt.s32.totalorder %v11075_v52, 2  ;;  %vm525_vm5 = vcmp.eq.s32.totalorder %v11070_v12, 0  ;;  %v612_v53 = vor.u32 4788187, %v611_v60  ;;  %v7386_v54 = vpop.eup %7385 }
 0x43c   :  { %v739_v7 = vsel %vm732_vm8, %v735_v9, %v738_v18  ;;  %vm944_vm12 = vcmp.eq.s32.totalorder %v939_v30, 2  ;;  %7391 = vcosq.f32 %v1141_v39  ;;  %v843_v13 = vsel %vm836_vm1, %v839_v6, %v842_v35 }
 0x43d   :  { %vm941_vm7 = vcmp.eq.s32.totalorder %v939_v30, 0  ;;  %v946_v61 = vsel %vm944_vm12, %v945_v15, %v7382_v3  ;;  %v1043_v0 = vand.u32 3, %v1042_v42  ;;  %v613_v27 = vand.u32 2147483647, %v612_v53 }
 0x43e   :  { %v615_v21 = vcvt.s32.f32 %v608_v4  ;;  %v943_v51 = vsel %vm941_vm7, %v7380_v10, %v942_v29  ;;  %v1140_v63 = vsel %vm1055_vm3, %v1139_v59, %v13051_v40  ;;  %vm524_vm10 = vcmp.lt.s32.totalorder %v11070_v12, 2  ;;  %v13053_v10 = vld [vmem:[#allocation41_spill] sm:$0xff]  ;;  %v13057_v40 = vld [vmem:[#allocation48_spill] sm:$0xff]  ;;  %v13058_v4 = vld [vmem:[#allocation67_spill] sm:$0xff] }
 0x43f   :  { %v529_v52 = vxor.u32 2147483648, %v7384_v49  ;;  %v11136_v18 = vsel %vm729_vm4, nan, %v739_v7  ;;  %vm940_vm8 = vcmp.lt.s32.totalorder %v939_v30, 2  ;;  %7393 = vsinq.f32 %v1141_v39  ;;  %v13059_v7 = vld [vmem:[#allocation60_spill] sm:$0xff] }
 0x440   :  { %v526_v9 = vxor.u32 2147483648, %v7386_v54  ;;  %v616_v35 = vmul.f32 %v615_v21, %v613_v27  ;;  %v11140_v6 = vsel %vm833_vm14, nan, %v843_v13  ;;  %v13054_v3 = vand.u32 2147483647, %v13053_v10  ;;  %v7388_v42 = vpop.eup %7387 }
 0x441   :  { %vm937_vm3 = vweird.f32 %v13034_v14  ;;  %v947_v26 = vsel %vm940_vm8, %v943_v51, %v946_v61  ;;  %v1142_v30 = vsel %vm11114_vm15, 0, %v1140_v63  ;;  %v1243_v59 = vsub.s32 4, %v13057_v40  ;;  %v13069_v14 = vld [vmem:[#allocation54_spill] sm:$0xff] }
 0x442   :  { %vm11144_vm7 = vcmp.le.f32.partialorder %v13054_v3, 0.7853982  ;;  %vm521_vm12 = vweird.f32 %v8527_v17  ;;  %v617_v60 = vxor.u32 2147483648, %v616_v35  ;;  %vm1045_vm4 = vcmp.eq.s32.totalorder %v1043_v0, 0  ;;  %v7390_v39 = vpop.eup %7389 }
 0x443   :  { %v1245_v1 = vsel %vm11144_vm7, %v13053_v10, %v13058_v4  ;;  %v1049_v29 = vxor.u32 2147483648, %v7388_v42  ;;  %v530_v53 = vsel %vm528_vm6, %v529_v52, %v7386_v54  ;;  %v1244_v46 = vsel %vm1159_vm0, %v1243_v59, %v13057_v40  ;;  %v13060_v52 = vld [vmem:[#allocation49_spill] sm:$0xff] }
 0x444   :  { %7395 = vcosq.f32 %v1245_v1  ;;  %v1347_v13 = vsub.s32 4, %v13059_v7  ;;  %v618_v61 = vsel %vm535_vm13, %v617_v60, %v616_v35  ;;  %v1046_v27 = vxor.u32 2147483648, %v7390_v39 }
 0x445   :  { %7397 = vsinq.f32 %v1245_v1  ;;  %vm1048_vm15 = vcmp.eq.s32.totalorder %v1043_v0, 2  ;;  %v1146_v21 = vadd.s32 3, %v1142_v30  ;;  %v527_v51 = vsel %vm525_vm5, %v7384_v49, %v526_v9  ;;  %v13064_v49 = vld [vmem:[#allocation78_spill] sm:$0xff] }
 0x446   :  { %v621_v54 = vsel %vm11055_vm2, %v13014_v44, %v618_v61  ;;  %v1246_v63 = vsel %vm11144_vm7, 0, %v1244_v46  ;;  %v13061_v3 = vand.u32 2147483647, %v13060_v52  ;;  %v7392_v35 = vpop.eup %7391  ;;  %v1047_v30 = vsel %vm1045_vm4, %v7388_v42, %v1046_v27  ;;  %v13065_v61 = vld [vmem:[#allocation46_spill] sm:$0xff] }
 0x447   :  { %7399 = vcosq.f32 %v621_v54  ;;  %v1050_v59 = vsel %vm1048_vm15, %v1049_v29, %v7390_v39  ;;  %v1250_v4 = vadd.s32 3, %v1246_v63  ;;  %vm1044_vm13 = vcmp.lt.s32.totalorder %v1043_v0, 2 }
 0x448   :  { %vm11174_vm0 = vcmp.le.f32.partialorder %v13061_v3, 0.7853982  ;;  %7401 = vsinq.f32 %v621_v54  ;;  %v1348_v31 = vsel %vm1263_vm11, %v1347_v13, %v13059_v7  ;;  %v531_v15 = vsel %vm524_vm10, %v527_v51, %v530_v53  ;;  %v13070_v54 = vld [vmem:[#allocation76_spill] sm:$0xff] }
 0x449   :  { %v1349_v9 = vsel %vm11174_vm0, %v13060_v52, %v13064_v49  ;;  %v1147_v1 = vand.u32 3, %v1146_v21  ;;  %v1350_v42 = vsel %vm11174_vm0, 0, %v1348_v31  ;;  %v7394_v60 = vpop.eup %7393  ;;  %vm1041_vm2 = vweird.f32 %v13041_v43  ;;  %v13071_v31 = vld [vmem:[#allocation77_spill] sm:$0xff] }
 0x44a   :  { %7403 = vcosq.f32 %v1349_v9  ;;  %v1051_v0 = vsel %vm1044_vm13, %v1047_v30, %v1050_v59  ;;  %v1153_v29 = vxor.u32 2147483648, %v7392_v35  ;;  %v1251_v39 = vand.u32 3, %v1250_v4 }
 0x44b   :  { %vm632_vm11 = vcmp.eq.s32.totalorder %v11124_v47, 2  ;;  %v2094_v46 = vpack.c.bf16 %v11140_v6, %v11136_v18  ;;  %v11196_v12 = vsel %vm937_vm3, nan, %v947_v26  ;;  %v1150_v53 = vxor.u32 2147483648, %v7394_v60 }
 0x44c   :  { %7405 = vsinq.f32 %v1349_v9  ;;  %v11200_v7 = vsel %vm521_vm12, nan, %v531_v15  ;;  %vm629_vm10 = vcmp.eq.s32.totalorder %v11124_v47, 0  ;;  %vm1145_vm6 = vweird.f32 %v13047_v2 }
 0x44d   :  { %v1354_v13 = vadd.s32 3, %v1350_v42  ;;  %v13066_v27 = vand.u32 2147483647, %v13065_v61  ;;  %v1451_v26 = vsub.s32 4, %v13069_v14  ;;  %vm628_vm1 = vcmp.lt.s32.totalorder %v11124_v47, 2 }
 0x44e   :  { %v7396_v51 = vpop.eup %7395  ;;  %v11214_v17 = vsel %vm1041_vm2, nan, %v1051_v0  ;;  %vm1149_vm5 = vcmp.eq.s32.totalorder %v1147_v1, 0  ;;  %vm1152_vm8 = vcmp.eq.s32.totalorder %v1147_v1, 2  ;;  %vm625_vm7 = vweird.f32 %v13014_v44 }
 0x44f   :  { %vm11206_vm14 = vcmp.le.f32.partialorder %v13066_v27, 0.7853982  ;;  %v7398_v3 = vpop.eup %7397  ;;  %v1154_v40 = vsel %vm1152_vm8, %v1153_v29, %v7394_v60  ;;  %vm1253_vm3 = vcmp.eq.s32.totalorder %v1251_v39, 0  ;;  %vm1256_vm12 = vcmp.eq.s32.totalorder %v1251_v39, 2 }
 0x450   :  { %v1453_v63 = vsel %vm11206_vm14, %v13065_v61, %v13070_v54  ;;  %v1257_v30 = vxor.u32 2147483648, %v7396_v51  ;;  %v1151_v59 = vsel %vm1149_vm5, %v7392_v35, %v1150_v53  ;;  %v1254_v4 = vxor.u32 2147483648, %v7398_v3 }
 0x451   :  { %v1452_v43 = vsel %vm1367_vm9, %v1451_v26, %v13069_v14  ;;  %v12866_v49 = vand.u32 2147483647, %v13071_v31  ;;  %v11225_v15 = vand.u32 3, %v1354_v13  ;;  %7407 = vcosq.f32 %v1453_v63  ;;  %v7400_v0 = vpop.eup %7399 }
 0x452   :  { %v1258_v9 = vsel %vm1256_vm12, %v1257_v30, %v7398_v3  ;;  %v1454_v42 = vsel %vm11206_vm14, 0, %v1452_v43  ;;  %vm1148_vm4 = vcmp.lt.s32.totalorder %v1147_v1, 2  ;;  %v1255_v60 = vsel %vm1253_vm3, %v7396_v51, %v1254_v4  ;;  %v7402_v35 = vpop.eup %7401  ;;  %v13072_v30 = vld [vmem:[#allocation95_spill] sm:$0xff] }
 0x453   :  { %7409 = vsinq.f32 %v1453_v63  ;;  %v1458_v29 = vadd.s32 3, %v1454_v42  ;;  %v633_v53 = vxor.u32 2147483648, %v7400_v0  ;;  %v1155_v27 = vsel %vm1148_vm4, %v1151_v59, %v1154_v40 }
 0x454   :  { %vm1249_vm15 = vweird.f32 %v13053_v10  ;;  %vm1252_vm9 = vcmp.lt.s32.totalorder %v1251_v39, 2  ;;  %v7404_v14 = vpop.eup %7403  ;;  %v630_v26 = vxor.u32 2147483648, %v7402_v35  ;;  %v2532_v21 = vand.u32 8388607, %v12866_v49 }
 0x455   :  { %v1259_v54 = vsel %vm1252_vm9, %v1255_v60, %v1258_v9  ;;  %v634_v1 = vsel %vm632_vm11, %v633_v53, %v7402_v35  ;;  %vm1357_vm0 = vcmp.eq.s32.totalorder %v11225_v15, 0  ;;  %v1361_v51 = vxor.u32 2147483648, %v7404_v14  ;;  %v13073_v9 = vld [vmem:[#allocation93_spill] sm:$0xff] }
 0x456   :  { %v11237_v63 = vand.u32 3, %v1458_v29  ;;  %v7406_v3 = vpop.eup %7405  ;;  %v631_v39 = vsel %vm629_vm10, %v7400_v0, %v630_v26  ;;  %v11243_v40 = vsel %vm1145_vm6, nan, %v1155_v27  ;;  %vm1360_vm13 = vcmp.eq.s32.totalorder %v11225_v15, 2  ;;  %v7269_v60 = vld [vmem:[#allocation5] sm:$0xff]  }
 0x457   :  { %v2541_v59 = vshrl.u32 %v12908_v32, %v13072_v30  ;;  %v635_v4 = vsel %vm628_vm1, %v631_v39, %v634_v1  ;;  %v11252_v43 = vsel %vm1249_vm15, nan, %v1259_v54  ;;  %v2542_v42 = vshll.u32 %v12908_v32, %v13073_v9 }
 0x458   :  { %v2543_v2 = vshrl.u32 %v12910_v55, %v13072_v30  ;;  %v636_v0 = vsel %vm625_vm7, nan, %v635_v4  ;;  %v2533_v29 = vor.u32 8388608, %v2532_v21  ;;  %v2545_v35 = vshll.u32 %v12910_v55, %v13073_v9 }
 0x459   :  { %v2546_v47 = vshrl.u32 %v12911_v23, %v13072_v30  ;;  %v2093_v10 = vpack.c.bf16 %v636_v0, %v11200_v7  ;;  %v1358_v53 = vxor.u32 2147483648, %v7406_v3  ;;  %v1362_v27 = vsel %vm1360_vm13, %v1361_v51, %v7406_v3  ;;  %v13074_v0 = vld [vmem:[#allocation94_spill] sm:$0xff] }
 0x45a   :  { %vm1461_vm2 = vcmp.eq.s32.totalorder %v11237_v63, 0  ;;  %v2544_v26 = vor.u32 %v2543_v2, %v2542_v42  ;;  %v2548_v44 = vshll.u32 %v12911_v23, %v13073_v9  ;;  %v2549_v21 = vshrl.u32 %v12912_v56, %v13072_v30 }
 0x45b   :  { %v2547_v54 = vor.u32 %v2546_v47, %v2545_v35  ;;  %v7408_v1 = vpop.eup %7407  ;;  %2316 = vmatprep.mubr.bf16.mxu0 %v2093_v10  ;;  %vm1356_vm11 = vcmp.lt.s32.totalorder %v11225_v15, 2  ;;  %v2551_v39 = vshll.u32 %v12912_v56, %v13073_v9  ;;  %v2552_v7 = vshrl.u32 %v12926_v36, %v13072_v30 }
 0x45c   :  { %v2554_v51 = vshll.u32 %v12926_v36, %v13073_v9  ;;  %v2555_v3 = vshrl.u32 %v12916_v19, %v13072_v30  ;;  %2317 = vmatmul.mubr.bf16.vlgmr.msra.gmra.mrb[0].mxu0 %v7269_v60  ;;  %vm1464_vm10 = vcmp.eq.s32.totalorder %v11237_v63, 2  ;;  %v1465_v42 = vxor.u32 2147483648, %v7408_v1 }
 0x45d   :  { %v7410_v4 = vpop.eup %7409  ;;  %v2550_v2 = vor.u32 %v2549_v21, %v2548_v44  ;;  %vm2557_vm6 = vcmp.lt.s32.totalorder %v13074_v0, 1  ;;  %2324 = vmatprep.mubr.bf16.mxu0 %v2094_v46  ;;  %v2553_v47 = vor.u32 %v2552_v7, %v2551_v39  ;;  %vm2560_vm14 = vcmp.lt.s32.totalorder %v13074_v0, 4 }
 0x45e   :  { %v1462_v35 = vxor.u32 2147483648, %v7410_v4  ;;  %v2556_v10 = vor.u32 %v2555_v3, %v2554_v51  ;;  %v1359_v30 = vsel %vm1357_vm0, %v7404_v14, %v1358_v53  ;;  %vm2559_vm1 = vcmp.lt.s32.totalorder %v13074_v0, 3  ;;  %v13075_v51 = vld [vmem:[#allocation73_spill] sm:$0xff] }
 0x45f   :  { %v2562_v9 = vsel %vm2560_vm14, %v2550_v2, 2102212464  ;;  %v2565_v60 = vsel %vm2557_vm6, %v2544_v26, %v2547_v54  ;;  %v2561_v49 = vsel %vm2557_vm6, %v2541_v59, %v2544_v26  ;;  %v2566_v21 = vsel %vm2560_vm14, %v2553_v47, 920167782 }
 0x460   :  { %v2563_v44 = vsel %vm2559_vm1, %v2547_v54, %v2562_v9  ;;  %v2569_v13 = vsel %vm2557_vm6, %v2547_v54, %v2550_v2  ;;  %v1466_v18 = vsel %vm1464_vm10, %v1465_v42, %v7410_v4  ;;  %vm2558_vm5 = vcmp.lt.s32.totalorder %v13074_v0, 2 }
 0x461   :  { %v2567_v6 = vsel %vm2559_vm1, %v2550_v2, %v2566_v21  ;;  %v2570_v46 = vsel %vm2560_vm14, %v2556_v10, 1326507024  ;;  %v1463_v39 = vsel %vm1461_vm2, %v7408_v1, %v1462_v35  ;;  %v2573_v7 = vshll.u32 %v2533_v29, 8 }
 0x462   :  { %v2568_v14 = vsel %vm2558_vm5, %v2565_v60, %v2567_v6  ;;  %v2571_v53 = vsel %vm2559_vm1, %v2553_v47, %v2570_v46  ;;  %vm1460_vm8 = vcmp.lt.s32.totalorder %v11237_v63, 2  ;;  %v2564_v59 = vsel %vm2558_vm5, %v2561_v49, %v2563_v44  ;;  %v13078_v47 = vld [vmem:[#allocation88_spill] sm:$0xff]  ;;  %v13079_v60 = vld [vmem:[#allocation90_spill] sm:$0xff] }
 0x463   :  { %v2572_v26 = vsel %vm2558_vm5, %v2569_v13, %v2571_v53  ;;  %v2629_v54 = vand.u32 2147483647, %v13075_v51  ;;  %v11298_v4 = vmul.u32.u64.low %v2573_v7, %v2568_v14  ;;  %v11299_v42 = vmul.u32.u64.high %v2573_v7, %v2568_v14, %v11298_v4 }
 0x464   :  { %v11295_v3 = vmul.u32.u64.low %v2573_v7, %v2572_v26  ;;  %v11296_v9 = vmul.u32.u64.high %v2573_v7, %v2572_v26, %v11295_v3  ;;  %v13076_v2 = vsub.s32 4294967266, %v11030_v41  ;;  %2325 = vmatmul.mubr.bf16.gmra.mrb[4].mxu0 %v7274_v45  ;;  %v2096_v29 = vpack.c.bf16 %v11252_v43, %v11243_v40 }
 0x465   :  { %v1363_v49 = vsel %vm1356_vm11, %v1359_v30, %v1362_v27  ;;  %v1467_v13 = vsel %vm1460_vm8, %v1463_v39, %v1466_v18  ;;  %v13077_v63 = vpack.c.bf16 %v11214_v17, %v11196_v12  ;;  %v2580_v1 = vmul.u32 %v2573_v7, %v2564_v59  ;;  %v7279_v30 = vld [vmem:[#allocation5 + $0x10] sm:$0xff]  }
 0x466   :  { %v11304_v0 = vadd.s32 127, %v13076_v2  ;;  %v2636_v35 = vand.u32 8388607, %v2629_v54  ;;  %v2646_v10 = vshll.u32 %v12908_v32, %v13078_v47  ;;  %v2647_v45 = vshrl.u32 %v12910_v55, %v13079_v60  ;;  %v13080_v7 = vld [vmem:[#allocation87_spill] sm:$0xff] }
 0x467   :  { %2332 = vmatprep.mubr.bf16.mxu0 %v13077_v63  ;;  %vm1353_vm7 = vweird.f32 %v13060_v52  ;;  %v2649_v15 = vshll.u32 %v12910_v55, %v13078_v47  ;;  %v2650_v40 = vshrl.u32 %v12911_v23, %v13079_v60  ;;  %v2652_v12 = vshll.u32 %v12911_v23, %v13078_v47 }
 0x468   :  { %v2653_v17 = vshrl.u32 %v12912_v56, %v13079_v60  ;;  %vm1457_vm3 = vweird.f32 %v13065_v61  ;;  %vm2582_vm12 = vc.u32 %v11296_v9, %v11298_v4  ;;  %v2583_v43 = vadd.s32 1, %v11299_v42 }
 0x469   :  { %v2645_v27 = vshrl.u32 %v12908_v32, %v13079_v60  ;;  %v2648_v55 = vor.u32 %v2647_v45, %v2646_v10  ;;  %v2651_v44 = vor.u32 %v2650_v40, %v2649_v15  ;;  %v2655_v23 = vshll.u32 %v12912_v56, %v13078_v47 }
 0x46a   :  { %v2654_v21 = vor.u32 %v2653_v17, %v2652_v12  ;;  %v2656_v18 = vshrl.u32 %v12926_v36, %v13079_v60  ;;  %v2584_v6 = vsel %vm2582_vm12, %v2583_v43, %v11299_v42  ;;  %v2637_v46 = vor.u32 8388608, %v2636_v35  ;;  %v7284_v12 = vld [vmem:[#allocation5 + $0x18] sm:$0xff]  }
 0x46b   :  { %v2658_v39 = vshll.u32 %v12926_v36, %v13078_v47  ;;  %v2659_v14 = vshrl.u32 %v12916_v19, %v13079_v60  ;;  %v2585_v32 = vadd.s32 %v2584_v6, %v2580_v1  ;;  %vm2661_vm4 = vcmp.lt.s32.totalorder %v13080_v7, 1  ;;  %v13083_v6 = vld [vmem:[#allocation75_spill] sm:$0xff] }
 0x46c   :  { %v2657_v53 = vor.u32 %v2656_v18, %v2655_v23  ;;  %vm2662_vm15 = vcmp.lt.s32.totalorder %v13080_v7, 2  ;;  %vm2663_vm9 = vcmp.lt.s32.totalorder %v13080_v7, 3  ;;  %vm2664_vm0 = vcmp.lt.s32.totalorder %v13080_v7, 4  ;;  %2333 = vmatmul.mubr.bf16.gmra.mrb[8].mxu0 %v7279_v30 }
 0x46d   :  { %v2660_v59 = vor.u32 %v2659_v14, %v2658_v39  ;;  %v2669_v56 = vsel %vm2661_vm4, %v2648_v55, %v2651_v44  ;;  %v2586_v26 = vadd.s32 536870912, %v2585_v32  ;;  %v2666_v3 = vsel %vm2664_vm0, %v2654_v21, 2102212464  ;;  %2340 = vmatprep.mubr.bf16.mxu0 %v2096_v29 }
 0x46e   :  { %v2670_v42 = vsel %vm2664_vm0, %v2657_v53, 920167782  ;;  %v2673_v36 = vsel %vm2661_vm4, %v2651_v44, %v2654_v21  ;;  %v2665_v2 = vsel %vm2661_vm4, %v2645_v27, %v2648_v55  ;;  %v2677_v1 = vshll.u32 %v2637_v46, 8 }
 0x46f   :  { %v2671_v19 = vsel %vm2663_vm9, %v2654_v21, %v2670_v42  ;;  %v2674_v63 = vsel %vm2664_vm0, %v2660_v59, 1326507024  ;;  %v2587_v35 = vshrl.u32 %v2586_v26, 30  ;;  %v2667_v47 = vsel %vm2663_vm9, %v2651_v44, %v2666_v3 }
 0x470   :  { %v2672_v10 = vsel %vm2662_vm15, %v2669_v56, %v2671_v19  ;;  %v2675_v60 = vsel %vm2663_vm9, %v2657_v53, %v2674_v63  ;;  %vm3879_vm13 = vcmp.lt.s32.totalorder %v10375_v24, 0  ;;  %v1364_v29 = vsel %vm1353_vm7, nan, %v1363_v49  ;;  %v13081_v49 = vld [vmem:[#allocation89_spill] sm:$0xff]  ;;  %v13089_v56 = vld [vmem:[#allocation83_spill] sm:$0xff] }
 0x471   :  { %v2676_v45 = vsel %vm2662_vm15, %v2673_v36, %v2675_v60  ;;  %v11360_v15 = vmul.u32.u64.low %v2677_v1, %v2672_v10  ;;  %v11361_v40 = vmul.u32.u64.high %v2677_v1, %v2672_v10, %v11360_v15  ;;  %v1468_v17 = vsel %vm1457_vm3, nan, %v1467_v13  ;;  %v13090_v36 = vld [vmem:[#allocation74_spill] sm:$0xff] }
 0x472   :  { %v2588_v43 = vshll.u32 %v2587_v35, 30  ;;  %v11366_v27 = vmul.u32.u64.low %v2677_v1, %v2676_v45  ;;  %v11367_v55 = vmul.u32.u64.high %v2677_v1, %v2676_v45, %v11366_v27  ;;  %v4059_v30 = vshll.u32 %v11304_v0, 23 }
 0x473   :  { %v2611_v44 = vsub.s32 4, %v2587_v35  ;;  %v2668_v52 = vsel %vm2662_vm15, %v2665_v2, %v2667_v47  ;;  %v2819_v21 = vsub.s32 4, %v13081_v49  ;;  %v4165_v23 = vand.u32 2147483647, %v11023_v37  ;;  %v13087_v37 = vld [vmem:[#allocation101_spill] sm:$0xff] }
 0x474   :  { %v13082_v18 = vshll.u32 %v10904_v5, %v11030_v41  ;;  %v11380_v13 = vsub.s32 %v2585_v32, %v2588_v43  ;;  %v13084_v46 = vand.u32 2147483647, %v13083_v6  ;;  %v2097_v39 = vpack.c.bf16 %v1468_v17, %v1364_v29  ;;  %2341 = vmatmul.mubr.bf16.gmra.mrb[12].mxu0 %v7284_v12  ;;  %v7288_v17 = vld [vmem:[#allocation5 + $0x20] sm:$0xff]  }
 0x475   :  { %vm2527_vm11 = vcmp.lt.s32.totalorder %v13071_v31, 0  ;;  %v2687_v14 = vadd.s32 1, %v11361_v40  ;;  %vm2686_vm10 = vc.u32 %v11367_v55, %v11360_v15  ;;  %vm13088_vm6 = vcmp.lt.s32.totalorder %v13083_v6, 0 }
 0x476   :  { %v11378_v61 = vor.u32 %v11068_v38, %v13082_v18  ;;  %vm11384_vm2 = vcmp.le.f32.partialorder %v13084_v46, 0.7853982  ;;  %v2591_v41 = vsub.s32 0, %v11380_v13  ;;  %v2684_v38 = vmul.u32 %v2677_v1, %v2668_v52  ;;  %2348 = vmatprep.mubr.bf16.mxu0 %v2097_v39  ;;  %v13103_v39 = vld [vmem:[#allocation64_spill] sm:$0xff] }
 0x477   :  { %v2821_v5 = vsel %vm11384_vm2, %v13083_v6, %v13087_v37  ;;  %v2820_v32 = vsel %vm13088_vm6, %v2819_v21, %v13081_v49  ;;  %v11400_v53 = vor.u32 4788187, %v4059_v30  ;;  %v2612_v7 = vsel %vm2527_vm11, %v2611_v44, %v2587_v35  ;;  %v13095_v35 = vld [vmem:[#allocation100_spill] sm:$0xff] }
 0x478   :  { %v2688_v59 = vsel %vm2686_vm10, %v2687_v14, %v11361_v40  ;;  %v2923_v26 = vsub.s32 4, %v13089_v56  ;;  %v6430_v3 = vmin.u32 %v2591_v41, %v11380_v13  ;;  %7411 = vcosq.f32 %v2821_v5 }
 0x479   :  { %v2689_v42 = vadd.s32 %v2688_v59, %v2684_v38  ;;  %v13091_v2 = vand.u32 2147483647, %v13090_v36  ;;  %v2822_v63 = vsel %vm11384_vm2, 0, %v2820_v32  ;;  %7413 = vsinq.f32 %v2821_v5 }
 0x47a   :  { %vm13094_vm1 = vcmp.lt.s32.totalorder %v13090_v36, 0  ;;  %v13096_v10 = vxor.u32 2147483648, %v10931_v34  ;;  %v3857_v29 = vxor.u32 2147483648, %v10971_v28  ;;  %v13097_v45 = vand.u32 2147483647, %v13071_v31 }
 0x47b   :  { %vm11409_vm14 = vcmp.le.f32.partialorder %v13091_v2, 0.7853982  ;;  %v2924_v1 = vsel %vm13094_vm1, %v2923_v26, %v13089_v56  ;;  %v2593_v12 = vclz %v6430_v3  ;;  %v13100_v43 = vcvt.s32.f32 %v10993_v58  ;;  %v13108_v3 = vld [vmem:[#allocation80_spill] sm:$0xff] }
 0x47c   :  { %v2925_v47 = vsel %vm11409_vm14, %v13090_v36, %v13095_v35  ;;  %v11427_v60 = vsel %vm3879_vm13, %v13096_v10, %v10931_v34  ;;  %vm11432_vm5 = vcmp.le.f32.partialorder %v13097_v45, 0.7853982  ;;  %v2690_v44 = vadd.s32 536870912, %v2689_v42  ;;  %2349 = vmatmul.mubr.bf16.gmra.mrb[16].mxu0 %v7288_v17 }
 0x47d   :  { %v11438_v27 = vmul.f32 %v13100_v43, %v4165_v23  ;;  %v2614_v30 = vsel %vm11432_vm5, 0, %v2612_v7  ;;  %7415 = vcosq.f32 %v2925_v47  ;;  %v6431_v34 = vadd.s32 4294967294, %v2593_v12 }
 0x47e   :  { %v2826_v52 = vadd.s32 3, %v2822_v63  ;;  %v2926_v49 = vsel %vm11409_vm14, 0, %v2924_v1  ;;  %7417 = vsinq.f32 %v2925_v47  ;;  %v4061_v21 = vand.u32 2147483647, %v11400_v53 }
 0x47f   :  { %v4063_v18 = vcvt.s32.f32 %v11378_v61  ;;  %vm11448_vm8 = vcmp.le.f32.partialorder %v2629_v54, 0.7853982  ;;  %v2691_v23 = vshrl.u32 %v2690_v44, 30  ;;  %v2581_v46 = vadd.s32 %v11298_v4, %v11296_v9  ;;  %v13104_v54 = vld [vmem:[#allocation57_spill] sm:$0xff] }
 0x480   :  { %vm6432_vm7 = vcmp.lt.s32.totalorder %v6431_v34, 0  ;;  %v2618_v0 = vadd.s32 3, %v2614_v30  ;;  %v1555_v14 = vsub.s32 4, %v13103_v39  ;;  %v2930_v38 = vadd.s32 3, %v2926_v49 }
 0x481   :  { %v2596_v37 = vsel %vm6432_vm7, 0, %v6431_v34  ;;  %v2692_v5 = vshll.u32 %v2691_v23, 30  ;;  %v2715_v41 = vsub.s32 4, %v2691_v23  ;;  %v2827_v59 = vand.u32 3, %v2826_v52 }
 0x482   :  { %v2597_v32 = vsub.s32 32, %v2596_v37  ;;  %v2601_v7 = vsub.s32 4294967266, %v2596_v37  ;;  %v13105_v56 = vand.u32 2147483647, %v13104_v54  ;;  %vm2631_vm12 = vcmp.lt.s32.totalorder %v13075_v51, 0  ;;  %v7412_v19 = vpop.eup %7411 }
 0x483   :  { %v11464_v9 = vadd.s32 %v11360_v15, %v11367_v55  ;;  %v11466_v4 = vsub.s32 %v2689_v42, %v2692_v5  ;;  %v2598_v63 = vshll.u32 %v11380_v13, %v2596_v37  ;;  %vm13109_vm4 = vcmp.lt.s32.totalorder %v13104_v54, 0  ;;  %v7414_v10 = vpop.eup %7413 }
 0x484   :  { %vm11457_vm3 = vcmp.le.f32.partialorder %v13105_v56, 0.7853982  ;;  %v2599_v1 = vshrl.u32 %v2581_v46, %v2597_v32  ;;  %v2602_v35 = vadd.s32 127, %v2601_v7  ;;  %v1556_v47 = vsel %vm13109_vm4, %v1555_v14, %v13103_v39  ;;  %v13110_v32 = vld [vmem:[#allocation62_spill] sm:$0xff] }
 0x485   :  { %v1557_v2 = vsel %vm11457_vm3, %v13104_v54, %v13108_v3  ;;  %v11476_v45 = vand.u32 3, %v2618_v0  ;;  %v2695_v15 = vsub.s32 0, %v11466_v4  ;;  %v2716_v55 = vsel %vm2631_vm12, %v2715_v41, %v2691_v23 }
 0x486   :  { %v2931_v42 = vand.u32 3, %v2930_v38  ;;  %v2600_v12 = vor.u32 %v2599_v1, %v2598_v63  ;;  %v2603_v17 = vshll.u32 %v2602_v35, 23  ;;  %vm2828_vm15 = vcmp.lt.s32.totalorder %v2827_v59, 2  ;;  %v13111_v1 = vld [vmem:[#allocation53_spill] sm:$0xff] }
 0x487   :  { %7419 = vcosq.f32 %v1557_v2  ;;  %v7416_v13 = vpop.eup %7415  ;;  %v6434_v43 = vmin.u32 %v2695_v15, %v11466_v4  ;;  %vm2829_vm9 = vcmp.eq.s32.totalorder %v2827_v59, 0  ;;  %v1558_v30 = vsel %vm11457_vm3, 0, %v1556_v47 }
 0x488   :  { %7421 = vsinq.f32 %v1557_v2  ;;  %v7418_v44 = vpop.eup %7417  ;;  %v2604_v34 = vor.u32 4788187, %v2603_v17  ;;  %v2718_v52 = vsel %vm11448_vm8, 0, %v2716_v55  ;;  %v2830_v49 = vxor.u32 2147483648, %v7414_v10 }
 0x489   :  { %v2833_v23 = vxor.u32 2147483648, %v7412_v19  ;;  %v2697_v46 = vclz %v6434_v43  ;;  %vm2832_vm0 = vcmp.eq.s32.totalorder %v2827_v59, 2  ;;  %vm2932_vm2 = vcmp.lt.s32.totalorder %v2931_v42, 2 }
 0x48a   :  { %v2937_v0 = vxor.u32 2147483648, %v7416_v13  ;;  %v2605_v39 = vand.u32 2147483647, %v2604_v34  ;;  %v2607_v14 = vcvt.s32.f32 %v2600_v12  ;;  %vm2933_vm10 = vcmp.eq.s32.totalorder %v2931_v42, 0 }
 0x48b   :  { %v2934_v37 = vxor.u32 2147483648, %v7418_v44  ;;  %v6435_v5 = vadd.s32 4294967294, %v2697_v46  ;;  %v11486_v41 = vadd.s32 3, %v2718_v52  ;;  %v1562_v38 = vadd.s32 3, %v1558_v30 }
 0x48c   :  { %v1659_v7 = vsub.s32 4, %v13110_v32  ;;  %v2608_v56 = vmul.f32 %v2607_v14, %v2605_v39  ;;  %vm2825_vm6 = vweird.f32 %v13083_v6  ;;  %v2831_v26 = vsel %vm2829_vm9, %v7412_v19, %v2830_v49  ;;  %v13116_v49 = vld [vmem:[#allocation79_spill] sm:$0xff] }
 0x48d   :  { %v2834_v3 = vsel %vm2832_vm0, %v2833_v23, %v7414_v10  ;;  %vm2929_vm14 = vweird.f32 %v13090_v36  ;;  %vm2936_vm1 = vcmp.eq.s32.totalorder %v2931_v42, 2  ;;  %vm6436_vm7 = vcmp.lt.s32.totalorder %v6435_v5, 0 }
 0x48e   :  { %v2935_v2 = vsel %vm2933_vm10, %v7416_v13, %v2934_v37  ;;  %v2938_v63 = vsel %vm2936_vm1, %v2937_v0, %v7418_v44  ;;  %vm13112_vm3 = vcmp.lt.s32.totalorder %v13111_v1, 0  ;;  %v2609_v47 = vxor.u32 2147483648, %v2608_v56 }
 0x48f   :  { %v1660_v35 = vsel %vm13112_vm3, %v1659_v7, %v13110_v32  ;;  %v2700_v15 = vsel %vm6436_vm7, 0, %v6435_v5  ;;  %v1563_v55 = vand.u32 3, %v1562_v38  ;;  %v13113_v12 = vand.u32 2147483647, %v13111_v1  ;;  %v13117_v7 = vld [vmem:[#allocation92_spill] sm:$0xff] }
 0x490   :  { %v2701_v19 = vsub.s32 32, %v2700_v15  ;;  %v2705_v10 = vsub.s32 4294967266, %v2700_v15  ;;  %v2835_v43 = vsel %vm2828_vm15, %v2831_v26, %v2834_v3  ;;  %v2610_v44 = vsel %vm2527_vm11, %v2609_v47, %v2608_v56 }
 0x491   :  { %vm11497_vm4 = vcmp.le.f32.partialorder %v13113_v12, 0.7853982  ;;  %v7420_v30 = vpop.eup %7419  ;;  %v2702_v34 = vshll.u32 %v11466_v4, %v2700_v15  ;;  %v2939_v52 = vsel %vm2932_vm2, %v2935_v2, %v2938_v63  ;;  %v2613_v59 = vsel %vm11432_vm5, %v13071_v31, %v2610_v44  ;;  %v13118_v63 = vld [vmem:[#allocation84_spill] sm:$0xff]  ;;  %v13121_v12 = vld [vmem:[#allocation107_spill] sm:$0xff] }
 0x492   :  { %v1662_v13 = vsel %vm11497_vm4, 0, %v1660_v35  ;;  %v1661_v23 = vsel %vm11497_vm4, %v13111_v1, %v13116_v49  ;;  %v7422_v46 = vpop.eup %7421  ;;  %v2703_v0 = vshrl.u32 %v11464_v9, %v2701_v19  ;;  %v2706_v39 = vadd.s32 127, %v2705_v10  ;;  %v13122_v19 = vld [vmem:[#allocation81_spill] sm:$0xff] }
 0x493   :  { %v1569_v14 = vxor.u32 2147483648, %v7420_v30  ;;  %7423 = vcosq.f32 %v2613_v59  ;;  %vm1565_vm11 = vcmp.eq.s32.totalorder %v1563_v55, 0  ;;  %v1566_v37 = vxor.u32 2147483648, %v7422_v46 }
 0x494   :  { %v1666_v4 = vadd.s32 3, %v1662_v13  ;;  %7425 = vsinq.f32 %v2613_v59  ;;  %v2704_v42 = vor.u32 %v2703_v0, %v2702_v34  ;;  %v2707_v5 = vshll.u32 %v2706_v39, 23  ;;  %v13127_v34 = vld [vmem:[#allocation103_spill] sm:$0xff] }
 0x495   :  { %vm1568_vm15 = vcmp.eq.s32.totalorder %v1563_v55, 2  ;;  %v1567_v38 = vsel %vm1565_vm11, %v7420_v30, %v1566_v37  ;;  %7427 = vcosq.f32 %v1661_v23  ;;  %v3027_v56 = vsub.s32 4, %v13117_v7  ;;  %v13129_v37 = vld [vmem:[#allocation71_spill] sm:$0xff] }
 0x496   :  { %v1570_v32 = vsel %vm1568_vm15, %v1569_v14, %v7422_v46  ;;  %v2708_v26 = vor.u32 4788187, %v2707_v5  ;;  %v11519_v40 = vsel %vm2825_vm6, nan, %v2835_v43  ;;  %v11523_v9 = vsel %vm2929_vm14, nan, %v2939_v52  ;;  %v13126_v43 = vld [vmem:[#allocation91_spill] sm:$0xff] }
 0x497   :  { %7429 = vsinq.f32 %v1661_v23  ;;  %v2711_v3 = vcvt.s32.f32 %v2704_v42  ;;  %vm1564_vm5 = vcmp.lt.s32.totalorder %v1563_v55, 2  ;;  %v11525_v2 = vand.u32 3, %v1666_v4 }
 0x498   :  { %v13119_v35 = vand.u32 2147483647, %v13118_v63  ;;  %v2709_v47 = vand.u32 2147483647, %v2708_v26  ;;  %v1571_v15 = vsel %vm1564_vm5, %v1567_v38, %v1570_v32  ;;  %vm13120_vm0 = vcmp.lt.s32.totalorder %v13118_v63, 0  ;;  %v13130_v26 = vld [vmem:[#allocation63_spill] sm:$0xff] }
 0x499   :  { %v3028_v6 = vsel %vm13120_vm0, %v3027_v56, %v13117_v7  ;;  %vm2624_vm2 = vcmp.eq.s32.totalorder %v11476_v45, 2  ;;  %v13123_v55 = vand.u32 2147483647, %v13122_v19  ;;  %v3131_v13 = vsub.s32 4, %v13126_v43 }
 0x49a   :  { %vm2942_vm9 = vcmp.le.f32.partialorder %v13119_v35, 0.7853982  ;;  %vm2621_vm6 = vcmp.eq.s32.totalorder %v11476_v45, 0  ;;  %v2712_v30 = vmul.f32 %v2711_v3, %v2709_v47  ;;  %v11548_v49 = vand.u32 3, %v11486_v41 }
 0x49b   :  { %v3029_v17 = vsel %vm2942_vm9, %v13118_v63, %v13121_v12  ;;  %v3030_v36 = vsel %vm2942_vm9, 0, %v3028_v6  ;;  %vm11537_vm10 = vcmp.le.f32.partialorder %v13123_v55, 0.7853982  ;;  %vm1561_vm14 = vweird.f32 %v13104_v54  ;;  %v13135_v12 = vld [vmem:[#allocation86_spill] sm:$0xff] }
 0x49c   :  { %7431 = vcosq.f32 %v3029_v17  ;;  %v3034_v44 = vadd.s32 3, %v3030_v36  ;;  %v3133_v52 = vsel %vm11537_vm10, %v13122_v19, %v13127_v34  ;;  %vm13128_vm1 = vcmp.lt.s32.totalorder %v13122_v19, 0 }
 0x49d   :  { %7433 = vsinq.f32 %v3029_v17  ;;  %v3132_v23 = vsel %vm13128_vm1, %v3131_v13, %v13126_v43  ;;  %v2713_v46 = vxor.u32 2147483648, %v2712_v30  ;;  %vm1665_vm7 = vweird.f32 %v13111_v1  ;;  %v7424_v0 = vpop.eup %7423 }
 0x49e   :  { %7435 = vcosq.f32 %v3133_v52  ;;  %v3134_v59 = vsel %vm11537_vm10, 0, %v3132_v23  ;;  %v4190_v39 = vpack.c.bf16 %v11523_v9, %v11519_v40  ;;  %v1572_v41 = vsel %vm1561_vm14, nan, %v1571_v15  ;;  %v7426_v4 = vpop.eup %7425 }
 0x49f   :  { %7437 = vsinq.f32 %v3133_v52  ;;  %v3138_v14 = vadd.s32 3, %v3134_v59  ;;  %v1763_v54 = vsub.s32 4, %v13129_v37  ;;  %v2625_v42 = vxor.u32 2147483648, %v7424_v0  ;;  %v7428_v32 = vpop.eup %7427 }
 0x4a0   :  { %v2714_v5 = vsel %vm2631_vm12, %v2713_v46, %v2712_v30  ;;  %vm1668_vm3 = vcmp.lt.s32.totalorder %v11525_v2, 2  ;;  %v11563_v38 = vand.u32 3, %v3034_v44  ;;  %vm2620_vm4 = vcmp.lt.s32.totalorder %v11476_v45, 2 }
 0x4a1   :  { %v2622_v7 = vxor.u32 2147483648, %v7426_v4  ;;  %v2717_v56 = vsel %vm11448_vm8, %v13075_v51, %v2714_v5  ;;  %vm1669_vm11 = vcmp.eq.s32.totalorder %v11525_v2, 0  ;;  %v13131_v3 = vand.u32 2147483647, %v13130_v26  ;;  %v7430_v47 = vpop.eup %7429 }
 0x4a2   :  { %7439 = vcosq.f32 %v2717_v56  ;;  %v1673_v15 = vxor.u32 2147483648, %v7428_v32  ;;  %vm13134_vm12 = vcmp.lt.s32.totalorder %v13130_v26, 0  ;;  %v1670_v17 = vxor.u32 2147483648, %v7430_v47 }
 0x4a3   :  { %vm11572_vm15 = vcmp.le.f32.partialorder %v13131_v3, 0.7853982  ;;  %v1764_v6 = vsel %vm13134_vm12, %v1763_v54, %v13129_v37  ;;  %7441 = vsinq.f32 %v2717_v56  ;;  %vm1672_vm8 = vcmp.eq.s32.totalorder %v11525_v2, 2  ;;  %v7290_v37 = vld [vmem:[#allocation5 + $0x28] sm:$0xff]  }
 0x4a4   :  { %v1765_v58 = vsel %vm11572_vm15, %v13130_v26, %v13135_v12  ;;  %v3139_v36 = vand.u32 3, %v3138_v14  ;;  %vm2617_vm5 = vweird.f32 %v13071_v31  ;;  %v2626_v55 = vsel %vm2624_vm2, %v2625_v42, %v7426_v4  ;;  %v13136_v54 = vld [vmem:[#allocation69_spill] sm:$0xff] }
 0x4a5   :  { %v1674_v10 = vsel %vm1672_vm8, %v1673_v15, %v7430_v47  ;;  %vm3037_vm9 = vcmp.eq.s32.totalorder %v11563_v38, 0  ;;  %vm3040_vm0 = vcmp.eq.s32.totalorder %v11563_v38, 2  ;;  %v2623_v13 = vsel %vm2621_vm6, %v7424_v0, %v2622_v7  ;;  %v13137_v7 = vld [vmem:[#allocation61_spill] sm:$0xff] }
 0x4a6   :  { %v7432_v43 = vpop.eup %7431  ;;  %v1671_v30 = vsel %vm1669_vm11, %v7428_v32, %v1670_v17  ;;  %v1766_v44 = vsel %vm11572_vm15, 0, %v1764_v6  ;;  %7443 = vcosq.f32 %v1765_v58  ;;  %vm2728_vm10 = vcmp.eq.s32.totalorder %v11548_v49, 2  ;;  %v13142_v47 = vld [vmem:[#allocation85_spill] sm:$0xff] }
 0x4a7   :  { %v7434_v34 = vpop.eup %7433  ;;  %v1675_v52 = vsel %vm1668_vm3, %v1671_v30, %v1674_v10  ;;  %vm3033_vm2 = vweird.f32 %v13118_v63  ;;  %v3041_v23 = vxor.u32 2147483648, %v7432_v43  ;;  %7445 = vsinq.f32 %v1765_v58 }
 0x4a8   :  { %v1770_v46 = vadd.s32 3, %v1766_v44  ;;  %v7436_v59 = vpop.eup %7435  ;;  %vm2725_vm6 = vcmp.eq.s32.totalorder %v11548_v49, 0  ;;  %v1676_v0 = vsel %vm1665_vm7, nan, %v1675_v52  ;;  %v3038_v14 = vxor.u32 2147483648, %v7434_v34 }
 0x4a9   :  { %vm3144_vm14 = vcmp.eq.s32.totalorder %v3139_v36, 2  ;;  %v1867_v4 = vsub.s32 4, %v13136_v54  ;;  %v7438_v42 = vpop.eup %7437  ;;  %vm2724_vm1 = vcmp.lt.s32.totalorder %v11548_v49, 2  ;;  %v2098_v2 = vpack.c.bf16 %v1676_v0, %v1572_v41 }
 0x4aa   :  { %v3042_v5 = vsel %vm3040_vm0, %v3041_v23, %v7434_v34  ;;  %v3145_v32 = vxor.u32 2147483648, %v7436_v59  ;;  %v13138_v56 = vand.u32 2147483647, %v13137_v7  ;;  %vm2721_vm7 = vweird.f32 %v13075_v51  ;;  %v13146_v23 = vld [vmem:[#allocation99_spill] sm:$0xff] }
 0x4ab   :  { %v3039_v1 = vsel %vm3037_vm9, %v7432_v43, %v3038_v14  ;;  %v3142_v35 = vxor.u32 2147483648, %v7438_v42  ;;  %vm13141_vm11 = vcmp.lt.s32.totalorder %v13137_v7, 0  ;;  %v2627_v6 = vsel %vm2620_vm4, %v2623_v13, %v2626_v55  ;;  %2356 = vmatprep.mubr.bf16.mxu0 %v2098_v2 }
 0x4ac   :  { %vm11608_vm3 = vcmp.le.f32.partialorder %v13138_v56, 0.7853982  ;;  %v1868_v41 = vsel %vm13141_vm11, %v1867_v4, %v13136_v54  ;;  %vm3141_vm15 = vcmp.eq.s32.totalorder %v3139_v36, 0  ;;  %v3146_v12 = vsel %vm3144_vm14, %v3145_v32, %v7438_v42  ;;  %2357 = vmatmul.mubr.bf16.gmra.mrb[20].mxu0 %v7290_v37  ;;  %v7440_v43 = vpop.eup %7439  ;;  %v7287_v32 = vld [vmem:[#allocation8] sm:$0xff]  }
 0x4ad   :  { %v1869_v15 = vsel %vm11608_vm3, %v13137_v7, %v13142_v47  ;;  %v11625_v58 = vand.u32 3, %v1770_v46  ;;  %vm3036_vm12 = vcmp.lt.s32.totalorder %v11563_v38, 2  ;;  %vm3140_vm8 = vcmp.lt.s32.totalorder %v3139_v36, 2  ;;  %v7442_v55 = vpop.eup %7441 }
 0x4ae   :  { %v3143_v17 = vsel %vm3141_vm15, %v7436_v59, %v3142_v35  ;;  %v1870_v10 = vsel %vm11608_vm3, 0, %v1868_v41  ;;  %v3043_v30 = vsel %vm3036_vm12, %v3039_v1, %v3042_v5  ;;  %vm3137_vm9 = vweird.f32 %v13122_v19 }
 0x4af   :  { %v3147_v45 = vsel %vm3140_vm8, %v3143_v17, %v3146_v12  ;;  %7447 = vcosq.f32 %v1869_v15  ;;  %v2628_v13 = vsel %vm2617_vm5, nan, %v2627_v6  ;;  %v2729_v44 = vxor.u32 2147483648, %v7440_v43  ;;  %v13152_v17 = vld [vmem:[#allocation70_spill] sm:$0xff] }
 0x4b0   :  { %7449 = vsinq.f32 %v1869_v15  ;;  %v1874_v34 = vadd.s32 3, %v1870_v10  ;;  %v2726_v38 = vxor.u32 2147483648, %v7442_v55  ;;  %vm1772_vm4 = vcmp.lt.s32.totalorder %v11625_v58, 2  ;;  %v7444_v46 = vpop.eup %7443  ;;  %v13151_v15 = vld [vmem:[#allocation98_spill] sm:$0xff] }
 0x4b1   :  { %v13143_v36 = vand.u32 2147483647, %v9931_v48  ;;  %v3235_v19 = vsub.s32 4, %v13146_v23  ;;  %v2730_v59 = vsel %vm2728_vm10, %v2729_v44, %v7442_v55  ;;  %v11645_v31 = vsel %vm3033_vm2, nan, %v3043_v30  ;;  %v7446_v37 = vpop.eup %7445  ;;  %v13157_v55 = vld [vmem:[#allocation82_spill] sm:$0xff] }
 0x4b2   :  { %v11647_v0 = vsel %vm3137_vm9, nan, %v3147_v45  ;;  %v2727_v54 = vsel %vm2725_vm6, %v7440_v43, %v2726_v38  ;;  %vm1773_vm5 = vcmp.eq.s32.totalorder %v11625_v58, 0  ;;  %vm1776_vm14 = vcmp.eq.s32.totalorder %v11625_v58, 2 }
 0x4b3   :  { %vm11636_vm0 = vcmp.le.f32.partialorder %v13143_v36, 0.7853982  ;;  %v1777_v4 = vxor.u32 2147483648, %v7444_v46  ;;  %v2731_v63 = vsel %vm2724_vm1, %v2727_v54, %v2730_v59  ;;  %vm1769_vm10 = vweird.f32 %v13130_v26  ;;  %v13160_v54 = vld [vmem:[#allocation65_spill] sm:$0xff] }
 0x4b4   :  { %v3237_v14 = vsel %vm11636_vm0, %v9931_v48, %v10679_v57  ;;  %v1774_v42 = vxor.u32 2147483648, %v7446_v37  ;;  %v1875_v2 = vand.u32 3, %v1874_v34  ;;  %vm13147_vm2 = vcmp.lt.s32.totalorder %v9931_v48, 0 }
 0x4b5   :  { %v3236_v57 = vsel %vm13147_vm2, %v3235_v19, %v13146_v23  ;;  %v2732_v5 = vsel %vm2721_vm7, nan, %v2731_v63  ;;  %v4191_v56 = vpack.c.bf16 %v11647_v0, %v11645_v31  ;;  %7451 = vcosq.f32 %v3237_v14 }
 0x4b6   :  { %v3238_v3 = vsel %vm11636_vm0, 0, %v3236_v57  ;;  %v4189_v49 = vpack.c.bf16 %v2732_v5, %v2628_v13  ;;  %vm1873_vm6 = vweird.f32 %v13137_v7  ;;  %7453 = vsinq.f32 %v3237_v14  ;;  %v13164_v5 = vld [vmem:[#allocation72_spill] sm:$0xff] }
 0x4b7   :  { %v3242_v1 = vadd.s32 3, %v3238_v3  ;;  %v13148_v35 = vand.u32 2147483647, %v9863_v8  ;;  %v1775_v51 = vsel %vm1773_vm5, %v7444_v46, %v1774_v42  ;;  %v1778_v47 = vsel %vm1776_vm14, %v1777_v4, %v7446_v37  ;;  %v13165_v3 = vld [vmem:[#allocation96_spill] sm:$0xff] }
 0x4b8   :  { %v3339_v6 = vsub.s32 4, %v13151_v15  ;;  %4412 = vmatprep.mubr.bf16.mxu1 %v4189_v49  ;;  %vm1876_vm3 = vcmp.lt.s32.totalorder %v1875_v2, 2  ;;  %vm1877_vm7 = vcmp.eq.s32.totalorder %v1875_v2, 0  ;;  %v13153_v10 = vand.u32 2147483647, %v13152_v17 }
 0x4b9   :  { %vm11672_vm1 = vcmp.le.f32.partialorder %v13148_v35, 0.7853982  ;;  %v7448_v30 = vpop.eup %7447  ;;  %4413 = vmatmul.mubr.bf16.vlgmr.msra.gmra.mrb[0].mxu1 %v7287_v32  ;;  %vm13156_vm15 = vcmp.lt.s32.totalorder %v9863_v8, 0  ;;  %v1971_v13 = vsub.s32 4, %v13157_v55  ;;  %v1779_v38 = vsel %vm1772_vm4, %v1775_v51, %v1778_v47  ;;  %v7292_v35 = vld [vmem:[#allocation5 + $0x30] sm:$0xff]  }
 0x4ba   :  { %v3341_v12 = vsel %vm11672_vm1, %v9863_v8, %v10672_v62  ;;  %vm11687_vm11 = vcmp.le.f32.partialorder %v13153_v10, 0.7853982  ;;  %v3340_v45 = vsel %vm13156_vm15, %v3339_v6, %v13151_v15  ;;  %v13158_v62 = vld [vmem:[#allocation97_spill] sm:$0xff]  ;;  %v7450_v34 = vpop.eup %7449  ;;  %4420 = vmatprep.mubr.bf16.mxu1 %v4190_v39  ;;  %vm1880_vm12 = vcmp.eq.s32.totalorder %v1875_v2, 2  ;;  %v7289_v39 = vld [vmem:[#allocation8 + $0x8] sm:$0xff]  }
 0x4bb   :  { %7455 = vcosq.f32 %v3341_v12  ;;  %v1973_v44 = vsel %vm11687_vm11, %v13152_v17, %v13158_v62  ;;  %v1881_v36 = vxor.u32 2147483648, %v7448_v30  ;;  %v3243_v52 = vand.u32 3, %v3242_v1  ;;  %v13170_v62 = vld [vmem:[#allocation104_spill] sm:$0xff] }
 0x4bc   :  { %7457 = vsinq.f32 %v3341_v12  ;;  %v1878_v23 = vxor.u32 2147483648, %v7450_v34  ;;  %v3342_v19 = vsel %vm11672_vm1, 0, %v3340_v45  ;;  %vm13159_vm8 = vcmp.lt.s32.totalorder %v13152_v17, 0 }
 0x4bd   :  { %v1972_v46 = vsel %vm13159_vm8, %v1971_v13, %v13157_v55  ;;  %7459 = vcosq.f32 %v1973_v44  ;;  %v1882_v59 = vsel %vm1880_vm12, %v1881_v36, %v7450_v34  ;;  %vm3241_vm9 = vweird.f32 %v9931_v48 }
 0x4be   :  { %v3346_v40 = vadd.s32 3, %v3342_v19  ;;  %v1974_v9 = vsel %vm11687_vm11, 0, %v1972_v46  ;;  %7461 = vsinq.f32 %v1973_v44  ;;  %v1780_v58 = vsel %vm1769_vm10, nan, %v1779_v38  ;;  %v7291_v38 = vld [vmem:[#allocation8 + $0x10] sm:$0xff]  }
 0x4bf   :  { %v1879_v14 = vsel %vm1877_vm7, %v7448_v30, %v1878_v23  ;;  %v1978_v37 = vadd.s32 3, %v1974_v9  ;;  %v13161_v4 = vand.u32 2147483647, %v13160_v54  ;;  %v2075_v32 = vsub.s32 4, %v13164_v5  ;;  %v7452_v49 = vpop.eup %7451 }
 0x4c0   :  { %v1883_v42 = vsel %vm1876_vm3, %v1879_v14, %v1882_v59  ;;  %v3347_v57 = vand.u32 3, %v3346_v40  ;;  %vm3244_vm0 = vcmp.lt.s32.totalorder %v3243_v52, 2  ;;  %vm3345_vm5 = vweird.f32 %v9863_v8  ;;  %v7454_v41 = vpop.eup %7453  ;;  %v13172_v14 = vld [vmem:[#allocation106_spill] sm:$0xff] }
 0x4c1   :  { %vm11717_vm4 = vcmp.le.f32.partialorder %v13161_v4, 0.7853982  ;;  %v1884_v1 = vsel %vm1873_vm6, nan, %v1883_v42  ;;  %vm3245_vm14 = vcmp.eq.s32.totalorder %v3243_v52, 0  ;;  %vm3248_vm10 = vcmp.eq.s32.totalorder %v3243_v52, 2  ;;  %4421 = vmatmul.mubr.bf16.gmra.mrb[4].mxu1 %v7289_v39 }
 0x4c2   :  { %v2077_v26 = vsel %vm11717_vm4, %v13160_v54, %v13165_v3  ;;  %v2099_v2 = vpack.c.bf16 %v1884_v1, %v1780_v58  ;;  %v3249_v51 = vxor.u32 2147483648, %v7452_v49  ;;  %v3246_v47 = vxor.u32 2147483648, %v7454_v41  ;;  %4428 = vmatprep.mubr.bf16.mxu1 %v4191_v56 }
 0x4c3   :  { %7463 = vcosq.f32 %v2077_v26  ;;  %vm3348_vm2 = vcmp.lt.s32.totalorder %v3347_v57, 2  ;;  %vm3349_vm1 = vcmp.eq.s32.totalorder %v3347_v57, 0  ;;  %v1979_v15 = vand.u32 3, %v1978_v37 }
 0x4c4   :  { %2364 = vmatprep.mubr.bf16.mxu0 %v2099_v2  ;;  %v3250_v7 = vsel %vm3248_vm10, %v3249_v51, %v7454_v41  ;;  %vm3352_vm6 = vcmp.eq.s32.totalorder %v3347_v57, 2  ;;  %vm13166_vm3 = vcmp.lt.s32.totalorder %v13160_v54, 0  ;;  %7465 = vsinq.f32 %v2077_v26  ;;  %v7293_v2 = vld [vmem:[#allocation8 + $0x18] sm:$0xff]  }
 0x4c5   :  { %v7456_v6 = vpop.eup %7455  ;;  %v2076_v12 = vsel %vm13166_vm3, %v2075_v32, %v13164_v5  ;;  %v3247_v43 = vsel %vm3245_vm14, %v7452_v49, %v3246_v47  ;;  %2365 = vmatmul.mubr.bf16.gmra.mrb[24].mxu0 %v7292_v35  ;;  %v13167_v55 = vand.u32 2147483647, %v10075_v11  ;;  %v3443_v44 = vsub.s32 4, %v13170_v62  ;;  %v13177_v49 = vld [vmem:[#allocation108_spill] sm:$0xff] }
 0x4c6   :  { %v7458_v10 = vpop.eup %7457  ;;  %v3353_v30 = vxor.u32 2147483648, %v7456_v6  ;;  %v2078_v45 = vsel %vm11717_vm4, 0, %v2076_v12  ;;  %v3251_v0 = vsel %vm3244_vm0, %v3247_v43, %v3250_v7  ;;  %vm1984_vm11 = vcmp.eq.s32.totalorder %v1979_v15, 2 }
 0x4c7   :  { %vm11741_vm7 = vcmp.le.f32.partialorder %v13167_v55, 0.7853982  ;;  %v3350_v56 = vxor.u32 2147483648, %v7458_v10  ;;  %v2082_v13 = vadd.s32 3, %v2078_v45  ;;  %v7460_v34 = vpop.eup %7459  ;;  %v3252_v36 = vsel %vm3241_vm9, nan, %v3251_v0 }
 0x4c8   :  { %v3354_v23 = vsel %vm3352_vm6, %v3353_v30, %v7458_v10  ;;  %v3445_v19 = vsel %vm11741_vm7, %v10075_v11, %v10862_v22  ;;  %v7462_v46 = vpop.eup %7461  ;;  %v1985_v59 = vxor.u32 2147483648, %v7460_v34  ;;  %vm13171_vm15 = vcmp.lt.s32.totalorder %v10075_v11, 0 }
 0x4c9   :  { %v3351_v52 = vsel %vm3349_vm1, %v7456_v6, %v3350_v56  ;;  %v2083_v40 = vand.u32 3, %v2082_v13  ;;  %v3444_v9 = vsel %vm13171_vm15, %v3443_v44, %v13170_v62  ;;  %v1982_v39 = vxor.u32 2147483648, %v7462_v46  ;;  %4429 = vmatmul.mubr.bf16.gmra.mrb[8].mxu1 %v7291_v38  ;;  %v13183_v44 = vld [vmem:[#allocation105_spill] sm:$0xff] }
 0x4ca   :  { %v3355_v48 = vsel %vm3348_vm2, %v3351_v52, %v3354_v23  ;;  %v3446_v58 = vsel %vm11741_vm7, 0, %v3444_v9  ;;  %7467 = vcosq.f32 %v3445_v19  ;;  %vm3775_vm12 = vcmp.lt.s32.totalorder %v13172_v14, 0 }
 0x4cb   :  { %v11766_v22 = vmul.f32 %v4063_v18, %v4061_v21  ;;  %v3356_v37 = vsel %vm3345_vm5, nan, %v3355_v48  ;;  %vm1981_vm8 = vcmp.eq.s32.totalorder %v1979_v15, 0  ;;  %v1986_v4 = vsel %vm1984_vm11, %v1985_v59, %v7462_v46  ;;  %v13176_v21 = vld [vmem:[#allocation102_spill] sm:$0xff]  ;;  %v13188_v59 = vld [vmem:[#allocation47_spill] sm:$0xff]  ;;  %v13189_v48 = vld [vmem:[#allocation112_spill] sm:$0xff] }
 0x4cc   :  { %v4192_v42 = vpack.c.bf16 %v3356_v37, %v3252_v36  ;;  %vm1977_vm9 = vweird.f32 %v13152_v17  ;;  %v1983_v57 = vsel %vm1981_vm8, %v7460_v34, %v1982_v39  ;;  %7469 = vsinq.f32 %v3445_v19 }
 0x4cd   :  { %v7464_v63 = vpop.eup %7463  ;;  %vm1980_vm4 = vcmp.lt.s32.totalorder %v1979_v15, 2  ;;  %v3450_v32 = vadd.s32 3, %v3446_v58  ;;  %v13173_v53 = vand.u32 2147483647, %v9980_v50  ;;  %vm2084_vm5 = vcmp.lt.s32.totalorder %v2083_v40, 2 }
 0x4ce   :  { %v2089_v5 = vxor.u32 2147483648, %v7464_v63  ;;  %4436 = vmatprep.mubr.bf16.mxu1 %v4192_v42  ;;  %v1987_v8 = vsel %vm1980_vm4, %v1983_v57, %v1986_v4  ;;  %v3547_v18 = vsub.s32 4, %v13176_v21  ;;  %v7466_v26 = vpop.eup %7465  ;;  %vm2085_vm14 = vcmp.eq.s32.totalorder %v2083_v40, 0 }
 0x4cf   :  { %vm11773_vm0 = vcmp.le.f32.partialorder %v13173_v53, 0.7853982  ;;  %vm2088_vm10 = vcmp.eq.s32.totalorder %v2083_v40, 2  ;;  %v3651_v1 = vsub.s32 4, %v13177_v49  ;;  %v2086_v35 = vxor.u32 2147483648, %v7466_v26  ;;  %v13193_v53 = vld [vmem:[#allocation111_spill] sm:$0xff] }
 0x4d0   :  { %v3549_v3 = vsel %vm11773_vm0, %v9980_v50, %v10692_v25  ;;  %v2090_v41 = vsel %vm2088_vm10, %v2089_v5, %v7466_v26  ;;  %vm13178_vm2 = vcmp.lt.s32.totalorder %v9980_v50, 0  ;;  %v1988_v47 = vsel %vm1977_vm9, nan, %v1987_v8 }
 0x4d1   :  { %7471 = vcosq.f32 %v3549_v3  ;;  %v3548_v51 = vsel %vm13178_vm2, %v3547_v18, %v13176_v21  ;;  %v3451_v15 = vand.u32 3, %v3450_v32  ;;  %v13179_v6 = vand.u32 2147483647, %v10198_v20  ;;  %4437 = vmatmul.mubr.bf16.gmra.mrb[12].mxu1 %v7293_v2 }
 0x4d2   :  { %7473 = vsinq.f32 %v3549_v3  ;;  %v3550_v25 = vsel %vm11773_vm0, 0, %v3548_v51  ;;  %v2087_v12 = vsel %vm2085_vm14, %v7464_v63, %v2086_v35  ;;  %vm13182_vm6 = vcmp.lt.s32.totalorder %v10198_v20, 0  ;;  %v13194_v51 = vld [vmem:[#allocation109_spill] sm:$0xff] }
 0x4d3   :  { %vm11792_vm1 = vcmp.le.f32.partialorder %v13179_v6, 0.7853982  ;;  %v3554_v10 = vadd.s32 3, %v3550_v25  ;;  %v3652_v43 = vsel %vm13182_vm6, %v3651_v1, %v13177_v49  ;;  %vm2081_vm3 = vweird.f32 %v13160_v54 }
 0x4d4   :  { %v3653_v17 = vsel %vm11792_vm1, %v10198_v20, %v10967_v16  ;;  %v2091_v30 = vsel %vm2084_vm5, %v2087_v12, %v2090_v41  ;;  %v3654_v45 = vsel %vm11792_vm1, 0, %v3652_v43  ;;  %v7468_v55 = vpop.eup %7467  ;;  %v3858_v31 = vsel %vm3775_vm12, %v3857_v29, %v10971_v28  ;;  %v7294_v16 = vld [vmem:[#allocation5 + $0x38] sm:$0xff]   ;;  %v13198_v43 = vld [vmem:[#allocation110_spill] sm:$0xff] }
 0x4d5   :  { %7475 = vcosq.f32 %v3653_v17  ;;  %v4169_v0 = vxor.u32 2147483648, %v11438_v27  ;;  %v2092_v56 = vsel %vm2081_vm3, nan, %v2091_v30  ;;  %v3457_v13 = vxor.u32 2147483648, %v7468_v55 }
 0x4d6   :  { %7477 = vsinq.f32 %v3653_v17  ;;  %v2100_v54 = vpack.c.bf16 %v2092_v56, %v1988_v47  ;;  %v3658_v62 = vadd.s32 3, %v3654_v45  ;;  %v3755_v34 = vsub.s32 4, %v13183_v44  ;;  %v7470_v38 = vpop.eup %7469 }
 0x4d7   :  { %v4065_v36 = vxor.u32 2147483648, %v11766_v22  ;;  %vm3456_vm7 = vcmp.eq.s32.totalorder %v3451_v15, 2  ;;  %v3555_v23 = vand.u32 3, %v3554_v10  ;;  %v13184_v19 = vand.u32 2147483647, %v10153_v33 }
 0x4d8   :  { %2372 = vmatprep.mubr.bf16.mxu0 %v2100_v54  ;;  %v3454_v29 = vxor.u32 2147483648, %v7470_v38  ;;  %v3458_v46 = vsel %vm3456_vm7, %v3457_v13, %v7470_v38  ;;  %vm13187_vm15 = vcmp.lt.s32.totalorder %v10153_v33, 0  ;;  %vm3449_vm8 = vweird.f32 %v10075_v11 }
 0x4d9   :  { %vm11817_vm11 = vcmp.le.f32.partialorder %v13184_v19, 0.7853982  ;;  %v3756_v52 = vsel %vm13187_vm15, %v3755_v34, %v13183_v44  ;;  %vm3452_vm9 = vcmp.lt.s32.totalorder %v3451_v15, 2  ;;  %vm3453_vm4 = vcmp.eq.s32.totalorder %v3451_v15, 0  ;;  %2373 = vmatmul.mubr.bf16.gmra.mrb[28].mxu0 %v7294_v16  ;;  %v7295_v15 = vld [vmem:[#allocation8 + $0x20] sm:$0xff]  }
 0x4da   :  { %v3757_v40 = vsel %vm11817_vm11, %v10153_v33, %v13188_v59  ;;  %vm3553_vm0 = vweird.f32 %v9980_v50  ;;  %vm3983_vm5 = vcmp.lt.s32.totalorder %v13189_v48, 0  ;;  %v3455_v39 = vsel %vm3453_vm4, %v7468_v55, %v3454_v29 }
 0x4db   :  { %v7472_v9 = vpop.eup %7471  ;;  %v3659_v58 = vand.u32 3, %v3658_v62  ;;  %v3758_v37 = vsel %vm11817_vm11, 0, %v3756_v52  ;;  %7479 = vcosq.f32 %v3757_v40  ;;  %v3459_v63 = vsel %vm3452_vm9, %v3455_v39, %v3458_v46 }
 0x4dc   :  { %v7474_v4 = vpop.eup %7473  ;;  %vm3556_vm14 = vcmp.lt.s32.totalorder %v3555_v23, 2  ;;  %v3561_v42 = vxor.u32 2147483648, %v7472_v9  ;;  %7481 = vsinq.f32 %v3757_v40  ;;  %vm3560_vm10 = vcmp.eq.s32.totalorder %v3555_v23, 2 }
 0x4dd   :  { %v3558_v57 = vxor.u32 2147483648, %v7474_v4  ;;  %v13190_v5 = vand.u32 2147483647, %v13172_v14  ;;  %v3859_v61 = vsub.s32 4, %v13193_v53  ;;  %vm3557_vm1 = vcmp.eq.s32.totalorder %v3555_v23, 0 }
 0x4de   :  { %v3562_v8 = vsel %vm3560_vm10, %v3561_v42, %v7474_v4  ;;  %v3762_v21 = vadd.s32 3, %v3758_v37  ;;  %v3460_v26 = vsel %vm3449_vm8, nan, %v3459_v63  ;;  %vm3661_vm6 = vcmp.eq.s32.totalorder %v3659_v58, 0  ;;  %v7296_v42 = vld [vmem:[#allocation8 + $0x28] sm:$0xff]  }
 0x4df   :  { %vm11835_vm2 = vcmp.le.f32.partialorder %v13190_v5, 0.7853982  ;;  %v7476_v3 = vpop.eup %7475  ;;  %v3559_v49 = vsel %vm3557_vm1, %v7472_v9, %v3558_v57  ;;  %vm3664_vm3 = vcmp.eq.s32.totalorder %v3659_v58, 2  ;;  %v3860_v2 = vsel %vm3775_vm12, %v3859_v61, %v13193_v53 }
 0x4e0   :  { %v3861_v18 = vsel %vm11835_vm2, %v13172_v14, %v3858_v31  ;;  %v7478_v1 = vpop.eup %7477  ;;  %v3563_v35 = vsel %vm3556_vm14, %v3559_v49, %v3562_v8  ;;  %v3665_v41 = vxor.u32 2147483648, %v7476_v3  ;;  %vm4087_vm7 = vcmp.lt.s32.totalorder %v13194_v51, 0 }
 0x4e1   :  { %7483 = vcosq.f32 %v3861_v18  ;;  %v3564_v47 = vsel %vm3553_vm0, nan, %v3563_v35  ;;  %v3662_v11 = vxor.u32 2147483648, %v7478_v1  ;;  %v3862_v25 = vsel %vm11835_vm2, 0, %v3860_v2 }
 0x4e2   :  { %7485 = vsinq.f32 %v3861_v18  ;;  %v4193_v6 = vpack.c.bf16 %v3564_v47, %v3460_v26  ;;  %v3763_v7 = vand.u32 3, %v3762_v21  ;;  %v13195_v12 = vand.u32 2147483647, %v10375_v24 }
 0x4e3   :  { %v3963_v17 = vsub.s32 4, %v13198_v43  ;;  %v3663_v30 = vsel %vm3661_vm6, %v7476_v3, %v3662_v11  ;;  %v3666_v50 = vsel %vm3664_vm3, %v3665_v41, %v7478_v1  ;;  %v3866_v45 = vadd.s32 3, %v3862_v25 }
 0x4e4   :  { %vm11856_vm11 = vcmp.le.f32.partialorder %v13195_v12, 0.7853982  ;;  %v4066_v31 = vsel %vm3983_vm5, %v4065_v36, %v11766_v22  ;;  %4444 = vmatprep.mubr.bf16.mxu1 %v4193_v6  ;;  %vm3657_vm12 = vweird.f32 %v10198_v20  ;;  %vm3660_vm15 = vcmp.lt.s32.totalorder %v3659_v58, 2  ;;  %v13203_v58 = vld [vmem:[#allocation113_spill] sm:$0xff] }
 0x4e5   :  { %v3965_v55 = vsel %vm11856_vm11, %v10375_v24, %v11427_v60  ;;  %v3964_v56 = vsel %vm3879_vm13, %v3963_v17, %v13198_v43  ;;  %v7480_v16 = vpop.eup %7479  ;;  %4445 = vmatmul.mubr.bf16.gmra.mrb[16].mxu1 %v7295_v15  ;;  %v13199_v60 = vld [vmem:[#allocation114_spill] sm:$0xff]  ;;  %v3667_v44 = vsel %vm3660_vm15, %v3663_v30, %v3666_v50  ;;  %vm3765_vm8 = vcmp.eq.s32.totalorder %v3763_v7, 0  ;;  %v7297_v17 = vld [vmem:[#allocation8 + $0x30] sm:$0xff]  }
 0x4e6   :  { %7487 = vcosq.f32 %v3965_v55  ;;  %v3966_v54 = vsel %vm11856_vm11, 0, %v3964_v56  ;;  %v4067_v13 = vsub.s32 4, %v13199_v60  ;;  %v7482_v62 = vpop.eup %7481  ;;  %v3769_v22 = vxor.u32 2147483648, %v7480_v16 }
 0x4e7   :  { %7489 = vsinq.f32 %v3965_v55  ;;  %v13200_v34 = vand.u32 2147483647, %v13189_v48  ;;  %v3766_v36 = vxor.u32 2147483648, %v7482_v62  ;;  %vm3768_vm13 = vcmp.eq.s32.totalorder %v3763_v7, 2 }
 0x4e8   :  { %v3867_v23 = vand.u32 3, %v3866_v45  ;;  %v3770_v28 = vsel %vm3768_vm13, %v3769_v22, %v7482_v62  ;;  %v3970_v29 = vadd.s32 3, %v3966_v54  ;;  %v4068_v46 = vsel %vm3983_vm5, %v4067_v13, %v13199_v60 }
 0x4e9   :  { %vm11879_vm9 = vcmp.le.f32.partialorder %v13200_v34, 0.7853982  ;;  %v3668_v52 = vsel %vm3657_vm12, nan, %v3667_v44  ;;  %vm3764_vm4 = vcmp.lt.s32.totalorder %v3763_v7, 2  ;;  %v3767_v59 = vsel %vm3765_vm8, %v7480_v16, %v3766_v36  ;;  %v7298_v34 = vld [vmem:[#allocation8 + $0x38] sm:$0xff]   ;;  %v7299_v36 = vld [vmem:[#allocation13] sm:$0xff]  }
 0x4ea   :  { %v4069_v19 = vsel %vm11879_vm9, %v13189_v48, %v4066_v31  ;;  %v4170_v9 = vsel %vm4087_vm7, %v4169_v0, %v11438_v27  ;;  %vm3761_vm0 = vweird.f32 %v10153_v33  ;;  %v3771_v39 = vsel %vm3764_vm4, %v3767_v59, %v3770_v28  ;;  %6993 = vmatprep.mubr.bf16.mxu0 %v7299_v36 }
 0x4eb   :  { %7491 = vcosq.f32 %v4069_v19  ;;  %v7484_v40 = vpop.eup %7483  ;;  %v4171_v37 = vsub.s32 4, %v13203_v58  ;;  %v3772_v63 = vsel %vm3761_vm0, nan, %v3771_v39  ;;  %vm3872_vm5 = vcmp.eq.s32.totalorder %v3867_v23, 2 }
 0x4ec   :  { %7493 = vsinq.f32 %v4069_v19  ;;  %v7486_v4 = vpop.eup %7485  ;;  %v3873_v20 = vxor.u32 2147483648, %v7484_v40  ;;  %v4070_v57 = vsel %vm11879_vm9, 0, %v4068_v46  ;;  %v4194_v5 = vpack.c.bf16 %v3772_v63, %v3668_v52 }
 0x4ed   :  { %v3870_v32 = vxor.u32 2147483648, %v7486_v4  ;;  %v3971_v53 = vand.u32 3, %v3970_v29  ;;  %v13204_v61 = vand.u32 2147483647, %v13194_v51  ;;  %vm3869_vm10 = vcmp.eq.s32.totalorder %v3867_v23, 0 }
 0x4ee   :  { %v3874_v33 = vsel %vm3872_vm5, %v3873_v20, %v7486_v4  ;;  %v4172_v0 = vsel %vm4087_vm7, %v4171_v37, %v13203_v58  ;;  %4452 = vmatprep.mubr.bf16.mxu1 %v4194_v5  ;;  %vm3868_vm2 = vcmp.lt.s32.totalorder %v3867_v23, 2  ;;  %v4074_v3 = vadd.s32 3, %v4070_v57 }
 0x4ef   :  { %vm11902_vm14 = vcmp.le.f32.partialorder %v13204_v61, 0.7853982  ;;  %v3871_v18 = vsel %vm3869_vm10, %v7484_v40, %v3870_v32  ;;  %4453 = vmatmul.mubr.bf16.gmra.mrb[20].mxu1 %v7296_v42  ;;  %vm3976_vm1 = vcmp.eq.s32.totalorder %v3971_v53, 2  ;;  %vm3865_vm6 = vweird.f32 %v13172_v14 }
 0x4f0   :  { %v4173_v8 = vsel %vm11902_vm14, %v13194_v51, %v4170_v9  ;;  %v7488_v21 = vpop.eup %7487  ;;  %v3875_v49 = vsel %vm3868_vm2, %v3871_v18, %v3874_v33  ;;  %v4174_v41 = vsel %vm11902_vm14, 0, %v4172_v0  ;;  %vm3973_vm3 = vcmp.eq.s32.totalorder %v3971_v53, 0 }
 0x4f1   :  { %v7490_v26 = vpop.eup %7489  ;;  %v3977_v1 = vxor.u32 2147483648, %v7488_v21  ;;  %7495 = vcosq.f32 %v4173_v8  ;;  %v3876_v15 = vsel %vm3865_vm6, nan, %v3875_v49  ;;  %vm3972_vm7 = vcmp.lt.s32.totalorder %v3971_v53, 2 }
 0x4f2   :  { %v3974_v35 = vxor.u32 2147483648, %v7490_v26  ;;  %7497 = vsinq.f32 %v4173_v8  ;;  %v4075_v25 = vand.u32 3, %v4074_v3  ;;  %vm3969_vm11 = vweird.f32 %v10375_v24 }
 0x4f3   :  { %v3978_v2 = vsel %vm3976_vm1, %v3977_v1, %v7490_v26  ;;  %v4178_v10 = vadd.s32 3, %v4174_v41  ;;  %vm4073_vm13 = vweird.f32 %v13189_v48  ;;  %vm4177_vm5 = vweird.f32 %v13194_v51  ;;  %v11918_v48 = vld [vmem:[#allocation7] ss:$0 sm:$0xff] }
 0x4f4   :  { %v3975_v11 = vsel %vm3973_vm3, %v7488_v21, %v3974_v35  ;;  %vm4077_vm12 = vcmp.eq.s32.totalorder %v4075_v25, 0  ;;  %vm4080_vm15 = vcmp.eq.s32.totalorder %v4075_v25, 2  ;;  %vm4076_vm8 = vcmp.lt.s32.totalorder %v4075_v25, 2 }
 0x4f5   :  { %v7492_v47 = vpop.eup %7491  ;;  %v3979_v7 = vsel %vm3972_vm7, %v3975_v11, %v3978_v2  ;;  %v4179_v55 = vand.u32 3, %v4178_v10  ;;  %vm7954_vm10 = vmmov 0  }
 0x4f6   :  { %v7494_v6 = vpop.eup %7493  ;;  %v4081_v12 = vxor.u32 2147483648, %v7492_v47  ;;  %v3980_v43 = vsel %vm3969_vm11, nan, %v3979_v7 }
 0x4f7   :  { %v4078_v30 = vxor.u32 2147483648, %v7494_v6  ;;  %v4195_v50 = vpack.c.bf16 %v3980_v43, %v3876_v15  ;;  %vm4184_vm9 = vcmp.eq.s32.totalorder %v4179_v55, 2  ;;  %vm4181_vm4 = vcmp.eq.s32.totalorder %v4179_v55, 0 }
 0x4f8   :  { %v4082_v45 = vsel %vm4080_vm15, %v4081_v12, %v7494_v6  ;;  %vm4180_vm0 = vcmp.lt.s32.totalorder %v4179_v55, 2  ;;  %v7319_v55 = vld [vmem:[#allocation16 + $0x50] sm:$0xff]  }
 0x4f9   :  { %4460 = vmatprep.mubr.bf16.mxu1 %v4195_v50  ;;  %v4079_v14 = vsel %vm4077_vm12, %v7492_v47, %v4078_v30  ;;  %v7315_v30 = vld [vmem:[#allocation16 + $0x40] sm:$0xff]  }
 0x4fa   :  { %4461 = vmatmul.mubr.bf16.gmra.mrb[24].mxu1 %v7297_v17  ;;  %v4083_v16 = vsel %vm4076_vm8, %v4079_v14, %v4082_v45  ;;  %v7316_v50 = vld [vmem:[#allocation16] sm:$0xff]   ;;  %v7317_v14 = vld [vmem:[#allocation16 + $0x48] sm:$0xff]   ;;  %6744 = vmatprep.subr.bf16.mxu1 %v7315_v30 }
 0x4fb   :  { %v7496_v31 = vpop.eup %7495  ;;  %v4084_v13 = vsel %vm4073_vm13, nan, %v4083_v16  ;;  %6745 = vmatpush3.bf16.msra.mxu1 %v7316_v50  ;;  %v7318_v45 = vld [vmem:[#allocation16 + $0x8] sm:$0xff]  }
 0x4fc   :  { %v7498_v56 = vpop.eup %7497  ;;  %v4185_v54 = vxor.u32 2147483648, %v7496_v31  ;;  %6746 = vmatprep.subr.bf16.mxu1 %v7317_v14 }
 0x4fd   :  { %v4182_v24 = vxor.u32 2147483648, %v7498_v56 }
 0x4fe   :  { %v4186_v60 = vsel %vm4184_vm9, %v4185_v54, %v7498_v56  ;;  %v7320_v56 = vld [vmem:[#allocation16 + $0x10] sm:$0xff]   ;;  %v7321_v54 = vld [vmem:[#allocation16 + $0x58] sm:$0xff]  }
 0x4ff   :  { %v4183_v62 = vsel %vm4181_vm4, %v7496_v31, %v4182_v24  ;;  %6747 = vmatpush3.bf16.msra.mxu1 %v7318_v45 }
 0x500   :  { %v4187_v44 = vsel %vm4180_vm0, %v4183_v62, %v4186_v60  ;;  %6748 = vmatprep.subr.bf16.mxu1 %v7319_v55 }
 0x501   :  { %v4188_v22 = vsel %vm4177_vm5, nan, %v4187_v44  ;;  %v7322_v44 = vld [vmem:[#allocation16 + $0x18] sm:$0xff]  }
 0x502   :  { %v4196_v38 = vpack.c.bf16 %v4188_v22, %v4084_v13  ;;  %v7323_v22 = vld [vmem:[#allocation16 + $0x60] sm:$0xff]  }
 0x503   :  { %6749 = vmatpush3.bf16.msra.mxu1 %v7320_v56 }
 0x504   :  { %4468 = vmatprep.mubr.bf16.mxu1 %v4196_v38  ;;  %6750 = vmatprep.subr.bf16.mxu1 %v7321_v54 }
 0x505   :  { %4469 = vmatmul.mubr.bf16.gmra.mrb[28].mxu1 %v7298_v34 }
 0x507   :  { %6751 = vmatpush3.bf16.msra.mxu1 %v7322_v44 }
 0x508   :  { %6752 = vmatprep.subr.bf16.mxu1 %v7323_v22 }
 0x52f   :  { %v6616_v23 = vpop.f32.mrb[0].mxu0 }
 0x530   :  { %v6617_v19 = vpop.f32.mrb[1].mxu0 }
 0x531   :  { %v6618_v28 = vadd.f32 %v6617_v19, %v6616_v23  ;;  %v6619_v29 = vpop.f32.mrb[2].mxu0  ;;  %v7324_v23 = vld [vmem:[#allocation16 + $0x20] sm:$0xff]   ;;  %v7325_v19 = vld [vmem:[#allocation16 + $0x68] sm:$0xff]  }
 0x532   :  { %v6620_v46 = vpop.f32.mrb[3].mxu0  ;;  %6753 = vmatpush3.bf16.msra.mxu1 %v7324_v23 }
 0x533   :  { %v6621_v52 = vadd.f32 %v6620_v46, %v6619_v29  ;;  %v2319_v59 = vadd.f32 %v6618_v28, %v11918_v48  ;;  %v11956_v29 = vld [vmem:[#allocation10] ss:$0 sm:$0xff]  ;;  %6754 = vmatprep.subr.bf16.mxu1 %v7325_v19  ;;  %v4483_v19 = vld [vmem:[#allocation11 + $0x30] sm:$0xff] }
 0x535   :  { %v2322_v51 = vadd.f32 %v6621_v52, %v11918_v48  ;;  %v7326_v52 = vld [vmem:[#allocation16 + $0x28] sm:$0xff]  }
 0x536   :  { %6755 = vmatpush3.bf16.msra.mxu1 %v7326_v52 }
 0x537   :  { %v6622_v40 = vpop.f32.mrb[4].mxu0  ;;  %v11922_v9 = vpack.c.bf16 %v2322_v51, %v2319_v59 }
 0x538   :  { %v6623_v39 = vpop.f32.mrb[5].mxu0 }
 0x539   :  { %v6624_v58 = vadd.f32 %v6623_v39, %v6622_v40  ;;  %v6625_v37 = vpop.f32.mrb[6].mxu0  ;;  %6977 = vmatprep.subr.bf16.mxu0 %v11922_v9  ;;  %v7327_v40 = vld [vmem:[#allocation16 + $0x70] sm:$0xff]   ;;  %v4477_v39 = vld [vmem:[#allocation11] sm:$0xff] }
 0x53a   :  { %v6626_v4 = vpop.f32.mrb[7].mxu0  ;;  %6978 = vmatpush3.bf16.msra.mxu0 %v11922_v9  ;;  %6756 = vmatprep.subr.bf16.mxu1 %v7327_v40  ;;  %v4484_v40 = vld [vmem:[#allocation11 + $0x38] sm:$0xff] }
 0x53b   :  { %v6627_v63 = vadd.f32 %v6626_v4, %v6625_v37  ;;  %v2327_v42 = vadd.f32 %v6624_v58, %v11918_v48 }
 0x53d   :  { %v2330_v20 = vadd.f32 %v6627_v63, %v11918_v48  ;;  %v4478_v63 = vld [vmem:[#allocation11 + $0x8] sm:$0xff] }
 0x53f   :  { %v6628_v57 = vpop.f32.mrb[8].mxu0  ;;  %v11928_v5 = vpack.c.bf16 %v2330_v20, %v2327_v42  ;;  %v7328_v42 = vld [vmem:[#allocation16 + $0x30] sm:$0xff]  }
 0x540   :  { %v6629_v32 = vpop.f32.mrb[9].mxu0  ;;  %6757 = vmatpush3.bf16.msra.mxu1 %v7328_v42 }
 0x541   :  { %v6630_v53 = vadd.f32 %v6629_v32, %v6628_v57  ;;  %v6631_v61 = vpop.f32.mrb[10].mxu0  ;;  %6979 = vmatprep.subr.bf16.mxu0 %v11928_v5 }
 0x542   :  { %v6632_v27 = vpop.f32.mrb[11].mxu0  ;;  %6980 = vmatpush3.bf16.msra.mxu0 %v11928_v5 }
 0x543   :  { %v6633_v33 = vadd.f32 %v6632_v27, %v6631_v61  ;;  %v2335_v0 = vadd.f32 %v6630_v53, %v11918_v48 }
 0x545   :  { %v2338_v8 = vadd.f32 %v6633_v33, %v11918_v48 }
 0x547   :  { %v6634_v21 = vpop.f32.mrb[12].mxu0  ;;  %v11934_v18 = vpack.c.bf16 %v2338_v8, %v2335_v0 }
 0x548   :  { %v6635_v3 = vpop.f32.mrb[13].mxu0 }
 0x549   :  { %v6636_v26 = vadd.f32 %v6635_v3, %v6634_v21  ;;  %v6637_v49 = vpop.f32.mrb[14].mxu0  ;;  %6981 = vmatprep.subr.bf16.mxu0 %v11934_v18  ;;  %v4479_v3 = vld [vmem:[#allocation11 + $0x10] sm:$0xff] }
 0x54a   :  { %v6638_v1 = vpop.f32.mrb[15].mxu0  ;;  %6982 = vmatpush3.bf16.msra.mxu0 %v11934_v18 }
 0x54b   :  { %v6639_v35 = vadd.f32 %v6638_v1, %v6637_v49  ;;  %v2343_v41 = vadd.f32 %v6636_v26, %v11918_v48 }
 0x54d   :  { %v2346_v2 = vadd.f32 %v6639_v35, %v11918_v48 }
 0x54f   :  { %v6640_v47 = vpop.f32.mrb[16].mxu0  ;;  %v11940_v15 = vpack.c.bf16 %v2346_v2, %v2343_v41 }
 0x550   :  { %v6641_v11 = vpop.f32.mrb[17].mxu0 }
 0x551   :  { %v6642_v25 = vadd.f32 %v6641_v11, %v6640_v47  ;;  %v6643_v6 = vpop.f32.mrb[18].mxu0  ;;  %6983 = vmatprep.subr.bf16.mxu0 %v11940_v15  ;;  %v4480_v47 = vld [vmem:[#allocation11 + $0x18] sm:$0xff] }
 0x552   :  { %v6644_v7 = vpop.f32.mrb[19].mxu0  ;;  %6984 = vmatpush3.bf16.msra.mxu0 %v11940_v15 }
 0x553   :  { %v6645_v12 = vadd.f32 %v6644_v7, %v6643_v6  ;;  %v2351_v10 = vadd.f32 %v6642_v25, %v11918_v48 }
 0x555   :  { %v2354_v43 = vadd.f32 %v6645_v12, %v11918_v48 }
 0x557   :  { %v11946_v17 = vpack.c.bf16 %v2354_v43, %v2351_v10 }
 0x559   :  { %6985 = vmatprep.subr.bf16.mxu0 %v11946_v17 }
 0x55a   :  { %6986 = vmatpush3.bf16.msra.mxu0 %v11946_v17 }
 0x57f   :  { %v6646_v31 = vpop.f32.mrb[20].mxu0 }
 0x580   :  { %v6647_v16 = vpop.f32.mrb[21].mxu0 }
 0x581   :  { %v6648_v24 = vadd.f32 %v6647_v16, %v6646_v31  ;;  %v6649_v60 = vpop.f32.mrb[22].mxu0  ;;  %v4481_v31 = vld [vmem:[#allocation11 + $0x20] sm:$0xff] }
 0x582   :  { %v6650_v13 = vpop.f32.mrb[23].mxu0 }
 0x583   :  { %v6651_v62 = vadd.f32 %v6650_v13, %v6649_v60  ;;  %v2359_v34 = vadd.f32 %v6648_v24, %v11918_v48  ;;  %v4482_v24 = vld [vmem:[#allocation11 + $0x28] sm:$0xff] }
 0x585   :  { %v2362_v38 = vadd.f32 %v6651_v62, %v11918_v48 }
 0x587   :  { %v11952_v36 = vpack.c.bf16 %v2362_v38, %v2359_v34 }
 0x589   :  { %6987 = vmatprep.subr.bf16.mxu0 %v11952_v36 }
 0x58a   :  { %6988 = vmatpush3.bf16.msra.mxu0 %v11952_v36 }
 0x58c   :  { %v6680_v28 = vpop.f32.mrb[0].mxu1 }
 0x58d   :  { %v6681_v46 = vpop.f32.mrb[1].mxu1 }
 0x58e   :  { %v6682_v59 = vadd.f32 %v6681_v46, %v6680_v28  ;;  %v6683_v51 = vpop.f32.mrb[2].mxu1 }
 0x58f   :  { %v6684_v58 = vpop.f32.mrb[3].mxu1 }
 0x590   :  { %v4415_v37 = vadd.f32 %v6682_v59, %v11956_v29  ;;  %v6685_v4 = vadd.f32 %v6684_v58, %v6683_v51 }
 0x592   :  { %v4493_v20 = vadd.f32 %v4477_v39, %v4415_v37  ;;  %v4418_v57 = vadd.f32 %v6685_v4, %v11956_v29 }
 0x594   :  { %v4494_v32 = vadd.f32 %v4478_v63, %v4418_v57  ;;  %v6686_v53 = vpop.f32.mrb[4].mxu1 }
 0x595   :  { %v6687_v61 = vpop.f32.mrb[5].mxu1 }
 0x596   :  { %v6688_v33 = vadd.f32 %v6687_v61, %v6686_v53  ;;  %v6689_v0 = vpop.f32.mrb[6].mxu1  ;;  %v11960_v8 = vpack.c.bf16 %v4494_v32, %v4493_v20 }
 0x597   :  { %v6690_v26 = vpop.f32.mrb[7].mxu1 }
 0x598   :  { %v6652_v27 = vpop.f32.mrb[24].mxu0  ;;  %v4423_v35 = vadd.f32 %v6688_v33, %v11956_v29  ;;  %v6691_v41 = vadd.f32 %v6690_v26, %v6689_v0  ;;  %4861 = vmatprep.mubr.bf16.mxu1 %v11960_v8  ;;  %v7301_v0 = vld [vmem:[#allocation13 + $0x10] sm:$0xff]  }
 0x599   :  { %v6653_v21 = vpop.f32.mrb[25].mxu0 }
 0x59a   :  { %v6654_v49 = vadd.f32 %v6653_v21, %v6652_v27  ;;  %v6655_v1 = vpop.f32.mrb[26].mxu0  ;;  %v4495_v25 = vadd.f32 %v4479_v3, %v4423_v35  ;;  %v4426_v6 = vadd.f32 %v6691_v41, %v11956_v29  ;;  %v7300_v27 = vld [vmem:[#allocation13 + $0x8] sm:$0xff]  }
 0x59b   :  { %v6656_v2 = vpop.f32.mrb[27].mxu0  ;;  %v4486_v41 = vld [vmem:[#allocation11 + $0x48] sm:$0xff] }
 0x59c   :  { %v6657_v11 = vadd.f32 %v6656_v2, %v6655_v1  ;;  %v2367_v7 = vadd.f32 %v6654_v49, %v11918_v48  ;;  %v4496_v10 = vadd.f32 %v4480_v47, %v4426_v6  ;;  %v6692_v43 = vpop.f32.mrb[8].mxu1  ;;  %v4485_v49 = vld [vmem:[#allocation11 + $0x40] sm:$0xff] }
 0x59d   :  { %v6693_v30 = vpop.f32.mrb[9].mxu1  ;;  %v7303_v6 = vld [vmem:[#allocation13 + $0x20] sm:$0xff]  }
 0x59e   :  { %v2370_v12 = vadd.f32 %v6657_v11, %v11918_v48  ;;  %v6694_v14 = vadd.f32 %v6693_v30, %v6692_v43  ;;  %v6695_v45 = vpop.f32.mrb[10].mxu1  ;;  %v11969_v55 = vpack.c.bf16 %v4496_v10, %v4495_v25  ;;  %v7302_v11 = vld [vmem:[#allocation13 + $0x18] sm:$0xff]   ;;  %v4487_v30 = vld [vmem:[#allocation11 + $0x50] sm:$0xff] }
 0x59f   :  { %v6696_v56 = vpop.f32.mrb[11].mxu1 }
 0x5a0   :  { %v11967_v50 = vpack.c.bf16 %v2370_v12, %v2367_v7  ;;  %v4431_v16 = vadd.f32 %v6694_v14, %v11956_v29  ;;  %v6697_v54 = vadd.f32 %v6696_v56, %v6695_v45  ;;  %v4488_v56 = vld [vmem:[#allocation11 + $0x58] sm:$0xff] }
 0x5a2   :  { %6989 = vmatprep.subr.bf16.mxu0 %v11967_v50  ;;  %v4497_v60 = vadd.f32 %v4481_v31, %v4431_v16  ;;  %v4434_v13 = vadd.f32 %v6697_v54, %v11956_v29  ;;  %v7304_v16 = vld [vmem:[#allocation13 + $0x28] sm:$0xff]  }
 0x5a3   :  { %6990 = vmatpush3.bf16.msra.mxu0 %v11967_v50 }
 0x5a4   :  { %v4498_v62 = vadd.f32 %v4482_v24, %v4434_v13  ;;  %v6698_v44 = vpop.f32.mrb[12].mxu1 }
 0x5a5   :  { %v6699_v22 = vpop.f32.mrb[13].mxu1 }
 0x5a6   :  { %v6700_v34 = vadd.f32 %v6699_v22, %v6698_v44  ;;  %v6701_v38 = vpop.f32.mrb[14].mxu1  ;;  %v11975_v23 = vpack.c.bf16 %v4498_v62, %v4497_v60  ;;  %v7305_v60 = vld [vmem:[#allocation13 + $0x30] sm:$0xff]  }
 0x5a7   :  { %v6702_v28 = vpop.f32.mrb[15].mxu1 }
 0x5a8   :  { %v4439_v52 = vadd.f32 %v6700_v34, %v11956_v29  ;;  %v6703_v59 = vadd.f32 %v6702_v28, %v6701_v38 }
 0x5aa   :  { %v4499_v37 = vadd.f32 %v4483_v19, %v4439_v52  ;;  %v4442_v4 = vadd.f32 %v6703_v59, %v11956_v29  ;;  %v4489_v19 = vld [vmem:[#allocation11 + $0x60] sm:$0xff]  ;;  %v7306_v59 = vld [vmem:[#allocation13 + $0x38] sm:$0xff]  }
 0x5ac   :  { %v6658_v46 = vpop.f32.mrb[28].mxu0  ;;  %v4500_v20 = vadd.f32 %v4484_v40, %v4442_v4  ;;  %v12008_v40 = vld [vmem:[#allocation14] sm:$0xff]  }
 0x5ad   :  { %v6659_v51 = vpop.f32.mrb[29].mxu0 }
 0x5ae   :  { %v6660_v39 = vadd.f32 %v6659_v51, %v6658_v46  ;;  %v6661_v58 = vpop.f32.mrb[30].mxu0  ;;  %v11981_v53 = vpack.c.bf16 %v4500_v20, %v4499_v37  ;;  %v4490_v51 = vld [vmem:[#allocation11 + $0x68] sm:$0xff] }
 0x5af   :  { %v6662_v63 = vpop.f32.mrb[31].mxu0 }
 0x5b0   :  { %v6663_v42 = vadd.f32 %v6662_v63, %v6661_v58  ;;  %v2375_v57 = vadd.f32 %v6660_v39, %v11918_v48 }
 0x5b2   :  { %v2378_v32 = vadd.f32 %v6663_v42, %v11918_v48 }
 0x5b4   :  { %v11983_v61 = vpack.c.bf16 %v2378_v32, %v2375_v57  ;;  %v4491_v32 = vld [vmem:[#allocation11 + $0x70] sm:$0xff] }
 0x5b6   :  { %6991 = vmatprep.subr.bf16.mxu0 %v11983_v61 }
 0x5b7   :  { %6992 = vmatpush3.bf16.msra.mxu0 %v11983_v61 }
 0x5b8   :  { %v6704_v33 = vpop.f32.mrb[16].mxu1  ;;  %7009 = vmatprep.subr.bf16.mxu0 %v11960_v8 }
 0x5b9   :  { %v6705_v21 = vpop.f32.mrb[17].mxu1 }
 0x5ba   :  { %v6706_v3 = vadd.f32 %v6705_v21, %v6704_v33  ;;  %v6707_v26 = vpop.f32.mrb[18].mxu1  ;;  %6994 = vmatmul.mubr.bf16.vlgmr.msra.gmra.mrb[32].mxu0 %v7300_v27  ;;  %v4492_v21 = vld [vmem:[#allocation11 + $0x78] sm:$0xff] }
 0x5bb   :  { %v6708_v1 = vpop.f32.mrb[19].mxu1  ;;  %7010 = vmatpush3.bf16.msra.mxu0 %v11960_v8  ;;  %6997 = vmatprep.mubr.bf16.mxu0 %v7301_v0 }
 0x5bc   :  { %v4447_v48 = vadd.f32 %v6706_v3, %v11956_v29  ;;  %v6709_v35 = vadd.f32 %v6708_v1, %v6707_v26  ;;  %7011 = vmatprep.subr.bf16.mxu0 %v11969_v55 }
 0x5be   :  { %v4501_v2 = vadd.f32 %v4485_v49, %v4447_v48  ;;  %v4450_v47 = vadd.f32 %v6709_v35, %v11956_v29  ;;  %v7308_v48 = vld [vmem:[#allocation14 + $0x8] sm:$0xff]   ;;  %v7309_v35 = vld [vmem:[#allocation14 + $0x10] sm:$0xff]  }
 0x5bf   :  { %7012 = vmatpush3.bf16.msra.mxu0 %v11969_v55 }
 0x5c0   :  { %v4502_v25 = vadd.f32 %v4486_v41, %v4450_v47  ;;  %7013 = vmatprep.subr.bf16.mxu0 %v11975_v23  ;;  %v7310_v41 = vld [vmem:[#allocation14 + $0x18] sm:$0xff]   ;;  %v7312_v47 = vld [vmem:[#allocation14 + $0x28] sm:$0xff]  }
 0x5c2   :  { %v6710_v7 = vpop.f32.mrb[20].mxu1  ;;  %v11994_v12 = vpack.c.bf16 %v4502_v25, %v4501_v2  ;;  %6998 = vmatmul.mubr.bf16.gmra.mrb[36].mxu0 %v7302_v11  ;;  %v7311_v2 = vld [vmem:[#allocation14 + $0x20] sm:$0xff]   ;;  %v7313_v11 = vld [vmem:[#allocation14 + $0x30] sm:$0xff]   ;;  %v7329_v25 = vld [vmem:[#allocation16 + $0x78] sm:$0xff]  }
 0x5c3   :  { %v6711_v8 = vpop.f32.mrb[21].mxu1  ;;  %7014 = vmatpush3.bf16.msra.mxu0 %v11975_v23  ;;  %7001 = vmatprep.mubr.bf16.mxu0 %v7303_v6  ;;  %v7330_v6 = vld [vmem:[#allocation16 + $0x38] sm:$0xff]  }
 0x5c4   :  { %v6712_v10 = vadd.f32 %v6711_v8, %v6710_v7  ;;  %v6713_v43 = vpop.f32.mrb[22].mxu1  ;;  %7015 = vmatprep.subr.bf16.mxu0 %v11981_v53  ;;  %6758 = vmatprep.subr.bf16.mxu1 %v7329_v25  ;;  %v7331_v7 = vld [vmem:[#allocation19 + $0x40] sm:$0xff]  }
 0x5c5   :  { %v6714_v14 = vpop.f32.mrb[23].mxu1  ;;  %6759 = vmatpush3.bf16.msra.mxu1 %v7330_v6  ;;  %v7332_v8 = vld [vmem:[#allocation19] sm:$0xff]  }
 0x5c6   :  { %v4455_v45 = vadd.f32 %v6712_v10, %v11956_v29  ;;  %v6715_v31 = vadd.f32 %v6714_v14, %v6713_v43  ;;  %v7333_v10 = vld [vmem:[#allocation19 + $0x48] sm:$0xff]   ;;  %v7336_v14 = vld [vmem:[#allocation19 + $0x10] sm:$0xff]  }
 0x5c7   :  { %7016 = vmatpush3.bf16.msra.mxu0 %v11981_v53  ;;  %v7334_v43 = vld [vmem:[#allocation19 + $0x8] sm:$0xff]  }
 0x5c8   :  { %v4503_v54 = vadd.f32 %v4487_v30, %v4455_v45  ;;  %v4458_v24 = vadd.f32 %v6715_v31, %v11956_v29  ;;  %7017 = vmatprep.subr.bf16.mxu0 %v11994_v12  ;;  %v7335_v30 = vld [vmem:[#allocation19 + $0x50] sm:$0xff]   ;;  %v7337_v45 = vld [vmem:[#allocation19 + $0x58] sm:$0xff]  }
 0x5c9   :  { %v7338_v31 = vld [vmem:[#allocation19 + $0x18] sm:$0xff]  }
 0x5ca   :  { %v4504_v13 = vadd.f32 %v4488_v56, %v4458_v24  ;;  %7002 = vmatmul.mubr.bf16.gmra.mrb[40].mxu0 %v7304_v16  ;;  %v7340_v56 = vld [vmem:[#allocation19 + $0x20] sm:$0xff]   ;;  %v7341_v16 = vld [vmem:[#allocation19 + $0x68] sm:$0xff]   ;;  %v7343_v24 = vld [vmem:[#allocation19 + $0x70] sm:$0xff]  }
 0x5cb   :  { %7018 = vmatpush3.bf16.msra.mxu0 %v11994_v12  ;;  %7005 = vmatprep.mubr.bf16.mxu0 %v7305_v60  ;;  %v7344_v60 = vld [vmem:[#allocation19 + $0x30] sm:$0xff]  }
 0x5cc   :  { %v12003_v22 = vpack.c.bf16 %v4504_v13, %v4503_v54  ;;  %v7342_v54 = vld [vmem:[#allocation19 + $0x28] sm:$0xff]   ;;  %v7345_v13 = vld [vmem:[#allocation19 + $0x78] sm:$0xff]  }
 0x5cd   :  { %v6716_v62 = vpop.f32.mrb[24].mxu1 }
 0x5ce   :  { %v6717_v44 = vpop.f32.mrb[25].mxu1  ;;  %7019 = vmatprep.subr.bf16.mxu0 %v12003_v22 }
 0x5cf   :  { %v6718_v34 = vadd.f32 %v6717_v44, %v6716_v62  ;;  %v6719_v38 = vpop.f32.mrb[26].mxu1  ;;  %7020 = vmatpush3.bf16.msra.mxu0 %v12003_v22  ;;  %v7346_v62 = vld [vmem:[#allocation19 + $0x38] sm:$0xff]  }
 0x5d0   :  { %v6720_v28 = vpop.f32.mrb[27].mxu1 }
 0x5d1   :  { %v4463_v46 = vadd.f32 %v6718_v34, %v11956_v29  ;;  %v6721_v52 = vadd.f32 %v6720_v28, %v6719_v38 }
 0x5d2   :  { %7006 = vmatmul.mubr.bf16.gmra.mrb[44].mxu0 %v7306_v59 }
 0x5d3   :  { %v4505_v39 = vadd.f32 %v4489_v19, %v4463_v46  ;;  %v4466_v58 = vadd.f32 %v6721_v52, %v11956_v29  ;;  %7025 = vmatprep.mubr.bf16.mxu0 %v12008_v40 }
 0x5d5   :  { %v4506_v37 = vadd.f32 %v4490_v51, %v4466_v58 }
 0x5d7   :  { %v12012_v4 = vpack.c.bf16 %v4506_v37, %v4505_v39 }
 0x5d8   :  { %v6722_v63 = vpop.f32.mrb[28].mxu1 }
 0x5d9   :  { %v6723_v42 = vpop.f32.mrb[29].mxu1  ;;  %7021 = vmatprep.subr.bf16.mxu0 %v12012_v4 }
 0x5da   :  { %v6724_v20 = vadd.f32 %v6723_v42, %v6722_v63  ;;  %v6725_v57 = vpop.f32.mrb[30].mxu1  ;;  %7022 = vmatpush3.bf16.msra.mxu0 %v12012_v4 }
 0x5db   :  { %v6726_v27 = vpop.f32.mrb[31].mxu1 }
 0x5dc   :  { %v4471_v33 = vadd.f32 %v6724_v20, %v11956_v29  ;;  %v6727_v0 = vadd.f32 %v6726_v27, %v6725_v57 }
 0x5de   :  { %v4507_v3 = vadd.f32 %v4491_v32, %v4471_v33  ;;  %v4474_v26 = vadd.f32 %v6727_v0, %v11956_v29  ;;  %v7314_v29 = vld [vmem:[#allocation14 + $0x38] sm:$0xff]  }
 0x5e0   :  { %v4508_v49 = vadd.f32 %v4492_v21, %v4474_v26 }
 0x5e2   :  { %v12018_v1 = vpack.c.bf16 %v4508_v49, %v4507_v3 }
 0x5e4   :  { %7023 = vmatprep.subr.bf16.mxu0 %v12018_v1 }
 0x5e5   :  { %7024 = vmatpush3.bf16.msra.mxu0 %v12018_v1 }
 0x5e6   :  { %6824 = vmatprep.subr.bf16.mxu0 %v7331_v7 }
 0x5e8   :  { %7026 = vmatmul.mubr.bf16.vlgmr.msra.gmra.mrb[48].mxu0 %v7308_v48 }
 0x5e9   :  { %7029 = vmatprep.mubr.bf16.mxu0 %v7309_v35  ;;  %6825 = vmatpush3.bf16.msra.mxu0 %v7332_v8 }
 0x5ea   :  { %6826 = vmatprep.subr.bf16.mxu0 %v7333_v10 }
 0x5ed   :  { %6827 = vmatpush3.bf16.msra.mxu0 %v7334_v43 }
 0x5ee   :  { %6828 = vmatprep.subr.bf16.mxu0 %v7335_v30 }
 0x5f0   :  { %7030 = vmatmul.mubr.bf16.gmra.mrb[52].mxu0 %v7310_v41 }
 0x5f1   :  { %7033 = vmatprep.mubr.bf16.mxu0 %v7311_v2  ;;  %6829 = vmatpush3.bf16.msra.mxu0 %v7336_v14 }
 0x5f2   :  { %6830 = vmatprep.subr.bf16.mxu0 %v7337_v45 }
 0x5f5   :  { %6831 = vmatpush3.bf16.msra.mxu0 %v7338_v31 }
 0x5f8   :  { %7034 = vmatmul.mubr.bf16.gmra.mrb[56].mxu0 %v7312_v47 }
 0x5f9   :  { %7037 = vmatprep.mubr.bf16.mxu0 %v7313_v11 }
 0x600   :  { %7038 = vmatmul.mubr.bf16.gmra.mrb[60].mxu0 %v7314_v29 }
 0x601   :  { %5262 = vmatprep.mubr.bf16.mxu0 %v11922_v9  ;;  %v7339_v9 = vld [vmem:[#allocation19 + $0x60] sm:$0xff]  }
 0x602   :  { %6832 = vmatprep.subr.bf16.mxu0 %v7339_v9 }
 0x603   :  { %6833 = vmatpush3.bf16.msra.mxu0 %v7340_v56 }
 0x604   :  { %6834 = vmatprep.subr.bf16.mxu0 %v7341_v16 }
 0x607   :  { %6835 = vmatpush3.bf16.msra.mxu0 %v7342_v54 }
 0x608   :  { %6836 = vmatprep.subr.bf16.mxu0 %v7343_v24 }
 0x60b   :  { %6837 = vmatpush3.bf16.msra.mxu0 %v7344_v60 }
 0x60c   :  { %6838 = vmatprep.subr.bf16.mxu0 %v7345_v13 }
 0x60f   :  { %6839 = vmatpush3.bf16.msra.mxu0 %v7346_v62 }
 0x68d   :  { %v6995_v44 = vpop.f32.mrb[32].mxu0 }
 0x68e   :  { %v4623_v34 = vpop.f32.mrb[33].mxu0 }
 0x68f   :  { %v6996_v38 = vpop.f32.mrb[34].mxu0 }
 0x690   :  { %v4687_v19 = vpack.c.bf16 %v6996_v38, %v6995_v44  ;;  %v4626_v28 = vpop.f32.mrb[35].mxu0 }
 0x691   :  { %v4686_v46 = vpack.c.bf16 %v4626_v28, %v4623_v34 }
 0x693   :  { %4862 = vmatmul.mubr.bf16.vlgmr.msra.gmra.mrb[32].mxu1 %v4686_v46 }
 0x694   :  { %4869 = vmatprep.mubr.bf16.mxu1 %v11969_v55 }
 0x695   :  { %v6999_v52 = vpop.f32.mrb[36].mxu0 }
 0x696   :  { %v4639_v59 = vpop.f32.mrb[37].mxu0 }
 0x697   :  { %v7000_v51 = vpop.f32.mrb[38].mxu0 }
 0x698   :  { %v4689_v39 = vpack.c.bf16 %v7000_v51, %v6999_v52  ;;  %v4642_v58 = vpop.f32.mrb[39].mxu0 }
 0x699   :  { %v4688_v37 = vpack.c.bf16 %v4642_v58, %v4639_v59 }
 0x69b   :  { %4870 = vmatmul.mubr.bf16.gmra.mrb[36].mxu1 %v4687_v19 }
 0x69c   :  { %4877 = vmatprep.mubr.bf16.mxu1 %v11975_v23 }
 0x69d   :  { %v7003_v63 = vpop.f32.mrb[40].mxu0 }
 0x69e   :  { %v4655_v42 = vpop.f32.mrb[41].mxu0 }
 0x69f   :  { %v7004_v20 = vpop.f32.mrb[42].mxu0 }
 0x6a0   :  { %v4691_v57 = vpack.c.bf16 %v7004_v20, %v7003_v63  ;;  %v4658_v32 = vpop.f32.mrb[43].mxu0 }
 0x6a1   :  { %v4690_v27 = vpack.c.bf16 %v4658_v32, %v4655_v42 }
 0x6a3   :  { %4878 = vmatmul.mubr.bf16.gmra.mrb[40].mxu1 %v4688_v37 }
 0x6a4   :  { %4885 = vmatprep.mubr.bf16.mxu1 %v11981_v53 }
 0x6a5   :  { %v7007_v33 = vpop.f32.mrb[44].mxu0 }
 0x6a6   :  { %v4671_v55 = vpop.f32.mrb[45].mxu0 }
 0x6a7   :  { %v7008_v0 = vpop.f32.mrb[46].mxu0 }
 0x6a8   :  { %v4693_v21 = vpack.c.bf16 %v7008_v0, %v7007_v33  ;;  %v4674_v3 = vpop.f32.mrb[47].mxu0 }
 0x6a9   :  { %v4692_v26 = vpack.c.bf16 %v4674_v3, %v4671_v55 }
 0x6ab   :  { %4886 = vmatmul.mubr.bf16.gmra.mrb[44].mxu1 %v4689_v39 }
 0x6ac   :  { %4893 = vmatprep.mubr.bf16.mxu1 %v11994_v12 }
 0x6b3   :  { %4894 = vmatmul.mubr.bf16.gmra.mrb[48].mxu1 %v4690_v27  ;;  %v7953_v27 = vmov 0.0  }
 0x6b4   :  { %4901 = vmatprep.mubr.bf16.mxu1 %v12003_v22  ;;  %7073 = vmatprep.subr.bf16.mxu0 %v7953_v27 }
 0x6bb   :  { %v7027_v23 = vpop.f32.mrb[48].mxu0  ;;  %4902 = vmatmul.mubr.bf16.gmra.mrb[52].mxu1 %v4691_v57 }
 0x6bc   :  { %v5024_v49 = vpop.f32.mrb[49].mxu0  ;;  %4909 = vmatprep.mubr.bf16.mxu1 %v12012_v4 }
 0x6bd   :  { %v7028_v48 = vpop.f32.mrb[50].mxu0 }
 0x6be   :  { %v5088_v35 = vpack.c.bf16 %v7028_v48, %v7027_v23  ;;  %v5027_v41 = vpop.f32.mrb[51].mxu0 }
 0x6bf   :  { %v5087_v2 = vpack.c.bf16 %v5027_v41, %v5024_v49 }
 0x6c1   :  { %5263 = vmatmul.mubr.bf16.vlgmr.msra.gmra.mrb[64].mxu0 %v5087_v2 }
 0x6c2   :  { %5270 = vmatprep.mubr.bf16.mxu0 %v11928_v5 }
 0x6c3   :  { %v7031_v53 = vpop.f32.mrb[52].mxu0  ;;  %4910 = vmatmul.mubr.bf16.gmra.mrb[56].mxu1 %v4692_v26 }
 0x6c4   :  { %v5040_v47 = vpop.f32.mrb[53].mxu0  ;;  %4917 = vmatprep.mubr.bf16.mxu1 %v12018_v1 }
 0x6c5   :  { %v7032_v11 = vpop.f32.mrb[54].mxu0 }
 0x6c6   :  { %v5090_v29 = vpack.c.bf16 %v7032_v11, %v7031_v53  ;;  %v5043_v12 = vpop.f32.mrb[55].mxu0 }
 0x6c7   :  { %v5089_v25 = vpack.c.bf16 %v5043_v12, %v5040_v47 }
 0x6c9   :  { %5271 = vmatmul.mubr.bf16.gmra.mrb[68].mxu0 %v5088_v35 }
 0x6ca   :  { %5278 = vmatprep.mubr.bf16.mxu0 %v11934_v18 }
 0x6cb   :  { %v7035_v22 = vpop.f32.mrb[56].mxu0  ;;  %4918 = vmatmul.mubr.bf16.gmra.mrb[60].mxu1 %v4693_v21 }
 0x6cc   :  { %v5056_v6 = vpop.f32.mrb[57].mxu0  ;;  %7057 = vmatprep.mubr.bf16.mxu1 %v12008_v40  ;;  %v12038_v40 = vld [vmem:[#allocation17] ss:$0 sm:$0xff] }
 0x6cd   :  { %v7036_v7 = vpop.f32.mrb[58].mxu0 }
 0x6ce   :  { %v5092_v4 = vpack.c.bf16 %v7036_v7, %v7035_v22  ;;  %v5059_v8 = vpop.f32.mrb[59].mxu0 }
 0x6cf   :  { %v5091_v10 = vpack.c.bf16 %v5059_v8, %v5056_v6 }
 0x6d1   :  { %5279 = vmatmul.mubr.bf16.gmra.mrb[72].mxu0 %v5089_v25 }
 0x6d2   :  { %5286 = vmatprep.mubr.bf16.mxu0 %v11940_v15 }
 0x6d3   :  { %v7039_v5 = vpop.f32.mrb[60].mxu0 }
 0x6d4   :  { %v5072_v43 = vpop.f32.mrb[61].mxu0 }
 0x6d5   :  { %v7040_v30 = vpop.f32.mrb[62].mxu0 }
 0x6d6   :  { %v5094_v14 = vpack.c.bf16 %v7040_v30, %v7039_v5  ;;  %v5075_v1 = vpop.f32.mrb[63].mxu0 }
 0x6d7   :  { %v5093_v45 = vpack.c.bf16 %v5075_v1, %v5072_v43 }
 0x6d9   :  { %5287 = vmatmul.mubr.bf16.gmra.mrb[76].mxu0 %v5090_v29 }
 0x6da   :  { %5294 = vmatprep.mubr.bf16.mxu0 %v11946_v17 }
 0x6e1   :  { %5295 = vmatmul.mubr.bf16.gmra.mrb[80].mxu0 %v5091_v10 }
 0x6e2   :  { %5302 = vmatprep.mubr.bf16.mxu0 %v11952_v36 }
 0x6e9   :  { %5303 = vmatmul.mubr.bf16.gmra.mrb[84].mxu0 %v5092_v4 }
 0x6ea   :  { %5310 = vmatprep.mubr.bf16.mxu0 %v11967_v50 }
 0x6f1   :  { %5311 = vmatmul.mubr.bf16.gmra.mrb[88].mxu0 %v5093_v45 }
 0x6f2   :  { %5318 = vmatprep.mubr.bf16.mxu0 %v11983_v61 }
 0x6f9   :  { %5319 = vmatmul.mubr.bf16.gmra.mrb[92].mxu0 %v5094_v14 }
 0x6fa   :  { %7089 = vmatprep.mubr.msk.bf16.mxu0 %vm7954_vm10, %v7953_v27 }
 0x766   :  { %v6760_v18 = vpop.f32.mrb[32].mxu1 }
 0x767   :  { %v6761_v15 = vpop.f32.mrb[33].mxu1 }
 0x768   :  { %v6762_v31 = vadd.f32 %v6761_v15, %v6760_v18  ;;  %v6763_v9 = vpop.f32.mrb[34].mxu1 }
 0x769   :  { %v6764_v56 = vpop.f32.mrb[35].mxu1 }
 0x76a   :  { %v6765_v16 = vadd.f32 %v6764_v56, %v6763_v9  ;;  %v12041_v17 = vadd.f32 %v6762_v31, %v12038_v40 }
 0x76c   :  { %5327 = vadd.xlane.f32.xlu0 %v12041_v17  ;;  %v12045_v36 = vadd.f32 %v6765_v16, %v12038_v40 }
 0x76e   :  { %v6766_v50 = vpop.f32.mrb[36].mxu1  ;;  %5329 = vadd.xlane.f32.xlu1 %v12045_v36 }
 0x76f   :  { %v6767_v61 = vpop.f32.mrb[37].mxu1 }
 0x770   :  { %v6768_v54 = vadd.f32 %v6767_v61, %v6766_v50  ;;  %v6769_v24 = vpop.f32.mrb[38].mxu1 }
 0x771   :  { %v6770_v60 = vpop.f32.mrb[39].mxu1 }
 0x772   :  { %v6771_v13 = vadd.f32 %v6770_v60, %v6769_v24  ;;  %v12049_v62 = vadd.f32 %v6768_v54, %v12038_v40 }
 0x774   :  { %5331 = vadd.xlane.f32.xlu0 %v12049_v62  ;;  %v12053_v34 = vadd.f32 %v6771_v13, %v12038_v40 }
 0x776   :  { %v6772_v44 = vpop.f32.mrb[40].mxu1 }
 0x777   :  { %v6773_v38 = vpop.f32.mrb[41].mxu1 }
 0x778   :  { %v6774_v19 = vadd.f32 %v6773_v38, %v6772_v44  ;;  %5333 = vadd.xlane.f32.xlu0 %v12053_v34  ;;  %v6775_v28 = vpop.f32.mrb[42].mxu1 }
 0x779   :  { %v6776_v46 = vpop.f32.mrb[43].mxu1 }
 0x77a   :  { %v6777_v52 = vadd.f32 %v6776_v46, %v6775_v28  ;;  %v12057_v59 = vadd.f32 %v6774_v19, %v12038_v40 }
 0x77c   :  { %5335 = vadd.xlane.f32.xlu1 %v12057_v59  ;;  %v12061_v51 = vadd.f32 %v6777_v52, %v12038_v40 }
 0x77e   :  { %v6778_v39 = vpop.f32.mrb[44].mxu1  ;;  %5337 = vadd.xlane.f32.xlu0 %v12061_v51 }
 0x77f   :  { %v6779_v58 = vpop.f32.mrb[45].mxu1 }
 0x780   :  { %v6780_v37 = vadd.f32 %v6779_v58, %v6778_v39  ;;  %v6781_v63 = vpop.f32.mrb[46].mxu1 }
 0x781   :  { %v6782_v42 = vpop.f32.mrb[47].mxu1 }
 0x782   :  { %v6783_v20 = vadd.f32 %v6782_v42, %v6781_v63  ;;  %v12065_v57 = vadd.f32 %v6780_v37, %v12038_v40 }
 0x784   :  { %5339 = vadd.xlane.f32.xlu1 %v12065_v57  ;;  %v12069_v32 = vadd.f32 %v6783_v20, %v12038_v40 }
 0x786   :  { %5341 = vadd.xlane.f32.xlu0 %v12069_v32  ;;  %v6784_v33 = vpop.f32.mrb[48].mxu1 }
 0x787   :  { %v6785_v55 = vpop.f32.mrb[49].mxu1 }
 0x788   :  { %v6786_v0 = vadd.f32 %v6785_v55, %v6784_v33  ;;  %v6787_v21 = vpop.f32.mrb[50].mxu1 }
 0x789   :  { %v6788_v3 = vpop.f32.mrb[51].mxu1 }
 0x78a   :  { %v6789_v26 = vadd.f32 %v6788_v3, %v6787_v21  ;;  %v12074_v23 = vadd.f32 %v6786_v0, %v12038_v40 }
 0x78c   :  { %5343 = vadd.xlane.f32.xlu1 %v12074_v23  ;;  %v12078_v49 = vadd.f32 %v6789_v26, %v12038_v40 }
 0x78e   :  { %v6790_v48 = vpop.f32.mrb[52].mxu1  ;;  %5345 = vadd.xlane.f32.xlu0 %v12078_v49 }
 0x78f   :  { %v6791_v35 = vpop.f32.mrb[53].mxu1 }
 0x790   :  { %v6792_v41 = vadd.f32 %v6791_v35, %v6790_v48  ;;  %v6793_v2 = vpop.f32.mrb[54].mxu1 }
 0x791   :  { %v6794_v53 = vpop.f32.mrb[55].mxu1 }
 0x792   :  { %v6795_v47 = vadd.f32 %v6794_v53, %v6793_v2  ;;  %v12082_v11 = vadd.f32 %v6792_v41, %v12038_v40 }
 0x794   :  { %5347 = vadd.xlane.f32.xlu1 %v12082_v11  ;;  %v12086_v29 = vadd.f32 %v6795_v47, %v12038_v40  ;;  %v6840_v31 = vpop.f32.mrb[64].mxu0 }
 0x795   :  { %v6841_v9 = vpop.f32.mrb[65].mxu0 }
 0x796   :  { %5349 = vadd.xlane.f32.xlu0 %v12086_v29  ;;  %v6796_v12 = vpop.f32.mrb[56].mxu1  ;;  %v12105_v56 = vadd.f32 %v6841_v9, %v6840_v31  ;;  %v6843_v16 = vpop.f32.mrb[66].mxu0 }
 0x797   :  { %v6797_v25 = vpop.f32.mrb[57].mxu1  ;;  %v6844_v50 = vpop.f32.mrb[67].mxu0 }
 0x798   :  { %v6798_v22 = vadd.f32 %v6797_v25, %v6796_v12  ;;  %v6799_v6 = vpop.f32.mrb[58].mxu1  ;;  %v12107_v61 = vadd.f32 %v6844_v50, %v6843_v16 }
 0x799   :  { %v6800_v7 = vpop.f32.mrb[59].mxu1 }
 0x79a   :  { %v6801_v4 = vadd.f32 %v6800_v7, %v6799_v6  ;;  %v12090_v8 = vadd.f32 %v6798_v22, %v12038_v40 }
 0x79c   :  { %5351 = vadd.xlane.f32.xlu1 %v12090_v8  ;;  %v12094_v10 = vadd.f32 %v6801_v4, %v12038_v40  ;;  %v6846_v54 = vpop.f32.mrb[68].mxu0 }
 0x79d   :  { %v6847_v24 = vpop.f32.mrb[69].mxu0 }
 0x79e   :  { %v6802_v5 = vpop.f32.mrb[60].mxu1  ;;  %5353 = vadd.xlane.f32.xlu0 %v12094_v10  ;;  %v12109_v60 = vadd.f32 %v6847_v24, %v6846_v54  ;;  %v6849_v13 = vpop.f32.mrb[70].mxu0 }
 0x79f   :  { %v6803_v43 = vpop.f32.mrb[61].mxu1  ;;  %v6850_v44 = vpop.f32.mrb[71].mxu0 }
 0x7a0   :  { %v6804_v30 = vadd.f32 %v6803_v43, %v6802_v5  ;;  %v6805_v14 = vpop.f32.mrb[62].mxu1  ;;  %v12111_v38 = vadd.f32 %v6850_v44, %v6849_v13 }
 0x7a1   :  { %v6806_v1 = vpop.f32.mrb[63].mxu1 }
 0x7a2   :  { %v6807_v45 = vadd.f32 %v6806_v1, %v6805_v14  ;;  %v12098_v18 = vadd.f32 %v6804_v30, %v12038_v40 }
 0x7a4   :  { %5355 = vadd.xlane.f32.xlu1 %v12098_v18  ;;  %v12102_v15 = vadd.f32 %v6807_v45, %v12038_v40  ;;  %v266_v40 = vlaneseq }
 0x7a6   :  { %5357 = vadd.xlane.f32.xlu0 %v12102_v15  ;;  %v267_v19 = vand.u32 127, %v266_v40 }
 0x7a8   :  { %vm268_vm14 = vcmp.lt.s32.totalorder %v267_v19, 32 }
 0x7a9   :  { %v12114_v39 = vsel %vm268_vm14, 1.0, %v7953_v27 }
 0x7f9   :  { %v5328_v28 = vpop.xlane.xlu0 %5327 }
 0x7fa   :  { %v5359_v46 = vmul.f32 0.03125, %v5328_v28 }
 0x7fb   :  { %v5330_v52 = vpop.xlane.xlu1 %5329 }
 0x7fc   :  { %v5375_v58 = vsub.f32 %v12041_v17, %v5359_v46  ;;  %v5360_v37 = vmul.f32 0.03125, %v5330_v52 }
 0x7fe   :  { %v5376_v63 = vsub.f32 %v12045_v36, %v5360_v37  ;;  %v12119_v42 = vmul.f32 %v12114_v39, %v5375_v58 }
 0x800   :  { %v5407_v20 = vmul.f32 %v12119_v42, %v12119_v42  ;;  %v12124_v33 = vmul.f32 %v12114_v39, %v5376_v63 }
 0x801   :  { %v5332_v55 = vpop.xlane.xlu0 %5331 }
 0x802   :  { %v5361_v0 = vmul.f32 0.03125, %v5332_v55  ;;  %5423 = vadd.xlane.f32.xlu1 %v5407_v20  ;;  %v5408_v21 = vmul.f32 %v12124_v33, %v12124_v33 }
 0x804   :  { %v5377_v17 = vsub.f32 %v12049_v62, %v5361_v0  ;;  %5425 = vadd.xlane.f32.xlu0 %v5408_v21 }
 0x805   :  { %v5334_v3 = vpop.xlane.xlu0 %5333 }
 0x806   :  { %v5362_v36 = vmul.f32 0.03125, %v5334_v3  ;;  %v12130_v26 = vmul.f32 %v12114_v39, %v5377_v17 }
 0x808   :  { %v5378_v48 = vsub.f32 %v12053_v34, %v5362_v36  ;;  %v5409_v35 = vmul.f32 %v12130_v26, %v12130_v26 }
 0x809   :  { %v5336_v41 = vpop.xlane.xlu1 %5335 }
 0x80a   :  { %v5363_v2 = vmul.f32 0.03125, %v5336_v41  ;;  %5427 = vadd.xlane.f32.xlu1 %v5409_v35  ;;  %v12136_v53 = vmul.f32 %v12114_v39, %v5378_v48 }
 0x80b   :  { %v5338_v47 = vpop.xlane.xlu0 %5337 }
 0x80c   :  { %v5379_v62 = vsub.f32 %v12057_v59, %v5363_v2  ;;  %v5364_v12 = vmul.f32 0.03125, %v5338_v47  ;;  %v5410_v25 = vmul.f32 %v12136_v53, %v12136_v53 }
 0x80e   :  { %v5380_v22 = vsub.f32 %v12061_v51, %v5364_v12  ;;  %5429 = vadd.xlane.f32.xlu0 %v5410_v25  ;;  %v12143_v34 = vmul.f32 %v12114_v39, %v5379_v62 }
 0x810   :  { %v5411_v6 = vmul.f32 %v12143_v34, %v12143_v34  ;;  %v12148_v7 = vmul.f32 %v12114_v39, %v5380_v22  ;;  %v12205_v22 = vld [vmem:[#allocation20] ss:$0 sm:$0xff] }
 0x811   :  { %v5340_v4 = vpop.xlane.xlu1 %5339 }
 0x812   :  { %v5365_v5 = vmul.f32 0.03125, %v5340_v4  ;;  %5431 = vadd.xlane.f32.xlu1 %v5411_v6  ;;  %v5412_v59 = vmul.f32 %v12148_v7, %v12148_v7 }
 0x813   :  { %v5342_v43 = vpop.xlane.xlu0 %5341 }
 0x814   :  { %v5381_v30 = vsub.f32 %v12065_v57, %v5365_v5  ;;  %v5366_v51 = vmul.f32 0.03125, %v5342_v43  ;;  %5433 = vadd.xlane.f32.xlu0 %v5412_v59  ;;  %v6852_v59 = vpop.f32.mrb[72].mxu0 }
 0x815   :  { %v6853_v43 = vpop.f32.mrb[73].mxu0 }
 0x816   :  { %v5382_v14 = vsub.f32 %v12069_v32, %v5366_v51  ;;  %v12155_v1 = vmul.f32 %v12114_v39, %v5381_v30  ;;  %v12224_v30 = vadd.f32 %v6853_v43, %v6852_v59  ;;  %v6855_v51 = vpop.f32.mrb[74].mxu0 }
 0x818   :  { %v5413_v45 = vmul.f32 %v12155_v1, %v12155_v1  ;;  %v12160_v31 = vmul.f32 %v12114_v39, %v5382_v14  ;;  %v6856_v14 = vpop.f32.mrb[75].mxu0 }
 0x819   :  { %v5344_v9 = vpop.xlane.xlu1 %5343 }
 0x81a   :  { %v5367_v16 = vmul.f32 0.03125, %v5344_v9  ;;  %5435 = vadd.xlane.f32.xlu1 %v5413_v45  ;;  %v5414_v50 = vmul.f32 %v12160_v31, %v12160_v31  ;;  %v12226_v45 = vadd.f32 %v6856_v14, %v6855_v51  ;;  %v6858_v9 = vpop.f32.mrb[76].mxu0 }
 0x81b   :  { %v5346_v57 = vpop.xlane.xlu0 %5345 }
 0x81c   :  { %v5383_v54 = vsub.f32 %v12074_v23, %v5367_v16  ;;  %v5368_v24 = vmul.f32 0.03125, %v5346_v57  ;;  %5437 = vadd.xlane.f32.xlu0 %v5414_v50 }
 0x81e   :  { %v5384_v32 = vsub.f32 %v12078_v49, %v5368_v24  ;;  %v12167_v13 = vmul.f32 %v12114_v39, %v5383_v54 }
 0x820   :  { %v5415_v44 = vmul.f32 %v12167_v13, %v12167_v13  ;;  %v12172_v40 = vmul.f32 %v12114_v39, %v5384_v32 }
 0x821   :  { %v5348_v19 = vpop.xlane.xlu1 %5347 }
 0x822   :  { %v5369_v28 = vmul.f32 0.03125, %v5348_v19  ;;  %5439 = vadd.xlane.f32.xlu1 %v5415_v44  ;;  %v5416_v46 = vmul.f32 %v12172_v40, %v12172_v40 }
 0x823   :  { %v5350_v23 = vpop.xlane.xlu0 %5349 }
 0x824   :  { %v5385_v52 = vsub.f32 %v12082_v11, %v5369_v28  ;;  %v5370_v58 = vmul.f32 0.03125, %v5350_v23  ;;  %5441 = vadd.xlane.f32.xlu0 %v5416_v46 }
 0x826   :  { %v5386_v49 = vsub.f32 %v12086_v29, %v5370_v58  ;;  %v12179_v37 = vmul.f32 %v12114_v39, %v5385_v52 }
 0x828   :  { %v5417_v63 = vmul.f32 %v12179_v37, %v12179_v37  ;;  %v12184_v20 = vmul.f32 %v12114_v39, %v5386_v49 }
 0x829   :  { %v5352_v55 = vpop.xlane.xlu1 %5351 }
 0x82a   :  { %v5371_v0 = vmul.f32 0.03125, %v5352_v55  ;;  %5443 = vadd.xlane.f32.xlu1 %v5417_v63  ;;  %v5418_v21 = vmul.f32 %v12184_v20, %v12184_v20 }
 0x82b   :  { %v5354_v11 = vpop.xlane.xlu0 %5353 }
 0x82c   :  { %v5387_v17 = vsub.f32 %v12090_v8, %v5371_v0  ;;  %v5372_v3 = vmul.f32 0.03125, %v5354_v11  ;;  %5445 = vadd.xlane.f32.xlu0 %v5418_v21 }
 0x82e   :  { %v5388_v29 = vsub.f32 %v12094_v10, %v5372_v3  ;;  %v12191_v36 = vmul.f32 %v12114_v39, %v5387_v17 }
 0x830   :  { %v5419_v48 = vmul.f32 %v12191_v36, %v12191_v36  ;;  %v12196_v35 = vmul.f32 %v12114_v39, %v5388_v29 }
 0x831   :  { %v5356_v41 = vpop.xlane.xlu1 %5355 }
 0x832   :  { %v5373_v2 = vmul.f32 0.03125, %v5356_v41  ;;  %5447 = vadd.xlane.f32.xlu1 %v5419_v48  ;;  %v5420_v47 = vmul.f32 %v12196_v35, %v12196_v35 }
 0x833   :  { %v5358_v8 = vpop.xlane.xlu0 %5357 }
 0x834   :  { %v5389_v62 = vsub.f32 %v12098_v18, %v5373_v2  ;;  %v5374_v12 = vmul.f32 0.03125, %v5358_v8  ;;  %5449 = vadd.xlane.f32.xlu0 %v5420_v47  ;;  %v12216_v18 = vadd.f32 %v12105_v56, %v12205_v22  ;;  %v6859_v56 = vpop.f32.mrb[77].mxu0 }
 0x835   :  { %v12228_v16 = vadd.f32 %v6859_v56, %v6858_v9  ;;  %v6861_v50 = vpop.f32.mrb[78].mxu0 }
 0x836   :  { %v5390_v10 = vsub.f32 %v12102_v15, %v5374_v12  ;;  %v12203_v25 = vmul.f32 %v12114_v39, %v5389_v62  ;;  %v12220_v15 = vadd.f32 %v12107_v61, %v12205_v22  ;;  %v6862_v57 = vpop.f32.mrb[79].mxu0 }
 0x837   :  { %v12230_v61 = vadd.f32 %v6862_v57, %v6861_v50  ;;  %v6864_v54 = vpop.f32.mrb[80].mxu0 }
 0x838   :  { %v5421_v6 = vmul.f32 %v12203_v25, %v12203_v25  ;;  %v12210_v4 = vmul.f32 %v12114_v39, %v5390_v10  ;;  %v6865_v24 = vpop.f32.mrb[81].mxu0 }
 0x839   :  { %v12232_v32 = vadd.f32 %v6865_v24, %v6864_v54  ;;  %v6867_v44 = vpop.f32.mrb[82].mxu0  ;;  %v12248_v54 = vld [vmem:[#allocation22] ss:$0 sm:$0xff] }
 0x83a   :  { %5451 = vadd.xlane.f32.xlu1 %v5421_v6  ;;  %v5422_v5 = vmul.f32 %v12210_v4, %v12210_v4  ;;  %v6868_v19 = vpop.f32.mrb[83].mxu0 }
 0x83b   :  { %v12234_v28 = vadd.f32 %v6868_v19, %v6867_v44  ;;  %v6870_v46 = vpop.f32.mrb[84].mxu0 }
 0x83c   :  { %5453 = vadd.xlane.f32.xlu0 %v5422_v5  ;;  %v6871_v23 = vpop.f32.mrb[85].mxu0 }
 0x83d   :  { %v12236_v52 = vadd.f32 %v6871_v23, %v6870_v46  ;;  %v6873_v58 = vpop.f32.mrb[86].mxu0  ;;  %v12254_v23 = vld [vmem:[%s12670_s18] ss:$0 sm:$0xff]  ;;  %s6321_s18 = sshll.u32 %s7955_s2, 4  ;;  %s6322_s18 = int_to_ptr.vmem [resolvable:$true] %s6321_s18 }
 0x83e   :  { %5581 = vadd.xlane.f32.xlu1 %v12216_v18  ;;  %v6874_v49 = vpop.f32.mrb[87].mxu0  ;;  %s7888_s28 = scalar_lea.vmem %s6322_s18, 128  ;;  %p7893_p1 = scmp.lt.s32.totalorder %s6322_s18, %s6322_s18 }
 0x83f   :  { %v12238_v63 = vadd.f32 %v6874_v49, %v6873_v58  ;;  %v6876_v55 = vpop.f32.mrb[88].mxu0  ;;  %p7889_p0 = scmp.ne.s32.totalorder %s6322_s18, %s7888_s28  ;;  %p7894_p2 = scmp.lt.s32.totalorder %s7888_s28, %s7888_s28 }
 0x840   :  { %5583 = vadd.xlane.f32.xlu0 %v12220_v15  ;;  %v6877_v0 = vpop.f32.mrb[89].mxu0 }
 0x841   :  { %v12240_v21 = vadd.f32 %v6877_v0, %v6876_v55  ;;  %v6879_v11 = vpop.f32.mrb[90].mxu0  ;;  %p7895_p3 = por %p7894_p2, %p7893_p1 }
 0x842   :  { %v6880_v17 = vpop.f32.mrb[91].mxu0 }
 0x843   :  { %v12242_v3 = vadd.f32 %v6880_v17, %v6879_v11  ;;  %v6882_v29 = vpop.f32.mrb[92].mxu0  ;;  %p7896_p4 = pnand %p7895_p3, %p7889_p0 }
 0x844   :  { %v6883_v48 = vpop.f32.mrb[93].mxu0 }
 0x845   :  { %v12244_v41 = vadd.f32 %v6883_v48, %v6882_v29  ;;  %v6885_v2 = vpop.f32.mrb[94].mxu0 }
 0x846   :  { %v6886_v47 = vpop.f32.mrb[95].mxu0 }
 0x847   :  { %v12246_v8 = vadd.f32 %v6886_v47, %v6885_v2 }
 0x88f   :  { %v5424_v62 = vpop.xlane.xlu1 %5423 }
 0x890   :  { %v5455_v12 = vmul.f32 0.03125, %v5424_v62 }
 0x891   :  { %v5426_v10 = vpop.xlane.xlu0 %5425 }
 0x892   :  { %v5471_v6 = vadd.f32 1e-05, %v5455_v12  ;;  %v5456_v5 = vmul.f32 0.03125, %v5426_v10 }
 0x894   :  { %7499 = vrsqrt.f32 %v5471_v6  ;;  %v5472_v59 = vadd.f32 1e-05, %v5456_v5 }
 0x896   :  { %7501 = vrsqrt.f32 %v5472_v59 }
 0x897   :  { %v5428_v43 = vpop.xlane.xlu1 %5427 }
 0x898   :  { %v5457_v51 = vmul.f32 0.03125, %v5428_v43 }
 0x89a   :  { %v5473_v14 = vadd.f32 1e-05, %v5457_v51 }
 0x89b   :  { %v5430_v9 = vpop.xlane.xlu0 %5429 }
 0x89c   :  { %7503 = vrsqrt.f32 %v5473_v14  ;;  %v5458_v56 = vmul.f32 0.03125, %v5430_v9 }
 0x89e   :  { %v7500_v50 = vpop.eup %7499  ;;  %v5474_v57 = vadd.f32 1e-05, %v5458_v56 }
 0x89f   :  { %v5432_v24 = vpop.xlane.xlu1 %5431  ;;  %v5503_v44 = vmul.f32 %v7500_v50, %v12119_v42 }
 0x8a0   :  { %v7502_v19 = vpop.eup %7501  ;;  %7505 = vrsqrt.f32 %v5474_v57  ;;  %v5459_v46 = vmul.f32 0.03125, %v5432_v24 }
 0x8a1   :  { %v5434_v58 = vpop.xlane.xlu0 %5433  ;;  %v5504_v49 = vmul.f32 %v7502_v19, %v12124_v33  ;;  %v5526_v55 = vmul.f32 %v12248_v54, %v5503_v44 }
 0x8a2   :  { %v5475_v0 = vadd.f32 1e-05, %v5459_v46  ;;  %v5460_v11 = vmul.f32 0.03125, %v5434_v58 }
 0x8a3   :  { %v5527_v17 = vmul.f32 %v12248_v54, %v5504_v49  ;;  %v5549_v29 = vadd.f32 %v12254_v23, %v5526_v55 }
 0x8a4   :  { %7507 = vrsqrt.f32 %v5475_v0  ;;  %v5476_v42 = vadd.f32 1e-05, %v5460_v11 }
 0x8a5   :  { %v5550_v48 = vadd.f32 %v12254_v23, %v5527_v17  ;;  %v5565_v62 = vmax.f32 %v5549_v29, 0.0 }
 0x8a6   :  { %v7504_v2 = vpop.eup %7503  ;;  %7509 = vrsqrt.f32 %v5476_v42 }
 0x8a7   :  { %v5436_v47 = vpop.xlane.xlu1 %5435  ;;  %v5566_v12 = vmax.f32 %v5550_v48, 0.0  ;;  %v5505_v10 = vmul.f32 %v7504_v2, %v12130_v26 }
 0x8a8   :  { %v5461_v33 = vmul.f32 0.03125, %v5436_v47 }
 0x8a9   :  { %v5438_v6 = vpop.xlane.xlu0 %5437  ;;  %v5835_v5 = vpack.c.bf16 %v5566_v12, %v5565_v62  ;;  %v5528_v59 = vmul.f32 %v12248_v54, %v5505_v10 }
 0x8aa   :  { %v7506_v43 = vpop.eup %7505  ;;  %v5477_v51 = vadd.f32 1e-05, %v5461_v33  ;;  %v5462_v14 = vmul.f32 0.03125, %v5438_v6 }
 0x8ab   :  { %7041 = vmatprep.subr.bf16.mxu1 %v5835_v5  ;;  %v5506_v9 = vmul.f32 %v7506_v43, %v12136_v53  ;;  %v5551_v57 = vadd.f32 %v12254_v23, %v5528_v59 }
 0x8ac   :  { %7511 = vrsqrt.f32 %v5477_v51  ;;  %v5478_v56 = vadd.f32 1e-05, %v5462_v14  ;;  %7042 = vmatpush3.bf16.msra.mxu1 %v5835_v5 }
 0x8ad   :  { %v5529_v50 = vmul.f32 %v12248_v54, %v5506_v9  ;;  %v5567_v55 = vmax.f32 %v5551_v57, 0.0 }
 0x8ae   :  { %v7508_v24 = vpop.eup %7507  ;;  %7513 = vrsqrt.f32 %v5478_v56 }
 0x8af   :  { %v5440_v26 = vpop.xlane.xlu1 %5439  ;;  %v5552_v44 = vadd.f32 %v12254_v23, %v5529_v50  ;;  %v5507_v19 = vmul.f32 %v7508_v24, %v12143_v34 }
 0x8b0   :  { %v7510_v46 = vpop.eup %7509  ;;  %v5463_v58 = vmul.f32 0.03125, %v5440_v26 }
 0x8b1   :  { %v5442_v49 = vpop.xlane.xlu0 %5441  ;;  %v5568_v0 = vmax.f32 %v5552_v44, 0.0  ;;  %v5508_v53 = vmul.f32 %v7510_v46, %v12148_v7  ;;  %v5530_v11 = vmul.f32 %v12248_v54, %v5507_v19 }
 0x8b2   :  { %v5479_v17 = vadd.f32 1e-05, %v5463_v58  ;;  %v5464_v29 = vmul.f32 0.03125, %v5442_v49 }
 0x8b3   :  { %v5836_v42 = vpack.c.bf16 %v5568_v0, %v5567_v55  ;;  %v5531_v48 = vmul.f32 %v12248_v54, %v5508_v53  ;;  %v5553_v2 = vadd.f32 %v12254_v23, %v5530_v11 }
 0x8b4   :  { %7515 = vrsqrt.f32 %v5479_v17  ;;  %v5480_v47 = vadd.f32 1e-05, %v5464_v29 }
 0x8b5   :  { %7043 = vmatprep.subr.bf16.mxu1 %v5836_v42  ;;  %v5554_v34 = vadd.f32 %v12254_v23, %v5531_v48  ;;  %v5569_v10 = vmax.f32 %v5553_v2, 0.0 }
 0x8b6   :  { %v7512_v62 = vpop.eup %7511  ;;  %7517 = vrsqrt.f32 %v5480_v47  ;;  %7044 = vmatpush3.bf16.msra.mxu1 %v5836_v42 }
 0x8b7   :  { %v5444_v12 = vpop.xlane.xlu1 %5443  ;;  %v5570_v7 = vmax.f32 %v5554_v34, 0.0  ;;  %v5509_v33 = vmul.f32 %v7512_v62, %v12155_v1 }
 0x8b8   :  { %v7514_v6 = vpop.eup %7513  ;;  %v5465_v5 = vmul.f32 0.03125, %v5444_v12 }
 0x8b9   :  { %v5446_v59 = vpop.xlane.xlu0 %5445  ;;  %v5837_v43 = vpack.c.bf16 %v5570_v7, %v5569_v10  ;;  %v5510_v51 = vmul.f32 %v7514_v6, %v12160_v31  ;;  %v5532_v14 = vmul.f32 %v12248_v54, %v5509_v33 }
 0x8ba   :  { %v5481_v9 = vadd.f32 1e-05, %v5465_v5  ;;  %v5466_v56 = vmul.f32 0.03125, %v5446_v59 }
 0x8bb   :  { %7045 = vmatprep.subr.bf16.mxu1 %v5837_v43  ;;  %v5533_v50 = vmul.f32 %v12248_v54, %v5510_v51  ;;  %v5555_v57 = vadd.f32 %v12254_v23, %v5532_v14 }
 0x8bc   :  { %7519 = vrsqrt.f32 %v5481_v9  ;;  %v5482_v24 = vadd.f32 1e-05, %v5466_v56  ;;  %7046 = vmatpush3.bf16.msra.mxu1 %v5837_v43 }
 0x8bd   :  { %v5556_v1 = vadd.f32 %v12254_v23, %v5533_v50  ;;  %v5571_v19 = vmax.f32 %v5555_v57, 0.0 }
 0x8be   :  { %v7516_v26 = vpop.eup %7515  ;;  %7521 = vrsqrt.f32 %v5482_v24 }
 0x8bf   :  { %v5448_v44 = vpop.xlane.xlu1 %5447  ;;  %v5572_v46 = vmax.f32 %v5556_v1, 0.0  ;;  %v5511_v31 = vmul.f32 %v7516_v26, %v12167_v13 }
 0x8c0   :  { %v7518_v58 = vpop.eup %7517  ;;  %v5467_v49 = vmul.f32 0.03125, %v5448_v44 }
 0x8c1   :  { %v5450_v55 = vpop.xlane.xlu0 %5449  ;;  %v5838_v0 = vpack.c.bf16 %v5572_v46, %v5571_v19  ;;  %v5512_v53 = vmul.f32 %v7518_v58, %v12172_v40  ;;  %v5534_v11 = vmul.f32 %v12248_v54, %v5511_v31 }
 0x8c2   :  { %v5483_v17 = vadd.f32 1e-05, %v5467_v49  ;;  %v5468_v29 = vmul.f32 0.03125, %v5450_v55 }
 0x8c3   :  { %7047 = vmatprep.subr.bf16.mxu1 %v5838_v0  ;;  %v5535_v42 = vmul.f32 %v12248_v54, %v5512_v53  ;;  %v5557_v48 = vadd.f32 %v12254_v23, %v5534_v11 }
 0x8c4   :  { %7523 = vrsqrt.f32 %v5483_v17  ;;  %v5484_v2 = vadd.f32 1e-05, %v5468_v29  ;;  %7048 = vmatpush3.bf16.msra.mxu1 %v5838_v0 }
 0x8c5   :  { %v5558_v13 = vadd.f32 %v12254_v23, %v5535_v42  ;;  %v5573_v62 = vmax.f32 %v5557_v48, 0.0  ;;  %v12311_v42 = vadd.f32 %v12109_v60, %v12205_v22 }
 0x8c6   :  { %v7520_v47 = vpop.eup %7519  ;;  %7525 = vrsqrt.f32 %v5484_v2 }
 0x8c7   :  { %v5452_v34 = vpop.xlane.xlu1 %5451  ;;  %v5574_v12 = vmax.f32 %v5558_v13, 0.0  ;;  %v5513_v40 = vmul.f32 %v7520_v47, %v12179_v37 }
 0x8c8   :  { %v7522_v10 = vpop.eup %7521  ;;  %v5469_v7 = vmul.f32 0.03125, %v5452_v34  ;;  %v12317_v34 = vadd.f32 %v12111_v38, %v12205_v22 }
 0x8c9   :  { %v5454_v33 = vpop.xlane.xlu0 %5453  ;;  %v5839_v6 = vpack.c.bf16 %v5574_v12, %v5573_v62  ;;  %v5514_v5 = vmul.f32 %v7522_v10, %v12184_v20  ;;  %v5536_v59 = vmul.f32 %v12248_v54, %v5513_v40  ;;  %v12321_v62 = vadd.f32 %v12224_v30, %v12205_v22 }
 0x8ca   :  { %v5485_v43 = vadd.f32 1e-05, %v5469_v7  ;;  %v5470_v51 = vmul.f32 0.03125, %v5454_v33  ;;  %v12335_v30 = vadd.f32 %v12228_v16, %v12205_v22  ;;  %v12351_v16 = vadd.f32 %v12234_v28, %v12205_v22 }
 0x8cb   :  { %7049 = vmatprep.subr.bf16.mxu1 %v5839_v6  ;;  %v5582_v14 = vpop.xlane.xlu1 %5581  ;;  %v5537_v9 = vmul.f32 %v12248_v54, %v5514_v5  ;;  %v5559_v56 = vadd.f32 %v12254_v23, %v5536_v59  ;;  %v12366_v28 = vadd.f32 %v12240_v21, %v12205_v22  ;;  %v7574_v5 = vld [vmem:[#allocation14 + $0x10] sm:$0xff]   ;;  %v12381_v21 = vadd.f32 %v12246_v8, %v12205_v22  ;;  %v7575_v59 = vld [vmem:[#allocation14 + $0x18] sm:$0xff]  }
 0x8cc   :  { %7527 = vrsqrt.f32 %v5485_v43  ;;  %v5486_v50 = vadd.f32 1e-05, %v5470_v51  ;;  %v5613_v57 = vmul.f32 0.03125, %v5582_v14  ;;  %7050 = vmatpush3.bf16.msra.mxu1 %v5839_v6  ;;  %v7576_v43 = vld [vmem:[#allocation14 + $0x20] sm:$0xff]   ;;  %v7578_v51 = vld [vmem:[#allocation14 + $0x30] sm:$0xff]  }
 0x8cd   :  { %v5584_v37 = vpop.xlane.xlu0 %5583  ;;  %v5560_v24 = vadd.f32 %v12254_v23, %v5537_v9  ;;  %v5575_v44 = vmax.f32 %v5559_v56, 0.0  ;;  %v7347_v14 = vld [vmem:[#allocation23 + $0x40] sm:$0xff]   ;;  %v7349_v56 = vld [vmem:[#allocation23 + $0x48] sm:$0xff]   ;;  %v7351_v8 = vld [vmem:[#allocation23 + $0x50] sm:$0xff]  }
 0x8ce   :  { %v7524_v1 = vpop.eup %7523  ;;  %7529 = vrsqrt.f32 %v5486_v50  ;;  %v5629_v20 = vsub.f32 %v12216_v18, %v5613_v57  ;;  %v5614_v26 = vmul.f32 0.03125, %v5584_v37  ;;  %v7348_v9 = vld [vmem:[#allocation23] sm:$0xff]   ;;  %v7352_v50 = vld [vmem:[#allocation23 + $0x10] sm:$0xff]   ;;  %v7353_v57 = vld [vmem:[#allocation23 + $0x58] sm:$0xff]  }
 0x8cf   :  { %v5576_v19 = vmax.f32 %v5560_v24, 0.0  ;;  %v5515_v46 = vmul.f32 %v7524_v1, %v12191_v36  ;;  %v7354_v37 = vld [vmem:[#allocation23 + $0x18] sm:$0xff]   ;;  %v7355_v24 = vld [vmem:[#allocation23 + $0x60] sm:$0xff]  }
 0x8d0   :  { %v7526_v31 = vpop.eup %7525  ;;  %v5630_v58 = vsub.f32 %v12220_v15, %v5614_v26  ;;  %v12295_v49 = vmul.f32 %v12114_v39, %v5629_v20  ;;  %v7356_v1 = vld [vmem:[#allocation23 + $0x20] sm:$0xff]   ;;  %v7357_v20 = vld [vmem:[#allocation23 + $0x68] sm:$0xff]  }
 0x8d1   :  { %v5840_v55 = vpack.c.bf16 %v5576_v19, %v5575_v44  ;;  %v5516_v0 = vmul.f32 %v7526_v31, %v12196_v35  ;;  %v5538_v53 = vmul.f32 %v12248_v54, %v5515_v46  ;;  %v7358_v26 = vld [vmem:[#allocation23 + $0x28] sm:$0xff]   ;;  %v7359_v44 = vld [vmem:[#allocation23 + $0x70] sm:$0xff]   ;;  %v7361_v46 = vld [vmem:[#allocation23 + $0x78] sm:$0xff]  }
 0x8d2   :  { %v5661_v11 = vmul.f32 %v12295_v49, %v12295_v49  ;;  %v12302_v18 = vmul.f32 %v12114_v39, %v5630_v58  ;;  %v7360_v19 = vld [vmem:[#allocation23 + $0x30] sm:$0xff]   ;;  %v7362_v31 = vld [vmem:[#allocation23 + $0x38] sm:$0xff]  }
 0x8d3   :  { %7051 = vmatprep.subr.bf16.mxu1 %v5840_v55  ;;  %v5539_v36 = vmul.f32 %v12248_v54, %v5516_v0  ;;  %v5561_v17 = vadd.f32 %v12254_v23, %v5538_v53 }
 0x8d4   :  { %7052 = vmatpush3.bf16.msra.mxu1 %v5840_v55  ;;  %5677 = vadd.xlane.f32.xlu1 %v5661_v11  ;;  %v5662_v15 = vmul.f32 %v12302_v18, %v12302_v18 }
 0x8d5   :  { %v5562_v35 = vadd.f32 %v12254_v23, %v5539_v36  ;;  %v5577_v48 = vmax.f32 %v5561_v17, 0.0 }
 0x8d6   :  { %v7528_v29 = vpop.eup %7527  ;;  %5679 = vadd.xlane.f32.xlu0 %v5662_v15 }
 0x8d7   :  { %v5578_v2 = vmax.f32 %v5562_v35, 0.0  ;;  %v5517_v13 = vmul.f32 %v7528_v29, %v12203_v25  ;;  %v12328_v25 = vadd.f32 %v12226_v45, %v12205_v22  ;;  %v12341_v45 = vadd.f32 %v12230_v61, %v12205_v22 }
 0x8d8   :  { %v7530_v47 = vpop.eup %7529  ;;  %5585 = vadd.xlane.f32.xlu1 %v12311_v42  ;;  %v12356_v61 = vadd.f32 %v12236_v52, %v12205_v22  ;;  %v12371_v52 = vadd.f32 %v12242_v3, %v12205_v22  ;;  %v7577_v3 = vld [vmem:[#allocation14 + $0x28] sm:$0xff]  }
 0x8d9   :  { %v5841_v12 = vpack.c.bf16 %v5578_v2, %v5577_v48  ;;  %v5518_v40 = vmul.f32 %v7530_v47, %v12210_v4  ;;  %v5540_v60 = vmul.f32 %v12248_v54, %v5517_v13 }
 0x8da   :  { %5587 = vadd.xlane.f32.xlu0 %v12317_v34 }
 0x8db   :  { %7053 = vmatprep.subr.bf16.mxu1 %v5841_v12  ;;  %v5541_v10 = vmul.f32 %v12248_v54, %v5518_v40  ;;  %v5563_v38 = vadd.f32 %v12254_v23, %v5540_v60  ;;  %v12346_v54 = vadd.f32 %v12232_v32, %v12205_v22  ;;  %v12361_v32 = vadd.f32 %v12238_v63, %v12205_v22 }
 0x8dc   :  { %7054 = vmatpush3.bf16.msra.mxu1 %v5841_v12  ;;  %5589 = vadd.xlane.f32.xlu1 %v12321_v62  ;;  %v12376_v63 = vadd.f32 %v12244_v41, %v12205_v22  ;;  %v7579_v41 = vld [vmem:[#allocation14 + $0x38] sm:$0xff]   ;;  %v7350_v22 = vld [vmem:[#allocation23 + $0x8] sm:$0xff]  }
 0x8dd   :  { %v5564_v4 = vadd.f32 %v12254_v23, %v5541_v10  ;;  %v5579_v7 = vmax.f32 %v5563_v38, 0.0  ;;  %v7573_v23 = vld [vmem:[#allocation14 + $0x8] sm:$0xff]  }
 0x8de   :  { %5591 = vadd.xlane.f32.xlu0 %v12328_v25 }
 0x8df   :  { %v5580_v33 = vmax.f32 %v5564_v4, 0.0  ;;  %v12401_v4 = vld [vmem:[%s12671_s19] ss:$0 sm:$0xff] }
 0x8e0   :  { %5593 = vadd.xlane.f32.xlu1 %v12335_v30 }
 0x8e1   :  { %v5842_v6 = vpack.c.bf16 %v5580_v33, %v5579_v7 }
 0x8e2   :  { %5595 = vadd.xlane.f32.xlu0 %v12341_v45 }
 0x8e3   :  { %7055 = vmatprep.subr.bf16.mxu1 %v5842_v6 }
 0x8e4   :  { %7056 = vmatpush3.bf16.msra.mxu1 %v5842_v6  ;;  %5597 = vadd.xlane.f32.xlu1 %v12346_v54 }
 0x8e5   :  { %6904 = vmatprep.subr.bf16.mxu1 %v7347_v14 }
 0x8e6   :  { %5599 = vadd.xlane.f32.xlu0 %v12351_v16 }
 0x8e7   :  { %7058 = vmatmul.mubr.bf16.vlgmr.msra.gmra.mrb[64].mxu1 %v7573_v23 }
 0x8e8   :  { %5601 = vadd.xlane.f32.xlu1 %v12356_v61  ;;  %7061 = vmatprep.mubr.bf16.mxu1 %v7574_v5 }
 0x8e9   :  { %6905 = vmatpush3.bf16.msra.mxu1 %v7348_v9 }
 0x8ea   :  { %5603 = vadd.xlane.f32.xlu0 %v12361_v32  ;;  %6906 = vmatprep.subr.bf16.mxu1 %v7349_v56 }
 0x8ec   :  { %5605 = vadd.xlane.f32.xlu1 %v12366_v28 }
 0x8ed   :  { %6907 = vmatpush3.bf16.msra.mxu1 %v7350_v22 }
 0x8ee   :  { %5607 = vadd.xlane.f32.xlu0 %v12371_v52  ;;  %6908 = vmatprep.subr.bf16.mxu1 %v7351_v8 }
 0x8ef   :  { %7062 = vmatmul.mubr.bf16.gmra.mrb[68].mxu1 %v7575_v59 }
 0x8f0   :  { %5609 = vadd.xlane.f32.xlu1 %v12376_v63  ;;  %7065 = vmatprep.mubr.bf16.mxu1 %v7576_v43 }
 0x8f1   :  { %6909 = vmatpush3.bf16.msra.mxu1 %v7352_v50 }
 0x8f2   :  { %5611 = vadd.xlane.f32.xlu0 %v12381_v21  ;;  %6910 = vmatprep.subr.bf16.mxu1 %v7353_v57 }
 0x8f5   :  { %6911 = vmatpush3.bf16.msra.mxu1 %v7354_v37 }
 0x8f6   :  { %6912 = vmatprep.subr.bf16.mxu1 %v7355_v24 }
 0x8f7   :  { %7066 = vmatmul.mubr.bf16.gmra.mrb[72].mxu1 %v7577_v3 }
 0x8f8   :  { %7069 = vmatprep.mubr.bf16.mxu1 %v7578_v51 }
 0x8f9   :  { %6913 = vmatpush3.bf16.msra.mxu1 %v7356_v1 }
 0x8fa   :  { %6914 = vmatprep.subr.bf16.mxu1 %v7357_v20 }
 0x8fd   :  { %6915 = vmatpush3.bf16.msra.mxu1 %v7358_v26 }
 0x8fe   :  { %6916 = vmatprep.subr.bf16.mxu1 %v7359_v44 }
 0x8ff   :  { %7070 = vmatmul.mubr.bf16.gmra.mrb[76].mxu1 %v7579_v41 }
 0x901   :  { %6917 = vmatpush3.bf16.msra.mxu1 %v7360_v19 }
 0x902   :  { %6918 = vmatprep.subr.bf16.mxu1 %v7361_v46 }
 0x905   :  { %6919 = vmatpush3.bf16.msra.mxu1 %v7362_v31 }
 0x961   :  { %v5678_v58 = vpop.xlane.xlu1 %5677 }
 0x962   :  { %v5709_v55 = vmul.f32 0.03125, %v5678_v58 }
 0x963   :  { %v5680_v0 = vpop.xlane.xlu0 %5679 }
 0x964   :  { %v5725_v53 = vadd.f32 1e-05, %v5709_v55  ;;  %v5710_v11 = vmul.f32 0.03125, %v5680_v0 }
 0x965   :  { %v5586_v36 = vpop.xlane.xlu1 %5585 }
 0x966   :  { %7531 = vrsqrt.f32 %v5725_v53  ;;  %v5726_v17 = vadd.f32 1e-05, %v5710_v11  ;;  %v5615_v15 = vmul.f32 0.03125, %v5586_v36 }
 0x968   :  { %7533 = vrsqrt.f32 %v5726_v17  ;;  %v5631_v35 = vsub.f32 %v12311_v42, %v5615_v15 }
 0x969   :  { %v5590_v29 = vpop.xlane.xlu1 %5589 }
 0x96a   :  { %v5617_v48 = vmul.f32 0.03125, %v5590_v29  ;;  %v12387_v2 = vmul.f32 %v12114_v39, %v5631_v35 }
 0x96c   :  { %v5633_v13 = vsub.f32 %v12321_v62, %v5617_v48  ;;  %v5663_v47 = vmul.f32 %v12387_v2, %v12387_v2 }
 0x96d   :  { %v5594_v12 = vpop.xlane.xlu1 %5593 }
 0x96e   :  { %v5619_v40 = vmul.f32 0.03125, %v5594_v12  ;;  %5681 = vadd.xlane.f32.xlu0 %v5663_v47  ;;  %v12393_v60 = vmul.f32 %v12114_v39, %v5633_v13 }
 0x970   :  { %v7532_v10 = vpop.eup %7531  ;;  %v5635_v38 = vsub.f32 %v12335_v30, %v5619_v40  ;;  %v5665_v42 = vmul.f32 %v12393_v60, %v12393_v60  ;;  %v12410_v30 = vld [vmem:[%s12672_s20] ss:$0 sm:$0xff] }
 0x971   :  { %v5598_v62 = vpop.xlane.xlu1 %5597  ;;  %v5757_v7 = vmul.f32 %v7532_v10, %v12295_v49 }
 0x972   :  { %v7534_v33 = vpop.eup %7533  ;;  %v5621_v6 = vmul.f32 0.03125, %v5598_v62  ;;  %5685 = vadd.xlane.f32.xlu0 %v5665_v42  ;;  %v12405_v23 = vmul.f32 %v12114_v39, %v5635_v38 }
 0x973   :  { %v5758_v5 = vmul.f32 %v7534_v33, %v12302_v18  ;;  %v5780_v59 = vmul.f32 %v12401_v4, %v5757_v7 }
 0x974   :  { %v5637_v43 = vsub.f32 %v12346_v54, %v5621_v6  ;;  %v5667_v49 = vmul.f32 %v12405_v23, %v12405_v23 }
 0x975   :  { %v5602_v3 = vpop.xlane.xlu1 %5601  ;;  %v5781_v51 = vmul.f32 %v12401_v4, %v5758_v5  ;;  %v5803_v41 = vadd.f32 %v12410_v30, %v5780_v59  ;;  %v5588_v59 = vpop.xlane.xlu0 %5587 }
 0x976   :  { %v5623_v14 = vmul.f32 0.03125, %v5602_v3  ;;  %5689 = vadd.xlane.f32.xlu0 %v5667_v49  ;;  %v12420_v9 = vmul.f32 %v12114_v39, %v5637_v43  ;;  %v5616_v3 = vmul.f32 0.03125, %v5588_v59 }
 0x977   :  { %v5804_v56 = vadd.f32 %v12410_v30, %v5781_v51  ;;  %v5819_v8 = vmax.f32 %v5803_v41, 0.0 }
 0x978   :  { %v5639_v18 = vsub.f32 %v12356_v61, %v5623_v14  ;;  %v5669_v54 = vmul.f32 %v12420_v9, %v12420_v9  ;;  %v5632_v41 = vsub.f32 %v12317_v34, %v5616_v3 }
 0x979   :  { %v5606_v22 = vpop.xlane.xlu1 %5605  ;;  %v5820_v50 = vmax.f32 %v5804_v56, 0.0  ;;  %v5592_v43 = vpop.xlane.xlu0 %5591 }
 0x97a   :  { %v5625_v57 = vmul.f32 0.03125, %v5606_v22  ;;  %5693 = vadd.xlane.f32.xlu0 %v5669_v54  ;;  %v12427_v37 = vmul.f32 %v12114_v39, %v5639_v18  ;;  %v5618_v14 = vmul.f32 0.03125, %v5592_v43  ;;  %v6572_v54 = vld [vmem:[%s12674_s22] ss:$0 sm:$0xff] }
 0x97b   :  { %v5843_v24 = vpack.c.bf16 %v5820_v50, %v5819_v8 }
 0x97c   :  { %v5641_v1 = vsub.f32 %v12366_v28, %v5625_v57  ;;  %v5671_v20 = vmul.f32 %v12427_v37, %v12427_v37  ;;  %v5634_v57 = vsub.f32 %v12328_v25, %v5618_v14 }
 0x97d   :  { %6123 = vmatprep.mubr.bf16.mxu1 %v5843_v24  ;;  %v5610_v26 = vpop.xlane.xlu1 %5609  ;;  %v5596_v49 = vpop.xlane.xlu0 %5595 }
 0x97e   :  { %v5627_v61 = vmul.f32 0.03125, %v5610_v26  ;;  %5697 = vadd.xlane.f32.xlu0 %v5671_v20  ;;  %v12433_v44 = vmul.f32 %v12114_v39, %v5641_v1  ;;  %v5620_v24 = vmul.f32 0.03125, %v5596_v49  ;;  %v12491_v20 = vmul.f32 %v12114_v39, %v5632_v41 }
 0x980   :  { %v5643_v19 = vsub.f32 %v12376_v63, %v5627_v61  ;;  %v5673_v46 = vmul.f32 %v12433_v44, %v12433_v44  ;;  %v5636_v34 = vsub.f32 %v12341_v45, %v5620_v24 }
 0x981   :  { %v5600_v51 = vpop.xlane.xlu0 %5599 }
 0x982   :  { %5701 = vadd.xlane.f32.xlu0 %v5673_v46  ;;  %v12439_v31 = vmul.f32 %v12114_v39, %v5643_v19  ;;  %v5622_v61 = vmul.f32 0.03125, %v5600_v51  ;;  %v5664_v19 = vmul.f32 %v12491_v20, %v12491_v20  ;;  %v12497_v46 = vmul.f32 %v12114_v39, %v5634_v57  ;;  %v7366_v57 = vld [vmem:[%s12677_s25 + $0x18] sm:$0xff]  }
 0x984   :  { %v5675_v28 = vmul.f32 %v12439_v31, %v12439_v31  ;;  %v5638_v25 = vsub.f32 %v12351_v16, %v5622_v61 }
 0x985   :  { %v5604_v26 = vpop.xlane.xlu0 %5603 }
 0x986   :  { %5705 = vadd.xlane.f32.xlu0 %v5675_v28  ;;  %v12509_v49 = vmul.f32 %v12114_v39, %v5638_v25 }
 0x988   :  { %v5670_v41 = vmul.f32 %v12509_v49, %v12509_v49 }
 0x989   :  { %v5608_v28 = vpop.xlane.xlu0 %5607 }
 0x98a   :  { %v5626_v59 = vmul.f32 0.03125, %v5608_v28 }
 0x98c   :  { %v5642_v16 = vsub.f32 %v12371_v52, %v5626_v59 }
 0x98d   :  { %v5612_v3 = vpop.xlane.xlu0 %5611 }
 0x98e   :  { %v5628_v51 = vmul.f32 0.03125, %v5612_v3 }
 0x9ba   :  { %v12443_v58 = vpop.f32.mrb[64].mxu1 }
 0x9bb   :  { %v5885_v55 = vpop.f32.mrb[65].mxu1 }
 0x9bc   :  { %v12445_v0 = vpop.f32.mrb[66].mxu1 }
 0x9bd   :  { %v5949_v53 = vpack.c.bf16 %v12445_v0, %v12443_v58  ;;  %v5888_v63 = vpop.f32.mrb[67].mxu1 }
 0x9be   :  { %v5948_v11 = vpack.c.bf16 %v5888_v63, %v5885_v55  ;;  %v5624_v55 = vmul.f32 0.03125, %v5604_v26  ;;  %v5666_v63 = vmul.f32 %v12497_v46, %v12497_v46 }
 0x9c0   :  { %6124 = vmatmul.mubr.bf16.vlgmr.msra.gmra.mrb[80].mxu1 %v5948_v11  ;;  %v12503_v11 = vmul.f32 %v12114_v39, %v5636_v34  ;;  %v5640_v45 = vsub.f32 %v12361_v32, %v5624_v55  ;;  %v5644_v32 = vsub.f32 %v12381_v21, %v5628_v51  ;;  %v7363_v21 = vld [vmem:[%s12677_s25] sm:$0xff]  }
 0x9c1   :  { %7074 = vmatpush3.bf16.msra.mxu0 %v7363_v21 }
 0x9c2   :  { %v12449_v36 = vpop.f32.mrb[68].mxu1  ;;  %v5668_v43 = vmul.f32 %v12503_v11, %v12503_v11  ;;  %v12515_v14 = vmul.f32 %v12114_v39, %v5640_v45  ;;  %7075 = vmatprep.subr.bf16.mxu0 %v7953_v27 }
 0x9c3   :  { %v12451_v17 = vpop.f32.mrb[69].mxu1 }
 0x9c4   :  { %v12453_v15 = vpop.f32.mrb[70].mxu1 }
 0x9c5   :  { %v5951_v35 = vpack.c.bf16 %v12453_v15, %v12449_v36  ;;  %v12457_v29 = vpop.f32.mrb[71].mxu1 }
 0x9c6   :  { %v5950_v48 = vpack.c.bf16 %v12457_v29, %v12451_v17  ;;  %v7368_v17 = vld [vmem:[%s12677_s25 + $0x28] sm:$0xff]  }
 0x9ca   :  { %v12461_v13 = vpop.f32.mrb[72].mxu1 }
 0x9cb   :  { %v12463_v47 = vpop.f32.mrb[73].mxu1 }
 0x9cc   :  { %v12465_v12 = vpop.f32.mrb[74].mxu1 }
 0x9cd   :  { %v5953_v40 = vpack.c.bf16 %v12465_v12, %v12461_v13  ;;  %v12469_v10 = vpop.f32.mrb[75].mxu1 }
 0x9ce   :  { %v5952_v38 = vpack.c.bf16 %v12469_v10, %v12463_v47 }
 0x9d2   :  { %v12473_v42 = vpop.f32.mrb[76].mxu1 }
 0x9d3   :  { %v12475_v62 = vpop.f32.mrb[77].mxu1 }
 0x9d4   :  { %v12477_v7 = vpop.f32.mrb[78].mxu1 }
 0x9d5   :  { %v5955_v33 = vpack.c.bf16 %v12477_v7, %v12473_v42  ;;  %v12481_v6 = vpop.f32.mrb[79].mxu1 }
 0x9d6   :  { %v5954_v5 = vpack.c.bf16 %v12481_v6, %v12475_v62 }
 0x9fb   :  { %v5682_v24 = vpop.xlane.xlu0 %5681 }
 0x9fc   :  { %v5711_v26 = vmul.f32 0.03125, %v5682_v24 }
 0x9fe   :  { %v5727_v61 = vadd.f32 1e-05, %v5711_v26 }
 0x9ff   :  { %v5686_v34 = vpop.xlane.xlu0 %5685 }
 0xa00   :  { %7535 = vrsqrt.f32 %v5727_v61 }
 0xa03   :  { %v5690_v28 = vpop.xlane.xlu0 %5689 }
 0xa04   :  { %v5715_v45 = vmul.f32 0.03125, %v5690_v28 }
 0xa06   :  { %v5731_v51 = vadd.f32 1e-05, %v5715_v45 }
 0xa0a   :  { %v7536_v21 = vpop.eup %7535 }
 0xa93   :  { %v6920_v56 = vpop.f32.mrb[80].mxu1 }
 0xa94   :  { %v6921_v18 = vpop.f32.mrb[81].mxu1 }
 0xa95   :  { %v6922_v22 = vadd.f32 %v6921_v18, %v6920_v56  ;;  %v6923_v8 = vpop.f32.mrb[82].mxu1  ;;  %v5672_v56 = vmul.f32 %v12515_v14, %v12515_v14  ;;  %v12521_v18 = vmul.f32 %v12114_v39, %v5642_v16 }
 0xa96   :  { %v6924_v50 = vpop.f32.mrb[83].mxu1  ;;  %v7364_v8 = vld [vmem:[%s12677_s25 + $0x8] sm:$0xff]  }
 0xa97   :  { %v6126_v1 = vadd.f32 %v6922_v22, %v6572_v54  ;;  %v5674_v52 = vmul.f32 %v12521_v18, %v12521_v18  ;;  %v12526_v54 = vmul.f32 %v12114_v39, %v5644_v32  ;;  %7076 = vmatpush3.bf16.msra.mxu0 %v7364_v8  ;;  %v7365_v50 = vld [vmem:[%s12677_s25 + $0x10] sm:$0xff]  }
 0xa98   :  { %7077 = vmatprep.subr.bf16.mxu0 %v7953_v27 }
 0xa99   :  { %6173 = vadd.xlane.f32.xlu1 %v6126_v1  ;;  %v5676_v22 = vmul.f32 %v12526_v54, %v12526_v54 }
 0xa9b   :  { %7078 = vmatpush3.bf16.msra.mxu0 %v7365_v50 }
 0xa9c   :  { %7079 = vmatprep.subr.bf16.mxu0 %v7953_v27 }
 0xa9d   :  { %5683 = vadd.xlane.f32.xlu1 %v5664_v19  ;;  %v5713_v19 = vmul.f32 0.03125, %v5686_v34 }
 0xa9f   :  { %7080 = vmatpush3.bf16.msra.mxu0 %v7366_v57  ;;  %v5729_v55 = vadd.f32 1e-05, %v5713_v19 }
 0xaa0   :  { %7081 = vmatprep.subr.bf16.mxu0 %v7953_v27 }
 0xaa1   :  { %5687 = vadd.xlane.f32.xlu1 %v5666_v63  ;;  %7537 = vrsqrt.f32 %v5729_v55 }
 0xaa5   :  { %5691 = vadd.xlane.f32.xlu1 %v5668_v43 }
 0xaa9   :  { %5695 = vadd.xlane.f32.xlu1 %v5670_v41 }
 0xaab   :  { %v7538_v24 = vpop.eup %7537 }
 0xaac   :  { %v5761_v55 = vmul.f32 %v7538_v24, %v12393_v60 }
 0xaad   :  { %5699 = vadd.xlane.f32.xlu1 %v5672_v56  ;;  %v5694_v56 = vpop.xlane.xlu0 %5693 }
 0xaae   :  { %v5717_v8 = vmul.f32 0.03125, %v5694_v56  ;;  %v5784_v56 = vmul.f32 %v12401_v4, %v5761_v55 }
 0xab0   :  { %v5733_v26 = vadd.f32 1e-05, %v5717_v8 }
 0xab1   :  { %5703 = vadd.xlane.f32.xlu1 %v5674_v52  ;;  %v5698_v61 = vpop.xlane.xlu0 %5697 }
 0xab2   :  { %v5719_v45 = vmul.f32 0.03125, %v5698_v61 }
 0xab5   :  { %5707 = vadd.xlane.f32.xlu1 %v5676_v22  ;;  %v5702_v8 = vpop.xlane.xlu0 %5701 }
 0xb26   :  { %v6174_v25 = vpop.xlane.xlu1 %6173 }
 0xb27   :  { %v6175_v63 = vmul.f32 0.03125, %v6174_v25 }
 0xb29   :  { %v6176_v59 = vsub.f32 %v6126_v1, %v6175_v63 }
 0xb2a   :  { %v5684_v43 = vpop.xlane.xlu1 %5683 }
 0xb2b   :  { %v12547_v3 = vmul.f32 %v12114_v39, %v6176_v59  ;;  %v5712_v16 = vmul.f32 0.03125, %v5684_v43  ;;  %v5759_v39 = vmul.f32 %v7536_v21, %v12387_v2 }
 0xb2d   :  { %v5728_v41 = vadd.f32 1e-05, %v5712_v16  ;;  %v6178_v32 = vmul.f32 %v12547_v3, %v12547_v3  ;;  %v5782_v25 = vmul.f32 %v12401_v4, %v5759_v39 }
 0xb2e   :  { %v5688_v52 = vpop.xlane.xlu1 %5687 }
 0xb2f   :  { %7539 = vrsqrt.f32 %v5728_v41  ;;  %v5714_v22 = vmul.f32 0.03125, %v5688_v52  ;;  %6179 = vadd.xlane.f32.xlu0 %v6178_v32  ;;  %v5805_v32 = vadd.f32 %v12410_v30, %v5782_v25 }
 0xb30   :  { %7541 = vrsqrt.f32 %v5731_v51 }
 0xb31   :  { %v5730_v1 = vadd.f32 1e-05, %v5714_v22  ;;  %v5735_v22 = vadd.f32 1e-05, %v5719_v45  ;;  %v5821_v39 = vmax.f32 %v5805_v32, 0.0  ;;  %v5706_v32 = vpop.xlane.xlu0 %5705 }
 0xb32   :  { %v5692_v50 = vpop.xlane.xlu1 %5691  ;;  %v5723_v58 = vmul.f32 0.03125, %v5706_v32 }
 0xb33   :  { %7543 = vrsqrt.f32 %v5730_v1  ;;  %v5716_v57 = vmul.f32 0.03125, %v5692_v50 }
 0xb35   :  { %v5732_v34 = vadd.f32 1e-05, %v5716_v57 }
 0xb36   :  { %v5696_v19 = vpop.xlane.xlu1 %5695 }
 0xb37   :  { %7545 = vrsqrt.f32 %v5732_v34  ;;  %v5718_v28 = vmul.f32 0.03125, %v5696_v19  ;;  %v5807_v34 = vadd.f32 %v12410_v30, %v5784_v56  ;;  %v5721_v19 = vmul.f32 0.03125, %v5702_v8 }
 0xb38   :  { %7547 = vrsqrt.f32 %v5733_v26 }
 0xb39   :  { %v7540_v63 = vpop.eup %7539  ;;  %v5734_v59 = vadd.f32 1e-05, %v5718_v28 }
 0xb3a   :  { %v7542_v43 = vpop.eup %7541  ;;  %v5700_v16 = vpop.xlane.xlu1 %5699  ;;  %v5760_v51 = vmul.f32 %v7540_v63, %v12491_v20 }
 0xb3b   :  { %7549 = vrsqrt.f32 %v5734_v59  ;;  %v5720_v2 = vmul.f32 0.03125, %v5700_v16  ;;  %v5763_v60 = vmul.f32 %v7542_v43, %v12405_v23  ;;  %v5823_v59 = vmax.f32 %v5807_v34, 0.0  ;;  %v7367_v34 = vld [vmem:[%s12677_s25 + $0x20] sm:$0xff]  }
 0xb3c   :  { %v5783_v41 = vmul.f32 %v12401_v4, %v5760_v51  ;;  %7082 = vmatpush3.bf16.msra.mxu0 %v7367_v34 }
 0xb3d   :  { %v7544_v52 = vpop.eup %7543  ;;  %v5736_v21 = vadd.f32 1e-05, %v5720_v2  ;;  %v5786_v28 = vmul.f32 %v12401_v4, %v5763_v60  ;;  %v5737_v2 = vadd.f32 1e-05, %v5721_v19  ;;  %7083 = vmatprep.subr.bf16.mxu0 %v7953_v27 }
 0xb3e   :  { %v5704_v1 = vpop.xlane.xlu1 %5703  ;;  %v5806_v50 = vadd.f32 %v12410_v30, %v5783_v41  ;;  %v5762_v57 = vmul.f32 %v7544_v52, %v12497_v46 }
 0xb3f   :  { %7551 = vrsqrt.f32 %v5736_v21  ;;  %v5722_v20 = vmul.f32 0.03125, %v5704_v1  ;;  %v5809_v41 = vadd.f32 %v12410_v30, %v5786_v28 }
 0xb40   :  { %v5822_v24 = vmax.f32 %v5806_v50, 0.0  ;;  %v5785_v26 = vmul.f32 %v12401_v4, %v5762_v57  ;;  %7553 = vrsqrt.f32 %v5735_v22  ;;  %7084 = vmatpush3.bf16.msra.mxu0 %v7368_v17 }
 0xb41   :  { %v7546_v61 = vpop.eup %7545  ;;  %v5738_v46 = vadd.f32 1e-05, %v5722_v20  ;;  %v5825_v0 = vmax.f32 %v5809_v41, 0.0  ;;  %7085 = vmatprep.subr.bf16.mxu0 %v7953_v27 }
 0xb42   :  { %v5844_v23 = vpack.c.bf16 %v5822_v24, %v5821_v39  ;;  %v5808_v25 = vadd.f32 %v12410_v30, %v5785_v26  ;;  %v5764_v55 = vmul.f32 %v7546_v61, %v12503_v11  ;;  %v7548_v63 = vpop.eup %7547  ;;  %v5708_v45 = vpop.xlane.xlu1 %5707 }
 0xb43   :  { %v5765_v52 = vmul.f32 %v7548_v63, %v12420_v9  ;;  %7555 = vrsqrt.f32 %v5738_v46  ;;  %v5724_v21 = vmul.f32 0.03125, %v5708_v45 }
 0xb44   :  { %6130 = vmatprep.mubr.bf16.mxu1 %v5844_v23  ;;  %v5824_v43 = vmax.f32 %v5808_v25, 0.0  ;;  %v5787_v16 = vmul.f32 %v12401_v4, %v5764_v55  ;;  %7557 = vrsqrt.f32 %v5737_v2  ;;  %v7369_v55 = vld [vmem:[%s12677_s25 + $0x30] sm:$0xff]  }
 0xb45   :  { %v7550_v51 = vpop.eup %7549  ;;  %6131 = vmatmul.mubr.bf16.gmra.mrb[84].mxu1 %v5949_v53  ;;  %v5788_v53 = vmul.f32 %v12401_v4, %v5765_v52  ;;  %v5740_v57 = vadd.f32 1e-05, %v5724_v21  ;;  %7086 = vmatpush3.bf16.msra.mxu0 %v7369_v55  ;;  %v6591_v55 = vld [vmem:[%s13208_s27] ss:$0 sm:$0xff] }
 0xb46   :  { %v5845_v56 = vpack.c.bf16 %v5824_v43, %v5823_v59  ;;  %v5810_v11 = vadd.f32 %v12410_v30, %v5787_v16  ;;  %v5766_v22 = vmul.f32 %v7550_v51, %v12509_v49  ;;  %v5739_v49 = vadd.f32 1e-05, %v5723_v58  ;;  %7087 = vmatprep.subr.bf16.mxu0 %v7953_v27 }
 0xb47   :  { %v5811_v24 = vadd.f32 %v12410_v30, %v5788_v53  ;;  %7559 = vrsqrt.f32 %v5740_v57 }
 0xb48   :  { %6136 = vmatprep.mubr.bf16.mxu1 %v5845_v56  ;;  %v5826_v60 = vmax.f32 %v5810_v11, 0.0  ;;  %v5789_v8 = vmul.f32 %v12401_v4, %v5766_v22  ;;  %7561 = vrsqrt.f32 %v5739_v49 }
 0xb49   :  { %v7552_v1 = vpop.eup %7551 }
 0xb4a   :  { %v7554_v50 = vpop.eup %7553  ;;  %v5846_v20 = vpack.c.bf16 %v5826_v60, %v5825_v0  ;;  %v5812_v39 = vadd.f32 %v12410_v30, %v5789_v8  ;;  %v5768_v9 = vmul.f32 %v7552_v1, %v12515_v14 }
 0xb4b   :  { %v5767_v26 = vmul.f32 %v7554_v50, %v12427_v37  ;;  %v5827_v37 = vmax.f32 %v5811_v24, 0.0 }
 0xb4c   :  { %v5828_v61 = vmax.f32 %v5812_v39, 0.0  ;;  %v5791_v14 = vmul.f32 %v12401_v4, %v5768_v9 }
 0xb4d   :  { %6137 = vmatmul.mubr.bf16.gmra.mrb[88].mxu1 %v5950_v48  ;;  %v7556_v29 = vpop.eup %7555  ;;  %v5790_v48 = vmul.f32 %v12401_v4, %v5767_v26 }
 0xb4e   :  { %6142 = vmatprep.mubr.bf16.mxu1 %v5846_v20  ;;  %v7558_v19 = vpop.eup %7557  ;;  %v5847_v28 = vpack.c.bf16 %v5828_v61, %v5827_v37  ;;  %v5814_v23 = vadd.f32 %v12410_v30, %v5791_v14  ;;  %v5770_v25 = vmul.f32 %v7556_v29, %v12521_v18  ;;  %v7370_v18 = vld [vmem:[%s12677_s25 + $0x38] sm:$0xff]  }
 0xb4f   :  { %v5813_v63 = vadd.f32 %v12410_v30, %v5790_v48  ;;  %v5769_v46 = vmul.f32 %v7558_v19, %v12433_v44  ;;  %7088 = vmatpush3.bf16.msra.mxu0 %v7370_v18 }
 0xb50   :  { %v5830_v45 = vmax.f32 %v5814_v23, 0.0  ;;  %v5793_v59 = vmul.f32 %v12401_v4, %v5770_v25 }
 0xb51   :  { %v7560_v43 = vpop.eup %7559  ;;  %v5829_v36 = vmax.f32 %v5813_v63, 0.0  ;;  %v5792_v15 = vmul.f32 %v12401_v4, %v5769_v46 }
 0xb52   :  { %v5816_v51 = vadd.f32 %v12410_v30, %v5793_v59  ;;  %v5772_v44 = vmul.f32 %v7560_v43, %v12526_v54 }
 0xb53   :  { %v5848_v16 = vpack.c.bf16 %v5830_v45, %v5829_v36  ;;  %v5815_v2 = vadd.f32 %v12410_v30, %v5792_v15 }
 0xb54   :  { %v5832_v27 = vmax.f32 %v5816_v51, 0.0  ;;  %v5795_v32 = vmul.f32 %v12401_v4, %v5772_v44 }
 0xb55   :  { %6143 = vmatmul.mubr.bf16.gmra.mrb[92].mxu1 %v5951_v35  ;;  %v7562_v35 = vpop.eup %7561  ;;  %v5831_v56 = vmax.f32 %v5815_v2, 0.0 }
 0xb56   :  { %6148 = vmatprep.mubr.bf16.mxu1 %v5847_v28  ;;  %v5771_v41 = vmul.f32 %v7562_v35, %v12439_v31  ;;  %v5818_v22 = vadd.f32 %v12410_v30, %v5795_v32 }
 0xb57   :  { %v5849_v52 = vpack.c.bf16 %v5832_v27, %v5831_v56 }
 0xb58   :  { %v5794_v11 = vmul.f32 %v12401_v4, %v5771_v41  ;;  %v5834_v10 = vmax.f32 %v5818_v22, 0.0 }
 0xb5a   :  { %v5817_v47 = vadd.f32 %v12410_v30, %v5794_v11  ;;  %v6589_v30 = vld [vmem:[%s12675_s23] ss:$0 sm:$0xff] }
 0xb5d   :  { %6149 = vmatmul.mubr.bf16.gmra.mrb[96].mxu1 %v5952_v38  ;;  %v5833_v38 = vmax.f32 %v5817_v47, 0.0 }
 0xb5e   :  { %6154 = vmatprep.mubr.bf16.mxu1 %v5848_v16 }
 0xb5f   :  { %v5850_v54 = vpack.c.bf16 %v5834_v10, %v5833_v38 }
 0xb65   :  { %6155 = vmatmul.mubr.bf16.gmra.mrb[100].mxu1 %v5953_v40  ;;  %v6590_v40 = vld [vmem:[%s13207_s13] ss:$0 sm:$0xff] }
 0xb66   :  { %6160 = vmatprep.mubr.bf16.mxu1 %v5849_v52 }
 0xb6d   :  { %6161 = vmatmul.mubr.bf16.gmra.mrb[104].mxu1 %v5954_v5 }
 0xb6e   :  { %6166 = vmatprep.mubr.bf16.mxu1 %v5850_v54 }
 0xb75   :  { %6167 = vmatmul.mubr.bf16.gmra.mrb[108].mxu1 %v5955_v33 }
 0xbbc   :  { %v6180_v4 = vpop.xlane.xlu0 %6179 }
 0xbbd   :  { %v6181_v31 = vmul.f32 0.03125, %v6180_v4 }
 0xbbf   :  { %v6182_v21 = vadd.f32 1e-05, %v6181_v31 }
 0xbc1   :  { %7563 = vrsqrt.f32 %v6182_v21 }
 0xbcb   :  { %v7564_v13 = vpop.eup %7563 }
 0xbcc   :  { %v6184_v12 = vmul.f32 %v7564_v13, %v12547_v3 }
 0xbce   :  { %v6192_v62 = vmul.f32 %v6589_v30, %v6184_v12 }
 0xbd0   :  { %v6200_v6 = vadd.f32 %v6590_v40, %v6192_v62 }
 0xbd2   :  { %v6201_v5 = vmax.f32 %v6200_v6, 0.0 }
 0xbd4   :  { %v6202_v42 = vpack.c.bf16 %v6201_v5, %v6201_v5 }
 0xbd6   :  { %7090 = vmatmul.mubr.bf16.vlgmr.msra.gmra.mrb[96].mxu0 %v6202_v42 }
 0xc18   :  { %v6926_v7 = vpop.f32.mrb[84].mxu1 }
 0xc19   :  { %v6927_v33 = vpop.f32.mrb[85].mxu1 }
 0xc1a   :  { %v6929_v60 = vpop.f32.mrb[86].mxu1 }
 0xc1b   :  { %v6930_v8 = vpop.f32.mrb[87].mxu1 }
 0xc20   :  { %v6932_v1 = vpop.f32.mrb[88].mxu1 }
 0xc21   :  { %v6933_v58 = vpop.f32.mrb[89].mxu1 }
 0xc22   :  { %v6935_v0 = vpop.f32.mrb[90].mxu1 }
 0xc23   :  { %v6936_v53 = vpop.f32.mrb[91].mxu1 }
 0xc28   :  { %v6938_v50 = vpop.f32.mrb[92].mxu1 }
 0xc29   :  { %v6939_v57 = vpop.f32.mrb[93].mxu1 }
 0xc2a   :  { %v6941_v3 = vpop.f32.mrb[94].mxu1 }
 0xc2b   :  { %v6942_v20 = vpop.f32.mrb[95].mxu1 }
 0xc30   :  { %v6944_v39 = vpop.f32.mrb[96].mxu1 }
 0xc31   :  { %v6945_v9 = vpop.f32.mrb[97].mxu1 }
 0xc32   :  { %v6947_v49 = vpop.f32.mrb[98].mxu1 }
 0xc33   :  { %v6948_v24 = vpop.f32.mrb[99].mxu1 }
 0xc38   :  { %v6950_v26 = vpop.f32.mrb[100].mxu1 }
 0xc39   :  { %v6951_v34 = vpop.f32.mrb[101].mxu1 }
 0xc3a   :  { %v6953_v61 = vpop.f32.mrb[102].mxu1 }
 0xc3b   :  { %v6954_v14 = vpop.f32.mrb[103].mxu1 }
 0xc40   :  { %v6956_v17 = vpop.f32.mrb[104].mxu1 }
 0xc41   :  { %v6957_v29 = vpop.f32.mrb[105].mxu1 }
 0xc42   :  { %v6959_v37 = vpop.f32.mrb[106].mxu1 }
 0xc43   :  { %v6960_v48 = vpop.f32.mrb[107].mxu1 }
 0xc48   :  { %v6962_v19 = vpop.f32.mrb[108].mxu1 }
 0xc49   :  { %v6963_v28 = vpop.f32.mrb[109].mxu1 }
 0xc4a   :  { %v6965_v23 = vpop.f32.mrb[110].mxu1 }
 0xc4b   :  { %v6966_v25 = vpop.f32.mrb[111].mxu1 }
 0xca9   :  { %v6308_v63 = vpop.f32.mrb[96].mxu0 }
 0xcaa   :  { %v6309_v46 = vadd.f32 %v6591_v55, %v6308_v63  ;;  %v7091_v45 = vpop.f32.mrb[97].mxu0 }
 0xcab   :  { %v6311_v59 = vpop.f32.mrb[98].mxu0 }
 0xcac   :  { %6314 = vst [vmem:[#allocation25] sm:$0xff] %v6309_v46  ;;  %v7092_v18 = vpop.f32.mrb[99].mxu0 }
 0xcad   :  { %7899 = shalt.err (!%p7896_p4)
}
 0xcae   :  { %s13209_s19 = sld [smem:[#allocation129_spill]] }
 0xcb4   :  { %s7900_s20 = scalar_lea.hbm %s13209_s19, 128 }
 0xcb5   :  { %p7901_p5 = scmp.ne.s32.totalorder %s13209_s19, %s7900_s20  ;;  %p7904_p6 = scmp.lt.u32.totalorder %s7900_s20, %s13209_s19 }
 0xcb7   :  { %p7906_p7 = pnand %p7904_p6, %p7901_p5 }
 0xcb9   :  { %7909 = shalt.err (!%p7906_p7)
}
 0xcba   :  { %6324 = dma.vmem_to_hbm [thread:$0]  %s6322_s18, 128, %s13209_s19, [#allocation4]  }
 0xcbb   :  { %7926 = dma.done.wait [#allocation4], 128  }
 0xcbc   :  { %7927 = vsyncadd [#allocation4], 4294967168 }
 0xcbd   :  { %6328 = vsyncpa [#allocation3], 1 }
 0xcbe   :  { %6329 = vsyncpa [#allocation6], 1 }
 0xcbf   :  { %6330 = vsyncpa [#allocation9], 1 }
 0xcc0   :  { %6331 = vsyncpa [#allocation12], 1 }
 0xcc1   :  { %6332 = vsyncpa [#allocation15], 1 }
 0xcc2   :  { %6333 = vsyncpa [#allocation18], 1 }
 0xcc3   :  { %6334 = vsyncpa [#allocation21], 1 }
 0xcc4   :  { %6335 = vsyncpa [#allocation24], 1 }
 0xcc5   :  { %6336 = vsyncpa [#allocation4], 1 }

</bundles_post_ra>
